<compile_context>
chip_gen: v7x
topology: tpu7x:2x2x1
jax: 0.10.0
libtpu: 0.0.40
codegen_flags: <defaults>
</compile_context>

<pallas_src>
import functools

import jax
import jax.numpy as jnp
from jax.experimental import pallas as pl
from jax.experimental.pallas import tpu as pltpu

EPS = 1e-5  # eps for both instance-norm and batch-norm (nn.BatchNorm1d default)

# 27 kernel offsets (offset-major ordering; matches weight layout [27, Cin, Cout]).
OFFSETS = [(dz, dy, dx) for dz in (-1, 0, 1) for dy in (-1, 0, 1) for dx in (-1, 0, 1)]


# ---------------------------------------------------------------------------
# Pallas kernels
# ---------------------------------------------------------------------------
def _fused_norm_kernel(x_ref, m_ref, *rest, C, relu, has_residual):
    """Fused masked norm: moments + affine (+ residual) (+ ReLU) + re-mask.

    x_ref/m_ref (and optional residual) are lane-packed [R, 128] blocks where
    lane j carries channel (j % C) of one of 128//C points per row.
    """
    if has_residual:
        r_ref, g_ref, b_ref, o_ref = rest
    else:
        g_ref, b_ref, o_ref = rest

    m = m_ref[...]                       # [R, 128] channel-broadcast mask
    x = x_ref[...] * m                   # pre-mask (no-op if already masked)

    L = x.shape[-1]
    # Fold matrix: lanes sharing (lane % C) belong to the same channel.
    li = jax.lax.broadcasted_iota(jnp.int32, (L, L), 0)
    lj = jax.lax.broadcasted_iota(jnp.int32, (L, L), 1)
    fold = (li % C == lj % C).astype(jnp.float32)          # [128, 128]

    s = jnp.sum(x, axis=0, keepdims=True)                  # [1, 128]
    sq = jnp.sum(x * x, axis=0, keepdims=True)             # [1, 128]
    cm = jnp.sum(m, axis=0, keepdims=True)                 # [1, 128]
    stats = jnp.concatenate([s, sq, cm], axis=0)           # [3, 128]
    # MXU fold: per-channel totals, already broadcast back to every lane slot.
    folded = jnp.dot(stats, fold, preferred_element_type=jnp.float32)
    sum_c, sq_c, cnt_c = folded[0:1], folded[1:2], folded[2:3]

    inv_n = 1.0 / jnp.maximum(cnt_c, 1.0)
    mean = sum_c * inv_n
    var = sq_c * inv_n - mean * mean
    inv_std = jax.lax.rsqrt(var + EPS)

    y = (x - mean) * (inv_std * g_ref[...]) + b_ref[...]
    if has_residual:
        y = y + r_ref[...]
    if relu:
        y = jnp.maximum(y, 0.0)
    o_ref[...] = y * m


def _conv_kernel(xp_ref, bw_ref, b_ref, m_ref, o_ref, *, D):
    """Sparse 3x3x3 conv for one batch element.

    xp_ref : [D+2, (H+2)*(W+2)*Ci]  padded grid (y, x, Ci merged into lanes)
    bw_ref : [3, (H+2)*(W+2)*Ci, H*W*Co] banded weights (dy/dx shift + Ci fold)
    b_ref  : [1, H*W*Co] bias (zeros if the conv has no bias)
    m_ref  : [D, H*W*Co] channel-broadcast mask
    o_ref  : [D, H*W*Co]
    """
    acc = jnp.dot(xp_ref[0:D, :], bw_ref[0], preferred_element_type=jnp.float32)
    acc = acc + jnp.dot(xp_ref[1:D + 1, :], bw_ref[1],
                        preferred_element_type=jnp.float32)
    acc = acc + jnp.dot(xp_ref[2:D + 2, :], bw_ref[2],
                        preferred_element_type=jnp.float32)
    o_ref[...] = (acc + b_ref[...]) * m_ref[...]


# ---------------------------------------------------------------------------
# Pallas wrappers
# ---------------------------------------------------------------------------
def fused_masked_norm(x, m, gamma, beta, residual=None, relu=True):
    """x, m, (residual): [G, R, 128] lane-packed.  Returns normalized [G, R, 128]."""
    G, R, L = x.shape
    assert L == 128
    C = gamma.shape[0]
    assert L % C == 0
    g_p = jnp.tile(gamma.astype(jnp.float32), L // C).reshape(1, L)
    b_p = jnp.tile(beta.astype(jnp.float32), L // C).reshape(1, L)

    has_res = residual is not None
    kern = functools.partial(_fused_norm_kernel, C=C, relu=relu,
                             has_residual=has_res)
    row_spec = pl.BlockSpec((None, R, L), lambda g: (g, 0, 0))
    vec_spec = pl.BlockSpec((1, L), lambda g: (0, 0))

    in_specs = [row_spec, row_spec]
    args = [x, m]
    if has_res:
        in_specs.append(row_spec)
        args.append(residual)
    in_specs += [vec_spec, vec_spec]
    args += [g_p, b_p]

    return pl.pallas_call(
        kern,
        out_shape=jax.ShapeDtypeStruct((G, R, L), jnp.float32),
        grid=(G,),
        in_specs=in_specs,
        out_specs=row_spec,
        compiler_params=pltpu.CompilerParams(dimension_semantics=("parallel",)),
    )(*args)


def _banded_conv_weights(w3, H, W):
    """w3: [3,3,3,Ci,Co] -> [3, (H+2)*(W+2)*Ci, H*W*Co] absorbing dy & dx shifts."""
    _, _, _, Ci, Co = w3.shape
    # fold dx: padded x pos vs output x pos
    wx = jnp.arange(W + 2)[:, None]
    ox = jnp.arange(W)[None, :]
    dx = wx - ox
    vx = (dx >= 0) & (dx <= 2)
    g = w3[:, :, jnp.clip(dx, 0, 2)]                               # [3,3,W+2,W,Ci,Co]
    g = jnp.where(vx[None, None, :, :, None, None], g, 0.0)
    bw1 = g.transpose(0, 1, 2, 4, 3, 5).reshape(3, 3, (W + 2) * Ci, W * Co)
    # fold dy: padded y pos vs output y pos
    hy = jnp.arange(H + 2)[:, None]
    oy = jnp.arange(H)[None, :]
    dy = hy - oy
    vy = (dy >= 0) & (dy <= 2)
    g2 = bw1[:, jnp.clip(dy, 0, 2)]                                # [3,H+2,H,(W+2)Ci,WCo]
    g2 = jnp.where(vy[None, :, :, None, None], g2, 0.0)
    bw2 = g2.transpose(0, 1, 3, 2, 4).reshape(3, (H + 2) * (W + 2) * Ci, H * W * Co)
    return bw2.astype(jnp.float32)


def sparse_conv3x3x3(x_grid, mask_flat, w, bias=None):
    """Minkowski-style 3x3x3 stride-1 sparse conv.

    x_grid    : [B, D, H, W, Ci]   (zeros at inactive sites)
    mask_flat : [B, D, H*W*Co]     channel-broadcast active mask
    w         : [27, Ci, Co]; bias : optional [Co]
    """
    B, D, H, W, Ci = x_grid.shape
    Co = w.shape[-1]
    K = (H + 2) * (W + 2) * Ci
    N = H * W * Co

    xp = jnp.pad(x_grid, ((0, 0), (1, 1), (1, 1), (1, 1), (0, 0)))
    xp3 = xp.reshape(B, D + 2, K)                                  # free reshape

    w3 = w.reshape(3, 3, 3, Ci, Co).astype(jnp.float32)
    bw = _banded_conv_weights(w3, H, W)                            # [3, K, N]

    if bias is None:
        bias_t = jnp.zeros((1, N), jnp.float32)
    else:
        bias_t = jnp.tile(bias.astype(jnp.float32), H * W).reshape(1, N)

    out = pl.pallas_call(
        functools.partial(_conv_kernel, D=D),
        out_shape=jax.ShapeDtypeStruct((B, D, N), jnp.float32),
        grid=(B,),
        in_specs=[
            pl.BlockSpec((None, D + 2, K), lambda b: (b, 0, 0)),
            pl.BlockSpec((3, K, N), lambda b: (0, 0, 0)),
            pl.BlockSpec((1, N), lambda b: (0, 0)),
            pl.BlockSpec((None, D, N), lambda b: (b, 0, 0)),
        ],
        out_specs=pl.BlockSpec((None, D, N), lambda b: (b, 0, 0)),
        compiler_params=pltpu.CompilerParams(dimension_semantics=("parallel",)),
    )(xp3, bw, bias_t, mask_flat)
    return out.reshape(B, D, H, W, Co)


# ---------------------------------------------------------------------------
# GeometryHeadSparse forward
# ---------------------------------------------------------------------------
def init_params(key, c_in, c_out, num_blocks):
    keys = jax.random.split(key, 2 * num_blocks + 2)
    k = 0
    params = {
        "in_gamma": jnp.ones((c_in,), jnp.float32),
        "in_beta": jnp.zeros((c_in,), jnp.float32),
        "blocks": [],
    }
    for _ in range(num_blocks):
        w1 = 0.1 * jax.random.normal(keys[k], (27, c_in, c_in), jnp.float32); k += 1
        w2 = 0.1 * jax.random.normal(keys[k], (27, c_in, c_in), jnp.float32); k += 1
        params["blocks"].append(dict(
            conv1_w=w1,
            bn1_gamma=jnp.ones((c_in,), jnp.float32), bn1_beta=jnp.zeros((c_in,), jnp.float32),
            conv2_w=w2,
            bn2_gamma=jnp.ones((c_in,), jnp.float32), bn2_beta=jnp.zeros((c_in,), jnp.float32),
        ))
    params["final_w"] = 0.1 * jax.random.normal(keys[k], (27, c_in, c_out), jnp.float32); k += 1
    params["final_b"] = 0.01 * jax.random.normal(keys[k], (c_out,), jnp.float32)
    return params


def geometry_head_sparse_forward(params, x_grid, mask_grid):
    B, D, H, W, C = x_grid.shape
    S = D * H * W
    assert (S * C) % 128 == 0, "per-batch feature size must pack into 128-lane rows"
    assert 128 % C == 0, "channel count must divide 128 for lane packing"
    Rb = (S * C) // 128
    Co_final = params["final_w"].shape[-1]

    # Channel-broadcast masks built once and reshaped (free) for every kernel.
    mask_c = mask_grid * jnp.ones((C,), jnp.float32)                  # [B,D,H,W,C]
    mask_conv = mask_c.reshape(B, D, H * W * C)                       # conv output mask (Co == C)
    mask_in = mask_c.reshape(B, Rb, 128)                              # instance-norm groups
    mask_bn = mask_c.reshape(1, B * Rb, 128)                          # batch-norm (single group)
    mask_final = (mask_grid * jnp.ones((Co_final,), jnp.float32)
                  ).reshape(B, D, H * W * Co_final)

    def norm(h, gamma, beta, m_packed, residual=None):
        G = m_packed.shape[0]
        hp = h.reshape(G, -1, 128)
        rp = None if residual is None else residual.reshape(G, -1, 128)
        return fused_masked_norm(hp, m_packed, gamma, beta,
                                 residual=rp, relu=True).reshape(h.shape)

    # --- MinkowskiInstanceNorm + MinkowskiReLU (per-instance stats) ---
    y = norm(x_grid, params["in_gamma"], params["in_beta"], mask_in)

    # --- SparseBasicBlock x num_blocks ---
    for blk in params["blocks"]:
        res = y
        h = sparse_conv3x3x3(y, mask_conv, blk["conv1_w"])            # conv1 (no bias)
        h = norm(h, blk["bn1_gamma"], blk["bn1_beta"], mask_bn)       # bn1 + relu
        h = sparse_conv3x3x3(h, mask_conv, blk["conv2_w"])            # conv2 (no bias)
        y = norm(h, blk["bn2_gamma"], blk["bn2_beta"], mask_bn,       # bn2 + res + relu
                 residual=res)

    # --- Final MinkowskiConvolution(c_in -> c_out, k=3, bias=True) ---
    return sparse_conv3x3x3(y, mask_final, params["final_w"], params["final_b"])


# ---------------------------------------------------------------------------
# Pure-JAX reference (same dense-grid semantics) for correctness checking
# ---------------------------------------------------------------------------
def _im2col(x_grid):
    B, D, H, W, C = x_grid.shape
    xp = jnp.pad(x_grid, ((0, 0), (1, 1), (1, 1), (1, 1), (0, 0)))
    cols = [xp[:, 1 + dz:1 + dz + D, 1 + dy:1 + dy + H, 1 + dx:1 + dx + W, :]
            for dz, dy, dx in OFFSETS]
    return jnp.concatenate(cols, axis=-1)


def ref_forward(params, x_grid, mask_grid):
    B, D, H, W, C = x_grid.shape
    S = D * H * W
    mb = mask_grid.reshape(B, S, 1)
    ma = mask_grid.reshape(1, B * S, 1)

    def moments(xf, mf):
        cnt = jnp.maximum(jnp.sum(mf, axis=1), 1.0)
        mean = jnp.sum(xf * mf, axis=1) / cnt
        var = jnp.sum(xf * xf * mf, axis=1) / cnt - mean ** 2
        return mean, 1.0 / jnp.sqrt(var + EPS)

    def norm_act(xf, mf, mean, inv, g, b, rf=None, relu=True):
        y = (xf - mean[:, None, :]) * inv[:, None, :] * g.reshape(1, 1, -1) + b.reshape(1, 1, -1)
        if rf is not None:
            y = y + rf
        if relu:
            y = jnp.maximum(y, 0.0)
        return y * mf

    def conv(x, w, b=None):
        cols = _im2col(x).reshape(B * S, -1)
        o = cols @ w.reshape(-1, w.shape[-1])
        if b is not None:
            o = o + b
        return (o * mask_grid.reshape(-1, 1)).reshape(B, D, H, W, -1)

    xf = (x_grid * mask_grid).reshape(B, S, C)
    mean, inv = moments(xf, mb)
    y = norm_act(xf, mb, mean, inv, params["in_gamma"], params["in_beta"]).reshape(B, D, H, W, C)

    for blk in params["blocks"]:
        res = y
        h = conv(y, blk["conv1_w"])
        hf = h.reshape(1, B * S, C)
        mean, inv = moments(hf, ma)
        h = norm_act(hf, ma, mean, inv, blk["bn1_gamma"], blk["bn1_beta"]).reshape(B, D, H, W, C)
        h = conv(h, blk["conv2_w"])
        hf = h.reshape(1, B * S, C)
        mean, inv = moments(hf, ma)
        y = norm_act(hf, ma, mean, inv, blk["bn2_gamma"], blk["bn2_beta"],
                     rf=res.reshape(1, B * S, C)).reshape(B, D, H, W, C)

    return conv(y, params["final_w"], params["final_b"])


# ---------------------------------------------------------------------------
if __name__ == "__main__":
    key = jax.random.PRNGKey(0)
    k_feat, k_mask, k_param = jax.random.split(key, 3)

    B, D, H, W = 2, 8, 8, 8
    C_IN, C_OUT = 8, 4
    NUM_BLOCKS = 2
    TRUNCATION = 3  # stored by GeometryHeadSparse.__init__ but unused in forward

    feats = jax.random.normal(k_feat, (B, D, H, W, C_IN), jnp.float32)
    mask = (jax.random.uniform(k_mask, (B, D, H, W, 1)) < 0.5).astype(jnp.float32)
    feats = feats * mask  # sparse tensor: only active voxels carry features

    params = init_params(k_param, C_IN, C_OUT, NUM_BLOCKS)

    fwd = jax.jit(geometry_head_sparse_forward)
    out = jax.block_until_ready(fwd(params, feats, mask))

    ref = ref_forward(params, feats, mask)
    assert out.shape == (B, D, H, W, C_OUT), out.shape
    assert jnp.allclose(out, ref, atol=2e-3, rtol=2e-3), float(jnp.max(jnp.abs(out - ref)))
    print("KERNEL_OK")
</pallas_src>

<mosaic_0001>
module attributes {stable_mosaic.version = 11 : i64} {
  func.func @_fused_norm_kernel(%arg0: i32, %arg1: memref<1x32x128xf32, #tpu.memory_space<vmem>>, %arg2: memref<1x32x128xf32, #tpu.memory_space<vmem>>, %arg3: memref<1x128xf32, #tpu.memory_space<vmem>>, %arg4: memref<1x128xf32, #tpu.memory_space<vmem>>, %arg5: memref<1x32x128xf32, #tpu.memory_space<vmem>>) attributes {dimension_semantics = [#tpu.dimension_semantics<parallel>], iteration_bounds = array<i64: 2>, scalar_prefetch = 0 : i64, scratch_operands = 0 : i64, tpu.core_type = #tpu.core_type<tc>, window_params = [{transform_indices = @transform_0, window_bounds = array<i64: 1, 32, 128>}, {transform_indices = @transform_1, window_bounds = array<i64: 1, 32, 128>}, {pipeline_mode = #tpu.pipeline_mode<synchronous>, transform_indices = @transform_2, window_bounds = array<i64: 1, 128>}, {pipeline_mode = #tpu.pipeline_mode<synchronous>, transform_indices = @transform_3, window_bounds = array<i64: 1, 128>}, {transform_indices = @transform_4, window_bounds = array<i64: 1, 32, 128>}]} {
    %c0 = arith.constant 0 : index
    %c0_0 = arith.constant 0 : index
    %c0_1 = arith.constant 0 : index
    %0 = vector.load %arg2[%c0, %c0_0, %c0_1] : memref<1x32x128xf32, #tpu.memory_space<vmem>>, vector<1x32x128xf32>
    %1 = vector.shape_cast %0 : vector<1x32x128xf32> to vector<32x128xf32>
    %c0_2 = arith.constant 0 : index
    %c0_3 = arith.constant 0 : index
    %c0_4 = arith.constant 0 : index
    %2 = vector.load %arg1[%c0_2, %c0_3, %c0_4] : memref<1x32x128xf32, #tpu.memory_space<vmem>>, vector<1x32x128xf32>
    %3 = vector.shape_cast %2 : vector<1x32x128xf32> to vector<32x128xf32>
    %4 = arith.mulf %3, %1 : vector<32x128xf32>
    %5 = tpu.iota {dimensions = array<i32: 0>} : vector<128x128xi32>
    %6 = tpu.iota {dimensions = array<i32: 1>} : vector<128x128xi32>
    %c8_i32 = arith.constant 8 : i32
    %c0_i32 = arith.constant 0 : i32
    %7 = arith.cmpi eq, %c8_i32, %c0_i32 : i32
    %c1_i32 = arith.constant 1 : i32
    %8 = arith.select %7, %c1_i32, %c8_i32 : i32
    %9 = vector.broadcast %8 : i32 to vector<128x128xi32>
    %10 = arith.remsi %5, %9 : vector<128x128xi32>
    %c0_i32_5 = arith.constant 0 : i32
    %11 = vector.broadcast %c0_i32_5 : i32 to vector<128x128xi32>
    %12 = arith.cmpi ne, %10, %11 : vector<128x128xi32>
    %c0_i32_6 = arith.constant 0 : i32
    %13 = vector.broadcast %c0_i32_6 : i32 to vector<128x128xi32>
    %14 = arith.cmpi slt, %10, %13 : vector<128x128xi32>
    %c0_i32_7 = arith.constant 0 : i32
    %15 = arith.cmpi slt, %8, %c0_i32_7 : i32
    %16 = vector.broadcast %15 : i1 to vector<128x128xi1>
    %17 = vector.broadcast %16 : vector<128x128xi1> to vector<128x128xi1>
    %18 = arith.xori %14, %17 : vector<128x128xi1>
    %19 = arith.andi %18, %12 : vector<128x128xi1>
    %20 = vector.broadcast %8 : i32 to vector<128x128xi32>
    %21 = arith.addi %10, %20 : vector<128x128xi32>
    %22 = arith.select %19, %21, %10 : vector<128x128xi1>, vector<128x128xi32>
    %c8_i32_8 = arith.constant 8 : i32
    %c0_i32_9 = arith.constant 0 : i32
    %23 = arith.cmpi eq, %c8_i32_8, %c0_i32_9 : i32
    %c1_i32_10 = arith.constant 1 : i32
    %24 = arith.select %23, %c1_i32_10, %c8_i32_8 : i32
    %25 = vector.broadcast %24 : i32 to vector<128x128xi32>
    %26 = arith.remsi %6, %25 : vector<128x128xi32>
    %c0_i32_11 = arith.constant 0 : i32
    %27 = vector.broadcast %c0_i32_11 : i32 to vector<128x128xi32>
    %28 = arith.cmpi ne, %26, %27 : vector<128x128xi32>
    %c0_i32_12 = arith.constant 0 : i32
    %29 = vector.broadcast %c0_i32_12 : i32 to vector<128x128xi32>
    %30 = arith.cmpi slt, %26, %29 : vector<128x128xi32>
    %c0_i32_13 = arith.constant 0 : i32
    %31 = arith.cmpi slt, %24, %c0_i32_13 : i32
    %32 = vector.broadcast %31 : i1 to vector<128x128xi1>
    %33 = vector.broadcast %32 : vector<128x128xi1> to vector<128x128xi1>
    %34 = arith.xori %30, %33 : vector<128x128xi1>
    %35 = arith.andi %34, %28 : vector<128x128xi1>
    %36 = vector.broadcast %24 : i32 to vector<128x128xi32>
    %37 = arith.addi %26, %36 : vector<128x128xi32>
    %38 = arith.select %35, %37, %26 : vector<128x128xi1>, vector<128x128xi32>
    %39 = arith.cmpi eq, %22, %38 : vector<128x128xi32>
    %40 = arith.extui %39 : vector<128x128xi1> to vector<128x128xi32>
    %41 = arith.sitofp %40 : vector<128x128xi32> to vector<128x128xf32>
    %cst = arith.constant dense<0.000000e+00> : vector<128xf32>
    %42 = vector.multi_reduction <add>, %4, %cst [0] : vector<32x128xf32> to vector<128xf32>
    %43 = vector.shape_cast %42 : vector<128xf32> to vector<1x128xf32>
    %44 = arith.mulf %4, %4 : vector<32x128xf32>
    %cst_14 = arith.constant dense<0.000000e+00> : vector<128xf32>
    %45 = vector.multi_reduction <add>, %44, %cst_14 [0] : vector<32x128xf32> to vector<128xf32>
    %46 = vector.shape_cast %45 : vector<128xf32> to vector<1x128xf32>
    %cst_15 = arith.constant dense<0.000000e+00> : vector<128xf32>
    %47 = vector.multi_reduction <add>, %1, %cst_15 [0] : vector<32x128xf32> to vector<128xf32>
    %48 = vector.shape_cast %47 : vector<128xf32> to vector<1x128xf32>
    %49 = tpu.concatenate %43, %46, %48 in 0 : vector<1x128xf32>, vector<1x128xf32>, vector<1x128xf32> -> vector<3x128xf32>
    %cst_16 = arith.constant dense<0.000000e+00> : vector<3x128xf32>
    %50 = tpu.matmul %49, %41, %cst_16 {dimension_numbers = #tpu.dot_dimension_numbers<[1], [0], [0], [1], [0, 0, 1, 1], [], []>} : vector<3x128xf32>, vector<128x128xf32>, vector<3x128xf32> -> vector<3x128xf32>
    %51 = vector.extract_strided_slice %50 {offsets = [0, 0], sizes = [1, 128], strides = [1, 1]} : vector<3x128xf32> to vector<1x128xf32>
    %52 = vector.extract_strided_slice %50 {offsets = [1, 0], sizes = [1, 128], strides = [1, 1]} : vector<3x128xf32> to vector<1x128xf32>
    %53 = vector.extract_strided_slice %50 {offsets = [2, 0], sizes = [1, 128], strides = [1, 1]} : vector<3x128xf32> to vector<1x128xf32>
    %cst_17 = arith.constant 1.000000e+00 : f32
    %54 = vector.broadcast %cst_17 : f32 to vector<1x128xf32>
    %55 = arith.maximumf %53, %54 : vector<1x128xf32>
    %cst_18 = arith.constant 1.000000e+00 : f32
    %56 = vector.broadcast %cst_18 : f32 to vector<1x128xf32>
    %57 = arith.divf %56, %55 : vector<1x128xf32>
    %58 = arith.mulf %51, %57 : vector<1x128xf32>
    %59 = arith.mulf %52, %57 : vector<1x128xf32>
    %60 = arith.mulf %58, %58 : vector<1x128xf32>
    %61 = arith.subf %59, %60 : vector<1x128xf32>
    %cst_19 = arith.constant 9.99999974E-6 : f32
    %62 = vector.broadcast %cst_19 : f32 to vector<1x128xf32>
    %63 = arith.addf %61, %62 : vector<1x128xf32>
    %64 = math.rsqrt %63 : vector<1x128xf32>
    %65 = vector.broadcast %58 : vector<1x128xf32> to vector<32x128xf32>
    %66 = arith.subf %4, %65 : vector<32x128xf32>
    %c0_20 = arith.constant 0 : index
    %c0_21 = arith.constant 0 : index
    %67 = vector.load %arg3[%c0_20, %c0_21] : memref<1x128xf32, #tpu.memory_space<vmem>>, vector<1x128xf32>
    %68 = arith.mulf %64, %67 : vector<1x128xf32>
    %69 = vector.broadcast %68 : vector<1x128xf32> to vector<32x128xf32>
    %70 = arith.mulf %66, %69 : vector<32x128xf32>
    %c0_22 = arith.constant 0 : index
    %c0_23 = arith.constant 0 : index
    %71 = vector.load %arg4[%c0_22, %c0_23] : memref<1x128xf32, #tpu.memory_space<vmem>>, vector<1x128xf32>
    %72 = vector.broadcast %71 : vector<1x128xf32> to vector<32x128xf32>
    %73 = arith.addf %70, %72 : vector<32x128xf32>
    %cst_24 = arith.constant 0.000000e+00 : f32
    %74 = vector.broadcast %cst_24 : f32 to vector<32x128xf32>
    %75 = arith.maximumf %73, %74 : vector<32x128xf32>
    %76 = arith.mulf %75, %1 : vector<32x128xf32>
    %c0_25 = arith.constant 0 : index
    %c0_26 = arith.constant 0 : index
    %c0_27 = arith.constant 0 : index
    %77 = vector.load %arg5[%c0_25, %c0_26, %c0_27] : memref<1x32x128xf32, #tpu.memory_space<vmem>>, vector<1x32x128xf32>
    %78 = vector.shape_cast %77 : vector<1x32x128xf32> to vector<32x128xf32>
    %79 = vector.shape_cast %76 : vector<32x128xf32> to vector<1x32x128xf32>
    tpu.vector_store %arg5[%c0_25, %c0_26, %c0_27], %79 {strides = array<i32>} : memref<1x32x128xf32, #tpu.memory_space<vmem>>, vector<1x32x128xf32>,
    return
  }
  func.func @transform_0(%arg0: i32) -> (i32, i32, i32) {
    %c0_i32 = arith.constant 0 : i32
    %c0_i32_0 = arith.constant 0 : i32
    %c0_i32_1 = arith.constant 0 : i32
    return %arg0, %c0_i32, %c0_i32_0 : i32, i32, i32
  }
  func.func @transform_1(%arg0: i32) -> (i32, i32, i32) {
    %c0_i32 = arith.constant 0 : i32
    %c0_i32_0 = arith.constant 0 : i32
    %c0_i32_1 = arith.constant 0 : i32
    return %arg0, %c0_i32, %c0_i32_0 : i32, i32, i32
  }
  func.func @transform_2(%arg0: i32) -> (i32, i32) {
    %c0_i32 = arith.constant 0 : i32
    %c0_i32_0 = arith.constant 0 : i32
    %c0_i32_1 = arith.constant 0 : i32
    return %c0_i32, %c0_i32_0 : i32, i32
  }
  func.func @transform_3(%arg0: i32) -> (i32, i32) {
    %c0_i32 = arith.constant 0 : i32
    %c0_i32_0 = arith.constant 0 : i32
    %c0_i32_1 = arith.constant 0 : i32
    return %c0_i32, %c0_i32_0 : i32, i32
  }
  func.func @transform_4(%arg0: i32) -> (i32, i32, i32) {
    %c0_i32 = arith.constant 0 : i32
    %c0_i32_0 = arith.constant 0 : i32
    %c0_i32_1 = arith.constant 0 : i32
    return %arg0, %c0_i32, %c0_i32_0 : i32, i32, i32
  }
}

module attributes {stable_mosaic.version = 11 : i64} {
  func.func @_conv_kernel(%arg0: i32, %arg1: memref<1x10x800xf32, #tpu.memory_space<vmem>>, %arg2: memref<3x800x512xf32, #tpu.memory_space<vmem>>, %arg3: memref<1x512xf32, #tpu.memory_space<vmem>>, %arg4: memref<1x8x512xf32, #tpu.memory_space<vmem>>, %arg5: memref<1x8x512xf32, #tpu.memory_space<vmem>>) attributes {dimension_semantics = [#tpu.dimension_semantics<parallel>], iteration_bounds = array<i64: 2>, scalar_prefetch = 0 : i64, scratch_operands = 0 : i64, tpu.core_type = #tpu.core_type<tc>, window_params = [{transform_indices = @transform_0, window_bounds = array<i64: 1, 10, 800>}, {pipeline_mode = #tpu.pipeline_mode<synchronous>, transform_indices = @transform_1, window_bounds = array<i64: 3, 800, 512>}, {pipeline_mode = #tpu.pipeline_mode<synchronous>, transform_indices = @transform_2, window_bounds = array<i64: 1, 512>}, {transform_indices = @transform_3, window_bounds = array<i64: 1, 8, 512>}, {transform_indices = @transform_4, window_bounds = array<i64: 1, 8, 512>}]} {
    %c0 = arith.constant 0 : index
    %c0_0 = arith.constant 0 : index
    %c0_1 = arith.constant 0 : index
    %0 = vector.load %arg1[%c0, %c0_0, %c0_1] : memref<1x10x800xf32, #tpu.memory_space<vmem>>, vector<1x8x800xf32>
    %1 = vector.shape_cast %0 : vector<1x8x800xf32> to vector<8x800xf32>
    %c0_2 = arith.constant 0 : index
    %c0_3 = arith.constant 0 : index
    %c0_4 = arith.constant 0 : index
    %2 = vector.load %arg2[%c0_2, %c0_3, %c0_4] : memref<3x800x512xf32, #tpu.memory_space<vmem>>, vector<1x800x512xf32>
    %3 = vector.shape_cast %2 : vector<1x800x512xf32> to vector<800x512xf32>
    %cst = arith.constant dense<0.000000e+00> : vector<8x512xf32>
    %4 = tpu.matmul %1, %3, %cst {dimension_numbers = #tpu.dot_dimension_numbers<[1], [0], [0], [1], [0, 0, 1, 1], [], []>} : vector<8x800xf32>, vector<800x512xf32>, vector<8x512xf32> -> vector<8x512xf32>
    %c0_5 = arith.constant 0 : index
    %c1 = arith.constant 1 : index
    %c0_6 = arith.constant 0 : index
    %5 = vector.load %arg1[%c0_5, %c1, %c0_6] : memref<1x10x800xf32, #tpu.memory_space<vmem>>, vector<1x8x800xf32>
    %6 = vector.shape_cast %5 : vector<1x8x800xf32> to vector<8x800xf32>
    %c1_7 = arith.constant 1 : index
    %c0_8 = arith.constant 0 : index
    %c0_9 = arith.constant 0 : index
    %7 = vector.load %arg2[%c1_7, %c0_8, %c0_9] : memref<3x800x512xf32, #tpu.memory_space<vmem>>, vector<1x800x512xf32>
    %8 = vector.shape_cast %7 : vector<1x800x512xf32> to vector<800x512xf32>
    %cst_10 = arith.constant dense<0.000000e+00> : vector<8x512xf32>
    %9 = tpu.matmul %6, %8, %cst_10 {dimension_numbers = #tpu.dot_dimension_numbers<[1], [0], [0], [1], [0, 0, 1, 1], [], []>} : vector<8x800xf32>, vector<800x512xf32>, vector<8x512xf32> -> vector<8x512xf32>
    %10 = arith.addf %4, %9 : vector<8x512xf32>
    %c0_11 = arith.constant 0 : index
    %c2 = arith.constant 2 : index
    %c0_12 = arith.constant 0 : index
    %11 = vector.load %arg1[%c0_11, %c2, %c0_12] : memref<1x10x800xf32, #tpu.memory_space<vmem>>, vector<1x8x800xf32>
    %12 = vector.shape_cast %11 : vector<1x8x800xf32> to vector<8x800xf32>
    %c2_13 = arith.constant 2 : index
    %c0_14 = arith.constant 0 : index
    %c0_15 = arith.constant 0 : index
    %13 = vector.load %arg2[%c2_13, %c0_14, %c0_15] : memref<3x800x512xf32, #tpu.memory_space<vmem>>, vector<1x800x512xf32>
    %14 = vector.shape_cast %13 : vector<1x800x512xf32> to vector<800x512xf32>
    %cst_16 = arith.constant dense<0.000000e+00> : vector<8x512xf32>
    %15 = tpu.matmul %12, %14, %cst_16 {dimension_numbers = #tpu.dot_dimension_numbers<[1], [0], [0], [1], [0, 0, 1, 1], [], []>} : vector<8x800xf32>, vector<800x512xf32>, vector<8x512xf32> -> vector<8x512xf32>
    %16 = arith.addf %10, %15 : vector<8x512xf32>
    %c0_17 = arith.constant 0 : index
    %c0_18 = arith.constant 0 : index
    %17 = vector.load %arg3[%c0_17, %c0_18] : memref<1x512xf32, #tpu.memory_space<vmem>>, vector<1x512xf32>
    %18 = vector.broadcast %17 : vector<1x512xf32> to vector<8x512xf32>
    %19 = arith.addf %16, %18 : vector<8x512xf32>
    %c0_19 = arith.constant 0 : index
    %c0_20 = arith.constant 0 : index
    %c0_21 = arith.constant 0 : index
    %20 = vector.load %arg4[%c0_19, %c0_20, %c0_21] : memref<1x8x512xf32, #tpu.memory_space<vmem>>, vector<1x8x512xf32>
    %21 = vector.shape_cast %20 : vector<1x8x512xf32> to vector<8x512xf32>
    %22 = arith.mulf %19, %21 : vector<8x512xf32>
    %c0_22 = arith.constant 0 : index
    %c0_23 = arith.constant 0 : index
    %c0_24 = arith.constant 0 : index
    %23 = vector.load %arg5[%c0_22, %c0_23, %c0_24] : memref<1x8x512xf32, #tpu.memory_space<vmem>>, vector<1x8x512xf32>
    %24 = vector.shape_cast %23 : vector<1x8x512xf32> to vector<8x512xf32>
    %25 = vector.shape_cast %22 : vector<8x512xf32> to vector<1x8x512xf32>
    tpu.vector_store %arg5[%c0_22, %c0_23, %c0_24], %25 {strides = array<i32>} : memref<1x8x512xf32, #tpu.memory_space<vmem>>, vector<1x8x512xf32>,
    return
  }
  func.func @transform_0(%arg0: i32) -> (i32, i32, i32) {
    %c0_i32 = arith.constant 0 : i32
    %c0_i32_0 = arith.constant 0 : i32
    %c0_i32_1 = arith.constant 0 : i32
    return %arg0, %c0_i32, %c0_i32_0 : i32, i32, i32
  }
  func.func @transform_1(%arg0: i32) -> (i32, i32, i32) {
    %c0_i32 = arith.constant 0 : i32
    %c0_i32_0 = arith.constant 0 : i32
    %c0_i32_1 = arith.constant 0 : i32
    %c0_i32_2 = arith.constant 0 : i32
    return %c0_i32, %c0_i32_0, %c0_i32_1 : i32, i32, i32
  }
  func.func @transform_2(%arg0: i32) -> (i32, i32) {
    %c0_i32 = arith.constant 0 : i32
    %c0_i32_0 = arith.constant 0 : i32
    %c0_i32_1 = arith.constant 0 : i32
    return %c0_i32, %c0_i32_0 : i32, i32
  }
  func.func @transform_3(%arg0: i32) -> (i32, i32, i32) {
    %c0_i32 = arith.constant 0 : i32
    %c0_i32_0 = arith.constant 0 : i32
    %c0_i32_1 = arith.constant 0 : i32
    return %arg0, %c0_i32, %c0_i32_0 : i32, i32, i32
  }
  func.func @transform_4(%arg0: i32) -> (i32, i32, i32) {
    %c0_i32 = arith.constant 0 : i32
    %c0_i32_0 = arith.constant 0 : i32
    %c0_i32_1 = arith.constant 0 : i32
    return %arg0, %c0_i32, %c0_i32_0 : i32, i32, i32
  }
}

module attributes {stable_mosaic.version = 11 : i64} {
  func.func @_fused_norm_kernel(%arg0: i32, %arg1: memref<1x64x128xf32, #tpu.memory_space<vmem>>, %arg2: memref<1x64x128xf32, #tpu.memory_space<vmem>>, %arg3: memref<1x128xf32, #tpu.memory_space<vmem>>, %arg4: memref<1x128xf32, #tpu.memory_space<vmem>>, %arg5: memref<1x64x128xf32, #tpu.memory_space<vmem>>) attributes {dimension_semantics = [#tpu.dimension_semantics<parallel>], iteration_bounds = array<i64: 1>, scalar_prefetch = 0 : i64, scratch_operands = 0 : i64, tpu.core_type = #tpu.core_type<tc>, window_params = [{transform_indices = @transform_0, window_bounds = array<i64: 1, 64, 128>}, {transform_indices = @transform_1, window_bounds = array<i64: 1, 64, 128>}, {pipeline_mode = #tpu.pipeline_mode<synchronous>, transform_indices = @transform_2, window_bounds = array<i64: 1, 128>}, {pipeline_mode = #tpu.pipeline_mode<synchronous>, transform_indices = @transform_3, window_bounds = array<i64: 1, 128>}, {transform_indices = @transform_4, window_bounds = array<i64: 1, 64, 128>}]} {
    %c0 = arith.constant 0 : index
    %c0_0 = arith.constant 0 : index
    %c0_1 = arith.constant 0 : index
    %0 = vector.load %arg2[%c0, %c0_0, %c0_1] : memref<1x64x128xf32, #tpu.memory_space<vmem>>, vector<1x64x128xf32>
    %1 = vector.shape_cast %0 : vector<1x64x128xf32> to vector<64x128xf32>
    %c0_2 = arith.constant 0 : index
    %c0_3 = arith.constant 0 : index
    %c0_4 = arith.constant 0 : index
    %2 = vector.load %arg1[%c0_2, %c0_3, %c0_4] : memref<1x64x128xf32, #tpu.memory_space<vmem>>, vector<1x64x128xf32>
    %3 = vector.shape_cast %2 : vector<1x64x128xf32> to vector<64x128xf32>
    %4 = arith.mulf %3, %1 : vector<64x128xf32>
    %5 = tpu.iota {dimensions = array<i32: 0>} : vector<128x128xi32>
    %6 = tpu.iota {dimensions = array<i32: 1>} : vector<128x128xi32>
    %c8_i32 = arith.constant 8 : i32
    %c0_i32 = arith.constant 0 : i32
    %7 = arith.cmpi eq, %c8_i32, %c0_i32 : i32
    %c1_i32 = arith.constant 1 : i32
    %8 = arith.select %7, %c1_i32, %c8_i32 : i32
    %9 = vector.broadcast %8 : i32 to vector<128x128xi32>
    %10 = arith.remsi %5, %9 : vector<128x128xi32>
    %c0_i32_5 = arith.constant 0 : i32
    %11 = vector.broadcast %c0_i32_5 : i32 to vector<128x128xi32>
    %12 = arith.cmpi ne, %10, %11 : vector<128x128xi32>
    %c0_i32_6 = arith.constant 0 : i32
    %13 = vector.broadcast %c0_i32_6 : i32 to vector<128x128xi32>
    %14 = arith.cmpi slt, %10, %13 : vector<128x128xi32>
    %c0_i32_7 = arith.constant 0 : i32
    %15 = arith.cmpi slt, %8, %c0_i32_7 : i32
    %16 = vector.broadcast %15 : i1 to vector<128x128xi1>
    %17 = vector.broadcast %16 : vector<128x128xi1> to vector<128x128xi1>
    %18 = arith.xori %14, %17 : vector<128x128xi1>
    %19 = arith.andi %18, %12 : vector<128x128xi1>
    %20 = vector.broadcast %8 : i32 to vector<128x128xi32>
    %21 = arith.addi %10, %20 : vector<128x128xi32>
    %22 = arith.select %19, %21, %10 : vector<128x128xi1>, vector<128x128xi32>
    %c8_i32_8 = arith.constant 8 : i32
    %c0_i32_9 = arith.constant 0 : i32
    %23 = arith.cmpi eq, %c8_i32_8, %c0_i32_9 : i32
    %c1_i32_10 = arith.constant 1 : i32
    %24 = arith.select %23, %c1_i32_10, %c8_i32_8 : i32
    %25 = vector.broadcast %24 : i32 to vector<128x128xi32>
    %26 = arith.remsi %6, %25 : vector<128x128xi32>
    %c0_i32_11 = arith.constant 0 : i32
    %27 = vector.broadcast %c0_i32_11 : i32 to vector<128x128xi32>
    %28 = arith.cmpi ne, %26, %27 : vector<128x128xi32>
    %c0_i32_12 = arith.constant 0 : i32
    %29 = vector.broadcast %c0_i32_12 : i32 to vector<128x128xi32>
    %30 = arith.cmpi slt, %26, %29 : vector<128x128xi32>
    %c0_i32_13 = arith.constant 0 : i32
    %31 = arith.cmpi slt, %24, %c0_i32_13 : i32
    %32 = vector.broadcast %31 : i1 to vector<128x128xi1>
    %33 = vector.broadcast %32 : vector<128x128xi1> to vector<128x128xi1>
    %34 = arith.xori %30, %33 : vector<128x128xi1>
    %35 = arith.andi %34, %28 : vector<128x128xi1>
    %36 = vector.broadcast %24 : i32 to vector<128x128xi32>
    %37 = arith.addi %26, %36 : vector<128x128xi32>
    %38 = arith.select %35, %37, %26 : vector<128x128xi1>, vector<128x128xi32>
    %39 = arith.cmpi eq, %22, %38 : vector<128x128xi32>
    %40 = arith.extui %39 : vector<128x128xi1> to vector<128x128xi32>
    %41 = arith.sitofp %40 : vector<128x128xi32> to vector<128x128xf32>
    %cst = arith.constant dense<0.000000e+00> : vector<128xf32>
    %42 = vector.multi_reduction <add>, %4, %cst [0] : vector<64x128xf32> to vector<128xf32>
    %43 = vector.shape_cast %42 : vector<128xf32> to vector<1x128xf32>
    %44 = arith.mulf %4, %4 : vector<64x128xf32>
    %cst_14 = arith.constant dense<0.000000e+00> : vector<128xf32>
    %45 = vector.multi_reduction <add>, %44, %cst_14 [0] : vector<64x128xf32> to vector<128xf32>
    %46 = vector.shape_cast %45 : vector<128xf32> to vector<1x128xf32>
    %cst_15 = arith.constant dense<0.000000e+00> : vector<128xf32>
    %47 = vector.multi_reduction <add>, %1, %cst_15 [0] : vector<64x128xf32> to vector<128xf32>
    %48 = vector.shape_cast %47 : vector<128xf32> to vector<1x128xf32>
    %49 = tpu.concatenate %43, %46, %48 in 0 : vector<1x128xf32>, vector<1x128xf32>, vector<1x128xf32> -> vector<3x128xf32>
    %cst_16 = arith.constant dense<0.000000e+00> : vector<3x128xf32>
    %50 = tpu.matmul %49, %41, %cst_16 {dimension_numbers = #tpu.dot_dimension_numbers<[1], [0], [0], [1], [0, 0, 1, 1], [], []>} : vector<3x128xf32>, vector<128x128xf32>, vector<3x128xf32> -> vector<3x128xf32>
    %51 = vector.extract_strided_slice %50 {offsets = [0, 0], sizes = [1, 128], strides = [1, 1]} : vector<3x128xf32> to vector<1x128xf32>
    %52 = vector.extract_strided_slice %50 {offsets = [1, 0], sizes = [1, 128], strides = [1, 1]} : vector<3x128xf32> to vector<1x128xf32>
    %53 = vector.extract_strided_slice %50 {offsets = [2, 0], sizes = [1, 128], strides = [1, 1]} : vector<3x128xf32> to vector<1x128xf32>
    %cst_17 = arith.constant 1.000000e+00 : f32
    %54 = vector.broadcast %cst_17 : f32 to vector<1x128xf32>
    %55 = arith.maximumf %53, %54 : vector<1x128xf32>
    %cst_18 = arith.constant 1.000000e+00 : f32
    %56 = vector.broadcast %cst_18 : f32 to vector<1x128xf32>
    %57 = arith.divf %56, %55 : vector<1x128xf32>
    %58 = arith.mulf %51, %57 : vector<1x128xf32>
    %59 = arith.mulf %52, %57 : vector<1x128xf32>
    %60 = arith.mulf %58, %58 : vector<1x128xf32>
    %61 = arith.subf %59, %60 : vector<1x128xf32>
    %cst_19 = arith.constant 9.99999974E-6 : f32
    %62 = vector.broadcast %cst_19 : f32 to vector<1x128xf32>
    %63 = arith.addf %61, %62 : vector<1x128xf32>
    %64 = math.rsqrt %63 : vector<1x128xf32>
    %65 = vector.broadcast %58 : vector<1x128xf32> to vector<64x128xf32>
    %66 = arith.subf %4, %65 : vector<64x128xf32>
    %c0_20 = arith.constant 0 : index
    %c0_21 = arith.constant 0 : index
    %67 = vector.load %arg3[%c0_20, %c0_21] : memref<1x128xf32, #tpu.memory_space<vmem>>, vector<1x128xf32>
    %68 = arith.mulf %64, %67 : vector<1x128xf32>
    %69 = vector.broadcast %68 : vector<1x128xf32> to vector<64x128xf32>
    %70 = arith.mulf %66, %69 : vector<64x128xf32>
    %c0_22 = arith.constant 0 : index
    %c0_23 = arith.constant 0 : index
    %71 = vector.load %arg4[%c0_22, %c0_23] : memref<1x128xf32, #tpu.memory_space<vmem>>, vector<1x128xf32>
    %72 = vector.broadcast %71 : vector<1x128xf32> to vector<64x128xf32>
    %73 = arith.addf %70, %72 : vector<64x128xf32>
    %cst_24 = arith.constant 0.000000e+00 : f32
    %74 = vector.broadcast %cst_24 : f32 to vector<64x128xf32>
    %75 = arith.maximumf %73, %74 : vector<64x128xf32>
    %76 = arith.mulf %75, %1 : vector<64x128xf32>
    %c0_25 = arith.constant 0 : index
    %c0_26 = arith.constant 0 : index
    %c0_27 = arith.constant 0 : index
    %77 = vector.load %arg5[%c0_25, %c0_26, %c0_27] : memref<1x64x128xf32, #tpu.memory_space<vmem>>, vector<1x64x128xf32>
    %78 = vector.shape_cast %77 : vector<1x64x128xf32> to vector<64x128xf32>
    %79 = vector.shape_cast %76 : vector<64x128xf32> to vector<1x64x128xf32>
    tpu.vector_store %arg5[%c0_25, %c0_26, %c0_27], %79 {strides = array<i32>} : memref<1x64x128xf32, #tpu.memory_space<vmem>>, vector<1x64x128xf32>,
    return
  }
  func.func @transform_0(%arg0: i32) -> (i32, i32, i32) {
    %c0_i32 = arith.constant 0 : i32
    %c0_i32_0 = arith.constant 0 : i32
    %c0_i32_1 = arith.constant 0 : i32
    return %arg0, %c0_i32, %c0_i32_0 : i32, i32, i32
  }
  func.func @transform_1(%arg0: i32) -> (i32, i32, i32) {
    %c0_i32 = arith.constant 0 : i32
    %c0_i32_0 = arith.constant 0 : i32
    %c0_i32_1 = arith.constant 0 : i32
    return %arg0, %c0_i32, %c0_i32_0 : i32, i32, i32
  }
  func.func @transform_2(%arg0: i32) -> (i32, i32) {
    %c0_i32 = arith.constant 0 : i32
    %c0_i32_0 = arith.constant 0 : i32
    %c0_i32_1 = arith.constant 0 : i32
    return %c0_i32, %c0_i32_0 : i32, i32
  }
  func.func @transform_3(%arg0: i32) -> (i32, i32) {
    %c0_i32 = arith.constant 0 : i32
    %c0_i32_0 = arith.constant 0 : i32
    %c0_i32_1 = arith.constant 0 : i32
    return %c0_i32, %c0_i32_0 : i32, i32
  }
  func.func @transform_4(%arg0: i32) -> (i32, i32, i32) {
    %c0_i32 = arith.constant 0 : i32
    %c0_i32_0 = arith.constant 0 : i32
    %c0_i32_1 = arith.constant 0 : i32
    return %arg0, %c0_i32, %c0_i32_0 : i32, i32, i32
  }
}

module attributes {stable_mosaic.version = 11 : i64} {
  func.func @_fused_norm_kernel(%arg0: i32, %arg1: memref<1x64x128xf32, #tpu.memory_space<vmem>>, %arg2: memref<1x64x128xf32, #tpu.memory_space<vmem>>, %arg3: memref<1x64x128xf32, #tpu.memory_space<vmem>>, %arg4: memref<1x128xf32, #tpu.memory_space<vmem>>, %arg5: memref<1x128xf32, #tpu.memory_space<vmem>>, %arg6: memref<1x64x128xf32, #tpu.memory_space<vmem>>) attributes {dimension_semantics = [#tpu.dimension_semantics<parallel>], iteration_bounds = array<i64: 1>, scalar_prefetch = 0 : i64, scratch_operands = 0 : i64, tpu.core_type = #tpu.core_type<tc>, window_params = [{transform_indices = @transform_0, window_bounds = array<i64: 1, 64, 128>}, {transform_indices = @transform_1, window_bounds = array<i64: 1, 64, 128>}, {transform_indices = @transform_2, window_bounds = array<i64: 1, 64, 128>}, {pipeline_mode = #tpu.pipeline_mode<synchronous>, transform_indices = @transform_3, window_bounds = array<i64: 1, 128>}, {pipeline_mode = #tpu.pipeline_mode<synchronous>, transform_indices = @transform_4, window_bounds = array<i64: 1, 128>}, {transform_indices = @transform_5, window_bounds = array<i64: 1, 64, 128>}]} {
    %c0 = arith.constant 0 : index
    %c0_0 = arith.constant 0 : index
    %c0_1 = arith.constant 0 : index
    %0 = vector.load %arg2[%c0, %c0_0, %c0_1] : memref<1x64x128xf32, #tpu.memory_space<vmem>>, vector<1x64x128xf32>
    %1 = vector.shape_cast %0 : vector<1x64x128xf32> to vector<64x128xf32>
    %c0_2 = arith.constant 0 : index
    %c0_3 = arith.constant 0 : index
    %c0_4 = arith.constant 0 : index
    %2 = vector.load %arg1[%c0_2, %c0_3, %c0_4] : memref<1x64x128xf32, #tpu.memory_space<vmem>>, vector<1x64x128xf32>
    %3 = vector.shape_cast %2 : vector<1x64x128xf32> to vector<64x128xf32>
    %4 = arith.mulf %3, %1 : vector<64x128xf32>
    %5 = tpu.iota {dimensions = array<i32: 0>} : vector<128x128xi32>
    %6 = tpu.iota {dimensions = array<i32: 1>} : vector<128x128xi32>
    %c8_i32 = arith.constant 8 : i32
    %c0_i32 = arith.constant 0 : i32
    %7 = arith.cmpi eq, %c8_i32, %c0_i32 : i32
    %c1_i32 = arith.constant 1 : i32
    %8 = arith.select %7, %c1_i32, %c8_i32 : i32
    %9 = vector.broadcast %8 : i32 to vector<128x128xi32>
    %10 = arith.remsi %5, %9 : vector<128x128xi32>
    %c0_i32_5 = arith.constant 0 : i32
    %11 = vector.broadcast %c0_i32_5 : i32 to vector<128x128xi32>
    %12 = arith.cmpi ne, %10, %11 : vector<128x128xi32>
    %c0_i32_6 = arith.constant 0 : i32
    %13 = vector.broadcast %c0_i32_6 : i32 to vector<128x128xi32>
    %14 = arith.cmpi slt, %10, %13 : vector<128x128xi32>
    %c0_i32_7 = arith.constant 0 : i32
    %15 = arith.cmpi slt, %8, %c0_i32_7 : i32
    %16 = vector.broadcast %15 : i1 to vector<128x128xi1>
    %17 = vector.broadcast %16 : vector<128x128xi1> to vector<128x128xi1>
    %18 = arith.xori %14, %17 : vector<128x128xi1>
    %19 = arith.andi %18, %12 : vector<128x128xi1>
    %20 = vector.broadcast %8 : i32 to vector<128x128xi32>
    %21 = arith.addi %10, %20 : vector<128x128xi32>
    %22 = arith.select %19, %21, %10 : vector<128x128xi1>, vector<128x128xi32>
    %c8_i32_8 = arith.constant 8 : i32
    %c0_i32_9 = arith.constant 0 : i32
    %23 = arith.cmpi eq, %c8_i32_8, %c0_i32_9 : i32
    %c1_i32_10 = arith.constant 1 : i32
    %24 = arith.select %23, %c1_i32_10, %c8_i32_8 : i32
    %25 = vector.broadcast %24 : i32 to vector<128x128xi32>
    %26 = arith.remsi %6, %25 : vector<128x128xi32>
    %c0_i32_11 = arith.constant 0 : i32
    %27 = vector.broadcast %c0_i32_11 : i32 to vector<128x128xi32>
    %28 = arith.cmpi ne, %26, %27 : vector<128x128xi32>
    %c0_i32_12 = arith.constant 0 : i32
    %29 = vector.broadcast %c0_i32_12 : i32 to vector<128x128xi32>
    %30 = arith.cmpi slt, %26, %29 : vector<128x128xi32>
    %c0_i32_13 = arith.constant 0 : i32
    %31 = arith.cmpi slt, %24, %c0_i32_13 : i32
    %32 = vector.broadcast %31 : i1 to vector<128x128xi1>
    %33 = vector.broadcast %32 : vector<128x128xi1> to vector<128x128xi1>
    %34 = arith.xori %30, %33 : vector<128x128xi1>
    %35 = arith.andi %34, %28 : vector<128x128xi1>
    %36 = vector.broadcast %24 : i32 to vector<128x128xi32>
    %37 = arith.addi %26, %36 : vector<128x128xi32>
    %38 = arith.select %35, %37, %26 : vector<128x128xi1>, vector<128x128xi32>
    %39 = arith.cmpi eq, %22, %38 : vector<128x128xi32>
    %40 = arith.extui %39 : vector<128x128xi1> to vector<128x128xi32>
    %41 = arith.sitofp %40 : vector<128x128xi32> to vector<128x128xf32>
    %cst = arith.constant dense<0.000000e+00> : vector<128xf32>
    %42 = vector.multi_reduction <add>, %4, %cst [0] : vector<64x128xf32> to vector<128xf32>
    %43 = vector.shape_cast %42 : vector<128xf32> to vector<1x128xf32>
    %44 = arith.mulf %4, %4 : vector<64x128xf32>
    %cst_14 = arith.constant dense<0.000000e+00> : vector<128xf32>
    %45 = vector.multi_reduction <add>, %44, %cst_14 [0] : vector<64x128xf32> to vector<128xf32>
    %46 = vector.shape_cast %45 : vector<128xf32> to vector<1x128xf32>
    %cst_15 = arith.constant dense<0.000000e+00> : vector<128xf32>
    %47 = vector.multi_reduction <add>, %1, %cst_15 [0] : vector<64x128xf32> to vector<128xf32>
    %48 = vector.shape_cast %47 : vector<128xf32> to vector<1x128xf32>
    %49 = tpu.concatenate %43, %46, %48 in 0 : vector<1x128xf32>, vector<1x128xf32>, vector<1x128xf32> -> vector<3x128xf32>
    %cst_16 = arith.constant dense<0.000000e+00> : vector<3x128xf32>
    %50 = tpu.matmul %49, %41, %cst_16 {dimension_numbers = #tpu.dot_dimension_numbers<[1], [0], [0], [1], [0, 0, 1, 1], [], []>} : vector<3x128xf32>, vector<128x128xf32>, vector<3x128xf32> -> vector<3x128xf32>
    %51 = vector.extract_strided_slice %50 {offsets = [0, 0], sizes = [1, 128], strides = [1, 1]} : vector<3x128xf32> to vector<1x128xf32>
    %52 = vector.extract_strided_slice %50 {offsets = [1, 0], sizes = [1, 128], strides = [1, 1]} : vector<3x128xf32> to vector<1x128xf32>
    %53 = vector.extract_strided_slice %50 {offsets = [2, 0], sizes = [1, 128], strides = [1, 1]} : vector<3x128xf32> to vector<1x128xf32>
    %cst_17 = arith.constant 1.000000e+00 : f32
    %54 = vector.broadcast %cst_17 : f32 to vector<1x128xf32>
    %55 = arith.maximumf %53, %54 : vector<1x128xf32>
    %cst_18 = arith.constant 1.000000e+00 : f32
    %56 = vector.broadcast %cst_18 : f32 to vector<1x128xf32>
    %57 = arith.divf %56, %55 : vector<1x128xf32>
    %58 = arith.mulf %51, %57 : vector<1x128xf32>
    %59 = arith.mulf %52, %57 : vector<1x128xf32>
    %60 = arith.mulf %58, %58 : vector<1x128xf32>
    %61 = arith.subf %59, %60 : vector<1x128xf32>
    %cst_19 = arith.constant 9.99999974E-6 : f32
    %62 = vector.broadcast %cst_19 : f32 to vector<1x128xf32>
    %63 = arith.addf %61, %62 : vector<1x128xf32>
    %64 = math.rsqrt %63 : vector<1x128xf32>
    %65 = vector.broadcast %58 : vector<1x128xf32> to vector<64x128xf32>
    %66 = arith.subf %4, %65 : vector<64x128xf32>
    %c0_20 = arith.constant 0 : index
    %c0_21 = arith.constant 0 : index
    %67 = vector.load %arg4[%c0_20, %c0_21] : memref<1x128xf32, #tpu.memory_space<vmem>>, vector<1x128xf32>
    %68 = arith.mulf %64, %67 : vector<1x128xf32>
    %69 = vector.broadcast %68 : vector<1x128xf32> to vector<64x128xf32>
    %70 = arith.mulf %66, %69 : vector<64x128xf32>
    %c0_22 = arith.constant 0 : index
    %c0_23 = arith.constant 0 : index
    %71 = vector.load %arg5[%c0_22, %c0_23] : memref<1x128xf32, #tpu.memory_space<vmem>>, vector<1x128xf32>
    %72 = vector.broadcast %71 : vector<1x128xf32> to vector<64x128xf32>
    %73 = arith.addf %70, %72 : vector<64x128xf32>
    %c0_24 = arith.constant 0 : index
    %c0_25 = arith.constant 0 : index
    %c0_26 = arith.constant 0 : index
    %74 = vector.load %arg3[%c0_24, %c0_25, %c0_26] : memref<1x64x128xf32, #tpu.memory_space<vmem>>, vector<1x64x128xf32>
    %75 = vector.shape_cast %74 : vector<1x64x128xf32> to vector<64x128xf32>
    %76 = arith.addf %73, %75 : vector<64x128xf32>
    %cst_27 = arith.constant 0.000000e+00 : f32
    %77 = vector.broadcast %cst_27 : f32 to vector<64x128xf32>
    %78 = arith.maximumf %76, %77 : vector<64x128xf32>
    %79 = arith.mulf %78, %1 : vector<64x128xf32>
    %c0_28 = arith.constant 0 : index
    %c0_29 = arith.constant 0 : index
    %c0_30 = arith.constant 0 : index
    %80 = vector.load %arg6[%c0_28, %c0_29, %c0_30] : memref<1x64x128xf32, #tpu.memory_space<vmem>>, vector<1x64x128xf32>
    %81 = vector.shape_cast %80 : vector<1x64x128xf32> to vector<64x128xf32>
    %82 = vector.shape_cast %79 : vector<64x128xf32> to vector<1x64x128xf32>
    tpu.vector_store %arg6[%c0_28, %c0_29, %c0_30], %82 {strides = array<i32>} : memref<1x64x128xf32, #tpu.memory_space<vmem>>, vector<1x64x128xf32>,
    return
  }
  func.func @transform_0(%arg0: i32) -> (i32, i32, i32) {
    %c0_i32 = arith.constant 0 : i32
    %c0_i32_0 = arith.constant 0 : i32
    %c0_i32_1 = arith.constant 0 : i32
    return %arg0, %c0_i32, %c0_i32_0 : i32, i32, i32
  }
  func.func @transform_1(%arg0: i32) -> (i32, i32, i32) {
    %c0_i32 = arith.constant 0 : i32
    %c0_i32_0 = arith.constant 0 : i32
    %c0_i32_1 = arith.constant 0 : i32
    return %arg0, %c0_i32, %c0_i32_0 : i32, i32, i32
  }
  func.func @transform_2(%arg0: i32) -> (i32, i32, i32) {
    %c0_i32 = arith.constant 0 : i32
    %c0_i32_0 = arith.constant 0 : i32
    %c0_i32_1 = arith.constant 0 : i32
    return %arg0, %c0_i32, %c0_i32_0 : i32, i32, i32
  }
  func.func @transform_3(%arg0: i32) -> (i32, i32) {
    %c0_i32 = arith.constant 0 : i32
    %c0_i32_0 = arith.constant 0 : i32
    %c0_i32_1 = arith.constant 0 : i32
    return %c0_i32, %c0_i32_0 : i32, i32
  }
  func.func @transform_4(%arg0: i32) -> (i32, i32) {
    %c0_i32 = arith.constant 0 : i32
    %c0_i32_0 = arith.constant 0 : i32
    %c0_i32_1 = arith.constant 0 : i32
    return %c0_i32, %c0_i32_0 : i32, i32
  }
  func.func @transform_5(%arg0: i32) -> (i32, i32, i32) {
    %c0_i32 = arith.constant 0 : i32
    %c0_i32_0 = arith.constant 0 : i32
    %c0_i32_1 = arith.constant 0 : i32
    return %arg0, %c0_i32, %c0_i32_0 : i32, i32, i32
  }
}

module attributes {stable_mosaic.version = 11 : i64} {
  func.func @_conv_kernel(%arg0: i32, %arg1: memref<1x10x800xf32, #tpu.memory_space<vmem>>, %arg2: memref<3x800x256xf32, #tpu.memory_space<vmem>>, %arg3: memref<1x256xf32, #tpu.memory_space<vmem>>, %arg4: memref<1x8x256xf32, #tpu.memory_space<vmem>>, %arg5: memref<1x8x256xf32, #tpu.memory_space<vmem>>) attributes {dimension_semantics = [#tpu.dimension_semantics<parallel>], iteration_bounds = array<i64: 2>, scalar_prefetch = 0 : i64, scratch_operands = 0 : i64, tpu.core_type = #tpu.core_type<tc>, window_params = [{transform_indices = @transform_0, window_bounds = array<i64: 1, 10, 800>}, {pipeline_mode = #tpu.pipeline_mode<synchronous>, transform_indices = @transform_1, window_bounds = array<i64: 3, 800, 256>}, {pipeline_mode = #tpu.pipeline_mode<synchronous>, transform_indices = @transform_2, window_bounds = array<i64: 1, 256>}, {transform_indices = @transform_3, window_bounds = array<i64: 1, 8, 256>}, {transform_indices = @transform_4, window_bounds = array<i64: 1, 8, 256>}]} {
    %c0 = arith.constant 0 : index
    %c0_0 = arith.constant 0 : index
    %c0_1 = arith.constant 0 : index
    %0 = vector.load %arg1[%c0, %c0_0, %c0_1] : memref<1x10x800xf32, #tpu.memory_space<vmem>>, vector<1x8x800xf32>
    %1 = vector.shape_cast %0 : vector<1x8x800xf32> to vector<8x800xf32>
    %c0_2 = arith.constant 0 : index
    %c0_3 = arith.constant 0 : index
    %c0_4 = arith.constant 0 : index
    %2 = vector.load %arg2[%c0_2, %c0_3, %c0_4] : memref<3x800x256xf32, #tpu.memory_space<vmem>>, vector<1x800x256xf32>
    %3 = vector.shape_cast %2 : vector<1x800x256xf32> to vector<800x256xf32>
    %cst = arith.constant dense<0.000000e+00> : vector<8x256xf32>
    %4 = tpu.matmul %1, %3, %cst {dimension_numbers = #tpu.dot_dimension_numbers<[1], [0], [0], [1], [0, 0, 1, 1], [], []>} : vector<8x800xf32>, vector<800x256xf32>, vector<8x256xf32> -> vector<8x256xf32>
    %c0_5 = arith.constant 0 : index
    %c1 = arith.constant 1 : index
    %c0_6 = arith.constant 0 : index
    %5 = vector.load %arg1[%c0_5, %c1, %c0_6] : memref<1x10x800xf32, #tpu.memory_space<vmem>>, vector<1x8x800xf32>
    %6 = vector.shape_cast %5 : vector<1x8x800xf32> to vector<8x800xf32>
    %c1_7 = arith.constant 1 : index
    %c0_8 = arith.constant 0 : index
    %c0_9 = arith.constant 0 : index
    %7 = vector.load %arg2[%c1_7, %c0_8, %c0_9] : memref<3x800x256xf32, #tpu.memory_space<vmem>>, vector<1x800x256xf32>
    %8 = vector.shape_cast %7 : vector<1x800x256xf32> to vector<800x256xf32>
    %cst_10 = arith.constant dense<0.000000e+00> : vector<8x256xf32>
    %9 = tpu.matmul %6, %8, %cst_10 {dimension_numbers = #tpu.dot_dimension_numbers<[1], [0], [0], [1], [0, 0, 1, 1], [], []>} : vector<8x800xf32>, vector<800x256xf32>, vector<8x256xf32> -> vector<8x256xf32>
    %10 = arith.addf %4, %9 : vector<8x256xf32>
    %c0_11 = arith.constant 0 : index
    %c2 = arith.constant 2 : index
    %c0_12 = arith.constant 0 : index
    %11 = vector.load %arg1[%c0_11, %c2, %c0_12] : memref<1x10x800xf32, #tpu.memory_space<vmem>>, vector<1x8x800xf32>
    %12 = vector.shape_cast %11 : vector<1x8x800xf32> to vector<8x800xf32>
    %c2_13 = arith.constant 2 : index
    %c0_14 = arith.constant 0 : index
    %c0_15 = arith.constant 0 : index
    %13 = vector.load %arg2[%c2_13, %c0_14, %c0_15] : memref<3x800x256xf32, #tpu.memory_space<vmem>>, vector<1x800x256xf32>
    %14 = vector.shape_cast %13 : vector<1x800x256xf32> to vector<800x256xf32>
    %cst_16 = arith.constant dense<0.000000e+00> : vector<8x256xf32>
    %15 = tpu.matmul %12, %14, %cst_16 {dimension_numbers = #tpu.dot_dimension_numbers<[1], [0], [0], [1], [0, 0, 1, 1], [], []>} : vector<8x800xf32>, vector<800x256xf32>, vector<8x256xf32> -> vector<8x256xf32>
    %16 = arith.addf %10, %15 : vector<8x256xf32>
    %c0_17 = arith.constant 0 : index
    %c0_18 = arith.constant 0 : index
    %17 = vector.load %arg3[%c0_17, %c0_18] : memref<1x256xf32, #tpu.memory_space<vmem>>, vector<1x256xf32>
    %18 = vector.broadcast %17 : vector<1x256xf32> to vector<8x256xf32>
    %19 = arith.addf %16, %18 : vector<8x256xf32>
    %c0_19 = arith.constant 0 : index
    %c0_20 = arith.constant 0 : index
    %c0_21 = arith.constant 0 : index
    %20 = vector.load %arg4[%c0_19, %c0_20, %c0_21] : memref<1x8x256xf32, #tpu.memory_space<vmem>>, vector<1x8x256xf32>
    %21 = vector.shape_cast %20 : vector<1x8x256xf32> to vector<8x256xf32>
    %22 = arith.mulf %19, %21 : vector<8x256xf32>
    %c0_22 = arith.constant 0 : index
    %c0_23 = arith.constant 0 : index
    %c0_24 = arith.constant 0 : index
    %23 = vector.load %arg5[%c0_22, %c0_23, %c0_24] : memref<1x8x256xf32, #tpu.memory_space<vmem>>, vector<1x8x256xf32>
    %24 = vector.shape_cast %23 : vector<1x8x256xf32> to vector<8x256xf32>
    %25 = vector.shape_cast %22 : vector<8x256xf32> to vector<1x8x256xf32>
    tpu.vector_store %arg5[%c0_22, %c0_23, %c0_24], %25 {strides = array<i32>} : memref<1x8x256xf32, #tpu.memory_space<vmem>>, vector<1x8x256xf32>,
    return
  }
  func.func @transform_0(%arg0: i32) -> (i32, i32, i32) {
    %c0_i32 = arith.constant 0 : i32
    %c0_i32_0 = arith.constant 0 : i32
    %c0_i32_1 = arith.constant 0 : i32
    return %arg0, %c0_i32, %c0_i32_0 : i32, i32, i32
  }
  func.func @transform_1(%arg0: i32) -> (i32, i32, i32) {
    %c0_i32 = arith.constant 0 : i32
    %c0_i32_0 = arith.constant 0 : i32
    %c0_i32_1 = arith.constant 0 : i32
    %c0_i32_2 = arith.constant 0 : i32
    return %c0_i32, %c0_i32_0, %c0_i32_1 : i32, i32, i32
  }
  func.func @transform_2(%arg0: i32) -> (i32, i32) {
    %c0_i32 = arith.constant 0 : i32
    %c0_i32_0 = arith.constant 0 : i32
    %c0_i32_1 = arith.constant 0 : i32
    return %c0_i32, %c0_i32_0 : i32, i32
  }
  func.func @transform_3(%arg0: i32) -> (i32, i32, i32) {
    %c0_i32 = arith.constant 0 : i32
    %c0_i32_0 = arith.constant 0 : i32
    %c0_i32_1 = arith.constant 0 : i32
    return %arg0, %c0_i32, %c0_i32_0 : i32, i32, i32
  }
  func.func @transform_4(%arg0: i32) -> (i32, i32, i32) {
    %c0_i32 = arith.constant 0 : i32
    %c0_i32_0 = arith.constant 0 : i32
    %c0_i32_1 = arith.constant 0 : i32
    return %arg0, %c0_i32, %c0_i32_0 : i32, i32, i32
  }
}

</mosaic_0001>

<bundles_post_ra>
// kernel: mul.8
= control target key start
LH: loop header
LB: loop body
LE: loop exit
PB: predicated region body
PF: predicated region fallthrough
CT: control target
= control target key end

     0   :  { %s2140_s0 = inlined_call_operand.vmem [shape: f32[2,8,8,8], index: 0, kind: input, shape index: {}]   ;;  %s2141_s1 = inlined_call_operand.vmem [shape: f32[2,8,8,8,8], index: 1, kind: output, shape index: {}]  }
   0x1   :  { %v1110_v0 = vld [vmem:[%s2140_s0 + $0x8] ss:$0 sm:$0xff]  ;;  %v4_v1 = vld [vmem:[%s2140_s0] ss:$0 sm:$0xff]  ;;  %v1116_v4 = vld [vmem:[%s2140_s0 + $0x50] ss:$0 sm:$0xff] }
   0x2   :  { %19 = vbcast.lane.b32.xlu1 %v1110_v0, 256  ;;  %6 = vbcast.lane.b32.xlu0 %v4_v1, 256  ;;  %v1112_v2 = vld [vmem:[%s2140_s0 + $0x48] ss:$0 sm:$0xff]  ;;  %v1108_v3 = vld [vmem:[%s2140_s0 + $0x40] ss:$0 sm:$0xff] }
   0x3   :  { %v1114_v5 = vld [vmem:[%s2140_s0 + $0x10] ss:$0 sm:$0xff]  ;;  %v1120_v6 = vld [vmem:[%s2140_s0 + $0x58] ss:$0 sm:$0xff]  ;;  %v1124_v8 = vld [vmem:[%s2140_s0 + $0x60] ss:$0 sm:$0xff] }
   0x4   :  { %v1118_v7 = vld [vmem:[%s2140_s0 + $0x18] ss:$0 sm:$0xff]  ;;  %v1122_v9 = vld [vmem:[%s2140_s0 + $0x20] ss:$0 sm:$0xff]  ;;  %v1128_v10 = vld [vmem:[%s2140_s0 + $0x68] ss:$0 sm:$0xff] }
   0x5   :  { %v1126_v11 = vld [vmem:[%s2140_s0 + $0x28] ss:$0 sm:$0xff]  ;;  %v1132_v12 = vld [vmem:[%s2140_s0 + $0x70] ss:$0 sm:$0xff]  ;;  %v1136_v14 = vld [vmem:[%s2140_s0 + $0x78] ss:$0 sm:$0xff] }
   0x6   :  { %26 = vbcast.lane.b32.xlu1 %v1112_v2, 256  ;;  %12 = vbcast.lane.b32.xlu0 %v1108_v3, 256  ;;  %v1130_v13 = vld [vmem:[%s2140_s0 + $0x30] ss:$0 sm:$0xff]  ;;  %v1134_v15 = vld [vmem:[%s2140_s0 + $0x38] ss:$0 sm:$0xff] }
   0x7   :  { %v1140_v16 = vld [vmem:[%s2140_s0 + $0x41] ss:$0 sm:$0xff]  ;;  %v1144_v18 = vld [vmem:[%s2140_s0 + $0x49] ss:$0 sm:$0xff]  ;;  %v1148_v20 = vld [vmem:[%s2140_s0 + $0x51] ss:$0 sm:$0xff] }
   0x8   :  { %v1138_v17 = vld [vmem:[%s2140_s0 + $0x1] ss:$0 sm:$0xff]  ;;  %v1142_v19 = vld [vmem:[%s2140_s0 + $0x9] ss:$0 sm:$0xff]  ;;  %v1146_v21 = vld [vmem:[%s2140_s0 + $0x11] ss:$0 sm:$0xff] }
   0x9   :  { %v1152_v22 = vld [vmem:[%s2140_s0 + $0x59] ss:$0 sm:$0xff]  ;;  %v1156_v24 = vld [vmem:[%s2140_s0 + $0x61] ss:$0 sm:$0xff]  ;;  %v1160_v26 = vld [vmem:[%s2140_s0 + $0x69] ss:$0 sm:$0xff] }
   0xa   :  { %40 = vbcast.lane.b32.xlu1 %v1116_v4, 256  ;;  %33 = vbcast.lane.b32.xlu0 %v1114_v5, 256  ;;  %v1150_v23 = vld [vmem:[%s2140_s0 + $0x19] ss:$0 sm:$0xff]  ;;  %v1154_v25 = vld [vmem:[%s2140_s0 + $0x21] ss:$0 sm:$0xff] }
   0xb   :  { %v1158_v27 = vld [vmem:[%s2140_s0 + $0x29] ss:$0 sm:$0xff]  ;;  %v1164_v28 = vld [vmem:[%s2140_s0 + $0x71] ss:$0 sm:$0xff]  ;;  %v1168_v30 = vld [vmem:[%s2140_s0 + $0x79] ss:$0 sm:$0xff] }
   0xc   :  { %v1162_v29 = vld [vmem:[%s2140_s0 + $0x31] ss:$0 sm:$0xff]  ;;  %v1166_v31 = vld [vmem:[%s2140_s0 + $0x39] ss:$0 sm:$0xff]  ;;  %v1172_v32 = vld [vmem:[%s2140_s0 + $0x42] ss:$0 sm:$0xff] }
   0xd   :  { %v1170_v33 = vld [vmem:[%s2140_s0 + $0x2] ss:$0 sm:$0xff]  ;;  %v1176_v34 = vld [vmem:[%s2140_s0 + $0x4a] ss:$0 sm:$0xff]  ;;  %v1180_v36 = vld [vmem:[%s2140_s0 + $0x52] ss:$0 sm:$0xff] }
   0xe   :  { %54 = vbcast.lane.b32.xlu1 %v1120_v6, 256  ;;  %47 = vbcast.lane.b32.xlu0 %v1118_v7, 256  ;;  %v1174_v35 = vld [vmem:[%s2140_s0 + $0xa] ss:$0 sm:$0xff]  ;;  %v1178_v37 = vld [vmem:[%s2140_s0 + $0x12] ss:$0 sm:$0xff] }
   0xf   :  { %v1184_v38 = vld [vmem:[%s2140_s0 + $0x5a] ss:$0 sm:$0xff]  ;;  %v1188_v40 = vld [vmem:[%s2140_s0 + $0x62] ss:$0 sm:$0xff]  ;;  %v1192_v42 = vld [vmem:[%s2140_s0 + $0x6a] ss:$0 sm:$0xff] }
  0x10   :  { %v1182_v39 = vld [vmem:[%s2140_s0 + $0x1a] ss:$0 sm:$0xff]  ;;  %v1186_v41 = vld [vmem:[%s2140_s0 + $0x22] ss:$0 sm:$0xff]  ;;  %v1190_v43 = vld [vmem:[%s2140_s0 + $0x2a] ss:$0 sm:$0xff] }
  0x11   :  { %v1196_v44 = vld [vmem:[%s2140_s0 + $0x72] ss:$0 sm:$0xff]  ;;  %v1200_v46 = vld [vmem:[%s2140_s0 + $0x7a] ss:$0 sm:$0xff]  ;;  %v1204_v48 = vld [vmem:[%s2140_s0 + $0x43] ss:$0 sm:$0xff] }
  0x12   :  { %68 = vbcast.lane.b32.xlu1 %v1124_v8, 256  ;;  %61 = vbcast.lane.b32.xlu0 %v1122_v9, 256  ;;  %v1194_v45 = vld [vmem:[%s2140_s0 + $0x32] ss:$0 sm:$0xff]  ;;  %v1198_v47 = vld [vmem:[%s2140_s0 + $0x3a] ss:$0 sm:$0xff] }
  0x13   :  { %v1202_v49 = vld [vmem:[%s2140_s0 + $0x3] ss:$0 sm:$0xff]  ;;  %v1208_v50 = vld [vmem:[%s2140_s0 + $0x4b] ss:$0 sm:$0xff]  ;;  %v1212_v52 = vld [vmem:[%s2140_s0 + $0x53] ss:$0 sm:$0xff] }
  0x14   :  { %v1206_v51 = vld [vmem:[%s2140_s0 + $0xb] ss:$0 sm:$0xff]  ;;  %v1210_v53 = vld [vmem:[%s2140_s0 + $0x13] ss:$0 sm:$0xff]  ;;  %v1216_v54 = vld [vmem:[%s2140_s0 + $0x5b] ss:$0 sm:$0xff] }
  0x15   :  { %v1214_v55 = vld [vmem:[%s2140_s0 + $0x1b] ss:$0 sm:$0xff]  ;;  %v1220_v56 = vld [vmem:[%s2140_s0 + $0x63] ss:$0 sm:$0xff]  ;;  %v1224_v58 = vld [vmem:[%s2140_s0 + $0x6b] ss:$0 sm:$0xff] }
  0x16   :  { %82 = vbcast.lane.b32.xlu1 %v1128_v10, 256  ;;  %75 = vbcast.lane.b32.xlu0 %v1126_v11, 256  ;;  %v1218_v57 = vld [vmem:[%s2140_s0 + $0x23] ss:$0 sm:$0xff]  ;;  %v1222_v59 = vld [vmem:[%s2140_s0 + $0x2b] ss:$0 sm:$0xff] }
  0x17   :  { %v1228_v62 = vld [vmem:[%s2140_s0 + $0x73] ss:$0 sm:$0xff]  ;;  %v1232_v2 = vld [vmem:[%s2140_s0 + $0x7b] ss:$0 sm:$0xff]  ;;  %v1236_v6 = vld [vmem:[%s2140_s0 + $0x44] ss:$0 sm:$0xff] }
  0x18   :  { %v1226_v63 = vld [vmem:[%s2140_s0 + $0x33] ss:$0 sm:$0xff]  ;;  %v1230_v3 = vld [vmem:[%s2140_s0 + $0x3b] ss:$0 sm:$0xff]  ;;  %v1234_v7 = vld [vmem:[%s2140_s0 + $0x4] ss:$0 sm:$0xff] }
  0x19   :  { %v1240_v10 = vld [vmem:[%s2140_s0 + $0x4c] ss:$0 sm:$0xff] }
  0x1a   :  { %96 = vbcast.lane.b32.xlu1 %v1132_v12, 256  ;;  %89 = vbcast.lane.b32.xlu0 %v1130_v13, 256  ;;  %v1238_v11 = vld [vmem:[%s2140_s0 + $0xc] ss:$0 sm:$0xff] }
  0x1e   :  { %110 = vbcast.lane.b32.xlu1 %v1136_v14, 256  ;;  %103 = vbcast.lane.b32.xlu0 %v1134_v15, 256  ;;  %v1244_v14 = vld [vmem:[%s2140_s0 + $0x54] ss:$0 sm:$0xff] }
  0x1f   :  { %v1242_v15 = vld [vmem:[%s2140_s0 + $0x14] ss:$0 sm:$0xff] }
  0x22   :  { %125 = vbcast.lane.b32.xlu1 %v1140_v16, 256  ;;  %117 = vbcast.lane.b32.xlu0 %v1138_v17, 256 }
  0x26   :  { %141 = vbcast.lane.b32.xlu1 %v1144_v18, 256  ;;  %133 = vbcast.lane.b32.xlu0 %v1142_v19, 256  ;;  %v1248_v18 = vld [vmem:[%s2140_s0 + $0x5c] ss:$0 sm:$0xff] }
  0x27   :  { %v1246_v19 = vld [vmem:[%s2140_s0 + $0x1c] ss:$0 sm:$0xff] }
  0x2a   :  { %157 = vbcast.lane.b32.xlu1 %v1148_v20, 256  ;;  %149 = vbcast.lane.b32.xlu0 %v1146_v21, 256 }
  0x2e   :  { %173 = vbcast.lane.b32.xlu1 %v1152_v22, 256  ;;  %165 = vbcast.lane.b32.xlu0 %v1150_v23, 256  ;;  %v1252_v22 = vld [vmem:[%s2140_s0 + $0x64] ss:$0 sm:$0xff] }
  0x2f   :  { %v1250_v23 = vld [vmem:[%s2140_s0 + $0x24] ss:$0 sm:$0xff] }
  0x32   :  { %189 = vbcast.lane.b32.xlu1 %v1156_v24, 256  ;;  %181 = vbcast.lane.b32.xlu0 %v1154_v25, 256 }
  0x36   :  { %205 = vbcast.lane.b32.xlu1 %v1160_v26, 256  ;;  %197 = vbcast.lane.b32.xlu0 %v1158_v27, 256  ;;  %v1256_v26 = vld [vmem:[%s2140_s0 + $0x6c] ss:$0 sm:$0xff] }
  0x37   :  { %v1254_v27 = vld [vmem:[%s2140_s0 + $0x2c] ss:$0 sm:$0xff] }
  0x3a   :  { %221 = vbcast.lane.b32.xlu1 %v1164_v28, 256  ;;  %213 = vbcast.lane.b32.xlu0 %v1162_v29, 256 }
  0x3e   :  { %237 = vbcast.lane.b32.xlu1 %v1168_v30, 256  ;;  %229 = vbcast.lane.b32.xlu0 %v1166_v31, 256  ;;  %v1260_v30 = vld [vmem:[%s2140_s0 + $0x74] ss:$0 sm:$0xff] }
  0x3f   :  { %v1258_v31 = vld [vmem:[%s2140_s0 + $0x34] ss:$0 sm:$0xff] }
  0x42   :  { %252 = vbcast.lane.b32.xlu1 %v1172_v32, 256  ;;  %244 = vbcast.lane.b32.xlu0 %v1170_v33, 256 }
  0x46   :  { %268 = vbcast.lane.b32.xlu1 %v1176_v34, 256  ;;  %260 = vbcast.lane.b32.xlu0 %v1174_v35, 256  ;;  %v1264_v34 = vld [vmem:[%s2140_s0 + $0x7c] ss:$0 sm:$0xff] }
  0x47   :  { %v1262_v35 = vld [vmem:[%s2140_s0 + $0x3c] ss:$0 sm:$0xff] }
  0x4a   :  { %284 = vbcast.lane.b32.xlu1 %v1180_v36, 256  ;;  %276 = vbcast.lane.b32.xlu0 %v1178_v37, 256 }
  0x4e   :  { %300 = vbcast.lane.b32.xlu1 %v1184_v38, 256  ;;  %292 = vbcast.lane.b32.xlu0 %v1182_v39, 256  ;;  %v1268_v38 = vld [vmem:[%s2140_s0 + $0x45] ss:$0 sm:$0xff] }
  0x4f   :  { %v1266_v39 = vld [vmem:[%s2140_s0 + $0x5] ss:$0 sm:$0xff] }
  0x52   :  { %316 = vbcast.lane.b32.xlu1 %v1188_v40, 256  ;;  %308 = vbcast.lane.b32.xlu0 %v1186_v41, 256 }
  0x56   :  { %332 = vbcast.lane.b32.xlu1 %v1192_v42, 256  ;;  %324 = vbcast.lane.b32.xlu0 %v1190_v43, 256  ;;  %v1272_v42 = vld [vmem:[%s2140_s0 + $0x4d] ss:$0 sm:$0xff] }
  0x57   :  { %v1270_v43 = vld [vmem:[%s2140_s0 + $0xd] ss:$0 sm:$0xff] }
  0x5a   :  { %348 = vbcast.lane.b32.xlu1 %v1196_v44, 256  ;;  %340 = vbcast.lane.b32.xlu0 %v1194_v45, 256 }
  0x5e   :  { %364 = vbcast.lane.b32.xlu1 %v1200_v46, 256  ;;  %356 = vbcast.lane.b32.xlu0 %v1198_v47, 256  ;;  %v1276_v46 = vld [vmem:[%s2140_s0 + $0x55] ss:$0 sm:$0xff] }
  0x5f   :  { %v1274_v47 = vld [vmem:[%s2140_s0 + $0x15] ss:$0 sm:$0xff] }
  0x62   :  { %379 = vbcast.lane.b32.xlu1 %v1204_v48, 256  ;;  %371 = vbcast.lane.b32.xlu0 %v1202_v49, 256 }
  0x66   :  { %395 = vbcast.lane.b32.xlu1 %v1208_v50, 256  ;;  %387 = vbcast.lane.b32.xlu0 %v1206_v51, 256  ;;  %v1280_v50 = vld [vmem:[%s2140_s0 + $0x5d] ss:$0 sm:$0xff] }
  0x67   :  { %v1278_v51 = vld [vmem:[%s2140_s0 + $0x1d] ss:$0 sm:$0xff] }
  0x6a   :  { %411 = vbcast.lane.b32.xlu1 %v1212_v52, 256  ;;  %403 = vbcast.lane.b32.xlu0 %v1210_v53, 256 }
  0x6e   :  { %427 = vbcast.lane.b32.xlu1 %v1216_v54, 256  ;;  %419 = vbcast.lane.b32.xlu0 %v1214_v55, 256  ;;  %v1284_v54 = vld [vmem:[%s2140_s0 + $0x65] ss:$0 sm:$0xff] }
  0x6f   :  { %v1282_v55 = vld [vmem:[%s2140_s0 + $0x25] ss:$0 sm:$0xff] }
  0x72   :  { %443 = vbcast.lane.b32.xlu1 %v1220_v56, 256  ;;  %435 = vbcast.lane.b32.xlu0 %v1218_v57, 256 }
  0x74   :  { %v20_v60 = vpop.permute.xlu1 %19  ;;  %v7_v61 = vpop.permute.xlu0 %6 }
  0x75   :  { %1111 = vst [vmem:[%s2141_s1 + $0x40] sm:$0xff] %v20_v60  ;;  %8 = vst [vmem:[%s2141_s1] sm:$0xff] %v7_v61 }
  0x76   :  { %459 = vbcast.lane.b32.xlu1 %v1224_v58, 256  ;;  %451 = vbcast.lane.b32.xlu0 %v1222_v59, 256  ;;  %v1288_v58 = vld [vmem:[%s2140_s0 + $0x6d] ss:$0 sm:$0xff] }
  0x77   :  { %v1286_v59 = vld [vmem:[%s2140_s0 + $0x2d] ss:$0 sm:$0xff] }
  0x78   :  { %v27_v0 = vpop.permute.xlu1 %26  ;;  %v13_v1 = vpop.permute.xlu0 %12 }
  0x79   :  { %1113 = vst [vmem:[%s2141_s1 + $0x240] sm:$0xff] %v27_v0  ;;  %1109 = vst [vmem:[%s2141_s1 + $0x200] sm:$0xff] %v13_v1 }
  0x7a   :  { %475 = vbcast.lane.b32.xlu1 %v1228_v62, 256  ;;  %467 = vbcast.lane.b32.xlu0 %v1226_v63, 256  ;;  %v1292_v62 = vld [vmem:[%s2140_s0 + $0x75] ss:$0 sm:$0xff] }
  0x7b   :  { %v1290_v63 = vld [vmem:[%s2140_s0 + $0x35] ss:$0 sm:$0xff] }
  0x7c   :  { %v41_v4 = vpop.permute.xlu1 %40  ;;  %v34_v5 = vpop.permute.xlu0 %33 }
  0x7d   :  { %1117 = vst [vmem:[%s2141_s1 + $0x280] sm:$0xff] %v41_v4  ;;  %1115 = vst [vmem:[%s2141_s1 + $0x80] sm:$0xff] %v34_v5 }
  0x7e   :  { %491 = vbcast.lane.b32.xlu1 %v1232_v2, 256  ;;  %483 = vbcast.lane.b32.xlu0 %v1230_v3, 256  ;;  %v1296_v2 = vld [vmem:[%s2140_s0 + $0x7d] ss:$0 sm:$0xff] }
  0x7f   :  { %v1294_v3 = vld [vmem:[%s2140_s0 + $0x3d] ss:$0 sm:$0xff] }
  0x80   :  { %v55_v8 = vpop.permute.xlu1 %54  ;;  %v48_v9 = vpop.permute.xlu0 %47 }
  0x81   :  { %1121 = vst [vmem:[%s2141_s1 + $0x2c0] sm:$0xff] %v55_v8  ;;  %1119 = vst [vmem:[%s2141_s1 + $0xc0] sm:$0xff] %v48_v9 }
  0x82   :  { %506 = vbcast.lane.b32.xlu1 %v1236_v6, 256  ;;  %498 = vbcast.lane.b32.xlu0 %v1234_v7, 256  ;;  %v1300_v6 = vld [vmem:[%s2140_s0 + $0x46] ss:$0 sm:$0xff] }
  0x83   :  { %v1298_v7 = vld [vmem:[%s2140_s0 + $0x6] ss:$0 sm:$0xff] }
  0x84   :  { %v69_v12 = vpop.permute.xlu1 %68  ;;  %v62_v13 = vpop.permute.xlu0 %61 }
  0x85   :  { %1125 = vst [vmem:[%s2141_s1 + $0x300] sm:$0xff] %v69_v12  ;;  %1123 = vst [vmem:[%s2141_s1 + $0x100] sm:$0xff] %v62_v13 }
  0x86   :  { %522 = vbcast.lane.b32.xlu1 %v1240_v10, 256  ;;  %514 = vbcast.lane.b32.xlu0 %v1238_v11, 256  ;;  %v1304_v10 = vld [vmem:[%s2140_s0 + $0x4e] ss:$0 sm:$0xff] }
  0x87   :  { %v1302_v11 = vld [vmem:[%s2140_s0 + $0xe] ss:$0 sm:$0xff] }
  0x88   :  { %v83_v16 = vpop.permute.xlu1 %82  ;;  %v76_v17 = vpop.permute.xlu0 %75 }
  0x89   :  { %1129 = vst [vmem:[%s2141_s1 + $0x340] sm:$0xff] %v83_v16  ;;  %1127 = vst [vmem:[%s2141_s1 + $0x140] sm:$0xff] %v76_v17 }
  0x8a   :  { %538 = vbcast.lane.b32.xlu1 %v1244_v14, 256  ;;  %530 = vbcast.lane.b32.xlu0 %v1242_v15, 256  ;;  %v1308_v14 = vld [vmem:[%s2140_s0 + $0x56] ss:$0 sm:$0xff] }
  0x8b   :  { %v1306_v15 = vld [vmem:[%s2140_s0 + $0x16] ss:$0 sm:$0xff] }
  0x8c   :  { %v97_v20 = vpop.permute.xlu1 %96  ;;  %v90_v21 = vpop.permute.xlu0 %89 }
  0x8d   :  { %1133 = vst [vmem:[%s2141_s1 + $0x380] sm:$0xff] %v97_v20  ;;  %1131 = vst [vmem:[%s2141_s1 + $0x180] sm:$0xff] %v90_v21 }
  0x8e   :  { %554 = vbcast.lane.b32.xlu1 %v1248_v18, 256  ;;  %546 = vbcast.lane.b32.xlu0 %v1246_v19, 256  ;;  %v1312_v18 = vld [vmem:[%s2140_s0 + $0x5e] ss:$0 sm:$0xff] }
  0x8f   :  { %v1310_v19 = vld [vmem:[%s2140_s0 + $0x1e] ss:$0 sm:$0xff] }
  0x90   :  { %v111_v24 = vpop.permute.xlu1 %110  ;;  %v104_v25 = vpop.permute.xlu0 %103 }
  0x91   :  { %1137 = vst [vmem:[%s2141_s1 + $0x3c0] sm:$0xff] %v111_v24  ;;  %1135 = vst [vmem:[%s2141_s1 + $0x1c0] sm:$0xff] %v104_v25 }
  0x92   :  { %570 = vbcast.lane.b32.xlu1 %v1252_v22, 256  ;;  %562 = vbcast.lane.b32.xlu0 %v1250_v23, 256  ;;  %v1316_v22 = vld [vmem:[%s2140_s0 + $0x66] ss:$0 sm:$0xff] }
  0x93   :  { %v1314_v23 = vld [vmem:[%s2140_s0 + $0x26] ss:$0 sm:$0xff] }
  0x94   :  { %v126_v28 = vpop.permute.xlu1 %125  ;;  %v118_v29 = vpop.permute.xlu0 %117 }
  0x95   :  { %1141 = vst [vmem:[%s2141_s1 + $0x208] sm:$0xff] %v126_v28  ;;  %1139 = vst [vmem:[%s2141_s1 + $0x8] sm:$0xff] %v118_v29 }
  0x96   :  { %586 = vbcast.lane.b32.xlu1 %v1256_v26, 256  ;;  %578 = vbcast.lane.b32.xlu0 %v1254_v27, 256  ;;  %v1320_v26 = vld [vmem:[%s2140_s0 + $0x6e] ss:$0 sm:$0xff] }
  0x97   :  { %v1318_v27 = vld [vmem:[%s2140_s0 + $0x2e] ss:$0 sm:$0xff] }
  0x98   :  { %v142_v32 = vpop.permute.xlu1 %141  ;;  %v134_v33 = vpop.permute.xlu0 %133 }
  0x99   :  { %1145 = vst [vmem:[%s2141_s1 + $0x248] sm:$0xff] %v142_v32  ;;  %1143 = vst [vmem:[%s2141_s1 + $0x48] sm:$0xff] %v134_v33 }
  0x9a   :  { %602 = vbcast.lane.b32.xlu1 %v1260_v30, 256  ;;  %594 = vbcast.lane.b32.xlu0 %v1258_v31, 256  ;;  %v1324_v30 = vld [vmem:[%s2140_s0 + $0x76] ss:$0 sm:$0xff] }
  0x9b   :  { %v1322_v31 = vld [vmem:[%s2140_s0 + $0x36] ss:$0 sm:$0xff] }
  0x9c   :  { %v158_v36 = vpop.permute.xlu1 %157  ;;  %v150_v37 = vpop.permute.xlu0 %149 }
  0x9d   :  { %1149 = vst [vmem:[%s2141_s1 + $0x288] sm:$0xff] %v158_v36  ;;  %1147 = vst [vmem:[%s2141_s1 + $0x88] sm:$0xff] %v150_v37 }
  0x9e   :  { %618 = vbcast.lane.b32.xlu1 %v1264_v34, 256  ;;  %610 = vbcast.lane.b32.xlu0 %v1262_v35, 256  ;;  %v1328_v34 = vld [vmem:[%s2140_s0 + $0x7e] ss:$0 sm:$0xff] }
  0x9f   :  { %v1326_v35 = vld [vmem:[%s2140_s0 + $0x3e] ss:$0 sm:$0xff] }
  0xa0   :  { %v174_v40 = vpop.permute.xlu1 %173  ;;  %v166_v41 = vpop.permute.xlu0 %165 }
  0xa1   :  { %1153 = vst [vmem:[%s2141_s1 + $0x2c8] sm:$0xff] %v174_v40  ;;  %1151 = vst [vmem:[%s2141_s1 + $0xc8] sm:$0xff] %v166_v41 }
  0xa2   :  { %633 = vbcast.lane.b32.xlu1 %v1268_v38, 256  ;;  %625 = vbcast.lane.b32.xlu0 %v1266_v39, 256  ;;  %v1332_v38 = vld [vmem:[%s2140_s0 + $0x47] ss:$0 sm:$0xff] }
  0xa3   :  { %v1330_v39 = vld [vmem:[%s2140_s0 + $0x7] ss:$0 sm:$0xff] }
  0xa4   :  { %v190_v44 = vpop.permute.xlu1 %189  ;;  %v182_v45 = vpop.permute.xlu0 %181 }
  0xa5   :  { %1157 = vst [vmem:[%s2141_s1 + $0x308] sm:$0xff] %v190_v44  ;;  %1155 = vst [vmem:[%s2141_s1 + $0x108] sm:$0xff] %v182_v45 }
  0xa6   :  { %649 = vbcast.lane.b32.xlu1 %v1272_v42, 256  ;;  %641 = vbcast.lane.b32.xlu0 %v1270_v43, 256  ;;  %v1336_v42 = vld [vmem:[%s2140_s0 + $0x4f] ss:$0 sm:$0xff] }
  0xa7   :  { %v1334_v43 = vld [vmem:[%s2140_s0 + $0xf] ss:$0 sm:$0xff] }
  0xa8   :  { %v206_v48 = vpop.permute.xlu1 %205  ;;  %v198_v49 = vpop.permute.xlu0 %197 }
  0xa9   :  { %1161 = vst [vmem:[%s2141_s1 + $0x348] sm:$0xff] %v206_v48  ;;  %1159 = vst [vmem:[%s2141_s1 + $0x148] sm:$0xff] %v198_v49 }
  0xaa   :  { %665 = vbcast.lane.b32.xlu1 %v1276_v46, 256  ;;  %657 = vbcast.lane.b32.xlu0 %v1274_v47, 256  ;;  %v1340_v46 = vld [vmem:[%s2140_s0 + $0x57] ss:$0 sm:$0xff] }
  0xab   :  { %v1338_v47 = vld [vmem:[%s2140_s0 + $0x17] ss:$0 sm:$0xff] }
  0xac   :  { %v222_v52 = vpop.permute.xlu1 %221  ;;  %v214_v53 = vpop.permute.xlu0 %213 }
  0xad   :  { %1165 = vst [vmem:[%s2141_s1 + $0x388] sm:$0xff] %v222_v52  ;;  %1163 = vst [vmem:[%s2141_s1 + $0x188] sm:$0xff] %v214_v53 }
  0xae   :  { %681 = vbcast.lane.b32.xlu1 %v1280_v50, 256  ;;  %673 = vbcast.lane.b32.xlu0 %v1278_v51, 256  ;;  %v1344_v50 = vld [vmem:[%s2140_s0 + $0x5f] ss:$0 sm:$0xff] }
  0xaf   :  { %v1342_v51 = vld [vmem:[%s2140_s0 + $0x1f] ss:$0 sm:$0xff] }
  0xb0   :  { %v238_v56 = vpop.permute.xlu1 %237  ;;  %v230_v57 = vpop.permute.xlu0 %229 }
  0xb1   :  { %1169 = vst [vmem:[%s2141_s1 + $0x3c8] sm:$0xff] %v238_v56  ;;  %1167 = vst [vmem:[%s2141_s1 + $0x1c8] sm:$0xff] %v230_v57 }
  0xb2   :  { %697 = vbcast.lane.b32.xlu1 %v1284_v54, 256  ;;  %689 = vbcast.lane.b32.xlu0 %v1282_v55, 256  ;;  %v1348_v54 = vld [vmem:[%s2140_s0 + $0x67] ss:$0 sm:$0xff] }
  0xb3   :  { %v1346_v55 = vld [vmem:[%s2140_s0 + $0x27] ss:$0 sm:$0xff] }
  0xb4   :  { %v253_v60 = vpop.permute.xlu1 %252  ;;  %v245_v61 = vpop.permute.xlu0 %244 }
  0xb5   :  { %1173 = vst [vmem:[%s2141_s1 + $0x210] sm:$0xff] %v253_v60  ;;  %1171 = vst [vmem:[%s2141_s1 + $0x10] sm:$0xff] %v245_v61 }
  0xb6   :  { %713 = vbcast.lane.b32.xlu1 %v1288_v58, 256  ;;  %705 = vbcast.lane.b32.xlu0 %v1286_v59, 256  ;;  %v1352_v58 = vld [vmem:[%s2140_s0 + $0x6f] ss:$0 sm:$0xff] }
  0xb7   :  { %v1350_v59 = vld [vmem:[%s2140_s0 + $0x2f] ss:$0 sm:$0xff] }
  0xb8   :  { %v269_v0 = vpop.permute.xlu1 %268  ;;  %v261_v1 = vpop.permute.xlu0 %260 }
  0xb9   :  { %1177 = vst [vmem:[%s2141_s1 + $0x250] sm:$0xff] %v269_v0  ;;  %1175 = vst [vmem:[%s2141_s1 + $0x50] sm:$0xff] %v261_v1 }
  0xba   :  { %729 = vbcast.lane.b32.xlu1 %v1292_v62, 256  ;;  %721 = vbcast.lane.b32.xlu0 %v1290_v63, 256  ;;  %v1356_v62 = vld [vmem:[%s2140_s0 + $0x77] ss:$0 sm:$0xff] }
  0xbb   :  { %v1354_v63 = vld [vmem:[%s2140_s0 + $0x37] ss:$0 sm:$0xff] }
  0xbc   :  { %v285_v4 = vpop.permute.xlu1 %284  ;;  %v277_v5 = vpop.permute.xlu0 %276 }
  0xbd   :  { %1181 = vst [vmem:[%s2141_s1 + $0x290] sm:$0xff] %v285_v4  ;;  %1179 = vst [vmem:[%s2141_s1 + $0x90] sm:$0xff] %v277_v5 }
  0xbe   :  { %745 = vbcast.lane.b32.xlu1 %v1296_v2, 256  ;;  %737 = vbcast.lane.b32.xlu0 %v1294_v3, 256  ;;  %v1360_v2 = vld [vmem:[%s2140_s0 + $0x7f] ss:$0 sm:$0xff] }
  0xbf   :  { %v1358_v3 = vld [vmem:[%s2140_s0 + $0x3f] ss:$0 sm:$0xff] }
  0xc0   :  { %v301_v8 = vpop.permute.xlu1 %300  ;;  %v293_v9 = vpop.permute.xlu0 %292 }
  0xc1   :  { %1185 = vst [vmem:[%s2141_s1 + $0x2d0] sm:$0xff] %v301_v8  ;;  %1183 = vst [vmem:[%s2141_s1 + $0xd0] sm:$0xff] %v293_v9 }
  0xc2   :  { %760 = vbcast.lane.b32.xlu1 %v1300_v6, 256  ;;  %752 = vbcast.lane.b32.xlu0 %v1298_v7, 256 }
  0xc4   :  { %v317_v12 = vpop.permute.xlu1 %316  ;;  %v309_v13 = vpop.permute.xlu0 %308 }
  0xc5   :  { %1189 = vst [vmem:[%s2141_s1 + $0x310] sm:$0xff] %v317_v12  ;;  %1187 = vst [vmem:[%s2141_s1 + $0x110] sm:$0xff] %v309_v13 }
  0xc6   :  { %776 = vbcast.lane.b32.xlu1 %v1304_v10, 256  ;;  %768 = vbcast.lane.b32.xlu0 %v1302_v11, 256 }
  0xc8   :  { %v333_v16 = vpop.permute.xlu1 %332  ;;  %v325_v17 = vpop.permute.xlu0 %324 }
  0xc9   :  { %1193 = vst [vmem:[%s2141_s1 + $0x350] sm:$0xff] %v333_v16  ;;  %1191 = vst [vmem:[%s2141_s1 + $0x150] sm:$0xff] %v325_v17 }
  0xca   :  { %792 = vbcast.lane.b32.xlu1 %v1308_v14, 256  ;;  %784 = vbcast.lane.b32.xlu0 %v1306_v15, 256 }
  0xcc   :  { %v349_v20 = vpop.permute.xlu1 %348  ;;  %v341_v21 = vpop.permute.xlu0 %340 }
  0xcd   :  { %1197 = vst [vmem:[%s2141_s1 + $0x390] sm:$0xff] %v349_v20  ;;  %1195 = vst [vmem:[%s2141_s1 + $0x190] sm:$0xff] %v341_v21 }
  0xce   :  { %808 = vbcast.lane.b32.xlu1 %v1312_v18, 256  ;;  %800 = vbcast.lane.b32.xlu0 %v1310_v19, 256 }
  0xd0   :  { %v365_v24 = vpop.permute.xlu1 %364  ;;  %v357_v25 = vpop.permute.xlu0 %356 }
  0xd1   :  { %1201 = vst [vmem:[%s2141_s1 + $0x3d0] sm:$0xff] %v365_v24  ;;  %1199 = vst [vmem:[%s2141_s1 + $0x1d0] sm:$0xff] %v357_v25 }
  0xd2   :  { %824 = vbcast.lane.b32.xlu1 %v1316_v22, 256  ;;  %816 = vbcast.lane.b32.xlu0 %v1314_v23, 256 }
  0xd4   :  { %v380_v28 = vpop.permute.xlu1 %379  ;;  %v372_v29 = vpop.permute.xlu0 %371 }
  0xd5   :  { %1205 = vst [vmem:[%s2141_s1 + $0x218] sm:$0xff] %v380_v28  ;;  %1203 = vst [vmem:[%s2141_s1 + $0x18] sm:$0xff] %v372_v29 }
  0xd6   :  { %840 = vbcast.lane.b32.xlu1 %v1320_v26, 256  ;;  %832 = vbcast.lane.b32.xlu0 %v1318_v27, 256 }
  0xd8   :  { %v396_v32 = vpop.permute.xlu1 %395  ;;  %v388_v33 = vpop.permute.xlu0 %387 }
  0xd9   :  { %1209 = vst [vmem:[%s2141_s1 + $0x258] sm:$0xff] %v396_v32  ;;  %1207 = vst [vmem:[%s2141_s1 + $0x58] sm:$0xff] %v388_v33 }
  0xda   :  { %856 = vbcast.lane.b32.xlu1 %v1324_v30, 256  ;;  %848 = vbcast.lane.b32.xlu0 %v1322_v31, 256 }
  0xdc   :  { %v412_v36 = vpop.permute.xlu1 %411  ;;  %v404_v37 = vpop.permute.xlu0 %403 }
  0xdd   :  { %1213 = vst [vmem:[%s2141_s1 + $0x298] sm:$0xff] %v412_v36  ;;  %1211 = vst [vmem:[%s2141_s1 + $0x98] sm:$0xff] %v404_v37 }
  0xde   :  { %872 = vbcast.lane.b32.xlu1 %v1328_v34, 256  ;;  %864 = vbcast.lane.b32.xlu0 %v1326_v35, 256 }
  0xe0   :  { %v428_v40 = vpop.permute.xlu1 %427  ;;  %v420_v41 = vpop.permute.xlu0 %419 }
  0xe1   :  { %1217 = vst [vmem:[%s2141_s1 + $0x2d8] sm:$0xff] %v428_v40  ;;  %1215 = vst [vmem:[%s2141_s1 + $0xd8] sm:$0xff] %v420_v41 }
  0xe2   :  { %887 = vbcast.lane.b32.xlu1 %v1332_v38, 256  ;;  %879 = vbcast.lane.b32.xlu0 %v1330_v39, 256 }
  0xe4   :  { %v444_v44 = vpop.permute.xlu1 %443  ;;  %v436_v45 = vpop.permute.xlu0 %435 }
  0xe5   :  { %1221 = vst [vmem:[%s2141_s1 + $0x318] sm:$0xff] %v444_v44  ;;  %1219 = vst [vmem:[%s2141_s1 + $0x118] sm:$0xff] %v436_v45 }
  0xe6   :  { %903 = vbcast.lane.b32.xlu1 %v1336_v42, 256  ;;  %895 = vbcast.lane.b32.xlu0 %v1334_v43, 256 }
  0xe8   :  { %v460_v48 = vpop.permute.xlu1 %459  ;;  %v452_v49 = vpop.permute.xlu0 %451 }
  0xe9   :  { %1225 = vst [vmem:[%s2141_s1 + $0x358] sm:$0xff] %v460_v48  ;;  %1223 = vst [vmem:[%s2141_s1 + $0x158] sm:$0xff] %v452_v49 }
  0xea   :  { %919 = vbcast.lane.b32.xlu1 %v1340_v46, 256  ;;  %911 = vbcast.lane.b32.xlu0 %v1338_v47, 256 }
  0xec   :  { %v476_v52 = vpop.permute.xlu1 %475  ;;  %v468_v53 = vpop.permute.xlu0 %467 }
  0xed   :  { %1229 = vst [vmem:[%s2141_s1 + $0x398] sm:$0xff] %v476_v52  ;;  %1227 = vst [vmem:[%s2141_s1 + $0x198] sm:$0xff] %v468_v53 }
  0xee   :  { %935 = vbcast.lane.b32.xlu1 %v1344_v50, 256  ;;  %927 = vbcast.lane.b32.xlu0 %v1342_v51, 256 }
  0xf0   :  { %v492_v56 = vpop.permute.xlu1 %491  ;;  %v484_v57 = vpop.permute.xlu0 %483 }
  0xf1   :  { %1233 = vst [vmem:[%s2141_s1 + $0x3d8] sm:$0xff] %v492_v56  ;;  %1231 = vst [vmem:[%s2141_s1 + $0x1d8] sm:$0xff] %v484_v57 }
  0xf2   :  { %951 = vbcast.lane.b32.xlu1 %v1348_v54, 256  ;;  %943 = vbcast.lane.b32.xlu0 %v1346_v55, 256 }
  0xf4   :  { %v507_v60 = vpop.permute.xlu1 %506  ;;  %v499_v61 = vpop.permute.xlu0 %498 }
  0xf5   :  { %1237 = vst [vmem:[%s2141_s1 + $0x220] sm:$0xff] %v507_v60  ;;  %1235 = vst [vmem:[%s2141_s1 + $0x20] sm:$0xff] %v499_v61 }
  0xf6   :  { %967 = vbcast.lane.b32.xlu1 %v1352_v58, 256  ;;  %959 = vbcast.lane.b32.xlu0 %v1350_v59, 256 }
  0xf8   :  { %v523_v0 = vpop.permute.xlu1 %522  ;;  %v515_v1 = vpop.permute.xlu0 %514 }
  0xf9   :  { %1241 = vst [vmem:[%s2141_s1 + $0x260] sm:$0xff] %v523_v0  ;;  %1239 = vst [vmem:[%s2141_s1 + $0x60] sm:$0xff] %v515_v1 }
  0xfa   :  { %983 = vbcast.lane.b32.xlu1 %v1356_v62, 256  ;;  %975 = vbcast.lane.b32.xlu0 %v1354_v63, 256 }
  0xfc   :  { %v539_v4 = vpop.permute.xlu1 %538  ;;  %v531_v5 = vpop.permute.xlu0 %530 }
  0xfd   :  { %1245 = vst [vmem:[%s2141_s1 + $0x2a0] sm:$0xff] %v539_v4  ;;  %1243 = vst [vmem:[%s2141_s1 + $0xa0] sm:$0xff] %v531_v5 }
  0xfe   :  { %999 = vbcast.lane.b32.xlu1 %v1360_v2, 256  ;;  %991 = vbcast.lane.b32.xlu0 %v1358_v3, 256 }
 0x100   :  { %v555_v6 = vpop.permute.xlu1 %554  ;;  %v547_v7 = vpop.permute.xlu0 %546 }
 0x101   :  { %1249 = vst [vmem:[%s2141_s1 + $0x2e0] sm:$0xff] %v555_v6  ;;  %1247 = vst [vmem:[%s2141_s1 + $0xe0] sm:$0xff] %v547_v7 }
 0x104   :  { %v571_v8 = vpop.permute.xlu1 %570  ;;  %v563_v9 = vpop.permute.xlu0 %562 }
 0x105   :  { %1253 = vst [vmem:[%s2141_s1 + $0x320] sm:$0xff] %v571_v8  ;;  %1251 = vst [vmem:[%s2141_s1 + $0x120] sm:$0xff] %v563_v9 }
 0x108   :  { %v587_v10 = vpop.permute.xlu1 %586  ;;  %v579_v11 = vpop.permute.xlu0 %578 }
 0x109   :  { %1257 = vst [vmem:[%s2141_s1 + $0x360] sm:$0xff] %v587_v10  ;;  %1255 = vst [vmem:[%s2141_s1 + $0x160] sm:$0xff] %v579_v11 }
 0x10c   :  { %v603_v12 = vpop.permute.xlu1 %602  ;;  %v595_v13 = vpop.permute.xlu0 %594 }
 0x10d   :  { %1261 = vst [vmem:[%s2141_s1 + $0x3a0] sm:$0xff] %v603_v12  ;;  %1259 = vst [vmem:[%s2141_s1 + $0x1a0] sm:$0xff] %v595_v13 }
 0x110   :  { %v619_v14 = vpop.permute.xlu1 %618  ;;  %v611_v15 = vpop.permute.xlu0 %610 }
 0x111   :  { %1265 = vst [vmem:[%s2141_s1 + $0x3e0] sm:$0xff] %v619_v14  ;;  %1263 = vst [vmem:[%s2141_s1 + $0x1e0] sm:$0xff] %v611_v15 }
 0x114   :  { %v634_v16 = vpop.permute.xlu1 %633  ;;  %v626_v17 = vpop.permute.xlu0 %625 }
 0x115   :  { %1269 = vst [vmem:[%s2141_s1 + $0x228] sm:$0xff] %v634_v16  ;;  %1267 = vst [vmem:[%s2141_s1 + $0x28] sm:$0xff] %v626_v17 }
 0x118   :  { %v650_v18 = vpop.permute.xlu1 %649  ;;  %v642_v19 = vpop.permute.xlu0 %641 }
 0x119   :  { %1273 = vst [vmem:[%s2141_s1 + $0x268] sm:$0xff] %v650_v18  ;;  %1271 = vst [vmem:[%s2141_s1 + $0x68] sm:$0xff] %v642_v19 }
 0x11c   :  { %v666_v20 = vpop.permute.xlu1 %665  ;;  %v658_v21 = vpop.permute.xlu0 %657 }
 0x11d   :  { %1277 = vst [vmem:[%s2141_s1 + $0x2a8] sm:$0xff] %v666_v20  ;;  %1275 = vst [vmem:[%s2141_s1 + $0xa8] sm:$0xff] %v658_v21 }
 0x120   :  { %v682_v22 = vpop.permute.xlu1 %681  ;;  %v674_v23 = vpop.permute.xlu0 %673 }
 0x121   :  { %1281 = vst [vmem:[%s2141_s1 + $0x2e8] sm:$0xff] %v682_v22  ;;  %1279 = vst [vmem:[%s2141_s1 + $0xe8] sm:$0xff] %v674_v23 }
 0x124   :  { %v698_v24 = vpop.permute.xlu1 %697  ;;  %v690_v25 = vpop.permute.xlu0 %689 }
 0x125   :  { %1285 = vst [vmem:[%s2141_s1 + $0x328] sm:$0xff] %v698_v24  ;;  %1283 = vst [vmem:[%s2141_s1 + $0x128] sm:$0xff] %v690_v25 }
 0x128   :  { %v714_v26 = vpop.permute.xlu1 %713  ;;  %v706_v27 = vpop.permute.xlu0 %705 }
 0x129   :  { %1289 = vst [vmem:[%s2141_s1 + $0x368] sm:$0xff] %v714_v26  ;;  %1287 = vst [vmem:[%s2141_s1 + $0x168] sm:$0xff] %v706_v27 }
 0x12c   :  { %v730_v28 = vpop.permute.xlu1 %729  ;;  %v722_v29 = vpop.permute.xlu0 %721 }
 0x12d   :  { %1293 = vst [vmem:[%s2141_s1 + $0x3a8] sm:$0xff] %v730_v28  ;;  %1291 = vst [vmem:[%s2141_s1 + $0x1a8] sm:$0xff] %v722_v29 }
 0x130   :  { %v746_v30 = vpop.permute.xlu1 %745  ;;  %v738_v31 = vpop.permute.xlu0 %737 }
 0x131   :  { %1297 = vst [vmem:[%s2141_s1 + $0x3e8] sm:$0xff] %v746_v30  ;;  %1295 = vst [vmem:[%s2141_s1 + $0x1e8] sm:$0xff] %v738_v31 }
 0x134   :  { %v761_v32 = vpop.permute.xlu1 %760  ;;  %v753_v33 = vpop.permute.xlu0 %752 }
 0x135   :  { %1301 = vst [vmem:[%s2141_s1 + $0x230] sm:$0xff] %v761_v32  ;;  %1299 = vst [vmem:[%s2141_s1 + $0x30] sm:$0xff] %v753_v33 }
 0x138   :  { %v777_v34 = vpop.permute.xlu1 %776  ;;  %v769_v35 = vpop.permute.xlu0 %768 }
 0x139   :  { %1305 = vst [vmem:[%s2141_s1 + $0x270] sm:$0xff] %v777_v34  ;;  %1303 = vst [vmem:[%s2141_s1 + $0x70] sm:$0xff] %v769_v35 }
 0x13c   :  { %v793_v36 = vpop.permute.xlu1 %792  ;;  %v785_v37 = vpop.permute.xlu0 %784 }
 0x13d   :  { %1309 = vst [vmem:[%s2141_s1 + $0x2b0] sm:$0xff] %v793_v36  ;;  %1307 = vst [vmem:[%s2141_s1 + $0xb0] sm:$0xff] %v785_v37 }
 0x140   :  { %v809_v38 = vpop.permute.xlu1 %808  ;;  %v801_v39 = vpop.permute.xlu0 %800 }
 0x141   :  { %1313 = vst [vmem:[%s2141_s1 + $0x2f0] sm:$0xff] %v809_v38  ;;  %1311 = vst [vmem:[%s2141_s1 + $0xf0] sm:$0xff] %v801_v39 }
 0x144   :  { %v825_v40 = vpop.permute.xlu1 %824  ;;  %v817_v41 = vpop.permute.xlu0 %816 }
 0x145   :  { %1317 = vst [vmem:[%s2141_s1 + $0x330] sm:$0xff] %v825_v40  ;;  %1315 = vst [vmem:[%s2141_s1 + $0x130] sm:$0xff] %v817_v41 }
 0x148   :  { %v841_v42 = vpop.permute.xlu1 %840  ;;  %v833_v43 = vpop.permute.xlu0 %832 }
 0x149   :  { %1321 = vst [vmem:[%s2141_s1 + $0x370] sm:$0xff] %v841_v42  ;;  %1319 = vst [vmem:[%s2141_s1 + $0x170] sm:$0xff] %v833_v43 }
 0x14c   :  { %v857_v44 = vpop.permute.xlu1 %856  ;;  %v849_v45 = vpop.permute.xlu0 %848 }
 0x14d   :  { %1325 = vst [vmem:[%s2141_s1 + $0x3b0] sm:$0xff] %v857_v44  ;;  %1323 = vst [vmem:[%s2141_s1 + $0x1b0] sm:$0xff] %v849_v45 }
 0x150   :  { %v873_v46 = vpop.permute.xlu1 %872  ;;  %v865_v47 = vpop.permute.xlu0 %864 }
 0x151   :  { %1329 = vst [vmem:[%s2141_s1 + $0x3f0] sm:$0xff] %v873_v46  ;;  %1327 = vst [vmem:[%s2141_s1 + $0x1f0] sm:$0xff] %v865_v47 }
 0x154   :  { %v888_v48 = vpop.permute.xlu1 %887  ;;  %v880_v49 = vpop.permute.xlu0 %879 }
 0x155   :  { %1333 = vst [vmem:[%s2141_s1 + $0x238] sm:$0xff] %v888_v48  ;;  %1331 = vst [vmem:[%s2141_s1 + $0x38] sm:$0xff] %v880_v49 }
 0x158   :  { %v904_v50 = vpop.permute.xlu1 %903  ;;  %v896_v51 = vpop.permute.xlu0 %895 }
 0x159   :  { %1337 = vst [vmem:[%s2141_s1 + $0x278] sm:$0xff] %v904_v50  ;;  %1335 = vst [vmem:[%s2141_s1 + $0x78] sm:$0xff] %v896_v51 }
 0x15c   :  { %v920_v52 = vpop.permute.xlu1 %919  ;;  %v912_v53 = vpop.permute.xlu0 %911 }
 0x15d   :  { %1341 = vst [vmem:[%s2141_s1 + $0x2b8] sm:$0xff] %v920_v52  ;;  %1339 = vst [vmem:[%s2141_s1 + $0xb8] sm:$0xff] %v912_v53 }
 0x160   :  { %v936_v54 = vpop.permute.xlu1 %935  ;;  %v928_v55 = vpop.permute.xlu0 %927 }
 0x161   :  { %1345 = vst [vmem:[%s2141_s1 + $0x2f8] sm:$0xff] %v936_v54  ;;  %1343 = vst [vmem:[%s2141_s1 + $0xf8] sm:$0xff] %v928_v55 }
 0x164   :  { %v952_v56 = vpop.permute.xlu1 %951  ;;  %v944_v57 = vpop.permute.xlu0 %943 }
 0x165   :  { %1349 = vst [vmem:[%s2141_s1 + $0x338] sm:$0xff] %v952_v56  ;;  %1347 = vst [vmem:[%s2141_s1 + $0x138] sm:$0xff] %v944_v57 }
 0x168   :  { %v968_v58 = vpop.permute.xlu1 %967  ;;  %v960_v59 = vpop.permute.xlu0 %959 }
 0x169   :  { %1353 = vst [vmem:[%s2141_s1 + $0x378] sm:$0xff] %v968_v58  ;;  %1351 = vst [vmem:[%s2141_s1 + $0x178] sm:$0xff] %v960_v59 }
 0x16c   :  { %v984_v60 = vpop.permute.xlu1 %983  ;;  %v976_v61 = vpop.permute.xlu0 %975 }
 0x16d   :  { %1357 = vst [vmem:[%s2141_s1 + $0x3b8] sm:$0xff] %v984_v60  ;;  %1355 = vst [vmem:[%s2141_s1 + $0x1b8] sm:$0xff] %v976_v61 }
 0x170   :  { %v1000_v62 = vpop.permute.xlu1 %999  ;;  %v992_v63 = vpop.permute.xlu0 %991 }
 0x171   :  { %1361 = vst [vmem:[%s2141_s1 + $0x3f8] sm:$0xff] %v1000_v62  ;;  %1359 = vst [vmem:[%s2141_s1 + $0x1f8] sm:$0xff] %v992_v63 }

// kernel: tile.58
= control target key start
LH: loop header
LB: loop body
LE: loop exit
PB: predicated region body
PF: predicated region fallthrough
CT: control target
= control target key end

     0   :  { %s28_s0 = inlined_call_operand.vmem [shape: f32[8], index: 0, kind: input, shape index: {}]   ;;  %s29_s1 = inlined_call_operand.vmem [shape: f32[16,8], index: 1, kind: output, shape index: {}]  }
   0x1   :  { %v4_v0 = vld [vmem:[%s28_s0] ss:$0 sm:$0xff] }
   0x2   :  { %5 = vst [vmem:[%s29_s1] sm:$0xff] %v4_v0  ;;  %8 = vst [vmem:[%s29_s1 + $0x8] sm:$0xff] %v4_v0 }

// kernel: tile.59
= control target key start
LH: loop header
LB: loop body
LE: loop exit
PB: predicated region body
PF: predicated region fallthrough
CT: control target
= control target key end

     0   :  { %s131_s10 = smov 120   ;;  %s132_s11 = smov 104   ;;  %vm3_vm0 = vcmask 64512   ;;  %vm9_vm1 = vcmask 1048512   ;;  %vm15_vm2 = vcmask 982912   ;;  %vm21_vm3 = vcmask 917312   ;;  %s207_s0 = inlined_call_operand.vmem [shape: f32[16,8], index: 0, kind: input, shape index: {}]   ;;  %s208_s1 = inlined_call_operand.vmem [shape: f32[1,128], index: 1, kind: output, shape index: {}]  }
   0x1   :  { %v101_v0 = vld [vmem:[%s207_s0 + $0xf] sm:$0x1]   ;;  %v103_v1 = vld [vmem:[%s207_s0 + $0xd] sm:$0x1]   ;;  %v102_v2 = vld [vmem:[%s207_s0 + $0xe] sm:$0x1]  }
   0x2   :  { %7 = vrot.lane.b32.xlu0 %v101_v0, %s131_s10  ;;  %19 = vrot.lane.b32.xlu1 %v103_v1, %s132_s11  ;;  %v104_v3 = vld [vmem:[%s207_s0 + $0xc] sm:$0x1]   ;;  %s133_s16 = smov 112   ;;  %s134_s17 = smov 96   ;;  %v105_v4 = vld [vmem:[%s207_s0 + $0xb] sm:$0x1]  }
   0x3   :  { %v106_v5 = vld [vmem:[%s207_s0 + $0xa] sm:$0x1]   ;;  %v2_v6 = vld [vmem:[%s207_s0] sm:$0x1]   ;;  %s135_s24 = smov 88   ;;  %s136_s25 = smov 80  }
   0x4   :  { %4 = vst.msk [vmem:[#allocation0] sm:$0x1] %vm3_vm0, %v2_v6   ;;  %v107_v7 = vld [vmem:[%s207_s0 + $0x9] sm:$0x1]   ;;  %v108_v8 = vld [vmem:[%s207_s0 + $0x8] sm:$0x1]  }
   0x5   :  { %s137_s30 = smov 72   ;;  %s138_s2 = smov 64   ;;  %v109_v9 = vld [vmem:[%s207_s0 + $0x7] sm:$0x1]   ;;  %v110_v10 = vld [vmem:[%s207_s0 + $0x6] sm:$0x1]  }
   0x6   :  { %13 = vrot.lane.b32.xlu0 %v102_v2, %s133_s16  ;;  %25 = vrot.lane.b32.xlu1 %v104_v3, %s134_s17  ;;  %s139_s7 = smov 56   ;;  %s140_s8 = smov 48   ;;  %v111_v11 = vld [vmem:[%s207_s0 + $0x5] sm:$0x1]   ;;  %v112_v12 = vld [vmem:[%s207_s0 + $0x4] sm:$0x1]  }
   0x7   :  { %s141_s13 = smov 40   ;;  %s142_s14 = smov 32   ;;  %v113_v13 = vld [vmem:[%s207_s0 + $0x3] sm:$0x1]   ;;  %v114_v14 = vld [vmem:[%s207_s0 + $0x2] sm:$0x1]  }
   0x8   :  { %s143_s19 = smov 24   ;;  %s144_s20 = smov 16   ;;  %v115_v15 = vld [vmem:[%s207_s0 + $0x1] sm:$0x1]   ;;  %vm27_vm4 = vcmask 851712   ;;  %vm33_vm5 = vcmask 786112  }
   0x9   :  { %s145_s0 = smov 8   ;;  %vm39_vm6 = vcmask 720512   ;;  %vm45_vm7 = vcmask 654912   ;;  %vm51_vm8 = vcmask 589312   ;;  %vm57_vm9 = vcmask 523712  }
   0xa   :  { %31 = vrot.lane.b32.xlu0 %v105_v4, %s135_s24  ;;  %37 = vrot.lane.b32.xlu1 %v106_v5, %s136_s25  ;;  %vm63_vm10 = vcmask 458112   ;;  %vm69_vm11 = vcmask 392512   ;;  %vm75_vm12 = vcmask 326912   ;;  %vm81_vm13 = vcmask 261312  }
   0xb   :  { %vm87_vm14 = vcmask 195712   ;;  %vm93_vm15 = vcmask 130112  }
   0xe   :  { %43 = vrot.lane.b32.xlu0 %v107_v7, %s137_s30  ;;  %49 = vrot.lane.b32.xlu1 %v108_v8, %s138_s2 }
  0x12   :  { %55 = vrot.lane.b32.xlu0 %v109_v9, %s139_s7  ;;  %61 = vrot.lane.b32.xlu1 %v110_v10, %s140_s8 }
  0x16   :  { %67 = vrot.lane.b32.xlu0 %v111_v11, %s141_s13  ;;  %73 = vrot.lane.b32.xlu1 %v112_v12, %s142_s14 }
  0x1a   :  { %79 = vrot.lane.b32.xlu0 %v113_v13, %s143_s19  ;;  %85 = vrot.lane.b32.xlu1 %v114_v14, %s144_s20 }
  0x1e   :  { %91 = vrot.lane.b32.xlu0 %v115_v15, %s145_s0 }
  0x74   :  { %v8_v16 = vpop.permute.xlu0 %7   ;;  %v20_v17 = vpop.permute.xlu1 %19  }
  0x75   :  { %10 = vst.msk [vmem:[#allocation0] sm:$0x1] %vm9_vm1, %v8_v16  }
  0x78   :  { %v14_v18 = vpop.permute.xlu0 %13   ;;  %v26_v19 = vpop.permute.xlu1 %25  }
  0x79   :  { %16 = vst.msk [vmem:[#allocation0] sm:$0x1] %vm15_vm2, %v14_v18  }
  0x7a   :  { %22 = vst.msk [vmem:[#allocation0] sm:$0x1] %vm21_vm3, %v20_v17  }
  0x7b   :  { %28 = vst.msk [vmem:[#allocation0] sm:$0x1] %vm27_vm4, %v26_v19  }
  0x7c   :  { %v32_v20 = vpop.permute.xlu0 %31   ;;  %v38_v21 = vpop.permute.xlu1 %37  }
  0x7d   :  { %34 = vst.msk [vmem:[#allocation0] sm:$0x1] %vm33_vm5, %v32_v20  }
  0x7e   :  { %40 = vst.msk [vmem:[#allocation0] sm:$0x1] %vm39_vm6, %v38_v21  }
  0x80   :  { %v44_v22 = vpop.permute.xlu0 %43   ;;  %v50_v23 = vpop.permute.xlu1 %49  }
  0x81   :  { %46 = vst.msk [vmem:[#allocation0] sm:$0x1] %vm45_vm7, %v44_v22  }
  0x82   :  { %52 = vst.msk [vmem:[#allocation0] sm:$0x1] %vm51_vm8, %v50_v23  }
  0x84   :  { %v56_v24 = vpop.permute.xlu0 %55   ;;  %v62_v25 = vpop.permute.xlu1 %61  }
  0x85   :  { %58 = vst.msk [vmem:[#allocation0] sm:$0x1] %vm57_vm9, %v56_v24  }
  0x86   :  { %64 = vst.msk [vmem:[#allocation0] sm:$0x1] %vm63_vm10, %v62_v25  }
  0x88   :  { %v68_v26 = vpop.permute.xlu0 %67   ;;  %v74_v27 = vpop.permute.xlu1 %73  }
  0x89   :  { %70 = vst.msk [vmem:[#allocation0] sm:$0x1] %vm69_vm11, %v68_v26  }
  0x8a   :  { %76 = vst.msk [vmem:[#allocation0] sm:$0x1] %vm75_vm12, %v74_v27  }
  0x8c   :  { %v80_v28 = vpop.permute.xlu0 %79   ;;  %v86_v29 = vpop.permute.xlu1 %85  }
  0x8d   :  { %82 = vst.msk [vmem:[#allocation0] sm:$0x1] %vm81_vm13, %v80_v28  }
  0x8e   :  { %88 = vst.msk [vmem:[#allocation0] sm:$0x1] %vm87_vm14, %v86_v29  }
  0x90   :  { %v92_v30 = vpop.permute.xlu0 %91  }
  0x91   :  { %94 = vst.msk [vmem:[#allocation0] sm:$0x1] %vm93_vm15, %v92_v30  }
  0x98   :  { %v98_v31 = vld [vmem:[#allocation0] sm:$0x1] }
  0x99   :  { %100 = vst [vmem:[%s208_s1] sm:$0x1] %v98_v31 }

// kernel: geometry_head_sparse_forward.10
= control target key start
LH: loop header
LB: loop body
LE: loop exit
PB: predicated region body
PF: predicated region fallthrough
CT: control target
= control target key end

     0   :  { %s916_s15 = smov 0   ;;  %s1111_s0 = inlined_call_operand.vmem [shape: f32[2,32,128], index: 0, kind: input, shape index: {}]   ;;  %s1112_s1 = inlined_call_operand.vmem [shape: f32[2,32,128], index: 1, kind: input, shape index: {}]   ;;  %s1113_s2 = inlined_call_operand.vmem [shape: f32[1,128], index: 2, kind: input, shape index: {}]   ;;  %s1114_s3 = inlined_call_operand.vmem [shape: f32[1,128], index: 3, kind: input, shape index: {}]   ;;  %s1115_s4 = inlined_call_operand.vmem [shape: f32[2,32,128], index: 4, kind: output, shape index: {}]  }
   0x1 LB: > { %s737_s16 = sadd.s32 4294967295, %s885_s15   ;;  %p741_p0 = scmp.ge.s32.totalorder %s885_s15, 1  ;;  %s885_s15 = sphi %s916_s15, %s14_s15  }
   0x2   : > { %p172_p1 = scmp.lt.s32.totalorder %s885_s15, 3 }
   0x4   : > { %p173_p2 = pnand %p741_p0, %p172_p1 }
   0x5   : > { %v230_v0 = vlaneseq (!%p173_p2)  ;;  %p203_p3 = scmp.lt.s32.totalorder (!%p173_p2), %s737_s16, 1  ;;  %v887_v1 = vmov (!%p173_p2), 0.0|0.0   ;;  %vm888_vm0 = vmmov (!%p173_p2), 0   ;;  %v889_v4 = vmov (!%p173_p2), 0.0   ;;  %v780_v53 = vld [vmem:[%s1113_s2] ss:$0 sm:$0xff] (!%p173_p2) }
   0x6   : > { %176 = sbr.rel (%p173_p2) target bundleno = 308 (0x134), region = 36  ;;  %839 = vmatprep.subr.bf16.mxu0 (!%p173_p2), %v887_v1  ;;  %836 = vmatprep.mubr.msk.f32.mxu0 (!%p173_p2), %vm888_vm0, %v889_v4  ;;  %v890_v21 = vmov (!%p173_p2), 1.0|1.0  }
   0x7   : > { %v925_v2 = vshrl.u32 (!%p173_p2), %v230_v0, 7  ;;  %v248_v3 = vand.u32 (!%p173_p2), 127, %v230_v0 }
   0x9   : > { %v232_v5 = vadd.s32 (!%p173_p2), 8, %v925_v2  ;;  %v253_v6 = vand.u32 (!%p173_p2), 7, %v925_v2  ;;  %v929_v7 = vand.u32 (!%p173_p2), 7, %v248_v3  ;;  %v233_v8 = vadd.s32 (!%p173_p2), 16, %v925_v2 }
   0xa   : > { %v234_v9 = vadd.s32 (!%p173_p2), 24, %v925_v2  ;;  %v235_v10 = vadd.s32 (!%p173_p2), 32, %v925_v2  ;;  %v236_v11 = vadd.s32 (!%p173_p2), 40, %v925_v2  ;;  %v237_v14 = vadd.s32 (!%p173_p2), 48, %v925_v2 }
   0xb   : > { %v260_v12 = vand.u32 (!%p173_p2), 7, %v232_v5  ;;  %vm453_vm1 = vcmp.eq.s32.totalorder (!%p173_p2), %v253_v6, %v929_v7  ;;  %v267_v13 = vand.u32 (!%p173_p2), 7, %v233_v8  ;;  %v238_v16 = vadd.s32 (!%p173_p2), 56, %v925_v2 }
   0xc   : > { %v274_v15 = vand.u32 (!%p173_p2), 7, %v234_v9  ;;  %v281_v18 = vand.u32 (!%p173_p2), 7, %v235_v10  ;;  %v288_v19 = vand.u32 (!%p173_p2), 7, %v236_v11  ;;  %v295_v22 = vand.u32 (!%p173_p2), 7, %v237_v14 }
   0xd   : > { %s1139_s16 = smov (!%p203_p3, %s737_s16), 1  ;;  %vm454_vm2 = vcmp.eq.s32.totalorder %v260_v12, %v929_v7  ;;  %vm942_vm3 = vcmp.eq.s32.totalorder %v267_v13, %v929_v7  ;;  %v302_v23 = vand.u32 7, %v238_v16  ;;  %v239_v24 = vadd.s32 64, %v925_v2 }
   0xe   : > { %s935_s17 = sshll.u32 %s1139_s16, 5  ;;  %vm840_vm4 = vmpackc.low %vm454_vm2, %vm453_vm1  ;;  %vm955_vm5 = vcmp.eq.s32.totalorder %v274_v15, %v929_v7  ;;  %vm969_vm7 = vcmp.eq.s32.totalorder %v281_v18, %v929_v7  ;;  %vm974_vm8 = vcmp.eq.s32.totalorder %v288_v19, %v929_v7  ;;  %v240_v29 = vadd.s32 72, %v925_v2 }
   0xf   : > { %s207_s20 = scalar_lea.vmem %s1111_s0, %s935_s17  ;;  %s212_s23 = scalar_lea.vmem %s1112_s1, %s935_s17  ;;  %841 = vmatpush3.bf16.msk.msra.mxu0 %vm840_vm4, %v890_v21  ;;  %vm843_vm6 = vmpackc.low %vm955_vm5, %vm942_vm3  ;;  %vm987_vm9 = vcmp.eq.s32.totalorder %v295_v22, %v929_v7  ;;  %vm1000_vm11 = vcmp.eq.s32.totalorder %v302_v23, %v929_v7  ;;  %v309_v39 = vand.u32 7, %v239_v24  ;;  %v241_v40 = vadd.s32 80, %v925_v2 }
  0x10   : > { %842 = vmatprep.subr.bf16.mxu0 %v887_v1  ;;  %v966_v25 = vld [vmem:[%s212_s23] sm:$0xff]  ;;  %v979_v30 = vld [vmem:[%s212_s23 + $0x8] sm:$0xff]  ;;  %v981_v31 = vld [vmem:[%s212_s23 + $0x10] sm:$0xff]  ;;  %v242_v41 = vadd.s32 88, %v925_v2  ;;  %v316_v42 = vand.u32 7, %v240_v29  ;;  %v243_v46 = vadd.s32 96, %v925_v2  ;;  %s217_s30 = scalar_lea.vmem %s1115_s4, %s935_s17 }
  0x11   : > { %v222_v26 = vld [vmem:[%s207_s20] sm:$0xff]  ;;  %v983_v32 = vld [vmem:[%s212_s23 + $0x18] sm:$0xff]  ;;  %v223_v33 = vld [vmem:[%s207_s20 + $0x8] sm:$0xff]  ;;  %v523_v48 = vadd.f32 %v979_v30, %v966_v25  ;;  %v244_v49 = vadd.s32 104, %v925_v2  ;;  %vm1034_vm13 = vcmp.eq.s32.totalorder %v309_v39, %v929_v7  ;;  %v323_v54 = vand.u32 7, %v241_v40 }
  0x12   : > { %v224_v34 = vld [vmem:[%s207_s20 + $0x10] sm:$0xff]  ;;  %v225_v35 = vld [vmem:[%s207_s20 + $0x18] sm:$0xff]  ;;  %v992_v37 = vmul.f32 %v222_v26, %v966_v25  ;;  %vm846_vm10 = vmpackc.low %vm974_vm8, %vm969_vm7  ;;  %v1007_v43 = vmul.f32 %v223_v33, %v979_v30  ;;  %v330_v55 = vand.u32 7, %v242_v41  ;;  %vm1040_vm14 = vcmp.eq.s32.totalorder %v316_v42, %v929_v7 }
  0x13   : > { %844 = vmatpush3.bf16.msk.msra.mxu0 %vm843_vm6, %v890_v21  ;;  %v1010_v44 = vmul.f32 %v224_v34, %v981_v31  ;;  %v1013_v45 = vmul.f32 %v225_v35, %v983_v32  ;;  %vm849_vm12 = vmpackc.low %vm1000_vm11, %vm987_vm9  ;;  %v524_v56 = vadd.f32 %v523_v48, %v981_v31  ;;  %v245_v62 = vadd.s32 112, %v925_v2 }
  0x14   : > { %845 = vmatprep.subr.bf16.mxu0 %v887_v1  ;;  %v510_v47 = vmul.f32 %v992_v37, %v992_v37  ;;  %v501_v50 = vadd.f32 %v1007_v43, %v992_v37  ;;  %v511_v51 = vmul.f32 %v1007_v43, %v1007_v43  ;;  %vm852_vm15 = vmpackc.low %vm1040_vm14, %vm1034_vm13  ;;  %v337_v3 = vand.u32 7, %v243_v46 }
  0x15   : > { %v512_v52 = vmul.f32 %v1010_v44, %v1010_v44  ;;  %v513_v59 = vmul.f32 %v1013_v45, %v1013_v45  ;;  %v525_v61 = vadd.f32 %v524_v56, %v983_v32  ;;  %v344_v4 = vand.u32 7, %v244_v49 }
  0x16   : > { %v502_v58 = vadd.f32 %v501_v50, %v1010_v44  ;;  %v514_v60 = vadd.f32 %v511_v51, %v510_v47  ;;  %v246_v5 = vadd.s32 120, %v925_v2  ;;  %vm1058_vm0 = vcmp.eq.s32.totalorder %v323_v54, %v929_v7 }
  0x17   : > { %847 = vmatpush3.bf16.msk.msra.mxu0 %vm846_vm10, %v890_v21  ;;  %v526_v6 = vrot.slane %v525_v61, 4  ;;  %vm1063_vm1 = vcmp.eq.s32.totalorder %v330_v55, %v929_v7  ;;  %v351_v15 = vand.u32 7, %v245_v62  ;;  %vm1074_vm3 = vcmp.eq.s32.totalorder %v337_v3, %v929_v7  ;;  %v781_v62 = vld [vmem:[%s1114_s3] ss:$0 sm:$0xff] }
  0x18   : > { %848 = vmatprep.subr.bf16.mxu0 %v887_v1  ;;  %v503_v63 = vadd.f32 %v502_v58, %v1013_v45  ;;  %v515_v0 = vadd.f32 %v514_v60, %v512_v52  ;;  %vm855_vm2 = vmpackc.low %vm1063_vm1, %vm1058_vm0  ;;  %v358_v16 = vand.u32 7, %v246_v5  ;;  %vm466_vm4 = vcmp.eq.s32.totalorder %v344_v4, %v929_v7 }
  0x19   : > { %v527_v12 = vadd.f32 %v526_v6, %v525_v61  ;;  %vm858_vm5 = vmpackc.low %vm466_vm4, %vm1074_vm3  ;;  %vm467_vm6 = vcmp.eq.s32.totalorder %v351_v15, %v929_v7  ;;  %vm532_vm9 = vcmask 1040384   ;;  %vm534_vm10 = vcmask 1041408  }
  0x1a   : > { %v504_v10 = vrot.slane %v503_v63, 4  ;;  %v516_v11 = vadd.f32 %v515_v0, %v513_v59  ;;  %vm468_vm7 = vcmp.eq.s32.totalorder %v358_v16, %v929_v7  ;;  %v625_v52 = vsub.s32 0, %v925_v2 }
  0x1b   : > { %850 = vmatpush3.bf16.msk.msra.mxu0 %vm849_vm12, %v890_v21  ;;  %v528_v17 = vrot.slane %v527_v12, 2  ;;  %vm861_vm8 = vmpackc.low %vm468_vm7, %vm467_vm6  ;;  %v641_v54 = vsub.s32 1, %v925_v2 }
  0x1c   : > { %851 = vmatprep.subr.bf16.mxu0 %v887_v1  ;;  %v505_v13 = vadd.f32 %v504_v10, %v503_v63  ;;  %v517_v14 = vrot.slane %v516_v11, 4 }
  0x1d   : > { %v529_v22 = vadd.f32 %v528_v17, %v527_v12 }
  0x1e   : > { %v506_v19 = vrot.slane %v505_v13, 2  ;;  %v518_v20 = vadd.f32 %v517_v14, %v516_v11 }
  0x1f   : > { %853 = vmatpush3.bf16.msk.msra.mxu0 %vm852_vm15, %v890_v21  ;;  %v530_v26 = vrot.slane %v529_v22, 1 }
  0x20   : > { %854 = vmatprep.subr.bf16.mxu0 %v887_v1  ;;  %v507_v23 = vadd.f32 %v506_v19, %v505_v13  ;;  %v519_v24 = vrot.slane %v518_v20, 2 }
  0x21   : > { %v531_v34 = vadd.f32 %v530_v26, %v529_v22 }
  0x22   : > { %v508_v27 = vrot.slane %v507_v23, 1  ;;  %v520_v28 = vadd.f32 %v519_v24, %v518_v20 }
  0x23   : > { %856 = vmatpush3.bf16.msk.msra.mxu0 %vm855_vm2, %v890_v21 }
  0x24   : > { %857 = vmatprep.subr.bf16.mxu0 %v887_v1  ;;  %v509_v29 = vadd.f32 %v508_v27, %v507_v23  ;;  %v521_v33 = vrot.slane %v520_v28, 1 }
  0x26   : > { %v522_v35 = vadd.f32 %v521_v33, %v520_v28 }
  0x27   : > { %859 = vmatpush3.bf16.msk.msra.mxu0 %vm858_vm5, %v890_v21 }
  0x28   : > { %860 = vmatprep.subr.bf16.mxu0 %v887_v1  ;;  %v533_v36 = vsel %vm532_vm9, %v509_v29, %v522_v35 }
  0x29   : > { %v535_v38 = vsel %vm534_vm10, %v533_v36, %v531_v34 }
  0x2b   : > { %862 = vmatpush3.bf16.msk.msra.mxu0 %vm861_vm8, %v890_v21 }
  0x2e   : > { %837 = vmatmul.mubr.f32.vlgmr.msra.gmra.mrb[0].mxu0 %v535_v38 }
 0x101   : > { %v602_v39 = vpop.f32.mrb[0].mxu0 }
 0x102   : > { %v606_v7 = vmax.f32 %v602_v39, 1.0  ;;  %v838_v40 = vpop.f32.mrb[1].mxu0 }
 0x104   : > { %875 = vrcp.f32 %v606_v7 }
 0x10e   : > { %v876_v41 = vpop.eup %875 }
 0x10f   : > { %v610_v42 = vrot.slane %v876_v41, 2  ;;  %v613_v47 = vrot.slane %v876_v41, 1 }
 0x111   : > { %v612_v46 = vmul.f32 %v610_v42, %v602_v39  ;;  %v615_v1 = vmul.f32 %v613_v47, %v602_v39 }
 0x113   : > { %v616_v48 = vmul.f32 %v612_v46, %v612_v46  ;;  %v626_v21 = vrot.slane %v612_v46, %v625_v52 }
 0x115   : > { %v618_v49 = vrot.slane %v616_v48, 7  ;;  %v627_v57 = vsub.f32 %v992_v37, %v626_v21  ;;  %v628_v58 = vsub.f32 %v1007_v43, %v626_v21  ;;  %v629_v59 = vsub.f32 %v1010_v44, %v626_v21 }
 0x116   : > { %v630_v60 = vsub.f32 %v1013_v45, %v626_v21 }
 0x117   : > { %v620_v50 = vsub.f32 %v615_v1, %v618_v49 }
 0x119   : > { %v621_v51 = vadd.f32 1e-05, %v620_v50 }
 0x11b   : > { %877 = vrsqrt.f32 %v621_v51 }
 0x125   : > { %v878_v55 = vpop.eup %877 }
 0x126   : > { %v638_v56 = vmul.f32 %v878_v55, %v780_v53 }
 0x128   : > { %v642_v61 = vrot.slane %v638_v56, %v641_v54 }
 0x12a   : > { %v643_v63 = vmul.f32 %v642_v61, %v627_v57  ;;  %v644_v0 = vmul.f32 %v642_v61, %v628_v58  ;;  %v645_v3 = vmul.f32 %v642_v61, %v629_v59  ;;  %v646_v2 = vmul.f32 %v642_v61, %v630_v60 }
 0x12c   : > { %v654_v4 = vadd.f32 %v781_v62, %v643_v63  ;;  %v655_v5 = vadd.f32 %v781_v62, %v644_v0  ;;  %v656_v6 = vadd.f32 %v781_v62, %v645_v3  ;;  %v657_v37 = vadd.f32 %v781_v62, %v646_v2 }
 0x12e   : > { %v658_v8 = vmax.f32 %v654_v4, 0.0  ;;  %v659_v43 = vmax.f32 %v655_v5, 0.0  ;;  %v660_v9 = vmax.f32 %v656_v6, 0.0  ;;  %v661_v44 = vmax.f32 %v657_v37, 0.0 }
 0x130   : > { %v662_v45 = vmul.f32 %v658_v8, %v966_v25  ;;  %v663_v10 = vmul.f32 %v659_v43, %v979_v30  ;;  %v664_v11 = vmul.f32 %v660_v9, %v981_v31  ;;  %v665_v12 = vmul.f32 %v661_v44, %v983_v32 }
 0x132   : > { %666 = vst [vmem:[%s217_s30] sm:$0xff] %v662_v45  ;;  %667 = vst [vmem:[%s217_s30 + $0x8] sm:$0xff] %v663_v10 }
 0x133   : > { %668 = vst [vmem:[%s217_s30 + $0x10] sm:$0xff] %v664_v11  ;;  %669 = vst [vmem:[%s217_s30 + $0x18] sm:$0xff] %v665_v12 }
 0x134 PF: > { %s14_s15 = sadd.s32 1, %s885_s15  }
 0x135   : > { %p11_p4 = scmp.ge.s32.totalorder %s14_s15, 4  }
 0x137   :  { %13 = sbr.rel (!%p11_p4) target bundleno = 1 (0x1), region = 69 }

// kernel: geometry_head_sparse_forward.12
= control target key start
LH: loop header
LB: loop body
LE: loop exit
PB: predicated region body
PF: predicated region fallthrough
CT: control target
= control target key end

     0   :  { %v41_v0 = vlaneseq  ;;  %v643_v1 = vmov 0.0|0.0   ;;  %vm644_vm0 = vmmov 0   ;;  %v645_v4 = vmov 0.0   ;;  %s970_s0 = inlined_call_operand.vmem [shape: f32[1,64,128], index: 0, kind: input, shape index: {}]   ;;  %s971_s1 = inlined_call_operand.vmem [shape: f32[1,64,128], index: 1, kind: input, shape index: {}]   ;;  %s972_s2 = inlined_call_operand.vmem [shape: f32[1,128], index: 2, kind: input, shape index: {}]   ;;  %s973_s3 = inlined_call_operand.vmem [shape: f32[1,128], index: 3, kind: input, shape index: {}]   ;;  %s974_s4 = inlined_call_operand.vmem [shape: f32[1,64,128], index: 4, kind: output, shape index: {}]  }
   0x1   :  { %611 = vmatprep.subr.bf16.mxu0 %v643_v1  ;;  %608 = vmatprep.mubr.msk.f32.mxu0 %vm644_vm0, %v645_v4  ;;  %v646_v23 = vmov 1.0|1.0   ;;  %v714_v26 = vld [vmem:[%s971_s1] sm:$0xff]  ;;  %v732_v31 = vld [vmem:[%s971_s1 + $0x8] sm:$0xff]  ;;  %v737_v32 = vld [vmem:[%s971_s1 + $0x10] sm:$0xff] }
   0x2   :  { %v673_v2 = vshrl.u32 %v41_v0, 7  ;;  %v59_v3 = vand.u32 127, %v41_v0  ;;  %v25_v27 = vld [vmem:[%s970_s0] sm:$0xff]  ;;  %v742_v33 = vld [vmem:[%s971_s1 + $0x18] sm:$0xff]  ;;  %v26_v35 = vld [vmem:[%s970_s0 + $0x8] sm:$0xff]  ;;  %v346_v41 = vadd.f32 %v732_v31, %v714_v26 }
   0x3   :  { %v27_v36 = vld [vmem:[%s970_s0 + $0x10] sm:$0xff]  ;;  %v28_v37 = vld [vmem:[%s970_s0 + $0x18] sm:$0xff]  ;;  %v757_v38 = vld [vmem:[%s971_s1 + $0x20] sm:$0xff]  ;;  %v763_v40 = vmul.f32 %v25_v27, %v714_v26  ;;  %v793_v49 = vmul.f32 %v26_v35, %v732_v31 }
   0x4   :  { %v43_v5 = vadd.s32 8, %v673_v2  ;;  %v64_v6 = vand.u32 7, %v673_v2  ;;  %v677_v7 = vand.u32 7, %v59_v3  ;;  %v44_v8 = vadd.s32 16, %v673_v2  ;;  %v29_v39 = vld [vmem:[%s970_s0 + $0x20] sm:$0xff]  ;;  %v787_v47 = vld [vmem:[%s971_s1 + $0x28] sm:$0xff] }
   0x5   :  { %v45_v9 = vadd.s32 24, %v673_v2  ;;  %v46_v10 = vadd.s32 32, %v673_v2  ;;  %v47_v11 = vadd.s32 40, %v673_v2  ;;  %v48_v16 = vadd.s32 48, %v673_v2  ;;  %v30_v48 = vld [vmem:[%s970_s0 + $0x28] sm:$0xff]  ;;  %v815_v56 = vld [vmem:[%s971_s1 + $0x30] sm:$0xff] }
   0x6   :  { %v71_v12 = vand.u32 7, %v43_v5  ;;  %vm684_vm1 = vcmp.eq.s32.totalorder %v64_v6, %v677_v7  ;;  %v78_v14 = vand.u32 7, %v44_v8  ;;  %v49_v17 = vadd.s32 56, %v673_v2  ;;  %v31_v57 = vld [vmem:[%s970_s0 + $0x30] sm:$0xff]  ;;  %v844_v4 = vld [vmem:[%s971_s1 + $0x38] sm:$0xff] }
   0x7   :  { %v85_v15 = vand.u32 7, %v45_v9  ;;  %v92_v19 = vand.u32 7, %v46_v10  ;;  %v99_v20 = vand.u32 7, %v47_v11  ;;  %v50_v22 = vadd.s32 64, %v673_v2  ;;  %v32_v5 = vld [vmem:[%s970_s0 + $0x38] sm:$0xff] }
   0x8   :  { %vm265_vm2 = vcmp.eq.s32.totalorder %v71_v12, %v677_v7  ;;  %vm692_vm3 = vcmp.eq.s32.totalorder %v78_v14, %v677_v7  ;;  %v106_v24 = vand.u32 7, %v48_v16  ;;  %v51_v25 = vadd.s32 72, %v673_v2 }
   0x9   :  { %vm612_vm4 = vmpackc.low %vm265_vm2, %vm684_vm1  ;;  %vm699_vm5 = vcmp.eq.s32.totalorder %v85_v15, %v677_v7  ;;  %vm720_vm7 = vcmp.eq.s32.totalorder %v92_v19, %v677_v7  ;;  %vm725_vm8 = vcmp.eq.s32.totalorder %v99_v20, %v677_v7  ;;  %v113_v30 = vand.u32 7, %v49_v17 }
   0xa   :  { %613 = vmatpush3.bf16.msk.msra.mxu0 %vm612_vm4, %v646_v23  ;;  %vm615_vm6 = vmpackc.low %vm699_vm5, %vm692_vm3  ;;  %v120_v34 = vand.u32 7, %v50_v22  ;;  %vm773_vm10 = vcmp.eq.s32.totalorder %v106_v24, %v677_v7  ;;  %v127_v43 = vand.u32 7, %v51_v25  ;;  %v52_v44 = vadd.s32 80, %v673_v2 }
   0xb   :  { %614 = vmatprep.subr.bf16.mxu0 %v643_v1  ;;  %vm618_vm9 = vmpackc.low %vm725_vm8, %vm720_vm7  ;;  %v53_v45 = vadd.s32 88, %v673_v2  ;;  %vm780_vm11 = vcmp.eq.s32.totalorder %v113_v30, %v677_v7  ;;  %v796_v50 = vmul.f32 %v27_v36, %v737_v32  ;;  %v799_v51 = vmul.f32 %v28_v37, %v742_v33 }
   0xc   :  { %vm802_vm12 = vcmp.eq.s32.totalorder %v120_v34, %v677_v7  ;;  %v54_v53 = vadd.s32 96, %v673_v2  ;;  %v55_v54 = vadd.s32 104, %v673_v2  ;;  %v809_v55 = vmul.f32 %v29_v39, %v757_v38  ;;  %vm621_vm13 = vmpackc.low %vm780_vm11, %vm773_vm10 }
   0xd   :  { %v312_v58 = vadd.f32 %v793_v49, %v763_v40  ;;  %v325_v59 = vmul.f32 %v763_v40, %v763_v40  ;;  %v326_v60 = vmul.f32 %v793_v49, %v793_v49  ;;  %v327_v61 = vmul.f32 %v796_v50, %v796_v50 }
   0xe   :  { %616 = vmatpush3.bf16.msk.msra.mxu0 %vm615_vm6, %v646_v23  ;;  %vm834_vm14 = vcmp.eq.s32.totalorder %v127_v43, %v677_v7  ;;  %v134_v63 = vand.u32 7, %v52_v44  ;;  %v141_v0 = vand.u32 7, %v53_v45  ;;  %v839_v3 = vmul.f32 %v30_v48, %v787_v47 }
   0xf   :  { %617 = vmatprep.subr.bf16.mxu0 %v643_v1  ;;  %v313_v6 = vadd.f32 %v312_v58, %v796_v50  ;;  %v328_v8 = vmul.f32 %v799_v51, %v799_v51  ;;  %v333_v9 = vadd.f32 %v326_v60, %v325_v59  ;;  %v347_v10 = vadd.f32 %v346_v41, %v737_v32  ;;  %vm624_vm15 = vmpackc.low %vm834_vm14, %vm802_vm12 }
  0x10   :  { %v148_v11 = vand.u32 7, %v54_v53  ;;  %v56_v12 = vadd.s32 112, %v673_v2  ;;  %v57_v13 = vadd.s32 120, %v673_v2  ;;  %v856_v14 = vmul.f32 %v31_v57, %v815_v56 }
  0x11   :  { %v314_v15 = vadd.f32 %v313_v6, %v799_v51  ;;  %v329_v16 = vmul.f32 %v809_v55, %v809_v55  ;;  %v334_v17 = vadd.f32 %v333_v9, %v327_v61  ;;  %v348_v18 = vadd.f32 %v347_v10, %v742_v33 }
  0x12   :  { %619 = vmatpush3.bf16.msk.msra.mxu0 %vm618_vm9, %v646_v23  ;;  %vm869_vm0 = vcmp.eq.s32.totalorder %v134_v63, %v677_v7  ;;  %vm874_vm1 = vcmp.eq.s32.totalorder %v141_v0, %v677_v7  ;;  %v155_v21 = vand.u32 7, %v55_v54  ;;  %v879_v22 = vmul.f32 %v32_v5, %v844_v4 }
  0x13   :  { %620 = vmatprep.subr.bf16.mxu0 %v643_v1  ;;  %v315_v24 = vadd.f32 %v314_v15, %v809_v55  ;;  %v330_v25 = vmul.f32 %v839_v3, %v839_v3  ;;  %v335_v27 = vadd.f32 %v334_v17, %v328_v8  ;;  %v349_v28 = vadd.f32 %v348_v18, %v757_v38  ;;  %vm627_vm2 = vmpackc.low %vm874_vm1, %vm869_vm0 }
  0x14   :  { %v331_v30 = vmul.f32 %v856_v14, %v856_v14  ;;  %vm896_vm3 = vcmp.eq.s32.totalorder %v148_v11, %v677_v7  ;;  %vm901_vm4 = vcmp.eq.s32.totalorder %v155_v21, %v677_v7  ;;  %v162_v39 = vand.u32 7, %v56_v12 }
  0x15   :  { %v316_v29 = vadd.f32 %v315_v24, %v839_v3  ;;  %v336_v34 = vadd.f32 %v335_v27, %v329_v16  ;;  %v350_v35 = vadd.f32 %v349_v28, %v787_v47  ;;  %v169_v41 = vand.u32 7, %v57_v13  ;;  %vm630_vm5 = vmpackc.low %vm901_vm4, %vm896_vm3 }
  0x16   :  { %622 = vmatpush3.bf16.msk.msra.mxu0 %vm621_vm13, %v646_v23  ;;  %v332_v43 = vmul.f32 %v879_v22, %v879_v22  ;;  %vm278_vm6 = vcmp.eq.s32.totalorder %v162_v39, %v677_v7  ;;  %vm359_vm9 = vcmask 1040384   ;;  %vm361_vm10 = vcmask 1041408  }
  0x17   :  { %623 = vmatprep.subr.bf16.mxu0 %v643_v1  ;;  %v317_v42 = vadd.f32 %v316_v29, %v856_v14  ;;  %v337_v44 = vadd.f32 %v336_v34, %v330_v25  ;;  %v351_v45 = vadd.f32 %v350_v35, %v815_v56  ;;  %vm279_vm7 = vcmp.eq.s32.totalorder %v169_v41, %v677_v7  ;;  %v557_v35 = vld [vmem:[%s972_s2] ss:$0 sm:$0xff] }
  0x18   :  { %vm633_vm8 = vmpackc.low %vm279_vm7, %vm278_vm6  ;;  %v472_v36 = vsub.s32 1, %v673_v2 }
  0x19   :  { %v318_v46 = vadd.f32 %v317_v42, %v879_v22  ;;  %v338_v48 = vadd.f32 %v337_v44, %v331_v30  ;;  %v352_v52 = vadd.f32 %v351_v45, %v844_v4  ;;  %v452_v30 = vsub.s32 0, %v673_v2  ;;  %v558_v2 = vld [vmem:[%s973_s3] ss:$0 sm:$0xff] }
  0x1a   :  { %625 = vmatpush3.bf16.msk.msra.mxu0 %vm624_vm15, %v646_v23 }
  0x1b   :  { %626 = vmatprep.subr.bf16.mxu0 %v643_v1  ;;  %v319_v53 = vrot.slane %v318_v46, 4  ;;  %v339_v54 = vadd.f32 %v338_v48, %v332_v43  ;;  %v353_v57 = vrot.slane %v352_v52, 4 }
  0x1d   :  { %v320_v58 = vadd.f32 %v319_v53, %v318_v46  ;;  %v340_v59 = vrot.slane %v339_v54, 4  ;;  %v354_v60 = vadd.f32 %v353_v57, %v352_v52 }
  0x1e   :  { %628 = vmatpush3.bf16.msk.msra.mxu0 %vm627_vm2, %v646_v23 }
  0x1f   :  { %629 = vmatprep.subr.bf16.mxu0 %v643_v1  ;;  %v321_v61 = vrot.slane %v320_v58, 2  ;;  %v341_v62 = vadd.f32 %v340_v59, %v339_v54  ;;  %v355_v63 = vrot.slane %v354_v60, 2 }
  0x21   :  { %v322_v0 = vadd.f32 %v321_v61, %v320_v58  ;;  %v342_v5 = vrot.slane %v341_v62, 2  ;;  %v356_v6 = vadd.f32 %v355_v63, %v354_v60 }
  0x22   :  { %631 = vmatpush3.bf16.msk.msra.mxu0 %vm630_vm5, %v646_v23 }
  0x23   :  { %632 = vmatprep.subr.bf16.mxu0 %v643_v1  ;;  %v323_v7 = vrot.slane %v322_v0, 1  ;;  %v343_v8 = vadd.f32 %v342_v5, %v341_v62  ;;  %v357_v9 = vrot.slane %v356_v6, 1 }
  0x25   :  { %v324_v10 = vadd.f32 %v323_v7, %v322_v0  ;;  %v344_v11 = vrot.slane %v343_v8, 1  ;;  %v358_v12 = vadd.f32 %v357_v9, %v356_v6 }
  0x26   :  { %634 = vmatpush3.bf16.msk.msra.mxu0 %vm633_vm8, %v646_v23 }
  0x27   :  { %v345_v13 = vadd.f32 %v344_v11, %v343_v8 }
  0x29   :  { %v360_v15 = vsel %vm359_vm9, %v324_v10, %v345_v13 }
  0x2a   :  { %v362_v1 = vsel %vm361_vm10, %v360_v15, %v358_v12 }
  0x2b   :  { %609 = vmatmul.mubr.f32.vlgmr.msra.gmra.mrb[0].mxu0 %v362_v1 }
  0xfe   :  { %v429_v16 = vpop.f32.mrb[0].mxu0 }
  0xff   :  { %v433_v17 = vmax.f32 %v429_v16, 1.0  ;;  %v610_v18 = vpop.f32.mrb[1].mxu0 }
 0x101   :  { %639 = vrcp.f32 %v433_v17 }
 0x10b   :  { %v640_v23 = vpop.eup %639 }
 0x10c   :  { %v437_v19 = vrot.slane %v640_v23, 2  ;;  %v440_v21 = vrot.slane %v640_v23, 1 }
 0x10e   :  { %v439_v20 = vmul.f32 %v437_v19, %v429_v16  ;;  %v442_v25 = vmul.f32 %v440_v21, %v429_v16 }
 0x110   :  { %v443_v24 = vmul.f32 %v439_v20, %v439_v20  ;;  %v453_v34 = vrot.slane %v439_v20, %v452_v30 }
 0x112   :  { %v445_v27 = vrot.slane %v443_v24, 7  ;;  %v454_v41 = vsub.f32 %v763_v40, %v453_v34  ;;  %v455_v42 = vsub.f32 %v793_v49, %v453_v34  ;;  %v456_v43 = vsub.f32 %v796_v50, %v453_v34 }
 0x113   :  { %v457_v44 = vsub.f32 %v799_v51, %v453_v34  ;;  %v458_v46 = vsub.f32 %v809_v55, %v453_v34  ;;  %v459_v48 = vsub.f32 %v839_v3, %v453_v34  ;;  %v460_v52 = vsub.f32 %v856_v14, %v453_v34 }
 0x114   :  { %v447_v28 = vsub.f32 %v442_v25, %v445_v27  ;;  %v461_v53 = vsub.f32 %v879_v22, %v453_v34 }
 0x116   :  { %v448_v29 = vadd.f32 1e-05, %v447_v28 }
 0x118   :  { %641 = vrsqrt.f32 %v448_v29 }
 0x122   :  { %v642_v37 = vpop.eup %641 }
 0x123   :  { %v469_v39 = vmul.f32 %v642_v37, %v557_v35 }
 0x125   :  { %v473_v45 = vrot.slane %v469_v39, %v472_v36 }
 0x127   :  { %v474_v40 = vmul.f32 %v473_v45, %v454_v41  ;;  %v475_v54 = vmul.f32 %v473_v45, %v455_v42  ;;  %v476_v49 = vmul.f32 %v473_v45, %v456_v43  ;;  %v477_v57 = vmul.f32 %v473_v45, %v457_v44 }
 0x128   :  { %v478_v50 = vmul.f32 %v473_v45, %v458_v46  ;;  %v479_v58 = vmul.f32 %v473_v45, %v459_v48  ;;  %v480_v51 = vmul.f32 %v473_v45, %v460_v52  ;;  %v481_v59 = vmul.f32 %v473_v45, %v461_v53 }
 0x129   :  { %v489_v60 = vadd.f32 %v558_v2, %v474_v40  ;;  %v490_v55 = vadd.f32 %v558_v2, %v475_v54  ;;  %v491_v61 = vadd.f32 %v558_v2, %v476_v49  ;;  %v492_v3 = vadd.f32 %v558_v2, %v477_v57 }
 0x12a   :  { %v493_v62 = vadd.f32 %v558_v2, %v478_v50  ;;  %v494_v14 = vadd.f32 %v558_v2, %v479_v58  ;;  %v495_v63 = vadd.f32 %v558_v2, %v480_v51  ;;  %v496_v22 = vadd.f32 %v558_v2, %v481_v59 }
 0x12b   :  { %v497_v0 = vmax.f32 %v489_v60, 0.0  ;;  %v498_v5 = vmax.f32 %v490_v55, 0.0  ;;  %v499_v6 = vmax.f32 %v491_v61, 0.0  ;;  %v500_v7 = vmax.f32 %v492_v3, 0.0 }
 0x12c   :  { %v501_v8 = vmax.f32 %v493_v62, 0.0  ;;  %v502_v9 = vmax.f32 %v494_v14, 0.0  ;;  %v503_v10 = vmax.f32 %v495_v63, 0.0  ;;  %v504_v11 = vmax.f32 %v496_v22, 0.0 }
 0x12d   :  { %v505_v12 = vmul.f32 %v497_v0, %v714_v26  ;;  %v506_v13 = vmul.f32 %v498_v5, %v732_v31  ;;  %v507_v15 = vmul.f32 %v499_v6, %v737_v32  ;;  %v508_v1 = vmul.f32 %v500_v7, %v742_v33 }
 0x12e   :  { %v509_v16 = vmul.f32 %v501_v8, %v757_v38  ;;  %v510_v17 = vmul.f32 %v502_v9, %v787_v47  ;;  %v511_v18 = vmul.f32 %v503_v10, %v815_v56  ;;  %v512_v23 = vmul.f32 %v504_v11, %v844_v4 }
 0x12f   :  { %513 = vst [vmem:[%s974_s4] sm:$0xff] %v505_v12  ;;  %514 = vst [vmem:[%s974_s4 + $0x8] sm:$0xff] %v506_v13 }
 0x130   :  { %515 = vst [vmem:[%s974_s4 + $0x10] sm:$0xff] %v507_v15  ;;  %516 = vst [vmem:[%s974_s4 + $0x18] sm:$0xff] %v508_v1 }
 0x131   :  { %517 = vst [vmem:[%s974_s4 + $0x20] sm:$0xff] %v509_v16  ;;  %518 = vst [vmem:[%s974_s4 + $0x28] sm:$0xff] %v510_v17 }
 0x132   :  { %519 = vst [vmem:[%s974_s4 + $0x30] sm:$0xff] %v511_v18  ;;  %520 = vst [vmem:[%s974_s4 + $0x38] sm:$0xff] %v512_v23 }

// kernel: geometry_head_sparse_forward.11
= control target key start
LH: loop header
LB: loop body
LE: loop exit
PB: predicated region body
PF: predicated region fallthrough
CT: control target
= control target key end

     0   :  { %s5468_s15 = smov 0   ;;  %s9168_s0 = inlined_call_operand.vmem [shape: f32[2,10,800], index: 0, kind: input, shape index: {}]   ;;  %s9169_s1 = inlined_call_operand.vmem [shape: f32[3,800,512], index: 1, kind: input, shape index: {}]   ;;  %s9170_s2 = inlined_call_operand.vmem [shape: f32[1,512], index: 2, kind: input, shape index: {}]   ;;  %s9171_s3 = inlined_call_operand.vmem [shape: f32[2,8,512], index: 3, kind: input, shape index: {}]   ;;  %s9172_s4 = inlined_call_operand.vmem [shape: f32[2,8,512], index: 4, kind: output, shape index: {}]  }
   0x1 LB: > { %s3360_s16 = sadd.s32 4294967295, %s5440_s15   ;;  %p3364_p0 = scmp.ge.s32.totalorder %s5440_s15, 1  ;;  %s5440_s15 = sphi %s5468_s15, %s14_s15  }
   0x2   : > { %p172_p1 = scmp.lt.s32.totalorder %s5440_s15, 3 }
   0x4   : > { %p173_p2 = pnand %p3364_p0, %p172_p1 }
   0x5   : > { %v3371_v0 = vld [vmem:[%s9169_s1 + $0xc88] sm:$0xff] (!%p173_p2)  ;;  %v3373_v2 = vld [vmem:[%s9169_s1 + $0xc98] sm:$0xff] (!%p173_p2)  ;;  %v3370_v5 = vld [vmem:[%s9169_s1 + $0xc80] sm:$0xff] (!%p173_p2)  ;;  %p5682_p3 = scmp.lt.s32.totalorder (!%p173_p2), %s3360_s16, 1  ;;  %vm1054_vm0 = vcmask (!%p173_p2), 1046528   ;;  %vm1082_vm1 = vcmask (!%p173_p2), 261120  }
   0x6   : > { %176 = sbr.rel (%p173_p2) target bundleno = 828 (0x33c), region = 36  ;;  %v3375_v1 = vld [vmem:[%s9169_s1 + $0xca8] sm:$0xff] (!%p173_p2)  ;;  %v3377_v4 = vld [vmem:[%s9169_s1 + $0xcb8] sm:$0xff] (!%p173_p2)  ;;  %v3374_v6 = vld [vmem:[%s9169_s1 + $0xca0] sm:$0xff] (!%p173_p2)  ;;  %vm2653_vm2 = vcmask (!%p173_p2), 1045504  }
   0x7   : > { %v4180_v3 = vpack.c.bf16 (!%p173_p2), %v3375_v1, %v3371_v0  ;;  %v4380_v7 = vpack.c.bf16 (!%p173_p2), %v3377_v4, %v3373_v2  ;;  %v4182_v8 = vpack.c.bf16 (!%p173_p2), %v3374_v6, %v3370_v5  ;;  %v3372_v9 = vld [vmem:[%s9169_s1 + $0xc90] sm:$0xff] (!%p173_p2)  ;;  %v3379_v11 = vld [vmem:[%s9169_s1 + $0xcc8] sm:$0xff] (!%p173_p2)  ;;  %v3381_v14 = vld [vmem:[%s9169_s1 + $0xcd8] sm:$0xff] (!%p173_p2) }
   0x8   : > { %v3376_v10 = vld [vmem:[%s9169_s1 + $0xcb0] sm:$0xff] (!%p173_p2)  ;;  %v3383_v13 = vld [vmem:[%s9169_s1 + $0xce8] sm:$0xff] (!%p173_p2)  ;;  %v3385_v15 = vld [vmem:[%s9169_s1 + $0xcf8] sm:$0xff] (!%p173_p2) }
   0x9   : > { %4181 = vmatprep.subr.bf16.mxu0 (!%p173_p2), %v4180_v3  ;;  %v4382_v12 = vpack.c.bf16 (!%p173_p2), %v3376_v10, %v3372_v9  ;;  %4381 = vmatprep.subr.bf16.mxu1 (!%p173_p2), %v4380_v7  ;;  %v4184_v16 = vpack.c.bf16 (!%p173_p2), %v3383_v13, %v3379_v11  ;;  %v4384_v17 = vpack.c.bf16 (!%p173_p2), %v3385_v15, %v3381_v14  ;;  %v3378_v18 = vld [vmem:[%s9169_s1 + $0xcc0] sm:$0xff] (!%p173_p2)  ;;  %v3380_v20 = vld [vmem:[%s9169_s1 + $0xcd0] sm:$0xff] (!%p173_p2)  ;;  %v3387_v23 = vld [vmem:[%s9169_s1 + $0xd08] sm:$0xff] (!%p173_p2) }
   0xa   : > { %4183 = vmatpush1.bf16.msra.mxu0 (!%p173_p2), %v4182_v8  ;;  %v3382_v19 = vld [vmem:[%s9169_s1 + $0xce0] sm:$0xff] (!%p173_p2)  ;;  %v3384_v22 = vld [vmem:[%s9169_s1 + $0xcf0] sm:$0xff] (!%p173_p2)  ;;  %v3391_v24 = vld [vmem:[%s9169_s1 + $0xd28] sm:$0xff] (!%p173_p2) }
   0xb   : > { %4383 = vmatpush1.bf16.msra.mxu1 (!%p173_p2), %v4382_v12  ;;  %v4186_v21 = vpack.c.bf16 (!%p173_p2), %v3382_v19, %v3378_v18  ;;  %4185 = vmatprep.subr.bf16.mxu0 (!%p173_p2), %v4184_v16  ;;  %v4386_v25 = vpack.c.bf16 (!%p173_p2), %v3384_v22, %v3380_v20  ;;  %v4188_v26 = vpack.c.bf16 (!%p173_p2), %v3391_v24, %v3387_v23  ;;  %v3389_v27 = vld [vmem:[%s9169_s1 + $0xd18] sm:$0xff] (!%p173_p2)  ;;  %v3386_v29 = vld [vmem:[%s9169_s1 + $0xd00] sm:$0xff] (!%p173_p2)  ;;  %v3388_v32 = vld [vmem:[%s9169_s1 + $0xd10] sm:$0xff] (!%p173_p2) }
   0xc   : > { %4385 = vmatprep.subr.bf16.mxu1 (!%p173_p2), %v4384_v17  ;;  %v3393_v28 = vld [vmem:[%s9169_s1 + $0xd38] sm:$0xff] (!%p173_p2)  ;;  %v3390_v31 = vld [vmem:[%s9169_s1 + $0xd20] sm:$0xff] (!%p173_p2)  ;;  %v3392_v33 = vld [vmem:[%s9169_s1 + $0xd30] sm:$0xff] (!%p173_p2) }
   0xd   : > { %v4388_v30 = vpack.c.bf16 %v3393_v28, %v3389_v27  ;;  %v4190_v34 = vpack.c.bf16 %v3390_v31, %v3386_v29  ;;  %v3395_v35 = vld [vmem:[%s9169_s1 + $0xd48] sm:$0xff]  ;;  %v3397_v37 = vld [vmem:[%s9169_s1 + $0xd58] sm:$0xff]  ;;  %v4390_v38 = vpack.c.bf16 %v3392_v33, %v3388_v32  ;;  %v3394_v41 = vld [vmem:[%s9169_s1 + $0xd40] sm:$0xff]  ;;  %s9175_s16 = smov (!%p5682_p3, %s3360_s16), 1 }
   0xe   : > { %4187 = vmatpush1.bf16.msra.mxu0 %v4186_v21  ;;  %v3399_v36 = vld [vmem:[%s9169_s1 + $0xd68] sm:$0xff]  ;;  %v3401_v40 = vld [vmem:[%s9169_s1 + $0xd78] sm:$0xff]  ;;  %v3398_v42 = vld [vmem:[%s9169_s1 + $0xd60] sm:$0xff]  ;;  %s5424_s18 = smul.u32 112, %s9175_s16 }
   0xf   : > { %4387 = vmatpush1.bf16.msra.mxu1 %v4386_v25  ;;  %4189 = vmatprep.subr.bf16.mxu0 %v4188_v26  ;;  %v4192_v39 = vpack.c.bf16 %v3399_v36, %v3395_v35  ;;  %v4392_v43 = vpack.c.bf16 %v3401_v40, %v3397_v37  ;;  %v3396_v44 = vld [vmem:[%s9169_s1 + $0xd50] sm:$0xff]  ;;  %v3403_v46 = vld [vmem:[%s9169_s1 + $0xd88] sm:$0xff]  ;;  %v3405_v48 = vld [vmem:[%s9169_s1 + $0xd98] sm:$0xff]  ;;  %v4194_v50 = vpack.c.bf16 %v3398_v42, %v3394_v41 }
  0x10   : > { %4389 = vmatprep.subr.bf16.mxu1 %v4388_v30  ;;  %v3400_v45 = vld [vmem:[%s9169_s1 + $0xd70] sm:$0xff]  ;;  %v3407_v47 = vld [vmem:[%s9169_s1 + $0xda8] sm:$0xff]  ;;  %v3409_v49 = vld [vmem:[%s9169_s1 + $0xdb8] sm:$0xff]  ;;  %s5768_s11 = scalar_lea.vmem %s9168_s0, %s5424_s18 }
  0x11   : > { %v4394_v51 = vpack.c.bf16 %v3400_v45, %v3396_v44  ;;  %v4196_v52 = vpack.c.bf16 %v3407_v47, %v3403_v46  ;;  %v3402_v53 = vld [vmem:[%s9169_s1 + $0xd80] sm:$0xff]  ;;  %v3404_v55 = vld [vmem:[%s9169_s1 + $0xd90] sm:$0xff]  ;;  %v4396_v56 = vpack.c.bf16 %v3409_v49, %v3405_v48  ;;  %v3411_v58 = vld [vmem:[%s9169_s1 + $0xdc8] sm:$0xff] }
  0x12   : > { %4191 = vmatpush1.bf16.msra.mxu0 %v4190_v34  ;;  %v3406_v54 = vld [vmem:[%s9169_s1 + $0xda0] sm:$0xff]  ;;  %v3408_v57 = vld [vmem:[%s9169_s1 + $0xdb0] sm:$0xff]  ;;  %v3415_v59 = vld [vmem:[%s9169_s1 + $0xde8] sm:$0xff] }
  0x13   : > { %4391 = vmatpush1.bf16.msra.mxu1 %v4390_v38  ;;  %4193 = vmatprep.subr.bf16.mxu0 %v4192_v39  ;;  %v3413_v60 = vld [vmem:[%s9169_s1 + $0xdd8] sm:$0xff]  ;;  %v4198_v62 = vpack.c.bf16 %v3406_v54, %v3402_v53  ;;  %v4398_v63 = vpack.c.bf16 %v3408_v57, %v3404_v55  ;;  %v4200_v0 = vpack.c.bf16 %v3415_v59, %v3411_v58  ;;  %v3410_v1 = vld [vmem:[%s9169_s1 + $0xdc0] sm:$0xff]  ;;  %v3412_v3 = vld [vmem:[%s9169_s1 + $0xdd0] sm:$0xff] }
  0x14   : > { %4393 = vmatprep.subr.bf16.mxu1 %v4392_v43  ;;  %v3417_v61 = vld [vmem:[%s9169_s1 + $0xdf8] sm:$0xff]  ;;  %v3414_v2 = vld [vmem:[%s9169_s1 + $0xde0] sm:$0xff]  ;;  %v3416_v5 = vld [vmem:[%s9169_s1 + $0xdf0] sm:$0xff] }
  0x15   : > { %v4400_v4 = vpack.c.bf16 %v3417_v61, %v3413_v60  ;;  %v3419_v6 = vld [vmem:[%s9169_s1 + $0xe08] sm:$0xff]  ;;  %v3421_v8 = vld [vmem:[%s9169_s1 + $0xe18] sm:$0xff]  ;;  %v4202_v10 = vpack.c.bf16 %v3414_v2, %v3410_v1  ;;  %v4402_v11 = vpack.c.bf16 %v3416_v5, %v3412_v3  ;;  %v3418_v13 = vld [vmem:[%s9169_s1 + $0xe00] sm:$0xff] }
  0x16   : > { %4195 = vmatpush1.bf16.msra.mxu0 %v4194_v50  ;;  %v3423_v7 = vld [vmem:[%s9169_s1 + $0xe28] sm:$0xff]  ;;  %v3425_v9 = vld [vmem:[%s9169_s1 + $0xe38] sm:$0xff]  ;;  %v3422_v14 = vld [vmem:[%s9169_s1 + $0xe20] sm:$0xff] }
  0x17   : > { %4395 = vmatpush1.bf16.msra.mxu1 %v4394_v51  ;;  %4197 = vmatprep.subr.bf16.mxu0 %v4196_v52  ;;  %v4204_v12 = vpack.c.bf16 %v3423_v7, %v3419_v6  ;;  %v3420_v15 = vld [vmem:[%s9169_s1 + $0xe10] sm:$0xff]  ;;  %v4404_v16 = vpack.c.bf16 %v3425_v9, %v3421_v8  ;;  %v3427_v18 = vld [vmem:[%s9169_s1 + $0xe48] sm:$0xff]  ;;  %v3429_v20 = vld [vmem:[%s9169_s1 + $0xe58] sm:$0xff]  ;;  %v4206_v22 = vpack.c.bf16 %v3422_v14, %v3418_v13 }
  0x18   : > { %4397 = vmatprep.subr.bf16.mxu1 %v4396_v56  ;;  %v3424_v17 = vld [vmem:[%s9169_s1 + $0xe30] sm:$0xff]  ;;  %v3431_v19 = vld [vmem:[%s9169_s1 + $0xe68] sm:$0xff]  ;;  %v3433_v21 = vld [vmem:[%s9169_s1 + $0xe78] sm:$0xff] }
  0x19   : > { %v4406_v23 = vpack.c.bf16 %v3424_v17, %v3420_v15  ;;  %v4208_v24 = vpack.c.bf16 %v3431_v19, %v3427_v18  ;;  %v3426_v25 = vld [vmem:[%s9169_s1 + $0xe40] sm:$0xff]  ;;  %v3428_v27 = vld [vmem:[%s9169_s1 + $0xe50] sm:$0xff]  ;;  %v4408_v28 = vpack.c.bf16 %v3433_v21, %v3429_v20  ;;  %v3435_v30 = vld [vmem:[%s9169_s1 + $0xe88] sm:$0xff] }
  0x1a   : > { %4199 = vmatpush1.bf16.msra.mxu0 %v4198_v62  ;;  %v3430_v26 = vld [vmem:[%s9169_s1 + $0xe60] sm:$0xff]  ;;  %v3432_v29 = vld [vmem:[%s9169_s1 + $0xe70] sm:$0xff]  ;;  %v3439_v31 = vld [vmem:[%s9169_s1 + $0xea8] sm:$0xff] }
  0x1b   : > { %4399 = vmatpush1.bf16.msra.mxu1 %v4398_v63  ;;  %4201 = vmatprep.subr.bf16.mxu0 %v4200_v0  ;;  %v3437_v32 = vld [vmem:[%s9169_s1 + $0xe98] sm:$0xff]  ;;  %v4210_v34 = vpack.c.bf16 %v3430_v26, %v3426_v25  ;;  %v4410_v35 = vpack.c.bf16 %v3432_v29, %v3428_v27  ;;  %v4212_v36 = vpack.c.bf16 %v3439_v31, %v3435_v30  ;;  %v3434_v37 = vld [vmem:[%s9169_s1 + $0xe80] sm:$0xff]  ;;  %v3436_v39 = vld [vmem:[%s9169_s1 + $0xe90] sm:$0xff] }
  0x1c   : > { %4401 = vmatprep.subr.bf16.mxu1 %v4400_v4  ;;  %v3441_v33 = vld [vmem:[%s9169_s1 + $0xeb8] sm:$0xff]  ;;  %v3438_v38 = vld [vmem:[%s9169_s1 + $0xea0] sm:$0xff]  ;;  %v3440_v41 = vld [vmem:[%s9169_s1 + $0xeb0] sm:$0xff] }
  0x1d   : > { %v4412_v40 = vpack.c.bf16 %v3441_v33, %v3437_v32  ;;  %v3443_v42 = vld [vmem:[%s9169_s1 + $0xec8] sm:$0xff]  ;;  %v3445_v44 = vld [vmem:[%s9169_s1 + $0xed8] sm:$0xff]  ;;  %v4214_v46 = vpack.c.bf16 %v3438_v38, %v3434_v37  ;;  %v4414_v47 = vpack.c.bf16 %v3440_v41, %v3436_v39  ;;  %v3442_v49 = vld [vmem:[%s9169_s1 + $0xec0] sm:$0xff] }
  0x1e   : > { %4203 = vmatpush1.bf16.msra.mxu0 %v4202_v10  ;;  %v3447_v43 = vld [vmem:[%s9169_s1 + $0xee8] sm:$0xff]  ;;  %v3449_v45 = vld [vmem:[%s9169_s1 + $0xef8] sm:$0xff]  ;;  %v3446_v50 = vld [vmem:[%s9169_s1 + $0xee0] sm:$0xff] }
  0x1f   : > { %4403 = vmatpush1.bf16.msra.mxu1 %v4402_v11  ;;  %4205 = vmatprep.subr.bf16.mxu0 %v4204_v12  ;;  %v4216_v48 = vpack.c.bf16 %v3447_v43, %v3443_v42  ;;  %v3444_v51 = vld [vmem:[%s9169_s1 + $0xed0] sm:$0xff]  ;;  %v4416_v52 = vpack.c.bf16 %v3449_v45, %v3445_v44  ;;  %v3451_v54 = vld [vmem:[%s9169_s1 + $0xf08] sm:$0xff]  ;;  %v3453_v56 = vld [vmem:[%s9169_s1 + $0xf18] sm:$0xff]  ;;  %v4218_v58 = vpack.c.bf16 %v3446_v50, %v3442_v49 }
  0x20   : > { %4405 = vmatprep.subr.bf16.mxu1 %v4404_v16  ;;  %v3448_v53 = vld [vmem:[%s9169_s1 + $0xef0] sm:$0xff]  ;;  %v3455_v55 = vld [vmem:[%s9169_s1 + $0xf28] sm:$0xff]  ;;  %v3457_v57 = vld [vmem:[%s9169_s1 + $0xf38] sm:$0xff] }
  0x21   : > { %v4418_v59 = vpack.c.bf16 %v3448_v53, %v3444_v51  ;;  %v4220_v60 = vpack.c.bf16 %v3455_v55, %v3451_v54  ;;  %v3450_v61 = vld [vmem:[%s9169_s1 + $0xf00] sm:$0xff]  ;;  %v3452_v63 = vld [vmem:[%s9169_s1 + $0xf10] sm:$0xff]  ;;  %v4420_v0 = vpack.c.bf16 %v3457_v57, %v3453_v56  ;;  %v3459_v2 = vld [vmem:[%s9169_s1 + $0xf48] sm:$0xff] }
  0x22   : > { %4207 = vmatpush1.bf16.msra.mxu0 %v4206_v22  ;;  %v3454_v62 = vld [vmem:[%s9169_s1 + $0xf20] sm:$0xff]  ;;  %v3456_v1 = vld [vmem:[%s9169_s1 + $0xf30] sm:$0xff]  ;;  %v3463_v3 = vld [vmem:[%s9169_s1 + $0xf68] sm:$0xff] }
  0x23   : > { %4407 = vmatpush1.bf16.msra.mxu1 %v4406_v23  ;;  %4209 = vmatprep.subr.bf16.mxu0 %v4208_v24  ;;  %v3461_v4 = vld [vmem:[%s9169_s1 + $0xf58] sm:$0xff]  ;;  %v4222_v6 = vpack.c.bf16 %v3454_v62, %v3450_v61  ;;  %v3458_v7 = vld [vmem:[%s9169_s1 + $0xf40] sm:$0xff]  ;;  %v4422_v8 = vpack.c.bf16 %v3456_v1, %v3452_v63  ;;  %v4224_v9 = vpack.c.bf16 %v3463_v3, %v3459_v2  ;;  %v3460_v11 = vld [vmem:[%s9169_s1 + $0xf50] sm:$0xff] }
  0x24   : > { %4409 = vmatprep.subr.bf16.mxu1 %v4408_v28  ;;  %v3465_v5 = vld [vmem:[%s9169_s1 + $0xf78] sm:$0xff]  ;;  %v3462_v10 = vld [vmem:[%s9169_s1 + $0xf60] sm:$0xff]  ;;  %v3464_v12 = vld [vmem:[%s9169_s1 + $0xf70] sm:$0xff] }
  0x25   : > { %v4424_v13 = vpack.c.bf16 %v3465_v5, %v3461_v4  ;;  %v3467_v14 = vld [vmem:[%s9169_s1 + $0xf88] sm:$0xff]  ;;  %v3469_v17 = vld [vmem:[%s9169_s1 + $0xf98] sm:$0xff]  ;;  %v633_v19 = vld [vmem:[%s5768_s11 + $0x40] sm:$0x1]  ;;  %v4226_v21 = vpack.c.bf16 %v3462_v10, %v3458_v7  ;;  %v4426_v23 = vpack.c.bf16 %v3464_v12, %v3460_v11 }
  0x26   : > { %4211 = vmatpush1.bf16.msra.mxu0 %v4210_v34  ;;  %v3471_v15 = vld [vmem:[%s9169_s1 + $0xfa8] sm:$0xff]  ;;  %v3473_v18 = vld [vmem:[%s9169_s1 + $0xfb8] sm:$0xff]  ;;  %v1059_v22 = vrot.slane %v633_v19, 1  ;;  %v3466_v25 = vld [vmem:[%s9169_s1 + $0xf80] sm:$0xff] }
  0x27   : > { %4411 = vmatpush1.bf16.msra.mxu1 %v4410_v35  ;;  %4213 = vmatprep.subr.bf16.mxu0 %v4212_v36  ;;  %v626_v16 = vld [vmem:[%s5768_s11 + $0x8] sm:$0xfe]  ;;  %v4228_v24 = vpack.c.bf16 %v3471_v15, %v3467_v14  ;;  %v3470_v26 = vld [vmem:[%s9169_s1 + $0xfa0] sm:$0xff]  ;;  %v3468_v27 = vld [vmem:[%s9169_s1 + $0xf90] sm:$0xff]  ;;  %v4428_v28 = vpack.c.bf16 %v3473_v18, %v3469_v17 }
  0x28   : > { %4413 = vmatprep.subr.bf16.mxu1 %v4412_v40  ;;  %v1058_v20 = vrot.slane %v626_v16, 1  ;;  %v3472_v29 = vld [vmem:[%s9169_s1 + $0xfb0] sm:$0xff]  ;;  %v3475_v30 = vld [vmem:[%s9169_s1 + $0xfc8] sm:$0xff]  ;;  %v3477_v33 = vld [vmem:[%s9169_s1 + $0xfd8] sm:$0xff]  ;;  %v4230_v35 = vpack.c.bf16 %v3470_v26, %v3466_v25 }
  0x29   : > { %v3479_v31 = vld [vmem:[%s9169_s1 + $0xfe8] sm:$0xff]  ;;  %v3481_v34 = vld [vmem:[%s9169_s1 + $0xff8] sm:$0xff]  ;;  %v4430_v36 = vpack.c.bf16 %v3472_v29, %v3468_v27  ;;  %v3474_v38 = vld [vmem:[%s9169_s1 + $0xfc0] sm:$0xff] }
  0x2a   : > { %4215 = vmatpush1.bf16.msra.mxu0 %v4214_v46  ;;  %v1060_v32 = vsel %vm1054_vm0, %v1058_v20, %v1059_v22  ;;  %v4232_v37 = vpack.c.bf16 %v3479_v31, %v3475_v30  ;;  %v3478_v39 = vld [vmem:[%s9169_s1 + $0xfe0] sm:$0xff]  ;;  %v3476_v40 = vld [vmem:[%s9169_s1 + $0xfd0] sm:$0xff]  ;;  %v4432_v41 = vpack.c.bf16 %v3481_v34, %v3477_v33  ;;  %v3483_v43 = vld [vmem:[%s9169_s1 + $0x1008] sm:$0xff] }
  0x2b   : > { %4415 = vmatpush1.bf16.msra.mxu1 %v4414_v47  ;;  %4217 = vmatprep.subr.bf16.mxu0 %v4216_v48  ;;  %v3480_v42 = vld [vmem:[%s9169_s1 + $0xff0] sm:$0xff]  ;;  %v3487_v44 = vld [vmem:[%s9169_s1 + $0x1028] sm:$0xff]  ;;  %v3485_v45 = vld [vmem:[%s9169_s1 + $0x1018] sm:$0xff]  ;;  %v4234_v47 = vpack.c.bf16 %v3478_v39, %v3474_v38 }
  0x2c   : > { %4417 = vmatprep.subr.bf16.mxu1 %v4416_v52  ;;  %1149 = vmatprep.mubr.f32.mxu0 %v1060_v32  ;;  %v3489_v46 = vld [vmem:[%s9169_s1 + $0x1038] sm:$0xff]  ;;  %v4434_v48 = vpack.c.bf16 %v3480_v42, %v3476_v40  ;;  %v4236_v49 = vpack.c.bf16 %v3487_v44, %v3483_v43  ;;  %v3482_v50 = vld [vmem:[%s9169_s1 + $0x1000] sm:$0xff]  ;;  %v3484_v52 = vld [vmem:[%s9169_s1 + $0x1010] sm:$0xff] }
  0x2d   : > { %1433 = vmatprep.mubr.f32.mxu1 %v1060_v32  ;;  %v3486_v51 = vld [vmem:[%s9169_s1 + $0x1020] sm:$0xff]  ;;  %v4436_v53 = vpack.c.bf16 %v3489_v46, %v3485_v45  ;;  %v3488_v54 = vld [vmem:[%s9169_s1 + $0x1030] sm:$0xff]  ;;  %v3491_v55 = vld [vmem:[%s9169_s1 + $0x1048] sm:$0xff] }
  0x2e   : > { %4219 = vmatpush1.bf16.msra.mxu0 %v4218_v58  ;;  %v3495_v56 = vld [vmem:[%s9169_s1 + $0x1068] sm:$0xff]  ;;  %v3493_v57 = vld [vmem:[%s9169_s1 + $0x1058] sm:$0xff]  ;;  %v3494_v61 = vld [vmem:[%s9169_s1 + $0x1060] sm:$0xff]  ;;  %v4438_v62 = vpack.c.bf16 %v3488_v54, %v3484_v52 }
  0x2f   : > { %4419 = vmatpush1.bf16.msra.mxu1 %v4418_v59  ;;  %4221 = vmatprep.subr.bf16.mxu0 %v4220_v60  ;;  %v3497_v58 = vld [vmem:[%s9169_s1 + $0x1078] sm:$0xff]  ;;  %v4238_v59 = vpack.c.bf16 %v3486_v51, %v3482_v50  ;;  %v3490_v60 = vld [vmem:[%s9169_s1 + $0x1040] sm:$0xff]  ;;  %v4240_v63 = vpack.c.bf16 %v3495_v56, %v3491_v55  ;;  %v3496_v4 = vld [vmem:[%s9169_s1 + $0x1070] sm:$0xff] }
  0x30   : > { %4421 = vmatprep.subr.bf16.mxu1 %v4420_v0  ;;  %v3492_v0 = vld [vmem:[%s9169_s1 + $0x1050] sm:$0xff]  ;;  %v625_v1 = vld [vmem:[%s5768_s11] sm:$0xfe]  ;;  %v632_v2 = vld [vmem:[%s5768_s11 + $0x38] sm:$0x1]  ;;  %v4440_v3 = vpack.c.bf16 %v3497_v58, %v3493_v57 }
  0x31   : > { %v3499_v5 = vld [vmem:[%s9169_s1 + $0x1088] sm:$0xff]  ;;  %v3501_v7 = vld [vmem:[%s9169_s1 + $0x1098] sm:$0xff]  ;;  %v1055_v10 = vrot.slane %v625_v1, 1  ;;  %v1056_v11 = vrot.slane %v632_v2, 1  ;;  %v4442_v12 = vpack.c.bf16 %v3496_v4, %v3492_v0  ;;  %v3498_v14 = vld [vmem:[%s9169_s1 + $0x1080] sm:$0xff] }
  0x32   : > { %4223 = vmatpush1.bf16.msra.mxu0 %v4222_v6  ;;  %v3503_v6 = vld [vmem:[%s9169_s1 + $0x10a8] sm:$0xff]  ;;  %v3502_v15 = vld [vmem:[%s9169_s1 + $0x10a0] sm:$0xff]  ;;  %v3500_v16 = vld [vmem:[%s9169_s1 + $0x1090] sm:$0xff] }
  0x33   : > { %4423 = vmatpush1.bf16.msra.mxu1 %v4422_v8  ;;  %4225 = vmatprep.subr.bf16.mxu0 %v4224_v9  ;;  %v3505_v8 = vld [vmem:[%s9169_s1 + $0x10b8] sm:$0xff]  ;;  %v4242_v9 = vpack.c.bf16 %v3494_v61, %v3490_v60  ;;  %v3504_v18 = vld [vmem:[%s9169_s1 + $0x10b0] sm:$0xff]  ;;  %v3507_v19 = vld [vmem:[%s9169_s1 + $0x10c8] sm:$0xff] }
  0x34   : > { %4425 = vmatprep.subr.bf16.mxu1 %v4424_v13  ;;  %v4244_v13 = vpack.c.bf16 %v3503_v6, %v3499_v5  ;;  %v4444_v17 = vpack.c.bf16 %v3505_v8, %v3501_v7  ;;  %v3511_v20 = vld [vmem:[%s9169_s1 + $0x10e8] sm:$0xff]  ;;  %v3513_v22 = vld [vmem:[%s9169_s1 + $0x10f8] sm:$0xff]  ;;  %v4446_v25 = vpack.c.bf16 %v3504_v18, %v3500_v16  ;;  %v3506_v27 = vld [vmem:[%s9169_s1 + $0x10c0] sm:$0xff] }
  0x35   : > { %v4248_v26 = vpack.c.bf16 %v3511_v20, %v3507_v19  ;;  %v3508_v29 = vld [vmem:[%s9169_s1 + $0x10d0] sm:$0xff]  ;;  %v3515_v32 = vld [vmem:[%s9169_s1 + $0x1108] sm:$0xff]  ;;  %v3517_v34 = vld [vmem:[%s9169_s1 + $0x1118] sm:$0xff] }
  0x36   : > { %4227 = vmatpush1.bf16.msra.mxu0 %v4226_v21  ;;  %v3509_v21 = vld [vmem:[%s9169_s1 + $0x10d8] sm:$0xff]  ;;  %v3512_v31 = vld [vmem:[%s9169_s1 + $0x10f0] sm:$0xff]  ;;  %v3519_v33 = vld [vmem:[%s9169_s1 + $0x1128] sm:$0xff] }
  0x37   : > { %4427 = vmatpush1.bf16.msra.mxu1 %v4426_v23  ;;  %4229 = vmatprep.subr.bf16.mxu0 %v4228_v24  ;;  %v1057_v23 = vsel %vm1054_vm0, %v1055_v10, %v1056_v11  ;;  %v4246_v24 = vpack.c.bf16 %v3502_v15, %v3498_v14  ;;  %v4448_v30 = vpack.c.bf16 %v3513_v22, %v3509_v21  ;;  %v3514_v39 = vld [vmem:[%s9169_s1 + $0x1100] sm:$0xff]  ;;  %v3520_v43 = vld [vmem:[%s9169_s1 + $0x1130] sm:$0xff]  ;;  %v3523_v44 = vld [vmem:[%s9169_s1 + $0x1148] sm:$0xff] }
  0x38   : > { %4429 = vmatprep.subr.bf16.mxu1 %v4428_v28  ;;  %v3510_v28 = vld [vmem:[%s9169_s1 + $0x10e0] sm:$0xff]  ;;  %v4252_v38 = vpack.c.bf16 %v3519_v33, %v3515_v32  ;;  %v3527_v45 = vld [vmem:[%s9169_s1 + $0x1168] sm:$0xff]  ;;  %v3525_v46 = vld [vmem:[%s9169_s1 + $0x1158] sm:$0xff] }
  0x39   : > { %v3518_v40 = vld [vmem:[%s9169_s1 + $0x1120] sm:$0xff]  ;;  %v4256_v50 = vpack.c.bf16 %v3527_v45, %v3523_v44  ;;  %v3528_v55 = vld [vmem:[%s9169_s1 + $0x1170] sm:$0xff]  ;;  %v3531_v56 = vld [vmem:[%s9169_s1 + $0x1188] sm:$0xff] }
  0x3a   : > { %4231 = vmatpush1.bf16.msra.mxu0 %v4230_v35  ;;  %v3521_v35 = vld [vmem:[%s9169_s1 + $0x1138] sm:$0xff]  ;;  %v3522_v51 = vld [vmem:[%s9169_s1 + $0x1140] sm:$0xff]  ;;  %v3535_v57 = vld [vmem:[%s9169_s1 + $0x11a8] sm:$0xff] }
  0x3b   : > { %4431 = vmatpush1.bf16.msra.mxu1 %v4430_v36  ;;  %4233 = vmatprep.subr.bf16.mxu0 %v4232_v37  ;;  %v4250_v36 = vpack.c.bf16 %v3510_v28, %v3506_v27  ;;  %v4450_v37 = vpack.c.bf16 %v3512_v31, %v3508_v29  ;;  %v4452_v42 = vpack.c.bf16 %v3521_v35, %v3517_v34  ;;  %v3526_v52 = vld [vmem:[%s9169_s1 + $0x1160] sm:$0xff]  ;;  %v3533_v58 = vld [vmem:[%s9169_s1 + $0x1198] sm:$0xff]  ;;  %v3532_v1 = vld [vmem:[%s9169_s1 + $0x1190] sm:$0xff] }
  0x3c   : > { %4433 = vmatprep.subr.bf16.mxu1 %v4432_v41  ;;  %v3516_v41 = vld [vmem:[%s9169_s1 + $0x1110] sm:$0xff]  ;;  %v4258_v60 = vpack.c.bf16 %v3526_v52, %v3522_v51  ;;  %v3534_v0 = vld [vmem:[%s9169_s1 + $0x11a0] sm:$0xff]  ;;  %v3539_v4 = vld [vmem:[%s9169_s1 + $0x11c8] sm:$0xff] }
  0x3d   : > { %v3543_v5 = vld [vmem:[%s9169_s1 + $0x11e8] sm:$0xff]  ;;  %v3541_v6 = vld [vmem:[%s9169_s1 + $0x11d8] sm:$0xff]  ;;  %v3538_v11 = vld [vmem:[%s9169_s1 + $0x11c0] sm:$0xff] }
  0x3e   : > { %4235 = vmatpush1.bf16.msra.mxu0 %v4234_v47  ;;  %v3529_v47 = vld [vmem:[%s9169_s1 + $0x1178] sm:$0xff]  ;;  %v4264_v10 = vpack.c.bf16 %v3543_v5, %v3539_v4  ;;  %v3544_v15 = vld [vmem:[%s9169_s1 + $0x11f0] sm:$0xff]  ;;  %v3547_v16 = vld [vmem:[%s9169_s1 + $0x1208] sm:$0xff] }
  0x3f   : > { %4435 = vmatpush1.bf16.msra.mxu1 %v4434_v48  ;;  %4237 = vmatprep.subr.bf16.mxu0 %v4236_v49  ;;  %v4254_v48 = vpack.c.bf16 %v3518_v40, %v3514_v39  ;;  %v4454_v49 = vpack.c.bf16 %v3520_v43, %v3516_v41  ;;  %v4456_v54 = vpack.c.bf16 %v3529_v47, %v3525_v46  ;;  %v3545_v7 = vld [vmem:[%s9169_s1 + $0x11f8] sm:$0xff]  ;;  %v3546_v21 = vld [vmem:[%s9169_s1 + $0x1200] sm:$0xff]  ;;  %v3555_v28 = vld [vmem:[%s9169_s1 + $0x1248] sm:$0xff] }
  0x40   : > { %4437 = vmatprep.subr.bf16.mxu1 %v4436_v53  ;;  %v3524_v53 = vld [vmem:[%s9169_s1 + $0x1150] sm:$0xff]  ;;  %v4464_v14 = vpack.c.bf16 %v3545_v7, %v3541_v6  ;;  %v3549_v18 = vld [vmem:[%s9169_s1 + $0x1218] sm:$0xff]  ;;  %v3559_v29 = vld [vmem:[%s9169_s1 + $0x1268] sm:$0xff] }
  0x41   : > { %v4458_v61 = vpack.c.bf16 %v3528_v55, %v3524_v53  ;;  %v3553_v19 = vld [vmem:[%s9169_s1 + $0x1238] sm:$0xff]  ;;  %v635_v33 = vld [vmem:[%s5768_s11 + $0x50] sm:$0x1]  ;;  %v3554_v39 = vld [vmem:[%s9169_s1 + $0x1240] sm:$0xff] }
  0x42   : > { %4239 = vmatpush1.bf16.msra.mxu0 %v4238_v59  ;;  %v3537_v59 = vld [vmem:[%s9169_s1 + $0x11b8] sm:$0xff]  ;;  %v4468_v27 = vpack.c.bf16 %v3553_v19, %v3549_v18  ;;  %v3558_v40 = vld [vmem:[%s9169_s1 + $0x1260] sm:$0xff]  ;;  %v3556_v41 = vld [vmem:[%s9169_s1 + $0x1250] sm:$0xff] }
  0x43   : > { %4439 = vmatpush1.bf16.msra.mxu1 %v4438_v62  ;;  %4241 = vmatprep.subr.bf16.mxu0 %v4240_v63  ;;  %v4260_v62 = vpack.c.bf16 %v3535_v57, %v3531_v56  ;;  %v3530_v63 = vld [vmem:[%s9169_s1 + $0x1180] sm:$0xff]  ;;  %v4460_v2 = vpack.c.bf16 %v3537_v59, %v3533_v58  ;;  %v3557_v31 = vld [vmem:[%s9169_s1 + $0x1258] sm:$0xff]  ;;  %v3560_v43 = vld [vmem:[%s9169_s1 + $0x1270] sm:$0xff] }
  0x44   : > { %4441 = vmatprep.subr.bf16.mxu1 %v4440_v3  ;;  %v3536_v3 = vld [vmem:[%s9169_s1 + $0x11b0] sm:$0xff]  ;;  %v4262_v8 = vpack.c.bf16 %v3534_v0, %v3530_v63  ;;  %v3561_v32 = vld [vmem:[%s9169_s1 + $0x1278] sm:$0xff]  ;;  %v3563_v44 = vld [vmem:[%s9169_s1 + $0x1288] sm:$0xff] }
  0x45   : > { %v3567_v45 = vld [vmem:[%s9169_s1 + $0x12a8] sm:$0xff]  ;;  %v3565_v47 = vld [vmem:[%s9169_s1 + $0x1298] sm:$0xff]  ;;  %v3562_v52 = vld [vmem:[%s9169_s1 + $0x1280] sm:$0xff] }
  0x46   : > { %4243 = vmatpush1.bf16.msra.mxu0 %v4242_v9  ;;  %v4462_v9 = vpack.c.bf16 %v3536_v3, %v3532_v1  ;;  %v4276_v51 = vpack.c.bf16 %v3567_v45, %v3563_v44  ;;  %v3566_v53 = vld [vmem:[%s9169_s1 + $0x12a0] sm:$0xff]  ;;  %v3568_v56 = vld [vmem:[%s9169_s1 + $0x12b0] sm:$0xff]  ;;  %v3571_v57 = vld [vmem:[%s9169_s1 + $0x12c8] sm:$0xff] }
  0x47   : > { %4443 = vmatpush1.bf16.msra.mxu1 %v4442_v12  ;;  %4245 = vmatprep.subr.bf16.mxu0 %v4244_v13  ;;  %v3542_v12 = vld [vmem:[%s9169_s1 + $0x11e0] sm:$0xff]  ;;  %v3540_v13 = vld [vmem:[%s9169_s1 + $0x11d0] sm:$0xff]  ;;  %v3575_v58 = vld [vmem:[%s9169_s1 + $0x12e8] sm:$0xff] }
  0x48   : > { %4445 = vmatprep.subr.bf16.mxu1 %v4444_v17  ;;  %v3551_v17 = vld [vmem:[%s9169_s1 + $0x1228] sm:$0xff]  ;;  %v4266_v20 = vpack.c.bf16 %v3542_v12, %v3538_v11  ;;  %v4466_v22 = vpack.c.bf16 %v3544_v15, %v3540_v13  ;;  %v3573_v59 = vld [vmem:[%s9169_s1 + $0x12d8] sm:$0xff]  ;;  %v4280_v63 = vpack.c.bf16 %v3575_v58, %v3571_v57  ;;  %v3570_v0 = vld [vmem:[%s9169_s1 + $0x12c0] sm:$0xff] }
  0x49   : > { %1150 = vmatmul.mubr.f32.vlgmr.msra.gmra.mrb[0].mxu0 %v1057_v23  ;;  %v3574_v1 = vld [vmem:[%s9169_s1 + $0x12e0] sm:$0xff]  ;;  %v3576_v4 = vld [vmem:[%s9169_s1 + $0x12f0] sm:$0xff]  ;;  %v3579_v5 = vld [vmem:[%s9169_s1 + $0x1308] sm:$0xff] }
  0x4a   : > { %4247 = vmatpush1.bf16.msra.mxu0 %v4246_v24  ;;  %1434 = vmatmul.mubr.f32.vlgmr.msra.gmra.mrb[0].mxu1 %v1057_v23  ;;  %v4268_v23 = vpack.c.bf16 %v3551_v17, %v3547_v16  ;;  %v3550_v24 = vld [vmem:[%s9169_s1 + $0x1220] sm:$0xff]  ;;  %v3583_v6 = vld [vmem:[%s9169_s1 + $0x1328] sm:$0xff]  ;;  %v3581_v7 = vld [vmem:[%s9169_s1 + $0x1318] sm:$0xff] }
  0x4b   : > { %4447 = vmatpush1.bf16.msra.mxu1 %v4446_v25  ;;  %4249 = vmatprep.subr.bf16.mxu0 %v4248_v26  ;;  %v3548_v25 = vld [vmem:[%s9169_s1 + $0x1210] sm:$0xff]  ;;  %v4270_v35 = vpack.c.bf16 %v3550_v24, %v3546_v21  ;;  %v4284_v11 = vpack.c.bf16 %v3583_v6, %v3579_v5  ;;  %v3578_v12 = vld [vmem:[%s9169_s1 + $0x1300] sm:$0xff]  ;;  %v3587_v17 = vld [vmem:[%s9169_s1 + $0x1348] sm:$0xff] }
  0x4c   : > { %4449 = vmatprep.subr.bf16.mxu1 %v4448_v30  ;;  %v3552_v26 = vld [vmem:[%s9169_s1 + $0x1230] sm:$0xff]  ;;  %v628_v30 = vld [vmem:[%s5768_s11 + $0x18] sm:$0xfe]  ;;  %v3582_v13 = vld [vmem:[%s9169_s1 + $0x1320] sm:$0xff] }
  0x4d   : > { %v1064_v34 = vrot.slane %v628_v30, 1  ;;  %v3584_v16 = vld [vmem:[%s9169_s1 + $0x1330] sm:$0xff]  ;;  %v3591_v18 = vld [vmem:[%s9169_s1 + $0x1368] sm:$0xff]  ;;  %v3589_v19 = vld [vmem:[%s9169_s1 + $0x1358] sm:$0xff]  ;;  %v4286_v21 = vpack.c.bf16 %v3582_v13, %v3578_v12 }
  0x4e   : > { %4251 = vmatpush1.bf16.msra.mxu0 %v4250_v36  ;;  %v1065_v36 = vrot.slane %v635_v33, 1  ;;  %v3586_v24 = vld [vmem:[%s9169_s1 + $0x1340] sm:$0xff]  ;;  %v3599_v30 = vld [vmem:[%s9169_s1 + $0x13a8] sm:$0xff]  ;;  %v3609_v44 = vld [vmem:[%s9169_s1 + $0x13f8] sm:$0xff] }
  0x4f   : > { %4451 = vmatpush1.bf16.msra.mxu1 %v4450_v37  ;;  %4253 = vmatprep.subr.bf16.mxu0 %v4252_v38  ;;  %v4470_v37 = vpack.c.bf16 %v3552_v26, %v3548_v25  ;;  %v4272_v38 = vpack.c.bf16 %v3559_v29, %v3555_v28  ;;  %v3590_v25 = vld [vmem:[%s9169_s1 + $0x1360] sm:$0xff]  ;;  %v3588_v26 = vld [vmem:[%s9169_s1 + $0x1350] sm:$0xff]  ;;  %v3595_v29 = vld [vmem:[%s9169_s1 + $0x1388] sm:$0xff] }
  0x50   : > { %4453 = vmatprep.subr.bf16.mxu1 %v4452_v42  ;;  %v4472_v42 = vpack.c.bf16 %v3561_v32, %v3557_v31  ;;  %v1066_v46 = vsel %vm1054_vm0, %v1064_v34, %v1065_v36  ;;  %v3592_v28 = vld [vmem:[%s9169_s1 + $0x1370] sm:$0xff]  ;;  %v3597_v31 = vld [vmem:[%s9169_s1 + $0x1398] sm:$0xff]  ;;  %v4290_v33 = vpack.c.bf16 %v3590_v25, %v3586_v24  ;;  %v3594_v36 = vld [vmem:[%s9169_s1 + $0x1380] sm:$0xff] }
  0x51   : > { %1220 = vmatprep.mubr.f32.mxu0 %v1066_v46  ;;  %1504 = vmatprep.mubr.f32.mxu1 %v1066_v46  ;;  %v3601_v32 = vld [vmem:[%s9169_s1 + $0x13b8] sm:$0xff]  ;;  %v4490_v34 = vpack.c.bf16 %v3592_v28, %v3588_v26  ;;  %v3618_v6 = vld [vmem:[%s9169_s1 + $0x1440] sm:$0xff]  ;;  %v634_v12 = vld [vmem:[%s5768_s11 + $0x48] sm:$0x1] }
  0x52   : > { %4255 = vmatpush1.bf16.msra.mxu0 %v4254_v48  ;;  %v3569_v48 = vld [vmem:[%s9169_s1 + $0x12b8] sm:$0xff]  ;;  %v3626_v24 = vld [vmem:[%s9169_s1 + $0x1480] sm:$0xff]  ;;  %v3628_v26 = vld [vmem:[%s9169_s1 + $0x1490] sm:$0xff] }
  0x53   : > { %4455 = vmatpush1.bf16.msra.mxu1 %v4454_v49  ;;  %4257 = vmatprep.subr.bf16.mxu0 %v4256_v50  ;;  %v4274_v49 = vpack.c.bf16 %v3558_v40, %v3554_v39  ;;  %v4474_v50 = vpack.c.bf16 %v3560_v43, %v3556_v41  ;;  %v4476_v55 = vpack.c.bf16 %v3569_v48, %v3565_v47  ;;  %v3600_v40 = vld [vmem:[%s9169_s1 + $0x13b0] sm:$0xff]  ;;  %v3603_v41 = vld [vmem:[%s9169_s1 + $0x13c8] sm:$0xff]  ;;  %v3605_v43 = vld [vmem:[%s9169_s1 + $0x13d8] sm:$0xff] }
  0x54   : > { %4457 = vmatprep.subr.bf16.mxu1 %v4456_v54  ;;  %v3564_v54 = vld [vmem:[%s9169_s1 + $0x1290] sm:$0xff]  ;;  %v4492_v39 = vpack.c.bf16 %v3601_v32, %v3597_v31  ;;  %v3602_v48 = vld [vmem:[%s9169_s1 + $0x13c0] sm:$0xff]  ;;  %v3637_v31 = vld [vmem:[%s9169_s1 + $0x14d8] sm:$0xff] }
  0x55   : > { %v3630_v25 = vld [vmem:[%s9169_s1 + $0x14a0] sm:$0xff]  ;;  %v3632_v28 = vld [vmem:[%s9169_s1 + $0x14b0] sm:$0xff]  ;;  %v3641_v32 = vld [vmem:[%s9169_s1 + $0x14f8] sm:$0xff] }
  0x56   : > { %4259 = vmatpush1.bf16.msra.mxu0 %v4258_v60  ;;  %v3577_v60 = vld [vmem:[%s9169_s1 + $0x12f8] sm:$0xff] }
  0x57   : > { %4459 = vmatpush1.bf16.msra.mxu1 %v4458_v61  ;;  %4261 = vmatprep.subr.bf16.mxu0 %v4260_v62  ;;  %v4278_v61 = vpack.c.bf16 %v3566_v53, %v3562_v52  ;;  %v4478_v62 = vpack.c.bf16 %v3568_v56, %v3564_v54  ;;  %v4480_v3 = vpack.c.bf16 %v3577_v60, %v3573_v59  ;;  %v3608_v52 = vld [vmem:[%s9169_s1 + $0x13f0] sm:$0xff]  ;;  %v3611_v53 = vld [vmem:[%s9169_s1 + $0x1408] sm:$0xff]  ;;  %v3617_v56 = vld [vmem:[%s9169_s1 + $0x1438] sm:$0xff] }
  0x58   : > { %4461 = vmatprep.subr.bf16.mxu1 %v4460_v2  ;;  %v3572_v2 = vld [vmem:[%s9169_s1 + $0x12d0] sm:$0xff]  ;;  %v3615_v54 = vld [vmem:[%s9169_s1 + $0x1428] sm:$0xff]  ;;  %v3610_v60 = vld [vmem:[%s9169_s1 + $0x1400] sm:$0xff] }
  0x59   : > { %v4300_v59 = vpack.c.bf16 %v3615_v54, %v3611_v53  ;;  %v3642_v53 = vld [vmem:[%s9169_s1 + $0x1500] sm:$0xff] }
  0x5a   : > { %4263 = vmatpush1.bf16.msra.mxu0 %v4262_v8  ;;  %v3585_v8 = vld [vmem:[%s9169_s1 + $0x1338] sm:$0xff]  ;;  %v3646_v54 = vld [vmem:[%s9169_s1 + $0x1520] sm:$0xff] }
  0x5b   : > { %4463 = vmatpush1.bf16.msra.mxu1 %v4462_v9  ;;  %4265 = vmatprep.subr.bf16.mxu0 %v4264_v10  ;;  %v4282_v9 = vpack.c.bf16 %v3574_v1, %v3570_v0  ;;  %v4482_v10 = vpack.c.bf16 %v3576_v4, %v3572_v2  ;;  %v4484_v15 = vpack.c.bf16 %v3585_v8, %v3581_v7  ;;  %v3616_v0 = vld [vmem:[%s9169_s1 + $0x1430] sm:$0xff]  ;;  %v3619_v1 = vld [vmem:[%s9169_s1 + $0x1448] sm:$0xff]  ;;  %v3625_v4 = vld [vmem:[%s9169_s1 + $0x1478] sm:$0xff] }
  0x5c   : > { %4465 = vmatprep.subr.bf16.mxu1 %v4464_v14  ;;  %v3580_v14 = vld [vmem:[%s9169_s1 + $0x1310] sm:$0xff]  ;;  %v3623_v2 = vld [vmem:[%s9169_s1 + $0x1468] sm:$0xff]  ;;  %v3622_v7 = vld [vmem:[%s9169_s1 + $0x1460] sm:$0xff] }
  0x5e   : > { %4267 = vmatpush1.bf16.msra.mxu0 %v4266_v20  ;;  %v3593_v20 = vld [vmem:[%s9169_s1 + $0x1378] sm:$0xff] }
  0x5f   : > { %4467 = vmatpush1.bf16.msra.mxu1 %v4466_v22  ;;  %4269 = vmatprep.subr.bf16.mxu0 %v4268_v23  ;;  %v4486_v22 = vpack.c.bf16 %v3584_v16, %v3580_v14  ;;  %v4288_v23 = vpack.c.bf16 %v3591_v18, %v3587_v17  ;;  %v3624_v14 = vld [vmem:[%s9169_s1 + $0x1470] sm:$0xff]  ;;  %v3631_v16 = vld [vmem:[%s9169_s1 + $0x14a8] sm:$0xff]  ;;  %v3629_v17 = vld [vmem:[%s9169_s1 + $0x1498] sm:$0xff] }
  0x60   : > { %4469 = vmatprep.subr.bf16.mxu1 %v4468_v27  ;;  %v4488_v27 = vpack.c.bf16 %v3593_v20, %v3589_v19  ;;  %v3633_v18 = vld [vmem:[%s9169_s1 + $0x14b8] sm:$0xff]  ;;  %v4306_v19 = vpack.c.bf16 %v3622_v7, %v3618_v6  ;;  %v3656_v6 = vld [vmem:[%s9169_s1 + $0x1570] sm:$0xff]  ;;  %v3659_v7 = vld [vmem:[%s9169_s1 + $0x1588] sm:$0xff] }
  0x62   : > { %4271 = vmatpush1.bf16.msra.mxu0 %v4270_v35  ;;  %v4292_v35 = vpack.c.bf16 %v3599_v30, %v3595_v29  ;;  %v3635_v29 = vld [vmem:[%s9169_s1 + $0x14c8] sm:$0xff] }
  0x63   : > { %4471 = vmatpush1.bf16.msra.mxu1 %v4470_v37  ;;  %4273 = vmatprep.subr.bf16.mxu0 %v4272_v38  ;;  %v3598_v37 = vld [vmem:[%s9169_s1 + $0x13a0] sm:$0xff]  ;;  %v3596_v38 = vld [vmem:[%s9169_s1 + $0x1390] sm:$0xff]  ;;  %v3639_v30 = vld [vmem:[%s9169_s1 + $0x14e8] sm:$0xff] }
  0x64   : > { %4473 = vmatprep.subr.bf16.mxu1 %v4472_v42  ;;  %v3607_v42 = vld [vmem:[%s9169_s1 + $0x13e8] sm:$0xff]  ;;  %v4294_v45 = vpack.c.bf16 %v3598_v37, %v3594_v36  ;;  %v4494_v46 = vpack.c.bf16 %v3600_v40, %v3596_v38  ;;  %v4510_v36 = vpack.c.bf16 %v3632_v28, %v3628_v26  ;;  %v4312_v37 = vpack.c.bf16 %v3639_v30, %v3635_v29  ;;  %v3638_v38 = vld [vmem:[%s9169_s1 + $0x14e0] sm:$0xff]  ;;  %v3640_v40 = vld [vmem:[%s9169_s1 + $0x14f0] sm:$0xff] }
  0x65   : > { %v4296_v47 = vpack.c.bf16 %v3607_v42, %v3603_v41  ;;  %v4512_v41 = vpack.c.bf16 %v3641_v32, %v3637_v31  ;;  %v3643_v42 = vld [vmem:[%s9169_s1 + $0x1508] sm:$0xff]  ;;  %v3666_v26 = vld [vmem:[%s9169_s1 + $0x15c0] sm:$0xff]  ;;  %v3668_v28 = vld [vmem:[%s9169_s1 + $0x15d0] sm:$0xff] }
  0x66   : > { %4275 = vmatpush1.bf16.msra.mxu0 %v4274_v49  ;;  %v3606_v49 = vld [vmem:[%s9169_s1 + $0x13e0] sm:$0xff]  ;;  %v3672_v30 = vld [vmem:[%s9169_s1 + $0x15f0] sm:$0xff]  ;;  %v3675_v31 = vld [vmem:[%s9169_s1 + $0x1608] sm:$0xff] }
  0x67   : > { %4475 = vmatpush1.bf16.msra.mxu1 %v4474_v50  ;;  %4277 = vmatprep.subr.bf16.mxu0 %v4276_v51  ;;  %v3604_v50 = vld [vmem:[%s9169_s1 + $0x13d0] sm:$0xff]  ;;  %v4496_v51 = vpack.c.bf16 %v3609_v44, %v3605_v43  ;;  %v4298_v57 = vpack.c.bf16 %v3606_v49, %v3602_v48  ;;  %v3647_v43 = vld [vmem:[%s9169_s1 + $0x1528] sm:$0xff] }
  0x68   : > { %4477 = vmatprep.subr.bf16.mxu1 %v4476_v55  ;;  %v3613_v55 = vld [vmem:[%s9169_s1 + $0x1418] sm:$0xff]  ;;  %v4498_v58 = vpack.c.bf16 %v3608_v52, %v3604_v50  ;;  %v630_v44 = vld [vmem:[%s5768_s11 + $0x28] sm:$0xfe]  ;;  %v4316_v52 = vpack.c.bf16 %v3647_v43, %v3643_v42  ;;  %v3680_v42 = vld [vmem:[%s9169_s1 + $0x1630] sm:$0xff] }
  0x69   : > { %v1070_v48 = vrot.slane %v630_v44, 1  ;;  %v3679_v32 = vld [vmem:[%s9169_s1 + $0x1628] sm:$0xff] }
  0x6a   : > { %4279 = vmatpush1.bf16.msra.mxu0 %v4278_v61  ;;  %v3614_v61 = vld [vmem:[%s9169_s1 + $0x1420] sm:$0xff]  ;;  %v3683_v43 = vld [vmem:[%s9169_s1 + $0x1648] sm:$0xff] }
  0x6b   : > { %4479 = vmatpush1.bf16.msra.mxu1 %v4478_v62  ;;  %4281 = vmatprep.subr.bf16.mxu0 %v4280_v63  ;;  %v3612_v62 = vld [vmem:[%s9169_s1 + $0x1410] sm:$0xff]  ;;  %v4500_v63 = vpack.c.bf16 %v3617_v56, %v3613_v55  ;;  %v4302_v5 = vpack.c.bf16 %v3614_v61, %v3610_v60  ;;  %v3653_v61 = vld [vmem:[%s9169_s1 + $0x1558] sm:$0xff]  ;;  %v3687_v44 = vld [vmem:[%s9169_s1 + $0x1668] sm:$0xff] }
  0x6c   : > { %4481 = vmatprep.subr.bf16.mxu1 %v4480_v3  ;;  %v3621_v3 = vld [vmem:[%s9169_s1 + $0x1458] sm:$0xff]  ;;  %v4502_v8 = vpack.c.bf16 %v3616_v0, %v3612_v62  ;;  %v3644_v55 = vld [vmem:[%s9169_s1 + $0x1510] sm:$0xff] }
  0x6d   : > { %v4504_v13 = vpack.c.bf16 %v3625_v4, %v3621_v3  ;;  %v3657_v62 = vld [vmem:[%s9169_s1 + $0x1578] sm:$0xff]  ;;  %v3654_v3 = vld [vmem:[%s9169_s1 + $0x1560] sm:$0xff]  ;;  %v3652_v4 = vld [vmem:[%s9169_s1 + $0x1550] sm:$0xff] }
  0x6e   : > { %4283 = vmatpush1.bf16.msra.mxu0 %v4282_v9  ;;  %v4304_v9 = vpack.c.bf16 %v3623_v2, %v3619_v1  ;;  %v3650_v2 = vld [vmem:[%s9169_s1 + $0x1540] sm:$0xff] }
  0x6f   : > { %4483 = vmatpush1.bf16.msra.mxu1 %v4482_v10  ;;  %4285 = vmatprep.subr.bf16.mxu0 %v4284_v11  ;;  %v3620_v10 = vld [vmem:[%s9169_s1 + $0x1450] sm:$0xff] }
  0x70   : > { %4485 = vmatprep.subr.bf16.mxu1 %v4484_v15  ;;  %v627_v11 = vld [vmem:[%s5768_s11 + $0x10] sm:$0xfe]  ;;  %v3627_v15 = vld [vmem:[%s9169_s1 + $0x1488] sm:$0xff] }
  0x71   : > { %v1061_v20 = vrot.slane %v627_v11, 1  ;;  %v4322_v11 = vpack.c.bf16 %v3654_v3, %v3650_v2  ;;  %v3696_v2 = vld [vmem:[%s9169_s1 + $0x16b0] sm:$0xff]  ;;  %v3699_v3 = vld [vmem:[%s9169_s1 + $0x16c8] sm:$0xff] }
  0x72   : > { %4287 = vmatpush1.bf16.msra.mxu0 %v4286_v21  ;;  %v1062_v21 = vrot.slane %v634_v12, 1  ;;  %v4522_v12 = vpack.c.bf16 %v3656_v6, %v3652_v4  ;;  %v3703_v4 = vld [vmem:[%s9169_s1 + $0x16e8] sm:$0xff]  ;;  %v3705_v6 = vld [vmem:[%s9169_s1 + $0x16f8] sm:$0xff] }
  0x73   : > { %4487 = vmatpush1.bf16.msra.mxu1 %v4486_v22  ;;  %4289 = vmatprep.subr.bf16.mxu0 %v4288_v23  ;;  %v4506_v22 = vpack.c.bf16 %v3624_v14, %v3620_v10  ;;  %v4308_v23 = vpack.c.bf16 %v3631_v16, %v3627_v15  ;;  %v3665_v10 = vld [vmem:[%s9169_s1 + $0x15b8] sm:$0xff]  ;;  %v3658_v14 = vld [vmem:[%s9169_s1 + $0x1580] sm:$0xff]  ;;  %v3660_v16 = vld [vmem:[%s9169_s1 + $0x1590] sm:$0xff] }
  0x74   : > { %4489 = vmatprep.subr.bf16.mxu1 %v4488_v27  ;;  %v4508_v27 = vpack.c.bf16 %v3633_v18, %v3629_v17  ;;  %v3662_v15 = vld [vmem:[%s9169_s1 + $0x15a0] sm:$0xff]  ;;  %v3664_v18 = vld [vmem:[%s9169_s1 + $0x15b0] sm:$0xff] }
  0x76   : > { %4291 = vmatpush1.bf16.msra.mxu0 %v4290_v33  ;;  %v1063_v33 = vsel %vm1054_vm0, %v1061_v20, %v1062_v21  ;;  %v3671_v20 = vld [vmem:[%s9169_s1 + $0x15e8] sm:$0xff]  ;;  %v3669_v21 = vld [vmem:[%s9169_s1 + $0x15d8] sm:$0xff] }
  0x77   : > { %4491 = vmatpush1.bf16.msra.mxu1 %v4490_v34  ;;  %4293 = vmatprep.subr.bf16.mxu0 %v4292_v35  ;;  %v4310_v34 = vpack.c.bf16 %v3630_v25, %v3626_v24  ;;  %v3634_v35 = vld [vmem:[%s9169_s1 + $0x14c0] sm:$0xff]  ;;  %v4526_v24 = vpack.c.bf16 %v3664_v18, %v3660_v16  ;;  %v3711_v16 = vld [vmem:[%s9169_s1 + $0x1728] sm:$0xff]  ;;  %v3713_v18 = vld [vmem:[%s9169_s1 + $0x1738] sm:$0xff] }
  0x78   : > { %4493 = vmatprep.subr.bf16.mxu1 %v4492_v39  ;;  %v3636_v39 = vld [vmem:[%s9169_s1 + $0x14d0] sm:$0xff]  ;;  %v4314_v49 = vpack.c.bf16 %v3638_v38, %v3634_v35  ;;  %v3674_v38 = vld [vmem:[%s9169_s1 + $0x1600] sm:$0xff] }
  0x7a   : > { %4295 = vmatpush1.bf16.msra.mxu0 %v4294_v45  ;;  %v3645_v45 = vld [vmem:[%s9169_s1 + $0x1518] sm:$0xff] }
  0x7b   : > { %4495 = vmatpush1.bf16.msra.mxu1 %v4494_v46  ;;  %4297 = vmatprep.subr.bf16.mxu0 %v4296_v47  ;;  %v3649_v46 = vld [vmem:[%s9169_s1 + $0x1538] sm:$0xff]  ;;  %v637_v47 = vld [vmem:[%s5768_s11 + $0x60] sm:$0x1] }
  0x7c   : > { %4497 = vmatprep.subr.bf16.mxu1 %v4496_v51  ;;  %v1071_v50 = vrot.slane %v637_v47, 1  ;;  %v4514_v51 = vpack.c.bf16 %v3640_v40, %v3636_v39  ;;  %v4516_v56 = vpack.c.bf16 %v3649_v46, %v3645_v45  ;;  %v3678_v39 = vld [vmem:[%s9169_s1 + $0x1620] sm:$0xff]  ;;  %v3676_v40 = vld [vmem:[%s9169_s1 + $0x1610] sm:$0xff]  ;;  %v3685_v45 = vld [vmem:[%s9169_s1 + $0x1658] sm:$0xff] }
  0x7d   : > { %v3689_v46 = vld [vmem:[%s9169_s1 + $0x1678] sm:$0xff]  ;;  %v4334_v47 = vpack.c.bf16 %v3678_v39, %v3674_v38  ;;  %v3720_v38 = vld [vmem:[%s9169_s1 + $0x1770] sm:$0xff]  ;;  %v3723_v39 = vld [vmem:[%s9169_s1 + $0x1788] sm:$0xff] }
  0x7e   : > { %4299 = vmatpush1.bf16.msra.mxu0 %v4298_v57  ;;  %v3648_v57 = vld [vmem:[%s9169_s1 + $0x1530] sm:$0xff]  ;;  %v1072_v60 = vsel %vm1054_vm0, %v1070_v48, %v1071_v50  ;;  %v4534_v48 = vpack.c.bf16 %v3680_v42, %v3676_v40  ;;  %v3682_v50 = vld [vmem:[%s9169_s1 + $0x1640] sm:$0xff]  ;;  %v3727_v40 = vld [vmem:[%s9169_s1 + $0x17a8] sm:$0xff] }
  0x7f   : > { %4499 = vmatpush1.bf16.msra.mxu1 %v4498_v58  ;;  %4301 = vmatprep.subr.bf16.mxu0 %v4300_v59  ;;  %v3651_v58 = vld [vmem:[%s9169_s1 + $0x1548] sm:$0xff]  ;;  %v4518_v0 = vpack.c.bf16 %v3648_v57, %v3644_v55  ;;  %v3693_v57 = vld [vmem:[%s9169_s1 + $0x1698] sm:$0xff] }
  0x80   : > { %4501 = vmatprep.subr.bf16.mxu1 %v4500_v63  ;;  %v3655_v59 = vld [vmem:[%s9169_s1 + $0x1568] sm:$0xff]  ;;  %v4318_v63 = vpack.c.bf16 %v3646_v54, %v3642_v53  ;;  %v4536_v53 = vpack.c.bf16 %v3689_v46, %v3685_v45  ;;  %v3688_v54 = vld [vmem:[%s9169_s1 + $0x1670] sm:$0xff]  ;;  %v3729_v42 = vld [vmem:[%s9169_s1 + $0x17b8] sm:$0xff]  ;;  %v4356_v45 = vpack.c.bf16 %v3727_v40, %v3723_v39 }
  0x81   : > { %v4320_v1 = vpack.c.bf16 %v3655_v59, %v3651_v58  ;;  %v3691_v55 = vld [vmem:[%s9169_s1 + $0x1688] sm:$0xff]  ;;  %v3697_v58 = vld [vmem:[%s9169_s1 + $0x16b8] sm:$0xff]  ;;  %v3722_v46 = vld [vmem:[%s9169_s1 + $0x1780] sm:$0xff] }
  0x82   : > { %4303 = vmatpush1.bf16.msra.mxu0 %v4302_v5  ;;  %v4520_v5 = vpack.c.bf16 %v3657_v62, %v3653_v61  ;;  %v3690_v62 = vld [vmem:[%s9169_s1 + $0x1680] sm:$0xff]  ;;  %v3763_v39 = vld [vmem:[%s9169_s1 + $0x18c8] sm:$0xff] }
  0x83   : > { %4503 = vmatpush1.bf16.msra.mxu1 %v4502_v8  ;;  %4305 = vmatprep.subr.bf16.mxu0 %v4304_v9  ;;  %v3663_v8 = vld [vmem:[%s9169_s1 + $0x15a8] sm:$0xff]  ;;  %v3661_v9 = vld [vmem:[%s9169_s1 + $0x1598] sm:$0xff] }
  0x84   : > { %4505 = vmatprep.subr.bf16.mxu1 %v4504_v13  ;;  %v4324_v13 = vpack.c.bf16 %v3663_v8, %v3659_v7  ;;  %v4524_v17 = vpack.c.bf16 %v3665_v10, %v3661_v9  ;;  %v4344_v9 = vpack.c.bf16 %v3703_v4, %v3699_v3  ;;  %v3698_v10 = vld [vmem:[%s9169_s1 + $0x16c0] sm:$0xff]  ;;  %v3767_v40 = vld [vmem:[%s9169_s1 + $0x18e8] sm:$0xff] }
  0x86   : > { %4307 = vmatpush1.bf16.msra.mxu0 %v4306_v19  ;;  %v3667_v19 = vld [vmem:[%s9169_s1 + $0x15c8] sm:$0xff] }
  0x87   : > { %4507 = vmatpush1.bf16.msra.mxu1 %v4506_v22  ;;  %4309 = vmatprep.subr.bf16.mxu0 %v4308_v23  ;;  %v3673_v22 = vld [vmem:[%s9169_s1 + $0x15f8] sm:$0xff]  ;;  %v4326_v23 = vpack.c.bf16 %v3662_v15, %v3658_v14  ;;  %v4328_v25 = vpack.c.bf16 %v3671_v20, %v3667_v19  ;;  %v3704_v14 = vld [vmem:[%s9169_s1 + $0x16f0] sm:$0xff]  ;;  %v3707_v15 = vld [vmem:[%s9169_s1 + $0x1708] sm:$0xff] }
  0x88   : > { %4509 = vmatprep.subr.bf16.mxu1 %v4508_v27  ;;  %v3670_v27 = vld [vmem:[%s9169_s1 + $0x15e0] sm:$0xff]  ;;  %v4528_v29 = vpack.c.bf16 %v3673_v22, %v3669_v21  ;;  %v4348_v21 = vpack.c.bf16 %v3711_v16, %v3707_v15 }
  0x89   : > { %1221 = vmatmul.mubr.f32.vlgmr.msra.gmra.mrb[0].mxu0 %v1063_v33  ;;  %v4330_v35 = vpack.c.bf16 %v3670_v27, %v3666_v26  ;;  %v3706_v22 = vld [vmem:[%s9169_s1 + $0x1700] sm:$0xff]  ;;  %v3712_v26 = vld [vmem:[%s9169_s1 + $0x1730] sm:$0xff]  ;;  %v3715_v27 = vld [vmem:[%s9169_s1 + $0x1748] sm:$0xff] }
  0x8a   : > { %4311 = vmatpush1.bf16.msra.mxu0 %v4310_v34  ;;  %1505 = vmatmul.mubr.f32.vlgmr.msra.gmra.mrb[0].mxu1 %v1063_v33  ;;  %v3677_v33 = vld [vmem:[%s9169_s1 + $0x1618] sm:$0xff]  ;;  %v3746_v16 = vld [vmem:[%s9169_s1 + $0x1840] sm:$0xff] }
  0x8b   : > { %4511 = vmatpush1.bf16.msra.mxu1 %v4510_v36  ;;  %4313 = vmatprep.subr.bf16.mxu0 %v4312_v37  ;;  %v3681_v34 = vld [vmem:[%s9169_s1 + $0x1638] sm:$0xff]  ;;  %v4530_v36 = vpack.c.bf16 %v3672_v30, %v3668_v28  ;;  %v4332_v37 = vpack.c.bf16 %v3679_v32, %v3675_v31  ;;  %v3719_v28 = vld [vmem:[%s9169_s1 + $0x1768] sm:$0xff] }
  0x8c   : > { %4513 = vmatprep.subr.bf16.mxu1 %v4512_v41  ;;  %1291 = vmatprep.mubr.f32.mxu0 %v1072_v60  ;;  %v4532_v41 = vpack.c.bf16 %v3681_v34, %v3677_v33  ;;  %v3721_v30 = vld [vmem:[%s9169_s1 + $0x1778] sm:$0xff]  ;;  %v4352_v33 = vpack.c.bf16 %v3719_v28, %v3715_v27  ;;  %v3714_v34 = vld [vmem:[%s9169_s1 + $0x1740] sm:$0xff] }
  0x8d   : > { %1575 = vmatprep.mubr.f32.mxu1 %v1072_v60  ;;  %v3757_v27 = vld [vmem:[%s9169_s1 + $0x1898] sm:$0xff] }
  0x8e   : > { %4315 = vmatpush1.bf16.msra.mxu0 %v4314_v49  ;;  %v4336_v49 = vpack.c.bf16 %v3687_v44, %v3683_v43  ;;  %v3761_v28 = vld [vmem:[%s9169_s1 + $0x18b8] sm:$0xff] }
  0x8f   : > { %4515 = vmatpush1.bf16.msra.mxu1 %v4514_v51  ;;  %4317 = vmatprep.subr.bf16.mxu0 %v4316_v52  ;;  %v3686_v51 = vld [vmem:[%s9169_s1 + $0x1660] sm:$0xff]  ;;  %v3684_v52 = vld [vmem:[%s9169_s1 + $0x1650] sm:$0xff] }
  0x90   : > { %4517 = vmatprep.subr.bf16.mxu1 %v4516_v56  ;;  %v3695_v56 = vld [vmem:[%s9169_s1 + $0x16a8] sm:$0xff]  ;;  %v4338_v59 = vpack.c.bf16 %v3686_v51, %v3682_v50  ;;  %v4538_v60 = vpack.c.bf16 %v3688_v54, %v3684_v52  ;;  %v3728_v50 = vld [vmem:[%s9169_s1 + $0x17b0] sm:$0xff]  ;;  %v3737_v54 = vld [vmem:[%s9169_s1 + $0x17f8] sm:$0xff] }
  0x91   : > { %v4340_v61 = vpack.c.bf16 %v3695_v56, %v3691_v55  ;;  %v3731_v51 = vld [vmem:[%s9169_s1 + $0x17c8] sm:$0xff] }
  0x92   : > { %4319 = vmatpush1.bf16.msra.mxu0 %v4318_v63  ;;  %v3694_v63 = vld [vmem:[%s9169_s1 + $0x16a0] sm:$0xff]  ;;  %v3735_v52 = vld [vmem:[%s9169_s1 + $0x17e8] sm:$0xff] }
  0x93   : > { %4519 = vmatpush1.bf16.msra.mxu1 %v4518_v0  ;;  %4321 = vmatprep.subr.bf16.mxu0 %v4320_v1  ;;  %v3692_v0 = vld [vmem:[%s9169_s1 + $0x1690] sm:$0xff]  ;;  %v4540_v1 = vpack.c.bf16 %v3697_v58, %v3693_v57  ;;  %v4342_v7 = vpack.c.bf16 %v3694_v63, %v3690_v62  ;;  %v4360_v57 = vpack.c.bf16 %v3735_v52, %v3731_v51  ;;  %v3730_v58 = vld [vmem:[%s9169_s1 + $0x17c0] sm:$0xff]  ;;  %v3739_v63 = vld [vmem:[%s9169_s1 + $0x1808] sm:$0xff] }
  0x94   : > { %4521 = vmatprep.subr.bf16.mxu1 %v4520_v5  ;;  %v3701_v5 = vld [vmem:[%s9169_s1 + $0x16d8] sm:$0xff]  ;;  %v4542_v8 = vpack.c.bf16 %v3696_v2, %v3692_v0  ;;  %v3736_v62 = vld [vmem:[%s9169_s1 + $0x17f0] sm:$0xff]  ;;  %v3743_v0 = vld [vmem:[%s9169_s1 + $0x1828] sm:$0xff] }
  0x95   : > { %v3745_v2 = vld [vmem:[%s9169_s1 + $0x1838] sm:$0xff]  ;;  %v638_v51 = vld [vmem:[%s5768_s11 + $0x68] sm:$0x1] }
  0x96   : > { %4323 = vmatpush1.bf16.msra.mxu0 %v4322_v11  ;;  %v3702_v11 = vld [vmem:[%s9169_s1 + $0x16e0] sm:$0xff] }
  0x97   : > { %4523 = vmatpush1.bf16.msra.mxu1 %v4522_v12  ;;  %4325 = vmatprep.subr.bf16.mxu0 %v4324_v13  ;;  %v3700_v12 = vld [vmem:[%s9169_s1 + $0x16d0] sm:$0xff]  ;;  %v4544_v13 = vpack.c.bf16 %v3705_v6, %v3701_v5  ;;  %v4346_v19 = vpack.c.bf16 %v3702_v11, %v3698_v10  ;;  %v4364_v5 = vpack.c.bf16 %v3743_v0, %v3739_v63  ;;  %v3738_v6 = vld [vmem:[%s9169_s1 + $0x1800] sm:$0xff]  ;;  %v3747_v11 = vld [vmem:[%s9169_s1 + $0x1848] sm:$0xff] }
  0x98   : > { %4525 = vmatprep.subr.bf16.mxu1 %v4524_v17  ;;  %v3709_v17 = vld [vmem:[%s9169_s1 + $0x1718] sm:$0xff]  ;;  %v4546_v20 = vpack.c.bf16 %v3704_v14, %v3700_v12  ;;  %v3744_v10 = vld [vmem:[%s9169_s1 + $0x1830] sm:$0xff]  ;;  %v3751_v12 = vld [vmem:[%s9169_s1 + $0x1868] sm:$0xff] }
  0x99   : > { %v3753_v14 = vld [vmem:[%s9169_s1 + $0x1878] sm:$0xff]  ;;  %v225_v63 = vld [vmem:[%s9169_s1] sm:$0xff] }
  0x9a   : > { %4327 = vmatpush1.bf16.msra.mxu0 %v4326_v23  ;;  %v3710_v23 = vld [vmem:[%s9169_s1 + $0x1720] sm:$0xff] }
  0x9b   : > { %4527 = vmatpush1.bf16.msra.mxu1 %v4526_v24  ;;  %4329 = vmatprep.subr.bf16.mxu0 %v4328_v25  ;;  %v3708_v24 = vld [vmem:[%s9169_s1 + $0x1710] sm:$0xff]  ;;  %v4548_v25 = vpack.c.bf16 %v3713_v18, %v3709_v17  ;;  %v4350_v31 = vpack.c.bf16 %v3710_v23, %v3706_v22  ;;  %v3750_v17 = vld [vmem:[%s9169_s1 + $0x1860] sm:$0xff]  ;;  %v636_v22 = vld [vmem:[%s5768_s11 + $0x58] sm:$0x1] }
  0x9c   : > { %4529 = vmatprep.subr.bf16.mxu1 %v4528_v29  ;;  %v3717_v29 = vld [vmem:[%s9169_s1 + $0x1758] sm:$0xff]  ;;  %v4550_v32 = vpack.c.bf16 %v3712_v26, %v3708_v24  ;;  %v3752_v24 = vld [vmem:[%s9169_s1 + $0x1870] sm:$0xff]  ;;  %v3759_v26 = vld [vmem:[%s9169_s1 + $0x18a8] sm:$0xff] }
  0x9d   : > { %v229_v0 = vld [vmem:[%s9169_s1 + $0x20] sm:$0xff] }
  0x9e   : > { %4331 = vmatpush1.bf16.msra.mxu0 %v4330_v35  ;;  %v3718_v35 = vld [vmem:[%s9169_s1 + $0x1760] sm:$0xff] }
  0x9f   : > { %4531 = vmatpush1.bf16.msra.mxu1 %v4530_v36  ;;  %4333 = vmatprep.subr.bf16.mxu0 %v4332_v37  ;;  %v3716_v36 = vld [vmem:[%s9169_s1 + $0x1750] sm:$0xff]  ;;  %v4552_v37 = vpack.c.bf16 %v3721_v30, %v3717_v29  ;;  %v4354_v43 = vpack.c.bf16 %v3718_v35, %v3714_v34  ;;  %v4370_v29 = vpack.c.bf16 %v3750_v17, %v3746_v16  ;;  %v3754_v34 = vld [vmem:[%s9169_s1 + $0x1880] sm:$0xff] }
  0xa0   : > { %4533 = vmatprep.subr.bf16.mxu1 %v4532_v41  ;;  %v3725_v41 = vld [vmem:[%s9169_s1 + $0x1798] sm:$0xff]  ;;  %v4554_v44 = vpack.c.bf16 %v3720_v38, %v3716_v36  ;;  %v3758_v35 = vld [vmem:[%s9169_s1 + $0x18a0] sm:$0xff]  ;;  %v3756_v36 = vld [vmem:[%s9169_s1 + $0x1890] sm:$0xff] }
  0xa1   : > { %v3760_v38 = vld [vmem:[%s9169_s1 + $0x18b0] sm:$0xff] }
  0xa2   : > { %4335 = vmatpush1.bf16.msra.mxu0 %v4334_v47  ;;  %v3726_v47 = vld [vmem:[%s9169_s1 + $0x17a0] sm:$0xff]  ;;  %v239_v17 = vld [vmem:[%s9169_s1 + $0x70] sm:$0xff] }
  0xa3   : > { %4535 = vmatpush1.bf16.msra.mxu1 %v4534_v48  ;;  %4337 = vmatprep.subr.bf16.mxu0 %v4336_v49  ;;  %v3724_v48 = vld [vmem:[%s9169_s1 + $0x1790] sm:$0xff]  ;;  %v4556_v49 = vpack.c.bf16 %v3729_v42, %v3725_v41  ;;  %v4358_v55 = vpack.c.bf16 %v3726_v47, %v3722_v46  ;;  %v3765_v41 = vld [vmem:[%s9169_s1 + $0x18d8] sm:$0xff]  ;;  %v3766_v46 = vld [vmem:[%s9169_s1 + $0x18e0] sm:$0xff]  ;;  %v4574_v47 = vpack.c.bf16 %v3760_v38, %v3756_v36 }
  0xa4   : > { %4537 = vmatprep.subr.bf16.mxu1 %v4536_v53  ;;  %v3733_v53 = vld [vmem:[%s9169_s1 + $0x17d8] sm:$0xff]  ;;  %v4558_v56 = vpack.c.bf16 %v3728_v50, %v3724_v48  ;;  %v4376_v48 = vpack.c.bf16 %v3767_v40, %v3763_v39  ;;  %v631_v50 = vld [vmem:[%s5768_s11 + $0x30] sm:$0xfe]  ;;  %v249_v38 = vld [vmem:[%s9169_s1 + $0xc0] sm:$0xff] }
  0xa5   : > { %v3769_v42 = vld [vmem:[%s9169_s1 + $0x18f8] sm:$0xff]  ;;  %v253_v39 = vld [vmem:[%s9169_s1 + $0xe0] sm:$0xff]  ;;  %v251_v40 = vld [vmem:[%s9169_s1 + $0xd0] sm:$0xff] }
  0xa6   : > { %4339 = vmatpush1.bf16.msra.mxu0 %v4338_v59  ;;  %v3734_v59 = vld [vmem:[%s9169_s1 + $0x17e0] sm:$0xff]  ;;  %v4576_v52 = vpack.c.bf16 %v3769_v42, %v3765_v41  ;;  %v255_v42 = vld [vmem:[%s9169_s1 + $0xf0] sm:$0xff] }
  0xa7   : > { %4539 = vmatpush1.bf16.msra.mxu1 %v4538_v60  ;;  %4341 = vmatprep.subr.bf16.mxu0 %v4340_v61  ;;  %v3732_v60 = vld [vmem:[%s9169_s1 + $0x17d0] sm:$0xff]  ;;  %v4560_v61 = vpack.c.bf16 %v3737_v54, %v3733_v53  ;;  %v4362_v3 = vpack.c.bf16 %v3734_v59, %v3730_v58  ;;  %v226_v54 = vld [vmem:[%s9169_s1 + $0x8] sm:$0xff]  ;;  %v1073_v59 = vrot.slane %v631_v50, 1  ;;  %v257_v50 = vld [vmem:[%s9169_s1 + $0x100] sm:$0xff] }
  0xa8   : > { %4541 = vmatprep.subr.bf16.mxu1 %v4540_v1  ;;  %v3741_v1 = vld [vmem:[%s9169_s1 + $0x1818] sm:$0xff]  ;;  %v4562_v4 = vpack.c.bf16 %v3736_v62, %v3732_v60  ;;  %v3768_v53 = vld [vmem:[%s9169_s1 + $0x18f0] sm:$0xff]  ;;  %v1074_v60 = vrot.slane %v638_v51, 1  ;;  %v261_v51 = vld [vmem:[%s9169_s1 + $0x120] sm:$0xff] }
  0xaa   : > { %4343 = vmatpush1.bf16.msra.mxu0 %v4342_v7  ;;  %v3742_v7 = vld [vmem:[%s9169_s1 + $0x1820] sm:$0xff] }
  0xab   : > { %4543 = vmatpush1.bf16.msra.mxu1 %v4542_v8  ;;  %4345 = vmatprep.subr.bf16.mxu0 %v4344_v9  ;;  %v3740_v8 = vld [vmem:[%s9169_s1 + $0x1810] sm:$0xff]  ;;  %v4564_v9 = vpack.c.bf16 %v3745_v2, %v3741_v1  ;;  %v4366_v15 = vpack.c.bf16 %v3742_v7, %v3738_v6  ;;  %v5442_v2 = vmov 0.0   ;;  %v238_v6 = vld [vmem:[%s9169_s1 + $0x68] sm:$0xff]  ;;  %v236_v7 = vld [vmem:[%s9169_s1 + $0x58] sm:$0xff] }
  0xac   : > { %4545 = vmatprep.subr.bf16.mxu1 %v4544_v13  ;;  %v3749_v13 = vld [vmem:[%s9169_s1 + $0x1858] sm:$0xff]  ;;  %v4566_v18 = vpack.c.bf16 %v3744_v10, %v3740_v8  ;;  %v227_v1 = vld [vmem:[%s9169_s1 + $0x10] sm:$0xff]  ;;  %v4582_v10 = vpack.c.bf16 %v229_v0, %v225_v63  ;;  %v269_v63 = vld [vmem:[%s9169_s1 + $0x160] sm:$0xff] }
  0xad   : > { %v4568_v23 = vpack.c.bf16 %v3753_v14, %v3749_v13  ;;  %v240_v8 = vld [vmem:[%s9169_s1 + $0x78] sm:$0xff]  ;;  %v233_v13 = vld [vmem:[%s9169_s1 + $0x40] sm:$0xff]  ;;  %v267_v0 = vld [vmem:[%s9169_s1 + $0x150] sm:$0xff] }
  0xae   : > { %4347 = vmatpush1.bf16.msra.mxu0 %v4346_v19  ;;  %v4368_v19 = vpack.c.bf16 %v3751_v12, %v3747_v11  ;;  %v237_v14 = vld [vmem:[%s9169_s1 + $0x60] sm:$0xff]  ;;  %v4784_v16 = vpack.c.bf16 %v240_v8, %v236_v7  ;;  %v280_v7 = vld [vmem:[%s9169_s1 + $0x1b8] sm:$0xff] }
  0xaf   : > { %4547 = vmatpush1.bf16.msra.mxu1 %v4546_v20  ;;  %4349 = vmatprep.subr.bf16.mxu0 %v4348_v21  ;;  %v3748_v20 = vld [vmem:[%s9169_s1 + $0x1850] sm:$0xff]  ;;  %v629_v21 = vld [vmem:[%s5768_s11 + $0x20] sm:$0xfe] }
  0xb0   : > { %4549 = vmatprep.subr.bf16.mxu1 %v4548_v25  ;;  %v3755_v25 = vld [vmem:[%s9169_s1 + $0x1888] sm:$0xff]  ;;  %v1067_v30 = vrot.slane %v629_v21, 1  ;;  %v248_v21 = vld [vmem:[%s9169_s1 + $0xb8] sm:$0xff] }
  0xb2   : > { %4351 = vmatpush1.bf16.msra.mxu0 %v4350_v31  ;;  %v1068_v31 = vrot.slane %v636_v22, 1  ;;  %v219_v22 = vld [vmem:[%s5768_s11 + $0x8] sm:$0xff] }
  0xb3   : > { %4551 = vmatpush1.bf16.msra.mxu1 %v4550_v32  ;;  %4353 = vmatprep.subr.bf16.mxu0 %v4352_v33  ;;  %v4570_v32 = vpack.c.bf16 %v3752_v24, %v3748_v20  ;;  %v4372_v33 = vpack.c.bf16 %v3759_v26, %v3755_v25  ;;  %v244_v20 = vld [vmem:[%s9169_s1 + $0x98] sm:$0xff]  ;;  %v241_v26 = vld [vmem:[%s9169_s1 + $0x80] sm:$0xff] }
  0xb4   : > { %4553 = vmatprep.subr.bf16.mxu1 %v4552_v37  ;;  %v4572_v37 = vpack.c.bf16 %v3761_v28, %v3757_v27  ;;  %v245_v27 = vld [vmem:[%s9169_s1 + $0xa0] sm:$0xff]  ;;  %v243_v28 = vld [vmem:[%s9169_s1 + $0x90] sm:$0xff] }
  0xb6   : > { %4355 = vmatpush1.bf16.msra.mxu0 %v4354_v43  ;;  %v1069_v43 = vsel %vm1054_vm0, %v1067_v30, %v1068_v31  ;;  %v247_v30 = vld [vmem:[%s9169_s1 + $0xb0] sm:$0xff]  ;;  %v250_v31 = vld [vmem:[%s9169_s1 + $0xc8] sm:$0xff] }
  0xb7   : > { %4555 = vmatpush1.bf16.msra.mxu1 %v4554_v44  ;;  %4357 = vmatprep.subr.bf16.mxu0 %v4356_v45  ;;  %v4374_v44 = vpack.c.bf16 %v3758_v35, %v3754_v34  ;;  %v3762_v45 = vld [vmem:[%s9169_s1 + $0x18c0] sm:$0xff]  ;;  %v256_v34 = vld [vmem:[%s9169_s1 + $0xf8] sm:$0xff]  ;;  %v4590_v35 = vpack.c.bf16 %v245_v27, %v241_v26  ;;  %v4790_v36 = vpack.c.bf16 %v247_v30, %v243_v28  ;;  %v287_v27 = vld [vmem:[%s9169_s1 + $0x1f0] sm:$0xff] }
  0xb8   : > { %4557 = vmatprep.subr.bf16.mxu1 %v4556_v49  ;;  %v3764_v49 = vld [vmem:[%s9169_s1 + $0x18d0] sm:$0xff]  ;;  %v4378_v58 = vpack.c.bf16 %v3766_v46, %v3762_v45  ;;  %v260_v45 = vld [vmem:[%s9169_s1 + $0x118] sm:$0xff]  ;;  %v290_v28 = vld [vmem:[%s9169_s1 + $0x208] sm:$0xff] }
  0xb9   : > { %v264_v46 = vld [vmem:[%s9169_s1 + $0x138] sm:$0xff] }
  0xba   : > { %4359 = vmatpush1.bf16.msra.mxu0 %v4358_v55  ;;  %v230_v55 = vld [vmem:[%s9169_s1 + $0x28] sm:$0xff]  ;;  %v292_v30 = vld [vmem:[%s9169_s1 + $0x218] sm:$0xff] }
  0xbb   : > { %4559 = vmatpush1.bf16.msra.mxu1 %v4558_v56  ;;  %4361 = vmatprep.subr.bf16.mxu0 %v4360_v57  ;;  %v228_v56 = vld [vmem:[%s9169_s1 + $0x18] sm:$0xff]  ;;  %v4580_v62 = vpack.c.bf16 %v230_v55, %v226_v54  ;;  %v263_v54 = vld [vmem:[%s9169_s1 + $0x130] sm:$0xff]  ;;  %v266_v55 = vld [vmem:[%s9169_s1 + $0x148] sm:$0xff] }
  0xbc   : > { %4561 = vmatprep.subr.bf16.mxu1 %v4560_v61  ;;  %v232_v57 = vld [vmem:[%s9169_s1 + $0x38] sm:$0xff]  ;;  %v4578_v61 = vpack.c.bf16 %v3768_v53, %v3764_v49  ;;  %v4796_v53 = vpack.c.bf16 %v264_v46, %v260_v45 }
  0xbe   : > { %4363 = vmatpush1.bf16.msra.mxu0 %v4362_v3  ;;  %v4780_v3 = vpack.c.bf16 %v232_v57, %v228_v56  ;;  %v270_v56 = vld [vmem:[%s9169_s1 + $0x168] sm:$0xff]  ;;  %v268_v57 = vld [vmem:[%s9169_s1 + $0x158] sm:$0xff] }
  0xbf   : > { %4563 = vmatpush1.bf16.msra.mxu1 %v4562_v4  ;;  %4365 = vmatprep.subr.bf16.mxu0 %v4364_v5  ;;  %v231_v4 = vld [vmem:[%s9169_s1 + $0x30] sm:$0xff]  ;;  %v234_v5 = vld [vmem:[%s9169_s1 + $0x48] sm:$0xff] }
  0xc0   : > { %4565 = vmatprep.subr.bf16.mxu1 %v4564_v9  ;;  %v1075_v9 = vsel %vm1054_vm0, %v1073_v59, %v1074_v60  ;;  %v4782_v11 = vpack.c.bf16 %v231_v4, %v227_v1  ;;  %v4584_v12 = vpack.c.bf16 %v238_v6, %v234_v5  ;;  %v4598_v59 = vpack.c.bf16 %v261_v51, %v257_v50  ;;  %v274_v4 = vld [vmem:[%s9169_s1 + $0x188] sm:$0xff]  ;;  %v276_v6 = vld [vmem:[%s9169_s1 + $0x198] sm:$0xff]  ;;  %v303_v51 = vld [vmem:[%s9169_s1 + $0x270] sm:$0xff] }
  0xc1   : > { %v278_v5 = vld [vmem:[%s9169_s1 + $0x1a8] sm:$0xff] }
  0xc2   : > { %4367 = vmatpush1.bf16.msra.mxu0 %v4366_v15  ;;  %v235_v15 = vld [vmem:[%s9169_s1 + $0x50] sm:$0xff] }
  0xc3   : > { %4567 = vmatpush1.bf16.msra.mxu1 %v4566_v18  ;;  %4369 = vmatprep.subr.bf16.mxu0 %v4368_v19  ;;  %v242_v18 = vld [vmem:[%s9169_s1 + $0x88] sm:$0xff]  ;;  %v4786_v24 = vpack.c.bf16 %v239_v17, %v235_v15  ;;  %v279_v15 = vld [vmem:[%s9169_s1 + $0x1b0] sm:$0xff] }
  0xc4   : > { %4569 = vmatprep.subr.bf16.mxu1 %v4568_v23  ;;  %v246_v19 = vld [vmem:[%s9169_s1 + $0xa8] sm:$0xff]  ;;  %v4586_v23 = vpack.c.bf16 %v237_v14, %v233_v13  ;;  %v275_v13 = vld [vmem:[%s9169_s1 + $0x190] sm:$0xff]  ;;  %v4804_v14 = vpack.c.bf16 %v280_v7, %v276_v6 }
  0xc5   : > { %v4588_v25 = vpack.c.bf16 %v246_v19, %v242_v18  ;;  %v286_v17 = vld [vmem:[%s9169_s1 + $0x1e8] sm:$0xff]  ;;  %v284_v18 = vld [vmem:[%s9169_s1 + $0x1d8] sm:$0xff] }
  0xc6   : > { %4371 = vmatpush1.bf16.msra.mxu0 %v4370_v29  ;;  %v4788_v29 = vpack.c.bf16 %v248_v21, %v244_v20  ;;  %v288_v19 = vld [vmem:[%s9169_s1 + $0x1f8] sm:$0xff]  ;;  %v4806_v21 = vpack.c.bf16 %v279_v15, %v275_v13  ;;  %v322_v13 = vld [vmem:[%s9169_s1 + $0x308] sm:$0xff] }
  0xc7   : > { %4571 = vmatpush1.bf16.msra.mxu1 %v4570_v32  ;;  %4373 = vmatprep.subr.bf16.mxu0 %v4372_v33  ;;  %v254_v32 = vld [vmem:[%s9169_s1 + $0xe8] sm:$0xff]  ;;  %v252_v33 = vld [vmem:[%s9169_s1 + $0xd8] sm:$0xff]  ;;  %v4808_v26 = vpack.c.bf16 %v288_v19, %v284_v18 }
  0xc8   : > { %4573 = vmatprep.subr.bf16.mxu1 %v4572_v37  ;;  %v4592_v37 = vpack.c.bf16 %v254_v32, %v250_v31  ;;  %v4792_v41 = vpack.c.bf16 %v256_v34, %v252_v33  ;;  %v296_v31 = vld [vmem:[%s9169_s1 + $0x238] sm:$0xff] }
  0xc9   : > { %1292 = vmatmul.mubr.f32.vlgmr.msra.gmra.mrb[0].mxu0 %v1069_v43  ;;  %v324_v15 = vld [vmem:[%s9169_s1 + $0x318] sm:$0xff] }
  0xca   : > { %4375 = vmatpush1.bf16.msra.mxu0 %v4374_v44  ;;  %1576 = vmatmul.mubr.f32.vlgmr.msra.gmra.mrb[0].mxu1 %v1069_v43  ;;  %v258_v43 = vld [vmem:[%s9169_s1 + $0x108] sm:$0xff] }
  0xcb   : > { %4575 = vmatpush1.bf16.msra.mxu1 %v4574_v47  ;;  %4377 = vmatprep.subr.bf16.mxu0 %v4376_v48  ;;  %v262_v44 = vld [vmem:[%s9169_s1 + $0x128] sm:$0xff]  ;;  %v4594_v47 = vpack.c.bf16 %v253_v39, %v249_v38  ;;  %v4794_v48 = vpack.c.bf16 %v255_v42, %v251_v40  ;;  %v4812_v38 = vpack.c.bf16 %v296_v31, %v292_v30  ;;  %v295_v39 = vld [vmem:[%s9169_s1 + $0x230] sm:$0xff]  ;;  %v300_v42 = vld [vmem:[%s9169_s1 + $0x258] sm:$0xff] }
  0xcc   : > { %4577 = vmatprep.subr.bf16.mxu1 %v4576_v52  ;;  %1362 = vmatprep.mubr.f32.mxu0 %v5442_v2  ;;  %v4596_v49 = vpack.c.bf16 %v262_v44, %v258_v43  ;;  %v259_v52 = vld [vmem:[%s9169_s1 + $0x110] sm:$0xff]  ;;  %v298_v40 = vld [vmem:[%s9169_s1 + $0x248] sm:$0xff]  ;;  %v304_v43 = vld [vmem:[%s9169_s1 + $0x278] sm:$0xff] }
  0xcd   : > { %1646 = vmatprep.mubr.f32.mxu1 %v5442_v2  ;;  %v4798_v60 = vpack.c.bf16 %v263_v54, %v259_v52  ;;  %v4816_v50 = vpack.c.bf16 %v304_v43, %v300_v42  ;;  %v306_v52 = vld [vmem:[%s9169_s1 + $0x288] sm:$0xff]  ;;  %v308_v54 = vld [vmem:[%s9169_s1 + $0x298] sm:$0xff] }
  0xce   : > { %4379 = vmatpush1.bf16.msra.mxu0 %v4378_v58  ;;  %v272_v58 = vld [vmem:[%s9169_s1 + $0x178] sm:$0xff] }
  0xcf   : > { %4579 = vmatpush1.bf16.msra.mxu1 %v4578_v61  ;;  %4581 = vmatprep.subr.bf16.mxu0 %v4580_v62  ;;  %v4600_v61 = vpack.c.bf16 %v270_v56, %v266_v55  ;;  %v265_v62 = vld [vmem:[%s9169_s1 + $0x140] sm:$0xff]  ;;  %v4800_v1 = vpack.c.bf16 %v272_v58, %v268_v57  ;;  %v312_v55 = vld [vmem:[%s9169_s1 + $0x2b8] sm:$0xff] }
  0xd0   : > { %4781 = vmatprep.subr.bf16.mxu1 %v4780_v3  ;;  %v271_v3 = vld [vmem:[%s9169_s1 + $0x170] sm:$0xff]  ;;  %v4602_v8 = vpack.c.bf16 %v269_v63, %v265_v62  ;;  %v4820_v62 = vpack.c.bf16 %v312_v55, %v308_v54 }
  0xd1   : > { %3770 = vmatmul.mubr.msk.f32.vlgmr.msra.gmra.mrb[0].mxu0 %vm1082_vm1, %v1075_v9  ;;  %v311_v63 = vld [vmem:[%s9169_s1 + $0x2b0] sm:$0xff] }
  0xd2   : > { %3771 = vmatmul.mubr.msk.f32.vlgmr.msra.gmra.mrb[0].mxu1 %vm1082_vm1, %v1075_v9  ;;  %4583 = vmatpush1.bf16.msra.mxu0 %v4582_v10  ;;  %v4802_v9 = vpack.c.bf16 %v271_v3, %v267_v0  ;;  %v4604_v10 = vpack.c.bf16 %v278_v5, %v274_v4  ;;  %v314_v0 = vld [vmem:[%s9169_s1 + $0x2c8] sm:$0xff]  ;;  %v316_v3 = vld [vmem:[%s9169_s1 + $0x2d8] sm:$0xff] }
  0xd3   : > { %4783 = vmatpush1.bf16.msra.mxu1 %v4782_v11  ;;  %4585 = vmatprep.subr.bf16.mxu0 %v4584_v12  ;;  %v273_v11 = vld [vmem:[%s9169_s1 + $0x180] sm:$0xff]  ;;  %v320_v4 = vld [vmem:[%s9169_s1 + $0x2f8] sm:$0xff] }
  0xd4   : > { %4785 = vmatprep.subr.bf16.mxu1 %v4784_v16  ;;  %1720 = vmatprep.mubr.f32.mxu0 %v219_v22  ;;  %v277_v12 = vld [vmem:[%s9169_s1 + $0x1a0] sm:$0xff]  ;;  %v282_v16 = vld [vmem:[%s9169_s1 + $0x1c8] sm:$0xff] }
  0xd5   : > { %2004 = vmatprep.mubr.f32.mxu1 %v219_v22  ;;  %v4606_v20 = vpack.c.bf16 %v277_v12, %v273_v11  ;;  %v4608_v22 = vpack.c.bf16 %v286_v17, %v282_v16  ;;  %v4824_v11 = vpack.c.bf16 %v320_v4, %v316_v3  ;;  %v319_v12 = vld [vmem:[%s9169_s1 + $0x2f0] sm:$0xff]  ;;  %v328_v16 = vld [vmem:[%s9169_s1 + $0x338] sm:$0xff] }
  0xd6   : > { %4587 = vmatpush1.bf16.msra.mxu0 %v4586_v23  ;;  %v281_v23 = vld [vmem:[%s9169_s1 + $0x1c0] sm:$0xff] }
  0xd7   : > { %4787 = vmatpush1.bf16.msra.mxu1 %v4786_v24  ;;  %4589 = vmatprep.subr.bf16.mxu0 %v4588_v25  ;;  %v285_v24 = vld [vmem:[%s9169_s1 + $0x1e0] sm:$0xff]  ;;  %v283_v25 = vld [vmem:[%s9169_s1 + $0x1d0] sm:$0xff] }
  0xd8   : > { %4789 = vmatprep.subr.bf16.mxu1 %v4788_v29  ;;  %v294_v29 = vld [vmem:[%s9169_s1 + $0x228] sm:$0xff]  ;;  %v4610_v32 = vpack.c.bf16 %v285_v24, %v281_v23  ;;  %v4810_v33 = vpack.c.bf16 %v287_v27, %v283_v25  ;;  %v4828_v23 = vpack.c.bf16 %v328_v16, %v324_v15  ;;  %v327_v24 = vld [vmem:[%s9169_s1 + $0x330] sm:$0xff]  ;;  %v332_v27 = vld [vmem:[%s9169_s1 + $0x358] sm:$0xff] }
  0xd9   : > { %v4612_v34 = vpack.c.bf16 %v294_v29, %v290_v28  ;;  %v330_v25 = vld [vmem:[%s9169_s1 + $0x348] sm:$0xff]  ;;  %v336_v28 = vld [vmem:[%s9169_s1 + $0x378] sm:$0xff] }
  0xda   : > { %4591 = vmatpush1.bf16.msra.mxu0 %v4590_v35  ;;  %v289_v35 = vld [vmem:[%s9169_s1 + $0x200] sm:$0xff] }
  0xdb   : > { %4791 = vmatpush1.bf16.msra.mxu1 %v4790_v36  ;;  %4593 = vmatprep.subr.bf16.mxu0 %v4592_v37  ;;  %v293_v36 = vld [vmem:[%s9169_s1 + $0x220] sm:$0xff]  ;;  %v291_v37 = vld [vmem:[%s9169_s1 + $0x210] sm:$0xff] }
  0xdc   : > { %4793 = vmatprep.subr.bf16.mxu1 %v4792_v41  ;;  %v302_v41 = vld [vmem:[%s9169_s1 + $0x268] sm:$0xff]  ;;  %v4614_v44 = vpack.c.bf16 %v293_v36, %v289_v35  ;;  %v4814_v45 = vpack.c.bf16 %v295_v39, %v291_v37  ;;  %v4832_v35 = vpack.c.bf16 %v336_v28, %v332_v27  ;;  %v335_v36 = vld [vmem:[%s9169_s1 + $0x370] sm:$0xff]  ;;  %v340_v39 = vld [vmem:[%s9169_s1 + $0x398] sm:$0xff] }
  0xdd   : > { %v4616_v46 = vpack.c.bf16 %v302_v41, %v298_v40  ;;  %v338_v37 = vld [vmem:[%s9169_s1 + $0x388] sm:$0xff]  ;;  %v344_v40 = vld [vmem:[%s9169_s1 + $0x3b8] sm:$0xff] }
  0xde   : > { %4595 = vmatpush1.bf16.msra.mxu0 %v4594_v47  ;;  %v297_v47 = vld [vmem:[%s9169_s1 + $0x240] sm:$0xff]  ;;  %v221_v27 = vld [vmem:[%s5768_s11 + $0x18] sm:$0xff] }
  0xdf   : > { %4795 = vmatpush1.bf16.msra.mxu1 %v4794_v48  ;;  %4597 = vmatprep.subr.bf16.mxu0 %v4596_v49  ;;  %v301_v48 = vld [vmem:[%s9169_s1 + $0x260] sm:$0xff]  ;;  %v299_v49 = vld [vmem:[%s9169_s1 + $0x250] sm:$0xff] }
  0xe0   : > { %4797 = vmatprep.subr.bf16.mxu1 %v4796_v53  ;;  %v310_v53 = vld [vmem:[%s9169_s1 + $0x2a8] sm:$0xff]  ;;  %v4618_v56 = vpack.c.bf16 %v301_v48, %v297_v47  ;;  %v4818_v57 = vpack.c.bf16 %v303_v51, %v299_v49  ;;  %v4836_v47 = vpack.c.bf16 %v344_v40, %v340_v39  ;;  %v343_v48 = vld [vmem:[%s9169_s1 + $0x3b0] sm:$0xff]  ;;  %v348_v51 = vld [vmem:[%s9169_s1 + $0x3d8] sm:$0xff] }
  0xe1   : > { %v4620_v58 = vpack.c.bf16 %v310_v53, %v306_v52  ;;  %v346_v49 = vld [vmem:[%s9169_s1 + $0x3c8] sm:$0xff]  ;;  %v352_v52 = vld [vmem:[%s9169_s1 + $0x3f8] sm:$0xff] }
  0xe2   : > { %4599 = vmatpush1.bf16.msra.mxu0 %v4598_v59  ;;  %v305_v59 = vld [vmem:[%s9169_s1 + $0x280] sm:$0xff]  ;;  %v384_v39 = vld [vmem:[%s9169_s1 + $0x4f8] sm:$0xff] }
  0xe3   : > { %4799 = vmatpush1.bf16.msra.mxu1 %v4798_v60  ;;  %4601 = vmatprep.subr.bf16.mxu0 %v4600_v61  ;;  %v309_v60 = vld [vmem:[%s9169_s1 + $0x2a0] sm:$0xff]  ;;  %v307_v61 = vld [vmem:[%s9169_s1 + $0x290] sm:$0xff] }
  0xe4   : > { %4801 = vmatprep.subr.bf16.mxu1 %v4800_v1  ;;  %v318_v1 = vld [vmem:[%s9169_s1 + $0x2e8] sm:$0xff]  ;;  %v4622_v5 = vpack.c.bf16 %v309_v60, %v305_v59  ;;  %v4822_v6 = vpack.c.bf16 %v311_v63, %v307_v61  ;;  %v4840_v59 = vpack.c.bf16 %v352_v52, %v348_v51  ;;  %v351_v60 = vld [vmem:[%s9169_s1 + $0x3f0] sm:$0xff]  ;;  %v356_v63 = vld [vmem:[%s9169_s1 + $0x418] sm:$0xff] }
  0xe5   : > { %v4624_v7 = vpack.c.bf16 %v318_v1, %v314_v0  ;;  %v354_v61 = vld [vmem:[%s9169_s1 + $0x408] sm:$0xff]  ;;  %v360_v0 = vld [vmem:[%s9169_s1 + $0x438] sm:$0xff] }
  0xe6   : > { %4603 = vmatpush1.bf16.msra.mxu0 %v4602_v8  ;;  %v313_v8 = vld [vmem:[%s9169_s1 + $0x2c0] sm:$0xff]  ;;  %v392_v51 = vld [vmem:[%s9169_s1 + $0x538] sm:$0xff] }
  0xe7   : > { %4803 = vmatpush1.bf16.msra.mxu1 %v4802_v9  ;;  %4605 = vmatprep.subr.bf16.mxu0 %v4604_v10  ;;  %v317_v9 = vld [vmem:[%s9169_s1 + $0x2e0] sm:$0xff]  ;;  %v315_v10 = vld [vmem:[%s9169_s1 + $0x2d0] sm:$0xff] }
  0xe8   : > { %4805 = vmatprep.subr.bf16.mxu1 %v4804_v14  ;;  %v326_v14 = vld [vmem:[%s9169_s1 + $0x328] sm:$0xff]  ;;  %v4626_v17 = vpack.c.bf16 %v317_v9, %v313_v8  ;;  %v4826_v18 = vpack.c.bf16 %v319_v12, %v315_v10  ;;  %v4844_v8 = vpack.c.bf16 %v360_v0, %v356_v63  ;;  %v359_v9 = vld [vmem:[%s9169_s1 + $0x430] sm:$0xff]  ;;  %v364_v12 = vld [vmem:[%s9169_s1 + $0x458] sm:$0xff] }
  0xe9   : > { %v4628_v19 = vpack.c.bf16 %v326_v14, %v322_v13  ;;  %v362_v10 = vld [vmem:[%s9169_s1 + $0x448] sm:$0xff]  ;;  %v368_v13 = vld [vmem:[%s9169_s1 + $0x478] sm:$0xff]  ;;  %v218_v14 = vld [vmem:[%s5768_s11] sm:$0xff] }
  0xea   : > { %4607 = vmatpush1.bf16.msra.mxu0 %v4606_v20  ;;  %v321_v20 = vld [vmem:[%s9169_s1 + $0x300] sm:$0xff]  ;;  %v400_v63 = vld [vmem:[%s9169_s1 + $0x578] sm:$0xff] }
  0xeb   : > { %4807 = vmatpush1.bf16.msra.mxu1 %v4806_v21  ;;  %4609 = vmatprep.subr.bf16.mxu0 %v4608_v22  ;;  %v325_v21 = vld [vmem:[%s9169_s1 + $0x320] sm:$0xff]  ;;  %v323_v22 = vld [vmem:[%s9169_s1 + $0x310] sm:$0xff] }
  0xec   : > { %4809 = vmatprep.subr.bf16.mxu1 %v4808_v26  ;;  %v334_v26 = vld [vmem:[%s9169_s1 + $0x368] sm:$0xff]  ;;  %v4630_v29 = vpack.c.bf16 %v325_v21, %v321_v20  ;;  %v4830_v30 = vpack.c.bf16 %v327_v24, %v323_v22  ;;  %v363_v20 = vld [vmem:[%s9169_s1 + $0x450] sm:$0xff]  ;;  %v4848_v21 = vpack.c.bf16 %v368_v13, %v364_v12  ;;  %v408_v12 = vld [vmem:[%s9169_s1 + $0x5b8] sm:$0xff] }
  0xed   : > { %v4632_v31 = vpack.c.bf16 %v334_v26, %v330_v25  ;;  %v367_v22 = vld [vmem:[%s9169_s1 + $0x470] sm:$0xff]  ;;  %v374_v24 = vld [vmem:[%s9169_s1 + $0x4a8] sm:$0xff]  ;;  %v372_v25 = vld [vmem:[%s9169_s1 + $0x498] sm:$0xff] }
  0xee   : > { %4611 = vmatpush1.bf16.msra.mxu0 %v4610_v32  ;;  %v329_v32 = vld [vmem:[%s9169_s1 + $0x340] sm:$0xff]  ;;  %v376_v26 = vld [vmem:[%s9169_s1 + $0x4b8] sm:$0xff] }
  0xef   : > { %4811 = vmatpush1.bf16.msra.mxu1 %v4810_v33  ;;  %4613 = vmatprep.subr.bf16.mxu0 %v4612_v34  ;;  %v333_v33 = vld [vmem:[%s9169_s1 + $0x360] sm:$0xff]  ;;  %v331_v34 = vld [vmem:[%s9169_s1 + $0x350] sm:$0xff] }
  0xf0   : > { %4813 = vmatprep.subr.bf16.mxu1 %v4812_v38  ;;  %v342_v38 = vld [vmem:[%s9169_s1 + $0x3a8] sm:$0xff]  ;;  %v4634_v41 = vpack.c.bf16 %v333_v33, %v329_v32  ;;  %v4834_v42 = vpack.c.bf16 %v335_v36, %v331_v34  ;;  %v373_v32 = vld [vmem:[%s9169_s1 + $0x4a0] sm:$0xff]  ;;  %v371_v33 = vld [vmem:[%s9169_s1 + $0x490] sm:$0xff]  ;;  %v4852_v34 = vpack.c.bf16 %v376_v26, %v372_v25 }
  0xf1   : > { %v4636_v43 = vpack.c.bf16 %v342_v38, %v338_v37  ;;  %v378_v36 = vld [vmem:[%s9169_s1 + $0x4c8] sm:$0xff]  ;;  %v380_v38 = vld [vmem:[%s9169_s1 + $0x4d8] sm:$0xff] }
  0xf2   : > { %4615 = vmatpush1.bf16.msra.mxu0 %v4614_v44  ;;  %v337_v44 = vld [vmem:[%s9169_s1 + $0x380] sm:$0xff]  ;;  %v382_v37 = vld [vmem:[%s9169_s1 + $0x4e8] sm:$0xff] }
  0xf3   : > { %4815 = vmatpush1.bf16.msra.mxu1 %v4814_v45  ;;  %4617 = vmatprep.subr.bf16.mxu0 %v4616_v46  ;;  %v341_v45 = vld [vmem:[%s9169_s1 + $0x3a0] sm:$0xff]  ;;  %v339_v46 = vld [vmem:[%s9169_s1 + $0x390] sm:$0xff] }
  0xf4   : > { %4817 = vmatprep.subr.bf16.mxu1 %v4816_v50  ;;  %v350_v50 = vld [vmem:[%s9169_s1 + $0x3e8] sm:$0xff]  ;;  %v4638_v53 = vpack.c.bf16 %v341_v45, %v337_v44  ;;  %v4838_v54 = vpack.c.bf16 %v343_v48, %v339_v46  ;;  %v381_v44 = vld [vmem:[%s9169_s1 + $0x4e0] sm:$0xff]  ;;  %v379_v45 = vld [vmem:[%s9169_s1 + $0x4d0] sm:$0xff]  ;;  %v4856_v46 = vpack.c.bf16 %v384_v39, %v380_v38 }
  0xf5   : > { %v4640_v55 = vpack.c.bf16 %v350_v50, %v346_v49  ;;  %v386_v48 = vld [vmem:[%s9169_s1 + $0x508] sm:$0xff]  ;;  %v388_v50 = vld [vmem:[%s9169_s1 + $0x518] sm:$0xff] }
  0xf6   : > { %4619 = vmatpush1.bf16.msra.mxu0 %v4618_v56  ;;  %v345_v56 = vld [vmem:[%s9169_s1 + $0x3c0] sm:$0xff]  ;;  %v390_v49 = vld [vmem:[%s9169_s1 + $0x528] sm:$0xff] }
  0xf7   : > { %4819 = vmatpush1.bf16.msra.mxu1 %v4818_v57  ;;  %4621 = vmatprep.subr.bf16.mxu0 %v4620_v58  ;;  %v349_v57 = vld [vmem:[%s9169_s1 + $0x3e0] sm:$0xff]  ;;  %v347_v58 = vld [vmem:[%s9169_s1 + $0x3d0] sm:$0xff] }
  0xf8   : > { %4821 = vmatprep.subr.bf16.mxu1 %v4820_v62  ;;  %v358_v62 = vld [vmem:[%s9169_s1 + $0x428] sm:$0xff]  ;;  %v4642_v1 = vpack.c.bf16 %v349_v57, %v345_v56  ;;  %v4842_v3 = vpack.c.bf16 %v351_v60, %v347_v58  ;;  %v389_v56 = vld [vmem:[%s9169_s1 + $0x520] sm:$0xff]  ;;  %v387_v57 = vld [vmem:[%s9169_s1 + $0x510] sm:$0xff]  ;;  %v4860_v58 = vpack.c.bf16 %v392_v51, %v388_v50 }
  0xf9   : > { %v4644_v4 = vpack.c.bf16 %v358_v62, %v354_v61  ;;  %v394_v60 = vld [vmem:[%s9169_s1 + $0x548] sm:$0xff]  ;;  %v396_v62 = vld [vmem:[%s9169_s1 + $0x558] sm:$0xff] }
  0xfa   : > { %4623 = vmatpush1.bf16.msra.mxu0 %v4622_v5  ;;  %v353_v5 = vld [vmem:[%s9169_s1 + $0x400] sm:$0xff]  ;;  %v398_v61 = vld [vmem:[%s9169_s1 + $0x568] sm:$0xff] }
  0xfb   : > { %4823 = vmatpush1.bf16.msra.mxu1 %v4822_v6  ;;  %4625 = vmatprep.subr.bf16.mxu0 %v4624_v7  ;;  %v357_v6 = vld [vmem:[%s9169_s1 + $0x420] sm:$0xff]  ;;  %v355_v7 = vld [vmem:[%s9169_s1 + $0x410] sm:$0xff] }
  0xfc   : > { %4825 = vmatprep.subr.bf16.mxu1 %v4824_v11  ;;  %v366_v11 = vld [vmem:[%s9169_s1 + $0x468] sm:$0xff]  ;;  %v4646_v15 = vpack.c.bf16 %v357_v6, %v353_v5  ;;  %v4846_v16 = vpack.c.bf16 %v359_v9, %v355_v7  ;;  %v397_v5 = vld [vmem:[%s9169_s1 + $0x560] sm:$0xff]  ;;  %v395_v6 = vld [vmem:[%s9169_s1 + $0x550] sm:$0xff]  ;;  %v4864_v7 = vpack.c.bf16 %v400_v63, %v396_v62 }
  0xfd   : > { %v402_v9 = vld [vmem:[%s9169_s1 + $0x588] sm:$0xff] }
  0xfe   : > { %4627 = vmatpush1.bf16.msra.mxu0 %v4626_v17  ;;  %v4648_v17 = vpack.c.bf16 %v366_v11, %v362_v10  ;;  %v406_v10 = vld [vmem:[%s9169_s1 + $0x5a8] sm:$0xff]  ;;  %v404_v11 = vld [vmem:[%s9169_s1 + $0x598] sm:$0xff] }
  0xff   : > { %4827 = vmatpush1.bf16.msra.mxu1 %v4826_v18  ;;  %4629 = vmatprep.subr.bf16.mxu0 %v4628_v19  ;;  %v361_v18 = vld [vmem:[%s9169_s1 + $0x440] sm:$0xff] }
 0x100   : > { %4829 = vmatprep.subr.bf16.mxu1 %v4828_v23  ;;  %v365_v19 = vld [vmem:[%s9169_s1 + $0x460] sm:$0xff]  ;;  %v370_v23 = vld [vmem:[%s9169_s1 + $0x488] sm:$0xff] }
 0x101   : > { %v4650_v28 = vpack.c.bf16 %v365_v19, %v361_v18  ;;  %v403_v18 = vld [vmem:[%s9169_s1 + $0x590] sm:$0xff]  ;;  %v4868_v19 = vpack.c.bf16 %v408_v12, %v404_v11 }
 0x102   : > { %4631 = vmatpush1.bf16.msra.mxu0 %v4630_v29  ;;  %v4850_v29 = vpack.c.bf16 %v367_v22, %v363_v20  ;;  %v407_v20 = vld [vmem:[%s9169_s1 + $0x5b0] sm:$0xff]  ;;  %v414_v22 = vld [vmem:[%s9169_s1 + $0x5e8] sm:$0xff] }
 0x103   : > { %4831 = vmatpush1.bf16.msra.mxu1 %v4830_v30  ;;  %4633 = vmatprep.subr.bf16.mxu0 %v4632_v31  ;;  %v4652_v30 = vpack.c.bf16 %v374_v24, %v370_v23  ;;  %v369_v31 = vld [vmem:[%s9169_s1 + $0x480] sm:$0xff]  ;;  %v412_v23 = vld [vmem:[%s9169_s1 + $0x5d8] sm:$0xff]  ;;  %v4870_v26 = vpack.c.bf16 %v407_v20, %v403_v18  ;;  %v450_v18 = vld [vmem:[%s9169_s1 + $0x708] sm:$0xff] }
 0x104   : > { %4833 = vmatprep.subr.bf16.mxu1 %v4832_v35  ;;  %v375_v35 = vld [vmem:[%s9169_s1 + $0x4b0] sm:$0xff]  ;;  %v4654_v40 = vpack.c.bf16 %v373_v32, %v369_v31  ;;  %v416_v24 = vld [vmem:[%s9169_s1 + $0x5f8] sm:$0xff] }
 0x105   : > { %v4872_v31 = vpack.c.bf16 %v416_v24, %v412_v23  ;;  %v415_v32 = vld [vmem:[%s9169_s1 + $0x5f0] sm:$0xff]  ;;  %v452_v20 = vld [vmem:[%s9169_s1 + $0x718] sm:$0xff] }
 0x106   : > { %4635 = vmatpush1.bf16.msra.mxu0 %v4634_v41  ;;  %v4854_v41 = vpack.c.bf16 %v375_v35, %v371_v33  ;;  %v418_v33 = vld [vmem:[%s9169_s1 + $0x608] sm:$0xff]  ;;  %v420_v35 = vld [vmem:[%s9169_s1 + $0x618] sm:$0xff] }
 0x107   : > { %4835 = vmatpush1.bf16.msra.mxu1 %v4834_v42  ;;  %4637 = vmatprep.subr.bf16.mxu0 %v4636_v43  ;;  %v4656_v42 = vpack.c.bf16 %v382_v37, %v378_v36  ;;  %v377_v43 = vld [vmem:[%s9169_s1 + $0x4c0] sm:$0xff]  ;;  %v424_v36 = vld [vmem:[%s9169_s1 + $0x638] sm:$0xff] }
 0x108   : > { %4837 = vmatprep.subr.bf16.mxu1 %v4836_v47  ;;  %v383_v47 = vld [vmem:[%s9169_s1 + $0x4f0] sm:$0xff]  ;;  %v4658_v52 = vpack.c.bf16 %v381_v44, %v377_v43  ;;  %v4876_v43 = vpack.c.bf16 %v424_v36, %v420_v35 }
 0x109   : > { %v423_v44 = vld [vmem:[%s9169_s1 + $0x630] sm:$0xff] }
 0x10a   : > { %4639 = vmatpush1.bf16.msra.mxu0 %v4638_v53  ;;  %v4858_v53 = vpack.c.bf16 %v383_v47, %v379_v45  ;;  %v426_v45 = vld [vmem:[%s9169_s1 + $0x648] sm:$0xff]  ;;  %v428_v47 = vld [vmem:[%s9169_s1 + $0x658] sm:$0xff] }
 0x10b   : > { %4839 = vmatpush1.bf16.msra.mxu1 %v4838_v54  ;;  %4641 = vmatprep.subr.bf16.mxu0 %v4640_v55  ;;  %v4660_v54 = vpack.c.bf16 %v390_v49, %v386_v48  ;;  %v385_v55 = vld [vmem:[%s9169_s1 + $0x500] sm:$0xff]  ;;  %v432_v48 = vld [vmem:[%s9169_s1 + $0x678] sm:$0xff] }
 0x10c   : > { %4841 = vmatprep.subr.bf16.mxu1 %v4840_v59  ;;  %v391_v59 = vld [vmem:[%s9169_s1 + $0x530] sm:$0xff]  ;;  %v4662_v0 = vpack.c.bf16 %v389_v56, %v385_v55  ;;  %v4880_v55 = vpack.c.bf16 %v432_v48, %v428_v47 }
 0x10d   : > { %v431_v56 = vld [vmem:[%s9169_s1 + $0x670] sm:$0xff] }
 0x10e   : > { %4643 = vmatpush1.bf16.msra.mxu0 %v4642_v1  ;;  %v4862_v1 = vpack.c.bf16 %v391_v59, %v387_v57  ;;  %v434_v57 = vld [vmem:[%s9169_s1 + $0x688] sm:$0xff]  ;;  %v436_v59 = vld [vmem:[%s9169_s1 + $0x698] sm:$0xff] }
 0x10f   : > { %4843 = vmatpush1.bf16.msra.mxu1 %v4842_v3  ;;  %4645 = vmatprep.subr.bf16.mxu0 %v4644_v4  ;;  %v4664_v3 = vpack.c.bf16 %v398_v61, %v394_v60  ;;  %v393_v4 = vld [vmem:[%s9169_s1 + $0x540] sm:$0xff]  ;;  %v440_v60 = vld [vmem:[%s9169_s1 + $0x6b8] sm:$0xff] }
 0x110   : > { %4845 = vmatprep.subr.bf16.mxu1 %v4844_v8  ;;  %v399_v8 = vld [vmem:[%s9169_s1 + $0x570] sm:$0xff]  ;;  %v4666_v13 = vpack.c.bf16 %v397_v5, %v393_v4  ;;  %v4884_v4 = vpack.c.bf16 %v440_v60, %v436_v59 }
 0x111   : > { %1721 = vmatmul.mubr.f32.vlgmr.msra.gmra.mrb[0].mxu0 %v218_v14  ;;  %v439_v5 = vld [vmem:[%s9169_s1 + $0x6b0] sm:$0xff] }
 0x112   : > { %4647 = vmatpush1.bf16.msra.mxu0 %v4646_v15  ;;  %2005 = vmatmul.mubr.f32.vlgmr.msra.gmra.mrb[0].mxu1 %v218_v14  ;;  %v4866_v14 = vpack.c.bf16 %v399_v8, %v395_v6  ;;  %v4668_v15 = vpack.c.bf16 %v406_v10, %v402_v9  ;;  %v442_v6 = vld [vmem:[%s9169_s1 + $0x6c8] sm:$0xff]  ;;  %v444_v8 = vld [vmem:[%s9169_s1 + $0x6d8] sm:$0xff] }
 0x113   : > { %4847 = vmatpush1.bf16.msra.mxu1 %v4846_v16  ;;  %4649 = vmatprep.subr.bf16.mxu0 %v4648_v17  ;;  %v401_v16 = vld [vmem:[%s9169_s1 + $0x580] sm:$0xff]  ;;  %v448_v9 = vld [vmem:[%s9169_s1 + $0x6f8] sm:$0xff] }
 0x114   : > { %4849 = vmatprep.subr.bf16.mxu1 %v4848_v21  ;;  %1791 = vmatprep.mubr.f32.mxu0 %v221_v27  ;;  %v405_v17 = vld [vmem:[%s9169_s1 + $0x5a0] sm:$0xff]  ;;  %v410_v21 = vld [vmem:[%s9169_s1 + $0x5c8] sm:$0xff] }
 0x115   : > { %2075 = vmatprep.mubr.f32.mxu1 %v221_v27  ;;  %v4670_v25 = vpack.c.bf16 %v405_v17, %v401_v16  ;;  %v4672_v27 = vpack.c.bf16 %v414_v22, %v410_v21  ;;  %v4888_v16 = vpack.c.bf16 %v448_v9, %v444_v8  ;;  %v447_v17 = vld [vmem:[%s9169_s1 + $0x6f0] sm:$0xff]  ;;  %v456_v21 = vld [vmem:[%s9169_s1 + $0x738] sm:$0xff] }
 0x116   : > { %4651 = vmatpush1.bf16.msra.mxu0 %v4650_v28  ;;  %v409_v28 = vld [vmem:[%s9169_s1 + $0x5c0] sm:$0xff] }
 0x117   : > { %4851 = vmatpush1.bf16.msra.mxu1 %v4850_v29  ;;  %4653 = vmatprep.subr.bf16.mxu0 %v4652_v30  ;;  %v413_v29 = vld [vmem:[%s9169_s1 + $0x5e0] sm:$0xff]  ;;  %v411_v30 = vld [vmem:[%s9169_s1 + $0x5d0] sm:$0xff] }
 0x118   : > { %4853 = vmatprep.subr.bf16.mxu1 %v4852_v34  ;;  %v422_v34 = vld [vmem:[%s9169_s1 + $0x628] sm:$0xff]  ;;  %v4674_v37 = vpack.c.bf16 %v413_v29, %v409_v28  ;;  %v4874_v38 = vpack.c.bf16 %v415_v32, %v411_v30  ;;  %v4892_v28 = vpack.c.bf16 %v456_v21, %v452_v20  ;;  %v455_v29 = vld [vmem:[%s9169_s1 + $0x730] sm:$0xff]  ;;  %v460_v32 = vld [vmem:[%s9169_s1 + $0x758] sm:$0xff] }
 0x119   : > { %v4676_v39 = vpack.c.bf16 %v422_v34, %v418_v33  ;;  %v458_v30 = vld [vmem:[%s9169_s1 + $0x748] sm:$0xff]  ;;  %v464_v33 = vld [vmem:[%s9169_s1 + $0x778] sm:$0xff] }
 0x11a   : > { %4655 = vmatpush1.bf16.msra.mxu0 %v4654_v40  ;;  %v417_v40 = vld [vmem:[%s9169_s1 + $0x600] sm:$0xff] }
 0x11b   : > { %4855 = vmatpush1.bf16.msra.mxu1 %v4854_v41  ;;  %4657 = vmatprep.subr.bf16.mxu0 %v4656_v42  ;;  %v421_v41 = vld [vmem:[%s9169_s1 + $0x620] sm:$0xff]  ;;  %v419_v42 = vld [vmem:[%s9169_s1 + $0x610] sm:$0xff] }
 0x11c   : > { %4857 = vmatprep.subr.bf16.mxu1 %v4856_v46  ;;  %v430_v46 = vld [vmem:[%s9169_s1 + $0x668] sm:$0xff]  ;;  %v4678_v49 = vpack.c.bf16 %v421_v41, %v417_v40  ;;  %v4878_v50 = vpack.c.bf16 %v423_v44, %v419_v42  ;;  %v4896_v40 = vpack.c.bf16 %v464_v33, %v460_v32  ;;  %v463_v41 = vld [vmem:[%s9169_s1 + $0x770] sm:$0xff]  ;;  %v468_v44 = vld [vmem:[%s9169_s1 + $0x798] sm:$0xff] }
 0x11d   : > { %v4680_v51 = vpack.c.bf16 %v430_v46, %v426_v45  ;;  %v466_v42 = vld [vmem:[%s9169_s1 + $0x788] sm:$0xff]  ;;  %v472_v45 = vld [vmem:[%s9169_s1 + $0x7b8] sm:$0xff] }
 0x11e   : > { %4659 = vmatpush1.bf16.msra.mxu0 %v4658_v52  ;;  %v425_v52 = vld [vmem:[%s9169_s1 + $0x640] sm:$0xff]  ;;  %v223_v32 = vld [vmem:[%s5768_s11 + $0x28] sm:$0xff] }
 0x11f   : > { %4859 = vmatpush1.bf16.msra.mxu1 %v4858_v53  ;;  %4661 = vmatprep.subr.bf16.mxu0 %v4660_v54  ;;  %v429_v53 = vld [vmem:[%s9169_s1 + $0x660] sm:$0xff]  ;;  %v427_v54 = vld [vmem:[%s9169_s1 + $0x650] sm:$0xff] }
 0x120   : > { %4861 = vmatprep.subr.bf16.mxu1 %v4860_v58  ;;  %v438_v58 = vld [vmem:[%s9169_s1 + $0x6a8] sm:$0xff]  ;;  %v4682_v61 = vpack.c.bf16 %v429_v53, %v425_v52  ;;  %v4882_v62 = vpack.c.bf16 %v431_v56, %v427_v54  ;;  %v4900_v52 = vpack.c.bf16 %v472_v45, %v468_v44  ;;  %v471_v53 = vld [vmem:[%s9169_s1 + $0x7b0] sm:$0xff]  ;;  %v476_v56 = vld [vmem:[%s9169_s1 + $0x7d8] sm:$0xff] }
 0x121   : > { %v4684_v63 = vpack.c.bf16 %v438_v58, %v434_v57  ;;  %v474_v54 = vld [vmem:[%s9169_s1 + $0x7c8] sm:$0xff]  ;;  %v480_v57 = vld [vmem:[%s9169_s1 + $0x7f8] sm:$0xff] }
 0x122   : > { %4663 = vmatpush1.bf16.msra.mxu0 %v4662_v0  ;;  %v433_v0 = vld [vmem:[%s9169_s1 + $0x680] sm:$0xff]  ;;  %v512_v44 = vld [vmem:[%s9169_s1 + $0x8f8] sm:$0xff] }
 0x123   : > { %4863 = vmatpush1.bf16.msra.mxu1 %v4862_v1  ;;  %4665 = vmatprep.subr.bf16.mxu0 %v4664_v3  ;;  %v437_v1 = vld [vmem:[%s9169_s1 + $0x6a0] sm:$0xff]  ;;  %v435_v3 = vld [vmem:[%s9169_s1 + $0x690] sm:$0xff] }
 0x124   : > { %4865 = vmatprep.subr.bf16.mxu1 %v4864_v7  ;;  %v446_v7 = vld [vmem:[%s9169_s1 + $0x6e8] sm:$0xff]  ;;  %v4686_v10 = vpack.c.bf16 %v437_v1, %v433_v0  ;;  %v4886_v11 = vpack.c.bf16 %v439_v5, %v435_v3  ;;  %v4904_v0 = vpack.c.bf16 %v480_v57, %v476_v56  ;;  %v479_v1 = vld [vmem:[%s9169_s1 + $0x7f0] sm:$0xff]  ;;  %v484_v5 = vld [vmem:[%s9169_s1 + $0x818] sm:$0xff] }
 0x125   : > { %v4688_v12 = vpack.c.bf16 %v446_v7, %v442_v6  ;;  %v482_v3 = vld [vmem:[%s9169_s1 + $0x808] sm:$0xff]  ;;  %v488_v6 = vld [vmem:[%s9169_s1 + $0x838] sm:$0xff] }
 0x126   : > { %4667 = vmatpush1.bf16.msra.mxu0 %v4666_v13  ;;  %v441_v13 = vld [vmem:[%s9169_s1 + $0x6c0] sm:$0xff]  ;;  %v520_v56 = vld [vmem:[%s9169_s1 + $0x938] sm:$0xff] }
 0x127   : > { %4867 = vmatpush1.bf16.msra.mxu1 %v4866_v14  ;;  %4669 = vmatprep.subr.bf16.mxu0 %v4668_v15  ;;  %v445_v14 = vld [vmem:[%s9169_s1 + $0x6e0] sm:$0xff]  ;;  %v443_v15 = vld [vmem:[%s9169_s1 + $0x6d0] sm:$0xff] }
 0x128   : > { %4869 = vmatprep.subr.bf16.mxu1 %v4868_v19  ;;  %v454_v19 = vld [vmem:[%s9169_s1 + $0x728] sm:$0xff]  ;;  %v4690_v22 = vpack.c.bf16 %v445_v14, %v441_v13  ;;  %v4890_v23 = vpack.c.bf16 %v447_v17, %v443_v15  ;;  %v4908_v13 = vpack.c.bf16 %v488_v6, %v484_v5  ;;  %v487_v14 = vld [vmem:[%s9169_s1 + $0x830] sm:$0xff]  ;;  %v492_v17 = vld [vmem:[%s9169_s1 + $0x858] sm:$0xff] }
 0x129   : > { %v4692_v24 = vpack.c.bf16 %v454_v19, %v450_v18  ;;  %v490_v15 = vld [vmem:[%s9169_s1 + $0x848] sm:$0xff]  ;;  %v496_v18 = vld [vmem:[%s9169_s1 + $0x878] sm:$0xff]  ;;  %v220_v19 = vld [vmem:[%s5768_s11 + $0x10] sm:$0xff] }
 0x12a   : > { %4671 = vmatpush1.bf16.msra.mxu0 %v4670_v25  ;;  %v449_v25 = vld [vmem:[%s9169_s1 + $0x700] sm:$0xff]  ;;  %v528_v5 = vld [vmem:[%s9169_s1 + $0x978] sm:$0xff] }
 0x12b   : > { %4871 = vmatpush1.bf16.msra.mxu1 %v4870_v26  ;;  %4673 = vmatprep.subr.bf16.mxu0 %v4672_v27  ;;  %v453_v26 = vld [vmem:[%s9169_s1 + $0x720] sm:$0xff]  ;;  %v451_v27 = vld [vmem:[%s9169_s1 + $0x710] sm:$0xff] }
 0x12c   : > { %4873 = vmatprep.subr.bf16.mxu1 %v4872_v31  ;;  %v462_v31 = vld [vmem:[%s9169_s1 + $0x768] sm:$0xff]  ;;  %v4694_v34 = vpack.c.bf16 %v453_v26, %v449_v25  ;;  %v4894_v35 = vpack.c.bf16 %v455_v29, %v451_v27  ;;  %v491_v25 = vld [vmem:[%s9169_s1 + $0x850] sm:$0xff]  ;;  %v4912_v26 = vpack.c.bf16 %v496_v18, %v492_v17  ;;  %v536_v17 = vld [vmem:[%s9169_s1 + $0x9b8] sm:$0xff] }
 0x12d   : > { %v4696_v36 = vpack.c.bf16 %v462_v31, %v458_v30  ;;  %v495_v27 = vld [vmem:[%s9169_s1 + $0x870] sm:$0xff]  ;;  %v502_v29 = vld [vmem:[%s9169_s1 + $0x8a8] sm:$0xff]  ;;  %v500_v30 = vld [vmem:[%s9169_s1 + $0x898] sm:$0xff] }
 0x12e   : > { %4675 = vmatpush1.bf16.msra.mxu0 %v4674_v37  ;;  %v457_v37 = vld [vmem:[%s9169_s1 + $0x740] sm:$0xff]  ;;  %v504_v31 = vld [vmem:[%s9169_s1 + $0x8b8] sm:$0xff] }
 0x12f   : > { %4875 = vmatpush1.bf16.msra.mxu1 %v4874_v38  ;;  %4677 = vmatprep.subr.bf16.mxu0 %v4676_v39  ;;  %v461_v38 = vld [vmem:[%s9169_s1 + $0x760] sm:$0xff]  ;;  %v459_v39 = vld [vmem:[%s9169_s1 + $0x750] sm:$0xff] }
 0x130   : > { %4877 = vmatprep.subr.bf16.mxu1 %v4876_v43  ;;  %v470_v43 = vld [vmem:[%s9169_s1 + $0x7a8] sm:$0xff]  ;;  %v4698_v46 = vpack.c.bf16 %v461_v38, %v457_v37  ;;  %v4898_v47 = vpack.c.bf16 %v463_v41, %v459_v39  ;;  %v501_v37 = vld [vmem:[%s9169_s1 + $0x8a0] sm:$0xff]  ;;  %v499_v38 = vld [vmem:[%s9169_s1 + $0x890] sm:$0xff]  ;;  %v4916_v39 = vpack.c.bf16 %v504_v31, %v500_v30 }
 0x131   : > { %v4700_v48 = vpack.c.bf16 %v470_v43, %v466_v42  ;;  %v506_v41 = vld [vmem:[%s9169_s1 + $0x8c8] sm:$0xff]  ;;  %v508_v43 = vld [vmem:[%s9169_s1 + $0x8d8] sm:$0xff] }
 0x132   : > { %4679 = vmatpush1.bf16.msra.mxu0 %v4678_v49  ;;  %v465_v49 = vld [vmem:[%s9169_s1 + $0x780] sm:$0xff]  ;;  %v510_v42 = vld [vmem:[%s9169_s1 + $0x8e8] sm:$0xff] }
 0x133   : > { %4879 = vmatpush1.bf16.msra.mxu1 %v4878_v50  ;;  %4681 = vmatprep.subr.bf16.mxu0 %v4680_v51  ;;  %v469_v50 = vld [vmem:[%s9169_s1 + $0x7a0] sm:$0xff]  ;;  %v467_v51 = vld [vmem:[%s9169_s1 + $0x790] sm:$0xff] }
 0x134   : > { %4881 = vmatprep.subr.bf16.mxu1 %v4880_v55  ;;  %v478_v55 = vld [vmem:[%s9169_s1 + $0x7e8] sm:$0xff]  ;;  %v4702_v58 = vpack.c.bf16 %v469_v50, %v465_v49  ;;  %v4902_v59 = vpack.c.bf16 %v471_v53, %v467_v51  ;;  %v509_v49 = vld [vmem:[%s9169_s1 + $0x8e0] sm:$0xff]  ;;  %v507_v50 = vld [vmem:[%s9169_s1 + $0x8d0] sm:$0xff]  ;;  %v4920_v51 = vpack.c.bf16 %v512_v44, %v508_v43 }
 0x135   : > { %v4704_v60 = vpack.c.bf16 %v478_v55, %v474_v54  ;;  %v514_v53 = vld [vmem:[%s9169_s1 + $0x908] sm:$0xff]  ;;  %v516_v55 = vld [vmem:[%s9169_s1 + $0x918] sm:$0xff] }
 0x136   : > { %4683 = vmatpush1.bf16.msra.mxu0 %v4682_v61  ;;  %v473_v61 = vld [vmem:[%s9169_s1 + $0x7c0] sm:$0xff]  ;;  %v518_v54 = vld [vmem:[%s9169_s1 + $0x928] sm:$0xff] }
 0x137   : > { %4883 = vmatpush1.bf16.msra.mxu1 %v4882_v62  ;;  %4685 = vmatprep.subr.bf16.mxu0 %v4684_v63  ;;  %v477_v62 = vld [vmem:[%s9169_s1 + $0x7e0] sm:$0xff]  ;;  %v475_v63 = vld [vmem:[%s9169_s1 + $0x7d0] sm:$0xff] }
 0x138   : > { %4885 = vmatprep.subr.bf16.mxu1 %v4884_v4  ;;  %v486_v4 = vld [vmem:[%s9169_s1 + $0x828] sm:$0xff]  ;;  %v4706_v7 = vpack.c.bf16 %v477_v62, %v473_v61  ;;  %v4906_v8 = vpack.c.bf16 %v479_v1, %v475_v63  ;;  %v517_v61 = vld [vmem:[%s9169_s1 + $0x920] sm:$0xff]  ;;  %v515_v62 = vld [vmem:[%s9169_s1 + $0x910] sm:$0xff]  ;;  %v4924_v63 = vpack.c.bf16 %v520_v56, %v516_v55 }
 0x139   : > { %v4708_v9 = vpack.c.bf16 %v486_v4, %v482_v3  ;;  %v522_v1 = vld [vmem:[%s9169_s1 + $0x948] sm:$0xff]  ;;  %v524_v4 = vld [vmem:[%s9169_s1 + $0x958] sm:$0xff] }
 0x13a   : > { %4687 = vmatpush1.bf16.msra.mxu0 %v4686_v10  ;;  %v481_v10 = vld [vmem:[%s9169_s1 + $0x800] sm:$0xff]  ;;  %v526_v3 = vld [vmem:[%s9169_s1 + $0x968] sm:$0xff] }
 0x13b   : > { %4887 = vmatpush1.bf16.msra.mxu1 %v4886_v11  ;;  %4689 = vmatprep.subr.bf16.mxu0 %v4688_v12  ;;  %v485_v11 = vld [vmem:[%s9169_s1 + $0x820] sm:$0xff]  ;;  %v483_v12 = vld [vmem:[%s9169_s1 + $0x810] sm:$0xff] }
 0x13c   : > { %4889 = vmatprep.subr.bf16.mxu1 %v4888_v16  ;;  %v494_v16 = vld [vmem:[%s9169_s1 + $0x868] sm:$0xff]  ;;  %v4710_v20 = vpack.c.bf16 %v485_v11, %v481_v10  ;;  %v4910_v21 = vpack.c.bf16 %v487_v14, %v483_v12  ;;  %v525_v10 = vld [vmem:[%s9169_s1 + $0x960] sm:$0xff]  ;;  %v523_v11 = vld [vmem:[%s9169_s1 + $0x950] sm:$0xff]  ;;  %v4928_v12 = vpack.c.bf16 %v528_v5, %v524_v4 }
 0x13d   : > { %v530_v14 = vld [vmem:[%s9169_s1 + $0x988] sm:$0xff] }
 0x13e   : > { %4691 = vmatpush1.bf16.msra.mxu0 %v4690_v22  ;;  %v4712_v22 = vpack.c.bf16 %v494_v16, %v490_v15  ;;  %v534_v15 = vld [vmem:[%s9169_s1 + $0x9a8] sm:$0xff]  ;;  %v532_v16 = vld [vmem:[%s9169_s1 + $0x998] sm:$0xff] }
 0x13f   : > { %4891 = vmatpush1.bf16.msra.mxu1 %v4890_v23  ;;  %4693 = vmatprep.subr.bf16.mxu0 %v4692_v24  ;;  %v489_v23 = vld [vmem:[%s9169_s1 + $0x840] sm:$0xff] }
 0x140   : > { %4893 = vmatprep.subr.bf16.mxu1 %v4892_v28  ;;  %v493_v24 = vld [vmem:[%s9169_s1 + $0x860] sm:$0xff]  ;;  %v498_v28 = vld [vmem:[%s9169_s1 + $0x888] sm:$0xff] }
 0x141   : > { %v4714_v33 = vpack.c.bf16 %v493_v24, %v489_v23  ;;  %v531_v23 = vld [vmem:[%s9169_s1 + $0x990] sm:$0xff]  ;;  %v4932_v24 = vpack.c.bf16 %v536_v17, %v532_v16 }
 0x142   : > { %4695 = vmatpush1.bf16.msra.mxu0 %v4694_v34  ;;  %v4914_v34 = vpack.c.bf16 %v495_v27, %v491_v25  ;;  %v535_v25 = vld [vmem:[%s9169_s1 + $0x9b0] sm:$0xff]  ;;  %v542_v27 = vld [vmem:[%s9169_s1 + $0x9e8] sm:$0xff] }
 0x143   : > { %4895 = vmatpush1.bf16.msra.mxu1 %v4894_v35  ;;  %4697 = vmatprep.subr.bf16.mxu0 %v4696_v36  ;;  %v4716_v35 = vpack.c.bf16 %v502_v29, %v498_v28  ;;  %v497_v36 = vld [vmem:[%s9169_s1 + $0x880] sm:$0xff]  ;;  %v540_v28 = vld [vmem:[%s9169_s1 + $0x9d8] sm:$0xff]  ;;  %v4934_v31 = vpack.c.bf16 %v535_v25, %v531_v23  ;;  %v578_v23 = vld [vmem:[%s9169_s1 + $0xb08] sm:$0xff] }
 0x144   : > { %4897 = vmatprep.subr.bf16.mxu1 %v4896_v40  ;;  %v503_v40 = vld [vmem:[%s9169_s1 + $0x8b0] sm:$0xff]  ;;  %v4718_v45 = vpack.c.bf16 %v501_v37, %v497_v36  ;;  %v544_v29 = vld [vmem:[%s9169_s1 + $0x9f8] sm:$0xff] }
 0x145   : > { %v4936_v36 = vpack.c.bf16 %v544_v29, %v540_v28  ;;  %v543_v37 = vld [vmem:[%s9169_s1 + $0x9f0] sm:$0xff]  ;;  %v580_v25 = vld [vmem:[%s9169_s1 + $0xb18] sm:$0xff] }
 0x146   : > { %4699 = vmatpush1.bf16.msra.mxu0 %v4698_v46  ;;  %v4918_v46 = vpack.c.bf16 %v503_v40, %v499_v38  ;;  %v546_v38 = vld [vmem:[%s9169_s1 + $0xa08] sm:$0xff]  ;;  %v548_v40 = vld [vmem:[%s9169_s1 + $0xa18] sm:$0xff] }
 0x147   : > { %4899 = vmatpush1.bf16.msra.mxu1 %v4898_v47  ;;  %4701 = vmatprep.subr.bf16.mxu0 %v4700_v48  ;;  %v4720_v47 = vpack.c.bf16 %v510_v42, %v506_v41  ;;  %v505_v48 = vld [vmem:[%s9169_s1 + $0x8c0] sm:$0xff]  ;;  %v552_v41 = vld [vmem:[%s9169_s1 + $0xa38] sm:$0xff] }
 0x148   : > { %4901 = vmatprep.subr.bf16.mxu1 %v4900_v52  ;;  %v511_v52 = vld [vmem:[%s9169_s1 + $0x8f0] sm:$0xff]  ;;  %v4722_v57 = vpack.c.bf16 %v509_v49, %v505_v48  ;;  %v4940_v48 = vpack.c.bf16 %v552_v41, %v548_v40 }
 0x149   : > { %v551_v49 = vld [vmem:[%s9169_s1 + $0xa30] sm:$0xff] }
 0x14a   : > { %4703 = vmatpush1.bf16.msra.mxu0 %v4702_v58  ;;  %v4922_v58 = vpack.c.bf16 %v511_v52, %v507_v50  ;;  %v554_v50 = vld [vmem:[%s9169_s1 + $0xa48] sm:$0xff]  ;;  %v556_v52 = vld [vmem:[%s9169_s1 + $0xa58] sm:$0xff] }
 0x14b   : > { %4903 = vmatpush1.bf16.msra.mxu1 %v4902_v59  ;;  %4705 = vmatprep.subr.bf16.mxu0 %v4704_v60  ;;  %v4724_v59 = vpack.c.bf16 %v518_v54, %v514_v53  ;;  %v513_v60 = vld [vmem:[%s9169_s1 + $0x900] sm:$0xff]  ;;  %v560_v53 = vld [vmem:[%s9169_s1 + $0xa78] sm:$0xff] }
 0x14c   : > { %4905 = vmatprep.subr.bf16.mxu1 %v4904_v0  ;;  %v519_v0 = vld [vmem:[%s9169_s1 + $0x930] sm:$0xff]  ;;  %v4726_v6 = vpack.c.bf16 %v517_v61, %v513_v60  ;;  %v4944_v60 = vpack.c.bf16 %v560_v53, %v556_v52 }
 0x14d   : > { %v559_v61 = vld [vmem:[%s9169_s1 + $0xa70] sm:$0xff] }
 0x14e   : > { %4707 = vmatpush1.bf16.msra.mxu0 %v4706_v7  ;;  %v4926_v7 = vpack.c.bf16 %v519_v0, %v515_v62  ;;  %v562_v62 = vld [vmem:[%s9169_s1 + $0xa88] sm:$0xff]  ;;  %v564_v0 = vld [vmem:[%s9169_s1 + $0xa98] sm:$0xff] }
 0x14f   : > { %4907 = vmatpush1.bf16.msra.mxu1 %v4906_v8  ;;  %4709 = vmatprep.subr.bf16.mxu0 %v4708_v9  ;;  %v4728_v8 = vpack.c.bf16 %v526_v3, %v522_v1  ;;  %v521_v9 = vld [vmem:[%s9169_s1 + $0x940] sm:$0xff]  ;;  %v568_v1 = vld [vmem:[%s9169_s1 + $0xab8] sm:$0xff] }
 0x150   : > { %4909 = vmatprep.subr.bf16.mxu1 %v4908_v13  ;;  %v527_v13 = vld [vmem:[%s9169_s1 + $0x970] sm:$0xff]  ;;  %v4730_v18 = vpack.c.bf16 %v525_v10, %v521_v9  ;;  %v4948_v9 = vpack.c.bf16 %v568_v1, %v564_v0 }
 0x151   : > { %1792 = vmatmul.mubr.f32.vlgmr.msra.gmra.mrb[0].mxu0 %v220_v19  ;;  %v567_v10 = vld [vmem:[%s9169_s1 + $0xab0] sm:$0xff] }
 0x152   : > { %4711 = vmatpush1.bf16.msra.mxu0 %v4710_v20  ;;  %2076 = vmatmul.mubr.f32.vlgmr.msra.gmra.mrb[0].mxu1 %v220_v19  ;;  %v4930_v19 = vpack.c.bf16 %v527_v13, %v523_v11  ;;  %v4732_v20 = vpack.c.bf16 %v534_v15, %v530_v14  ;;  %v570_v11 = vld [vmem:[%s9169_s1 + $0xac8] sm:$0xff]  ;;  %v572_v13 = vld [vmem:[%s9169_s1 + $0xad8] sm:$0xff] }
 0x153   : > { %4911 = vmatpush1.bf16.msra.mxu1 %v4910_v21  ;;  %4713 = vmatprep.subr.bf16.mxu0 %v4712_v22  ;;  %v529_v21 = vld [vmem:[%s9169_s1 + $0x980] sm:$0xff]  ;;  %v576_v14 = vld [vmem:[%s9169_s1 + $0xaf8] sm:$0xff] }
 0x154   : > { %4913 = vmatprep.subr.bf16.mxu1 %v4912_v26  ;;  %1862 = vmatprep.mubr.f32.mxu0 %v223_v32  ;;  %v533_v22 = vld [vmem:[%s9169_s1 + $0x9a0] sm:$0xff]  ;;  %v538_v26 = vld [vmem:[%s9169_s1 + $0x9c8] sm:$0xff] }
 0x155   : > { %2146 = vmatprep.mubr.f32.mxu1 %v223_v32  ;;  %v4734_v30 = vpack.c.bf16 %v533_v22, %v529_v21  ;;  %v4736_v32 = vpack.c.bf16 %v542_v27, %v538_v26  ;;  %v4952_v21 = vpack.c.bf16 %v576_v14, %v572_v13  ;;  %v575_v22 = vld [vmem:[%s9169_s1 + $0xaf0] sm:$0xff]  ;;  %v584_v26 = vld [vmem:[%s9169_s1 + $0xb38] sm:$0xff] }
 0x156   : > { %4715 = vmatpush1.bf16.msra.mxu0 %v4714_v33  ;;  %v537_v33 = vld [vmem:[%s9169_s1 + $0x9c0] sm:$0xff] }
 0x157   : > { %4915 = vmatpush1.bf16.msra.mxu1 %v4914_v34  ;;  %4717 = vmatprep.subr.bf16.mxu0 %v4716_v35  ;;  %v541_v34 = vld [vmem:[%s9169_s1 + $0x9e0] sm:$0xff]  ;;  %v539_v35 = vld [vmem:[%s9169_s1 + $0x9d0] sm:$0xff] }
 0x158   : > { %4917 = vmatprep.subr.bf16.mxu1 %v4916_v39  ;;  %v550_v39 = vld [vmem:[%s9169_s1 + $0xa28] sm:$0xff]  ;;  %v4738_v42 = vpack.c.bf16 %v541_v34, %v537_v33  ;;  %v4938_v43 = vpack.c.bf16 %v543_v37, %v539_v35  ;;  %v4956_v33 = vpack.c.bf16 %v584_v26, %v580_v25  ;;  %v583_v34 = vld [vmem:[%s9169_s1 + $0xb30] sm:$0xff]  ;;  %v588_v37 = vld [vmem:[%s9169_s1 + $0xb58] sm:$0xff] }
 0x159   : > { %v4740_v44 = vpack.c.bf16 %v550_v39, %v546_v38  ;;  %v586_v35 = vld [vmem:[%s9169_s1 + $0xb48] sm:$0xff]  ;;  %v592_v38 = vld [vmem:[%s9169_s1 + $0xb78] sm:$0xff] }
 0x15a   : > { %4719 = vmatpush1.bf16.msra.mxu0 %v4718_v45  ;;  %v545_v45 = vld [vmem:[%s9169_s1 + $0xa00] sm:$0xff] }
 0x15b   : > { %4919 = vmatpush1.bf16.msra.mxu1 %v4918_v46  ;;  %4721 = vmatprep.subr.bf16.mxu0 %v4720_v47  ;;  %v549_v46 = vld [vmem:[%s9169_s1 + $0xa20] sm:$0xff]  ;;  %v547_v47 = vld [vmem:[%s9169_s1 + $0xa10] sm:$0xff] }
 0x15c   : > { %4921 = vmatprep.subr.bf16.mxu1 %v4920_v51  ;;  %v558_v51 = vld [vmem:[%s9169_s1 + $0xa68] sm:$0xff]  ;;  %v4742_v54 = vpack.c.bf16 %v549_v46, %v545_v45  ;;  %v4942_v55 = vpack.c.bf16 %v551_v49, %v547_v47  ;;  %v4960_v45 = vpack.c.bf16 %v592_v38, %v588_v37  ;;  %v591_v46 = vld [vmem:[%s9169_s1 + $0xb70] sm:$0xff]  ;;  %v596_v49 = vld [vmem:[%s9169_s1 + $0xb98] sm:$0xff] }
 0x15d   : > { %v4744_v56 = vpack.c.bf16 %v558_v51, %v554_v50  ;;  %v594_v47 = vld [vmem:[%s9169_s1 + $0xb88] sm:$0xff]  ;;  %v600_v50 = vld [vmem:[%s9169_s1 + $0xbb8] sm:$0xff] }
 0x15e   : > { %4723 = vmatpush1.bf16.msra.mxu0 %v4722_v57  ;;  %v553_v57 = vld [vmem:[%s9169_s1 + $0xa40] sm:$0xff]  ;;  %v2225_v38 = vld [vmem:[%s5768_s11 + $0x8] sm:$0xfc] }
 0x15f   : > { %4923 = vmatpush1.bf16.msra.mxu1 %v4922_v58  ;;  %4725 = vmatprep.subr.bf16.mxu0 %v4724_v59  ;;  %v557_v58 = vld [vmem:[%s9169_s1 + $0xa60] sm:$0xff]  ;;  %v555_v59 = vld [vmem:[%s9169_s1 + $0xa50] sm:$0xff] }
 0x160   : > { %4925 = vmatprep.subr.bf16.mxu1 %v4924_v63  ;;  %v566_v63 = vld [vmem:[%s9169_s1 + $0xaa8] sm:$0xff]  ;;  %v4746_v3 = vpack.c.bf16 %v557_v58, %v553_v57  ;;  %v4946_v4 = vpack.c.bf16 %v559_v61, %v555_v59  ;;  %v4964_v57 = vpack.c.bf16 %v600_v50, %v596_v49  ;;  %v599_v58 = vld [vmem:[%s9169_s1 + $0xbb0] sm:$0xff]  ;;  %v604_v61 = vld [vmem:[%s9169_s1 + $0xbd8] sm:$0xff] }
 0x161   : > { %v4748_v5 = vpack.c.bf16 %v566_v63, %v562_v62  ;;  %v602_v59 = vld [vmem:[%s9169_s1 + $0xbc8] sm:$0xff]  ;;  %v608_v62 = vld [vmem:[%s9169_s1 + $0xbf8] sm:$0xff] }
 0x162   : > { %4727 = vmatpush1.bf16.msra.mxu0 %v4726_v6  ;;  %v561_v6 = vld [vmem:[%s9169_s1 + $0xa80] sm:$0xff]  ;;  %v3785_v49 = vld [vmem:[%s9169_s1 + $0x1958] sm:$0xff] }
 0x163   : > { %4927 = vmatpush1.bf16.msra.mxu1 %v4926_v7  ;;  %4729 = vmatprep.subr.bf16.mxu0 %v4728_v8  ;;  %v565_v7 = vld [vmem:[%s9169_s1 + $0xaa0] sm:$0xff]  ;;  %v563_v8 = vld [vmem:[%s9169_s1 + $0xa90] sm:$0xff]  ;;  %v3789_v50 = vld [vmem:[%s9169_s1 + $0x1978] sm:$0xff] }
 0x164   : > { %4929 = vmatprep.subr.bf16.mxu1 %v4928_v12  ;;  %v574_v12 = vld [vmem:[%s9169_s1 + $0xae8] sm:$0xff]  ;;  %v4750_v15 = vpack.c.bf16 %v565_v7, %v561_v6  ;;  %v4950_v16 = vpack.c.bf16 %v567_v10, %v563_v8  ;;  %v4968_v6 = vpack.c.bf16 %v608_v62, %v604_v61  ;;  %v607_v7 = vld [vmem:[%s9169_s1 + $0xbf0] sm:$0xff]  ;;  %v612_v10 = vld [vmem:[%s9169_s1 + $0xc18] sm:$0xff] }
 0x165   : > { %v4752_v17 = vpack.c.bf16 %v574_v12, %v570_v11  ;;  %v610_v8 = vld [vmem:[%s9169_s1 + $0xc08] sm:$0xff]  ;;  %v616_v11 = vld [vmem:[%s9169_s1 + $0xc38] sm:$0xff]  ;;  %v3788_v61 = vld [vmem:[%s9169_s1 + $0x1970] sm:$0xff] }
 0x166   : > { %4731 = vmatpush1.bf16.msra.mxu0 %v4730_v18  ;;  %v569_v18 = vld [vmem:[%s9169_s1 + $0xac0] sm:$0xff]  ;;  %v3791_v62 = vld [vmem:[%s9169_s1 + $0x1988] sm:$0xff] }
 0x167   : > { %4931 = vmatpush1.bf16.msra.mxu1 %v4930_v19  ;;  %4733 = vmatprep.subr.bf16.mxu0 %v4732_v20  ;;  %v573_v19 = vld [vmem:[%s9169_s1 + $0xae0] sm:$0xff]  ;;  %v571_v20 = vld [vmem:[%s9169_s1 + $0xad0] sm:$0xff] }
 0x168   : > { %4933 = vmatprep.subr.bf16.mxu1 %v4932_v24  ;;  %v582_v24 = vld [vmem:[%s9169_s1 + $0xb28] sm:$0xff]  ;;  %v4754_v27 = vpack.c.bf16 %v573_v19, %v569_v18  ;;  %v4954_v28 = vpack.c.bf16 %v575_v22, %v571_v20  ;;  %v4972_v18 = vpack.c.bf16 %v616_v11, %v612_v10  ;;  %v615_v19 = vld [vmem:[%s9169_s1 + $0xc30] sm:$0xff]  ;;  %v620_v22 = vld [vmem:[%s9169_s1 + $0xc58] sm:$0xff] }
 0x169   : > { %v4756_v29 = vpack.c.bf16 %v582_v24, %v578_v23  ;;  %v618_v20 = vld [vmem:[%s9169_s1 + $0xc48] sm:$0xff]  ;;  %v624_v23 = vld [vmem:[%s9169_s1 + $0xc78] sm:$0xff]  ;;  %v222_v24 = vld [vmem:[%s5768_s11 + $0x20] sm:$0xff] }
 0x16a   : > { %4735 = vmatpush1.bf16.msra.mxu0 %v4734_v30  ;;  %v577_v30 = vld [vmem:[%s9169_s1 + $0xb00] sm:$0xff]  ;;  %v3796_v11 = vld [vmem:[%s9169_s1 + $0x19b0] sm:$0xff] }
 0x16b   : > { %4935 = vmatpush1.bf16.msra.mxu1 %v4934_v31  ;;  %4737 = vmatprep.subr.bf16.mxu0 %v4736_v32  ;;  %v581_v31 = vld [vmem:[%s9169_s1 + $0xb20] sm:$0xff]  ;;  %v579_v32 = vld [vmem:[%s9169_s1 + $0xb10] sm:$0xff] }
 0x16c   : > { %4937 = vmatprep.subr.bf16.mxu1 %v4936_v36  ;;  %v590_v36 = vld [vmem:[%s9169_s1 + $0xb68] sm:$0xff]  ;;  %v4758_v39 = vpack.c.bf16 %v581_v31, %v577_v30  ;;  %v4958_v40 = vpack.c.bf16 %v583_v34, %v579_v32  ;;  %v619_v30 = vld [vmem:[%s9169_s1 + $0xc50] sm:$0xff]  ;;  %v4976_v31 = vpack.c.bf16 %v624_v23, %v620_v22 }
 0x16d   : > { %v4760_v41 = vpack.c.bf16 %v590_v36, %v586_v35  ;;  %v623_v32 = vld [vmem:[%s9169_s1 + $0xc70] sm:$0xff]  ;;  %v3779_v34 = vld [vmem:[%s9169_s1 + $0x1928] sm:$0xff]  ;;  %v3777_v35 = vld [vmem:[%s9169_s1 + $0x1918] sm:$0xff] }
 0x16e   : > { %4739 = vmatpush1.bf16.msra.mxu0 %v4738_v42  ;;  %v585_v42 = vld [vmem:[%s9169_s1 + $0xb40] sm:$0xff]  ;;  %v3781_v36 = vld [vmem:[%s9169_s1 + $0x1938] sm:$0xff]  ;;  %v3804_v23 = vld [vmem:[%s9169_s1 + $0x19f0] sm:$0xff] }
 0x16f   : > { %4939 = vmatpush1.bf16.msra.mxu1 %v4938_v43  ;;  %4741 = vmatprep.subr.bf16.mxu0 %v4740_v44  ;;  %v589_v43 = vld [vmem:[%s9169_s1 + $0xb60] sm:$0xff]  ;;  %v587_v44 = vld [vmem:[%s9169_s1 + $0xb50] sm:$0xff] }
 0x170   : > { %4941 = vmatprep.subr.bf16.mxu1 %v4940_v48  ;;  %v598_v48 = vld [vmem:[%s9169_s1 + $0xba8] sm:$0xff]  ;;  %v4762_v51 = vpack.c.bf16 %v589_v43, %v585_v42  ;;  %v4962_v52 = vpack.c.bf16 %v591_v46, %v587_v44  ;;  %v3774_v42 = vld [vmem:[%s9169_s1 + $0x1900] sm:$0xff]  ;;  %v3776_v44 = vld [vmem:[%s9169_s1 + $0x1910] sm:$0xff] }
 0x171   : > { %v4764_v53 = vpack.c.bf16 %v598_v48, %v594_v47  ;;  %v3778_v43 = vld [vmem:[%s9169_s1 + $0x1920] sm:$0xff]  ;;  %v3780_v46 = vld [vmem:[%s9169_s1 + $0x1930] sm:$0xff]  ;;  %v3783_v47 = vld [vmem:[%s9169_s1 + $0x1948] sm:$0xff] }
 0x172   : > { %4743 = vmatpush1.bf16.msra.mxu0 %v4742_v54  ;;  %v593_v54 = vld [vmem:[%s9169_s1 + $0xb80] sm:$0xff]  ;;  %v3787_v48 = vld [vmem:[%s9169_s1 + $0x1968] sm:$0xff] }
 0x173   : > { %4943 = vmatpush1.bf16.msra.mxu1 %v4942_v55  ;;  %4745 = vmatprep.subr.bf16.mxu0 %v4744_v56  ;;  %v597_v55 = vld [vmem:[%s9169_s1 + $0xba0] sm:$0xff]  ;;  %v595_v56 = vld [vmem:[%s9169_s1 + $0xb90] sm:$0xff] }
 0x174   : > { %4945 = vmatprep.subr.bf16.mxu1 %v4944_v60  ;;  %v606_v60 = vld [vmem:[%s9169_s1 + $0xbe8] sm:$0xff]  ;;  %v4766_v63 = vpack.c.bf16 %v597_v55, %v593_v54  ;;  %v4966_v0 = vpack.c.bf16 %v599_v58, %v595_v56  ;;  %v4982_v54 = vpack.c.bf16 %v3778_v43, %v3774_v42  ;;  %v5182_v55 = vpack.c.bf16 %v3780_v46, %v3776_v44  ;;  %v3786_v58 = vld [vmem:[%s9169_s1 + $0x1960] sm:$0xff] }
 0x175   : > { %v4768_v1 = vpack.c.bf16 %v606_v60, %v602_v59  ;;  %v4984_v56 = vpack.c.bf16 %v3787_v48, %v3783_v47  ;;  %v3784_v59 = vld [vmem:[%s9169_s1 + $0x1950] sm:$0xff]  ;;  %v5184_v60 = vpack.c.bf16 %v3789_v50, %v3785_v49  ;;  %v3814_v43 = vld [vmem:[%s9169_s1 + $0x1a40] sm:$0xff]  ;;  %v3823_v48 = vld [vmem:[%s9169_s1 + $0x1a88] sm:$0xff] }
 0x176   : > { %4747 = vmatpush1.bf16.msra.mxu0 %v4746_v3  ;;  %v601_v3 = vld [vmem:[%s9169_s1 + $0xbc0] sm:$0xff]  ;;  %v3820_v47 = vld [vmem:[%s9169_s1 + $0x1a70] sm:$0xff]  ;;  %v3827_v49 = vld [vmem:[%s9169_s1 + $0x1aa8] sm:$0xff] }
 0x177   : > { %4947 = vmatpush1.bf16.msra.mxu1 %v4946_v4  ;;  %4749 = vmatprep.subr.bf16.mxu0 %v4748_v5  ;;  %v605_v4 = vld [vmem:[%s9169_s1 + $0xbe0] sm:$0xff]  ;;  %v603_v5 = vld [vmem:[%s9169_s1 + $0xbd0] sm:$0xff]  ;;  %v3825_v50 = vld [vmem:[%s9169_s1 + $0x1a98] sm:$0xff] }
 0x178   : > { %4949 = vmatprep.subr.bf16.mxu1 %v4948_v9  ;;  %v614_v9 = vld [vmem:[%s9169_s1 + $0xc28] sm:$0xff]  ;;  %v4770_v12 = vpack.c.bf16 %v605_v4, %v601_v3  ;;  %v4970_v13 = vpack.c.bf16 %v607_v7, %v603_v5  ;;  %v5186_v5 = vpack.c.bf16 %v3788_v61, %v3784_v59  ;;  %v3790_v7 = vld [vmem:[%s9169_s1 + $0x1980] sm:$0xff]  ;;  %v3828_v59 = vld [vmem:[%s9169_s1 + $0x1ab0] sm:$0xff] }
 0x179   : > { %v4772_v14 = vpack.c.bf16 %v614_v9, %v610_v8  ;;  %v3794_v8 = vld [vmem:[%s9169_s1 + $0x19a0] sm:$0xff]  ;;  %v3792_v9 = vld [vmem:[%s9169_s1 + $0x1990] sm:$0xff]  ;;  %v3835_v61 = vld [vmem:[%s9169_s1 + $0x1ae8] sm:$0xff] }
 0x17a   : > { %4751 = vmatpush1.bf16.msra.mxu0 %v4750_v15  ;;  %v609_v15 = vld [vmem:[%s9169_s1 + $0xc00] sm:$0xff] }
 0x17b   : > { %4951 = vmatpush1.bf16.msra.mxu1 %v4950_v16  ;;  %4753 = vmatprep.subr.bf16.mxu0 %v4752_v17  ;;  %v613_v16 = vld [vmem:[%s9169_s1 + $0xc20] sm:$0xff]  ;;  %v611_v17 = vld [vmem:[%s9169_s1 + $0xc10] sm:$0xff] }
 0x17c   : > { %4953 = vmatprep.subr.bf16.mxu1 %v4952_v21  ;;  %v622_v21 = vld [vmem:[%s9169_s1 + $0xc68] sm:$0xff]  ;;  %v4774_v25 = vpack.c.bf16 %v613_v16, %v609_v15  ;;  %v4974_v26 = vpack.c.bf16 %v615_v19, %v611_v17  ;;  %v3805_v15 = vld [vmem:[%s9169_s1 + $0x19f8] sm:$0xff]  ;;  %v4990_v16 = vpack.c.bf16 %v3794_v8, %v3790_v7  ;;  %v5190_v17 = vpack.c.bf16 %v3796_v11, %v3792_v9  ;;  %v3798_v19 = vld [vmem:[%s9169_s1 + $0x19c0] sm:$0xff] }
 0x17d   : > { %v3818_v44 = vld [vmem:[%s9169_s1 + $0x1a60] sm:$0xff]  ;;  %v3836_v8 = vld [vmem:[%s9169_s1 + $0x1af0] sm:$0xff]  ;;  %v3839_v9 = vld [vmem:[%s9169_s1 + $0x1b08] sm:$0xff] }
 0x17e   : > { %4755 = vmatpush1.bf16.msra.mxu0 %v4754_v27  ;;  %v4776_v27 = vpack.c.bf16 %v622_v21, %v618_v20  ;;  %v3802_v20 = vld [vmem:[%s9169_s1 + $0x19e0] sm:$0xff]  ;;  %v3800_v21 = vld [vmem:[%s9169_s1 + $0x19d0] sm:$0xff]  ;;  %v3841_v11 = vld [vmem:[%s9169_s1 + $0x1b18] sm:$0xff] }
 0x17f   : > { %4955 = vmatpush1.bf16.msra.mxu1 %v4954_v28  ;;  %4757 = vmatprep.subr.bf16.mxu0 %v4756_v29  ;;  %v617_v28 = vld [vmem:[%s9169_s1 + $0xc40] sm:$0xff] }
 0x180   : > { %4957 = vmatprep.subr.bf16.mxu1 %v4956_v33  ;;  %v621_v29 = vld [vmem:[%s9169_s1 + $0xc60] sm:$0xff]  ;;  %v3775_v33 = vld [vmem:[%s9169_s1 + $0x1908] sm:$0xff] }
 0x181   : > { %v4778_v37 = vpack.c.bf16 %v621_v29, %v617_v28  ;;  %v4994_v28 = vpack.c.bf16 %v3802_v20, %v3798_v19  ;;  %v5194_v29 = vpack.c.bf16 %v3804_v23, %v3800_v21  ;;  %v3844_v20 = vld [vmem:[%s9169_s1 + $0x1b30] sm:$0xff]  ;;  %v3847_v21 = vld [vmem:[%s9169_s1 + $0x1b48] sm:$0xff]  ;;  %v3849_v23 = vld [vmem:[%s9169_s1 + $0x1b58] sm:$0xff] }
 0x182   : > { %4759 = vmatpush1.bf16.msra.mxu0 %v4758_v39  ;;  %v2232_v39 = vld [vmem:[%s5768_s11 + $0x40] sm:$0x3] }
 0x183   : > { %4959 = vmatpush1.bf16.msra.mxu1 %v4958_v40  ;;  %4761 = vmatprep.subr.bf16.mxu0 %v4760_v41  ;;  %v4978_v40 = vpack.c.bf16 %v623_v32, %v619_v30  ;;  %v4980_v41 = vpack.c.bf16 %v3779_v34, %v3775_v33  ;;  %v3810_v32 = vld [vmem:[%s9169_s1 + $0x1a20] sm:$0xff]  ;;  %v3808_v33 = vld [vmem:[%s9169_s1 + $0x1a10] sm:$0xff] }
 0x184   : > { %4961 = vmatprep.subr.bf16.mxu1 %v4960_v45  ;;  %v5180_v45 = vpack.c.bf16 %v3781_v36, %v3777_v35  ;;  %v3812_v35 = vld [vmem:[%s9169_s1 + $0x1a30] sm:$0xff]  ;;  %v3815_v36 = vld [vmem:[%s9169_s1 + $0x1a48] sm:$0xff] }
 0x186   : > { %4763 = vmatpush1.bf16.msra.mxu0 %v4762_v51  ;;  %v2657_v51 = vrot.slane %v2225_v38, 2  ;;  %v3817_v38 = vld [vmem:[%s9169_s1 + $0x1a58] sm:$0xff] }
 0x187   : > { %4963 = vmatpush1.bf16.msra.mxu1 %v4962_v52  ;;  %4765 = vmatprep.subr.bf16.mxu0 %v4764_v53  ;;  %v2658_v52 = vrot.slane %v2232_v39, 2  ;;  %v224_v53 = vld [vmem:[%s5768_s11 + $0x30] sm:$0xff]  ;;  %v3821_v39 = vld [vmem:[%s9169_s1 + $0x1a78] sm:$0xff] }
 0x188   : > { %4965 = vmatprep.subr.bf16.mxu1 %v4964_v57  ;;  %v3782_v57 = vld [vmem:[%s9169_s1 + $0x1940] sm:$0xff]  ;;  %v5200_v46 = vpack.c.bf16 %v3821_v39, %v3817_v38 }
 0x189   : > { %v2659_v3 = vsel %vm2653_vm2, %v2657_v51, %v2658_v52  ;;  %v4986_v4 = vpack.c.bf16 %v3786_v58, %v3782_v57  ;;  %v3829_v51 = vld [vmem:[%s9169_s1 + $0x1ab8] sm:$0xff]  ;;  %v5002_v52 = vpack.c.bf16 %v3818_v44, %v3814_v43  ;;  %v3824_v57 = vld [vmem:[%s9169_s1 + $0x1a90] sm:$0xff] }
 0x18a   : > { %4767 = vmatpush1.bf16.msra.mxu0 %v4766_v63  ;;  %v3795_v63 = vld [vmem:[%s9169_s1 + $0x19a8] sm:$0xff]  ;;  %v5204_v58 = vpack.c.bf16 %v3829_v51, %v3825_v50  ;;  %v3860_v44 = vld [vmem:[%s9169_s1 + $0x1bb0] sm:$0xff] }
 0x18b   : > { %4967 = vmatpush1.bf16.msra.mxu1 %v4966_v0  ;;  %4769 = vmatprep.subr.bf16.mxu0 %v4768_v1  ;;  %v3793_v0 = vld [vmem:[%s9169_s1 + $0x1998] sm:$0xff] }
 0x18c   : > { %4969 = vmatprep.subr.bf16.mxu1 %v4968_v6  ;;  %v3797_v1 = vld [vmem:[%s9169_s1 + $0x19b8] sm:$0xff]  ;;  %v4988_v6 = vpack.c.bf16 %v3795_v63, %v3791_v62 }
 0x18d   : > { %v5188_v10 = vpack.c.bf16 %v3797_v1, %v3793_v0  ;;  %v3833_v62 = vld [vmem:[%s9169_s1 + $0x1ad8] sm:$0xff]  ;;  %v5206_v1 = vpack.c.bf16 %v3828_v59, %v3824_v57  ;;  %v3871_v57 = vld [vmem:[%s9169_s1 + $0x1c08] sm:$0xff] }
 0x18e   : > { %4771 = vmatpush1.bf16.msra.mxu0 %v4770_v12  ;;  %v3799_v12 = vld [vmem:[%s9169_s1 + $0x19c8] sm:$0xff]  ;;  %v3837_v63 = vld [vmem:[%s9169_s1 + $0x1af8] sm:$0xff] }
 0x18f   : > { %4971 = vmatpush1.bf16.msra.mxu1 %v4970_v13  ;;  %4773 = vmatprep.subr.bf16.mxu0 %v4772_v14  ;;  %v3803_v13 = vld [vmem:[%s9169_s1 + $0x19e8] sm:$0xff]  ;;  %v3801_v14 = vld [vmem:[%s9169_s1 + $0x19d8] sm:$0xff]  ;;  %v5208_v7 = vpack.c.bf16 %v3837_v63, %v3833_v62 }
 0x190   : > { %4973 = vmatprep.subr.bf16.mxu1 %v4972_v18  ;;  %v4992_v18 = vpack.c.bf16 %v3803_v13, %v3799_v12  ;;  %v5192_v22 = vpack.c.bf16 %v3805_v15, %v3801_v14  ;;  %v3845_v12 = vld [vmem:[%s9169_s1 + $0x1b38] sm:$0xff] }
 0x191   : > { %1863 = vmatmul.mubr.f32.vlgmr.msra.gmra.mrb[0].mxu0 %v222_v24  ;;  %v5212_v19 = vpack.c.bf16 %v3845_v12, %v3841_v11  ;;  %v3873_v59 = vld [vmem:[%s9169_s1 + $0x1c18] sm:$0xff] }
 0x192   : > { %4775 = vmatpush1.bf16.msra.mxu0 %v4774_v25  ;;  %2147 = vmatmul.mubr.f32.vlgmr.msra.gmra.mrb[0].mxu1 %v222_v24  ;;  %v3807_v24 = vld [vmem:[%s9169_s1 + $0x1a08] sm:$0xff] }
 0x193   : > { %4975 = vmatpush1.bf16.msra.mxu1 %v4974_v26  ;;  %4777 = vmatprep.subr.bf16.mxu0 %v4776_v27  ;;  %v3811_v25 = vld [vmem:[%s9169_s1 + $0x1a28] sm:$0xff]  ;;  %v3809_v26 = vld [vmem:[%s9169_s1 + $0x1a18] sm:$0xff] }
 0x194   : > { %4977 = vmatprep.subr.bf16.mxu1 %v4976_v31  ;;  %1933 = vmatprep.mubr.f32.mxu0 %v5442_v2  ;;  %v3813_v27 = vld [vmem:[%s9169_s1 + $0x1a38] sm:$0xff]  ;;  %v4996_v30 = vpack.c.bf16 %v3811_v25, %v3807_v24  ;;  %v3806_v31 = vld [vmem:[%s9169_s1 + $0x1a00] sm:$0xff] }
 0x195   : > { %2217 = vmatprep.mubr.f32.mxu1 %v5442_v2  ;;  %v5196_v34 = vpack.c.bf16 %v3813_v27, %v3809_v26  ;;  %v3853_v24 = vld [vmem:[%s9169_s1 + $0x1b78] sm:$0xff] }
 0x196   : > { %4779 = vmatpush1.bf16.msra.mxu0 %v4778_v37  ;;  %v3819_v37 = vld [vmem:[%s9169_s1 + $0x1a68] sm:$0xff] }
 0x197   : > { %4979 = vmatpush1.bf16.msra.mxu1 %v4978_v40  ;;  %4981 = vmatprep.subr.bf16.mxu0 %v4980_v41  ;;  %v4998_v40 = vpack.c.bf16 %v3810_v32, %v3806_v31  ;;  %v5198_v41 = vpack.c.bf16 %v3812_v35, %v3808_v33  ;;  %v5000_v42 = vpack.c.bf16 %v3819_v37, %v3815_v36  ;;  %v3852_v32 = vld [vmem:[%s9169_s1 + $0x1b70] sm:$0xff]  ;;  %v3855_v33 = vld [vmem:[%s9169_s1 + $0x1b88] sm:$0xff]  ;;  %v3857_v35 = vld [vmem:[%s9169_s1 + $0x1b98] sm:$0xff] }
 0x198   : > { %5181 = vmatprep.subr.bf16.mxu1 %v5180_v45  ;;  %v3816_v45 = vld [vmem:[%s9169_s1 + $0x1a50] sm:$0xff]  ;;  %v5216_v31 = vpack.c.bf16 %v3853_v24, %v3849_v23  ;;  %v3861_v36 = vld [vmem:[%s9169_s1 + $0x1bb8] sm:$0xff] }
 0x199   : > { %3772 = vmatmul.mubr.msk.f32.vlgmr.msra.gmra.mrb[0].mxu0 %vm1082_vm1, %v224_v53  ;;  %v5220_v43 = vpack.c.bf16 %v3861_v36, %v3857_v35  ;;  %v3894_v35 = vld [vmem:[%s9169_s1 + $0x1cc0] sm:$0xff] }
 0x19a   : > { %3773 = vmatmul.mubr.msk.f32.vlgmr.msra.gmra.mrb[0].mxu1 %vm1082_vm1, %v224_v53  ;;  %4983 = vmatpush1.bf16.msra.mxu0 %v4982_v54  ;;  %v5202_v53 = vpack.c.bf16 %v3820_v47, %v3816_v45  ;;  %v5004_v54 = vpack.c.bf16 %v3827_v49, %v3823_v48  ;;  %v3863_v45 = vld [vmem:[%s9169_s1 + $0x1bc8] sm:$0xff]  ;;  %v3865_v47 = vld [vmem:[%s9169_s1 + $0x1bd8] sm:$0xff]  ;;  %v3898_v36 = vld [vmem:[%s9169_s1 + $0x1ce0] sm:$0xff] }
 0x19b   : > { %5183 = vmatpush1.bf16.msra.mxu1 %v5182_v55  ;;  %4985 = vmatprep.subr.bf16.mxu0 %v4984_v56  ;;  %v3822_v55 = vld [vmem:[%s9169_s1 + $0x1a80] sm:$0xff]  ;;  %v3869_v48 = vld [vmem:[%s9169_s1 + $0x1bf8] sm:$0xff] }
 0x19c   : > { %5185 = vmatprep.subr.bf16.mxu1 %v5184_v60  ;;  %2747 = vmatprep.mubr.f32.mxu0 %v2659_v3  ;;  %v3826_v56 = vld [vmem:[%s9169_s1 + $0x1aa0] sm:$0xff]  ;;  %v3831_v60 = vld [vmem:[%s9169_s1 + $0x1ac8] sm:$0xff] }
 0x19d   : > { %3031 = vmatprep.mubr.f32.mxu1 %v2659_v3  ;;  %v5006_v0 = vpack.c.bf16 %v3826_v56, %v3822_v55  ;;  %v5008_v3 = vpack.c.bf16 %v3835_v61, %v3831_v60  ;;  %v5224_v55 = vpack.c.bf16 %v3869_v48, %v3865_v47  ;;  %v3868_v56 = vld [vmem:[%s9169_s1 + $0x1bf0] sm:$0xff]  ;;  %v3877_v60 = vld [vmem:[%s9169_s1 + $0x1c38] sm:$0xff]  ;;  %v5042_v48 = vpack.c.bf16 %v3898_v36, %v3894_v35 }
 0x19e   : > { %4987 = vmatpush1.bf16.msra.mxu0 %v4986_v4  ;;  %v3830_v4 = vld [vmem:[%s9169_s1 + $0x1ac0] sm:$0xff]  ;;  %v3909_v47 = vld [vmem:[%s9169_s1 + $0x1d38] sm:$0xff]  ;;  %v3932_v36 = vld [vmem:[%s9169_s1 + $0x1df0] sm:$0xff] }
 0x19f   : > { %5187 = vmatpush1.bf16.msra.mxu1 %v5186_v5  ;;  %4989 = vmatprep.subr.bf16.mxu0 %v4988_v6  ;;  %v3834_v5 = vld [vmem:[%s9169_s1 + $0x1ae0] sm:$0xff]  ;;  %v3832_v6 = vld [vmem:[%s9169_s1 + $0x1ad0] sm:$0xff] }
 0x1a0   : > { %5189 = vmatprep.subr.bf16.mxu1 %v5188_v10  ;;  %v3843_v10 = vld [vmem:[%s9169_s1 + $0x1b28] sm:$0xff]  ;;  %v5010_v13 = vpack.c.bf16 %v3834_v5, %v3830_v4  ;;  %v5210_v14 = vpack.c.bf16 %v3836_v8, %v3832_v6  ;;  %v5228_v4 = vpack.c.bf16 %v3877_v60, %v3873_v59  ;;  %v3876_v5 = vld [vmem:[%s9169_s1 + $0x1c30] sm:$0xff]  ;;  %v3881_v8 = vld [vmem:[%s9169_s1 + $0x1c58] sm:$0xff] }
 0x1a1   : > { %v5012_v15 = vpack.c.bf16 %v3843_v10, %v3839_v9  ;;  %v3879_v6 = vld [vmem:[%s9169_s1 + $0x1c48] sm:$0xff]  ;;  %v3885_v9 = vld [vmem:[%s9169_s1 + $0x1c78] sm:$0xff]  ;;  %v3908_v59 = vld [vmem:[%s9169_s1 + $0x1d30] sm:$0xff] }
 0x1a2   : > { %4991 = vmatpush1.bf16.msra.mxu0 %v4990_v16  ;;  %v3838_v16 = vld [vmem:[%s9169_s1 + $0x1b00] sm:$0xff]  ;;  %v3911_v60 = vld [vmem:[%s9169_s1 + $0x1d48] sm:$0xff] }
 0x1a3   : > { %5191 = vmatpush1.bf16.msra.mxu1 %v5190_v17  ;;  %4993 = vmatprep.subr.bf16.mxu0 %v4992_v18  ;;  %v3842_v17 = vld [vmem:[%s9169_s1 + $0x1b20] sm:$0xff]  ;;  %v3840_v18 = vld [vmem:[%s9169_s1 + $0x1b10] sm:$0xff] }
 0x1a4   : > { %5193 = vmatprep.subr.bf16.mxu1 %v5192_v22  ;;  %v3851_v22 = vld [vmem:[%s9169_s1 + $0x1b68] sm:$0xff]  ;;  %v5014_v25 = vpack.c.bf16 %v3842_v17, %v3838_v16  ;;  %v5214_v26 = vpack.c.bf16 %v3844_v20, %v3840_v18  ;;  %v5232_v16 = vpack.c.bf16 %v3885_v9, %v3881_v8  ;;  %v3884_v17 = vld [vmem:[%s9169_s1 + $0x1c70] sm:$0xff]  ;;  %v3889_v20 = vld [vmem:[%s9169_s1 + $0x1c98] sm:$0xff] }
 0x1a5   : > { %v5016_v27 = vpack.c.bf16 %v3851_v22, %v3847_v21  ;;  %v3887_v18 = vld [vmem:[%s9169_s1 + $0x1c88] sm:$0xff]  ;;  %v3893_v21 = vld [vmem:[%s9169_s1 + $0x1cb8] sm:$0xff]  ;;  %v3914_v8 = vld [vmem:[%s9169_s1 + $0x1d60] sm:$0xff] }
 0x1a6   : > { %4995 = vmatpush1.bf16.msra.mxu0 %v4994_v28  ;;  %v3846_v28 = vld [vmem:[%s9169_s1 + $0x1b40] sm:$0xff]  ;;  %v3912_v9 = vld [vmem:[%s9169_s1 + $0x1d50] sm:$0xff] }
 0x1a7   : > { %5195 = vmatpush1.bf16.msra.mxu1 %v5194_v29  ;;  %4997 = vmatprep.subr.bf16.mxu0 %v4996_v30  ;;  %v3850_v29 = vld [vmem:[%s9169_s1 + $0x1b60] sm:$0xff]  ;;  %v3848_v30 = vld [vmem:[%s9169_s1 + $0x1b50] sm:$0xff] }
 0x1a8   : > { %5197 = vmatprep.subr.bf16.mxu1 %v5196_v34  ;;  %v3859_v34 = vld [vmem:[%s9169_s1 + $0x1ba8] sm:$0xff]  ;;  %v5018_v37 = vpack.c.bf16 %v3850_v29, %v3846_v28  ;;  %v5218_v38 = vpack.c.bf16 %v3852_v32, %v3848_v30  ;;  %v5236_v28 = vpack.c.bf16 %v3893_v21, %v3889_v20  ;;  %v3892_v29 = vld [vmem:[%s9169_s1 + $0x1cb0] sm:$0xff]  ;;  %v3897_v32 = vld [vmem:[%s9169_s1 + $0x1cd8] sm:$0xff] }
 0x1a9   : > { %v5020_v39 = vpack.c.bf16 %v3859_v34, %v3855_v33  ;;  %v3895_v30 = vld [vmem:[%s9169_s1 + $0x1cc8] sm:$0xff]  ;;  %v3901_v33 = vld [vmem:[%s9169_s1 + $0x1cf8] sm:$0xff]  ;;  %v3918_v20 = vld [vmem:[%s9169_s1 + $0x1d80] sm:$0xff] }
 0x1aa   : > { %4999 = vmatpush1.bf16.msra.mxu0 %v4998_v40  ;;  %v3854_v40 = vld [vmem:[%s9169_s1 + $0x1b80] sm:$0xff] }
 0x1ab   : > { %5199 = vmatpush1.bf16.msra.mxu1 %v5198_v41  ;;  %5001 = vmatprep.subr.bf16.mxu0 %v5000_v42  ;;  %v3858_v41 = vld [vmem:[%s9169_s1 + $0x1ba0] sm:$0xff]  ;;  %v3856_v42 = vld [vmem:[%s9169_s1 + $0x1b90] sm:$0xff] }
 0x1ac   : > { %5201 = vmatprep.subr.bf16.mxu1 %v5200_v46  ;;  %v3867_v46 = vld [vmem:[%s9169_s1 + $0x1be8] sm:$0xff]  ;;  %v5022_v49 = vpack.c.bf16 %v3858_v41, %v3854_v40  ;;  %v5222_v50 = vpack.c.bf16 %v3860_v44, %v3856_v42  ;;  %v2224_v40 = vld [vmem:[%s5768_s11] sm:$0xfc]  ;;  %v2231_v41 = vld [vmem:[%s5768_s11 + $0x38] sm:$0x3]  ;;  %v5240_v42 = vpack.c.bf16 %v3901_v33, %v3897_v32 }
 0x1ad   : > { %v5024_v51 = vpack.c.bf16 %v3867_v46, %v3863_v45  ;;  %v3903_v44 = vld [vmem:[%s9169_s1 + $0x1d08] sm:$0xff]  ;;  %v3905_v46 = vld [vmem:[%s9169_s1 + $0x1d18] sm:$0xff]  ;;  %v3922_v21 = vld [vmem:[%s9169_s1 + $0x1da0] sm:$0xff] }
 0x1ae   : > { %5003 = vmatpush1.bf16.msra.mxu0 %v5002_v52  ;;  %v3862_v52 = vld [vmem:[%s9169_s1 + $0x1bc0] sm:$0xff]  ;;  %v3907_v45 = vld [vmem:[%s9169_s1 + $0x1d28] sm:$0xff] }
 0x1af   : > { %5203 = vmatpush1.bf16.msra.mxu1 %v5202_v53  ;;  %5005 = vmatprep.subr.bf16.mxu0 %v5004_v54  ;;  %v3866_v53 = vld [vmem:[%s9169_s1 + $0x1be0] sm:$0xff]  ;;  %v3864_v54 = vld [vmem:[%s9169_s1 + $0x1bd0] sm:$0xff] }
 0x1b0   : > { %5205 = vmatprep.subr.bf16.mxu1 %v5204_v58  ;;  %v3875_v58 = vld [vmem:[%s9169_s1 + $0x1c28] sm:$0xff]  ;;  %v5026_v61 = vpack.c.bf16 %v3866_v53, %v3862_v52  ;;  %v5226_v62 = vpack.c.bf16 %v3868_v56, %v3864_v54  ;;  %v2234_v52 = vld [vmem:[%s5768_s11 + $0x50] sm:$0x3]  ;;  %v5044_v54 = vpack.c.bf16 %v3907_v45, %v3903_v44  ;;  %v3906_v56 = vld [vmem:[%s9169_s1 + $0x1d20] sm:$0xff] }
 0x1b1   : > { %v5028_v63 = vpack.c.bf16 %v3875_v58, %v3871_v57  ;;  %v3904_v57 = vld [vmem:[%s9169_s1 + $0x1d10] sm:$0xff]  ;;  %v5244_v58 = vpack.c.bf16 %v3909_v47, %v3905_v46  ;;  %v3926_v32 = vld [vmem:[%s9169_s1 + $0x1dc0] sm:$0xff] }
 0x1b2   : > { %5007 = vmatpush1.bf16.msra.mxu0 %v5006_v0  ;;  %v3870_v0 = vld [vmem:[%s9169_s1 + $0x1c00] sm:$0xff]  ;;  %v3936_v46 = vld [vmem:[%s9169_s1 + $0x1e10] sm:$0xff] }
 0x1b3   : > { %5207 = vmatpush1.bf16.msra.mxu1 %v5206_v1  ;;  %5009 = vmatprep.subr.bf16.mxu0 %v5008_v3  ;;  %v3874_v1 = vld [vmem:[%s9169_s1 + $0x1c20] sm:$0xff]  ;;  %v3872_v3 = vld [vmem:[%s9169_s1 + $0x1c10] sm:$0xff] }
 0x1b4   : > { %5209 = vmatprep.subr.bf16.mxu1 %v5208_v7  ;;  %v3883_v7 = vld [vmem:[%s9169_s1 + $0x1c68] sm:$0xff]  ;;  %v5030_v10 = vpack.c.bf16 %v3874_v1, %v3870_v0  ;;  %v5230_v11 = vpack.c.bf16 %v3876_v5, %v3872_v3  ;;  %v2664_v1 = vrot.slane %v2234_v52, 2  ;;  %v5246_v5 = vpack.c.bf16 %v3908_v59, %v3904_v57  ;;  %v3930_v33 = vld [vmem:[%s9169_s1 + $0x1de0] sm:$0xff]  ;;  %v3949_v52 = vld [vmem:[%s9169_s1 + $0x1e78] sm:$0xff] }
 0x1b5   : > { %v5032_v12 = vpack.c.bf16 %v3883_v7, %v3879_v6  ;;  %v3910_v7 = vld [vmem:[%s9169_s1 + $0x1d40] sm:$0xff] }
 0x1b6   : > { %5011 = vmatpush1.bf16.msra.mxu0 %v5010_v13  ;;  %v3878_v13 = vld [vmem:[%s9169_s1 + $0x1c40] sm:$0xff] }
 0x1b7   : > { %5211 = vmatpush1.bf16.msra.mxu1 %v5210_v14  ;;  %5013 = vmatprep.subr.bf16.mxu0 %v5012_v15  ;;  %v3882_v14 = vld [vmem:[%s9169_s1 + $0x1c60] sm:$0xff]  ;;  %v3880_v15 = vld [vmem:[%s9169_s1 + $0x1c50] sm:$0xff] }
 0x1b8   : > { %5213 = vmatprep.subr.bf16.mxu1 %v5212_v19  ;;  %v3891_v19 = vld [vmem:[%s9169_s1 + $0x1ca8] sm:$0xff]  ;;  %v5034_v22 = vpack.c.bf16 %v3882_v14, %v3878_v13  ;;  %v5234_v23 = vpack.c.bf16 %v3884_v17, %v3880_v15  ;;  %v3921_v14 = vld [vmem:[%s9169_s1 + $0x1d98] sm:$0xff]  ;;  %v5050_v17 = vpack.c.bf16 %v3914_v8, %v3910_v7  ;;  %v3934_v44 = vld [vmem:[%s9169_s1 + $0x1e00] sm:$0xff] }
 0x1b9   : > { %v5036_v24 = vpack.c.bf16 %v3891_v19, %v3887_v18  ;;  %v3923_v13 = vld [vmem:[%s9169_s1 + $0x1da8] sm:$0xff]  ;;  %v3925_v15 = vld [vmem:[%s9169_s1 + $0x1db8] sm:$0xff]  ;;  %v3938_v45 = vld [vmem:[%s9169_s1 + $0x1e20] sm:$0xff] }
 0x1ba   : > { %5015 = vmatpush1.bf16.msra.mxu0 %v5014_v25  ;;  %v3886_v25 = vld [vmem:[%s9169_s1 + $0x1c80] sm:$0xff]  ;;  %v3952_v7 = vld [vmem:[%s9169_s1 + $0x1e90] sm:$0xff] }
 0x1bb   : > { %5215 = vmatpush1.bf16.msra.mxu1 %v5214_v26  ;;  %5017 = vmatprep.subr.bf16.mxu0 %v5016_v27  ;;  %v3890_v26 = vld [vmem:[%s9169_s1 + $0x1ca0] sm:$0xff]  ;;  %v3888_v27 = vld [vmem:[%s9169_s1 + $0x1c90] sm:$0xff] }
 0x1bc   : > { %5217 = vmatprep.subr.bf16.mxu1 %v5216_v31  ;;  %v3899_v31 = vld [vmem:[%s9169_s1 + $0x1ce8] sm:$0xff]  ;;  %v5038_v34 = vpack.c.bf16 %v3890_v26, %v3886_v25  ;;  %v3946_v57 = vld [vmem:[%s9169_s1 + $0x1e60] sm:$0xff] }
 0x1bd   : > { %v3927_v25 = vld [vmem:[%s9169_s1 + $0x1dc8] sm:$0xff] }
 0x1be   : > { %5019 = vmatpush1.bf16.msra.mxu0 %v5018_v37  ;;  %v5238_v37 = vpack.c.bf16 %v3892_v29, %v3888_v27  ;;  %v3931_v26 = vld [vmem:[%s9169_s1 + $0x1de8] sm:$0xff]  ;;  %v3929_v27 = vld [vmem:[%s9169_s1 + $0x1dd8] sm:$0xff]  ;;  %v5054_v29 = vpack.c.bf16 %v3922_v21, %v3918_v20  ;;  %v3964_v21 = vld [vmem:[%s9169_s1 + $0x1ef0] sm:$0xff] }
 0x1bf   : > { %5219 = vmatpush1.bf16.msra.mxu1 %v5218_v38  ;;  %5021 = vmatprep.subr.bf16.mxu0 %v5020_v39  ;;  %v5040_v38 = vpack.c.bf16 %v3899_v31, %v3895_v30  ;;  %v3896_v39 = vld [vmem:[%s9169_s1 + $0x1cd0] sm:$0xff]  ;;  %v5056_v31 = vpack.c.bf16 %v3931_v26, %v3927_v25  ;;  %v3973_v25 = vld [vmem:[%s9169_s1 + $0x1f38] sm:$0xff] }
 0x1c0   : > { %5221 = vmatprep.subr.bf16.mxu1 %v5220_v43  ;;  %v3900_v43 = vld [vmem:[%s9169_s1 + $0x1cf0] sm:$0xff] }
 0x1c1   : > { %v5242_v53 = vpack.c.bf16 %v3900_v43, %v3896_v39  ;;  %v3937_v39 = vld [vmem:[%s9169_s1 + $0x1e18] sm:$0xff] }
 0x1c2   : > { %5023 = vmatpush1.bf16.msra.mxu0 %v5022_v49  ;;  %v2654_v49 = vrot.slane %v2224_v40, 2  ;;  %v3941_v40 = vld [vmem:[%s9169_s1 + $0x1e38] sm:$0xff] }
 0x1c3   : > { %5223 = vmatpush1.bf16.msra.mxu1 %v5222_v50  ;;  %5025 = vmatprep.subr.bf16.mxu0 %v5024_v51  ;;  %v2655_v50 = vrot.slane %v2231_v41, 2  ;;  %v2227_v51 = vld [vmem:[%s5768_s11 + $0x18] sm:$0xfc]  ;;  %v5058_v41 = vpack.c.bf16 %v3930_v33, %v3926_v32  ;;  %v5260_v47 = vpack.c.bf16 %v3941_v40, %v3937_v39  ;;  %v3972_v33 = vld [vmem:[%s9169_s1 + $0x1f30] sm:$0xff] }
 0x1c4   : > { %5225 = vmatprep.subr.bf16.mxu1 %v5224_v55  ;;  %v3902_v55 = vld [vmem:[%s9169_s1 + $0x1d00] sm:$0xff]  ;;  %v2663_v0 = vrot.slane %v2227_v51, 2  ;;  %v3945_v51 = vld [vmem:[%s9169_s1 + $0x1e58] sm:$0xff] }
 0x1c5   : > { %v2656_v3 = vsel %vm2653_vm2, %v2654_v49, %v2655_v50  ;;  %v3943_v49 = vld [vmem:[%s9169_s1 + $0x1e48] sm:$0xff]  ;;  %v5264_v59 = vpack.c.bf16 %v3949_v52, %v3945_v51 }
 0x1c6   : > { %5027 = vmatpush1.bf16.msra.mxu0 %v5026_v61  ;;  %v3915_v61 = vld [vmem:[%s9169_s1 + $0x1d68] sm:$0xff] }
 0x1c7   : > { %5227 = vmatpush1.bf16.msra.mxu1 %v5226_v62  ;;  %5029 = vmatprep.subr.bf16.mxu0 %v5028_v63  ;;  %v3913_v62 = vld [vmem:[%s9169_s1 + $0x1d58] sm:$0xff]  ;;  %v5048_v6 = vpack.c.bf16 %v3915_v61, %v3911_v60  ;;  %v3947_v50 = vld [vmem:[%s9169_s1 + $0x1e68] sm:$0xff]  ;;  %v3948_v60 = vld [vmem:[%s9169_s1 + $0x1e70] sm:$0xff] }
 0x1c8   : > { %5229 = vmatprep.subr.bf16.mxu1 %v5228_v4  ;;  %v3917_v63 = vld [vmem:[%s9169_s1 + $0x1d78] sm:$0xff]  ;;  %v5046_v4 = vpack.c.bf16 %v3906_v56, %v3902_v55  ;;  %v5064_v55 = vpack.c.bf16 %v3947_v50, %v3943_v49  ;;  %v3942_v56 = vld [vmem:[%s9169_s1 + $0x1e40] sm:$0xff]  ;;  %v3951_v61 = vld [vmem:[%s9169_s1 + $0x1e88] sm:$0xff] }
 0x1c9   : > { %v3989_v49 = vld [vmem:[%s9169_s1 + $0x1fb8] sm:$0xff] }
 0x1ca   : > { %5031 = vmatpush1.bf16.msra.mxu0 %v5030_v10  ;;  %v5248_v10 = vpack.c.bf16 %v3917_v63, %v3913_v62  ;;  %v3955_v62 = vld [vmem:[%s9169_s1 + $0x1ea8] sm:$0xff]  ;;  %v3953_v63 = vld [vmem:[%s9169_s1 + $0x1e98] sm:$0xff] }
 0x1cb   : > { %5231 = vmatpush1.bf16.msra.mxu1 %v5230_v11  ;;  %5033 = vmatprep.subr.bf16.mxu0 %v5032_v12  ;;  %v3916_v11 = vld [vmem:[%s9169_s1 + $0x1d70] sm:$0xff]  ;;  %v3919_v12 = vld [vmem:[%s9169_s1 + $0x1d88] sm:$0xff] }
 0x1cc   : > { %5233 = vmatprep.subr.bf16.mxu1 %v5232_v16  ;;  %v2665_v16 = vsel %vm2653_vm2, %v2663_v0, %v2664_v1  ;;  %v5250_v18 = vpack.c.bf16 %v3916_v11, %v3912_v9  ;;  %v5052_v19 = vpack.c.bf16 %v3923_v13, %v3919_v12  ;;  %v3957_v0 = vld [vmem:[%s9169_s1 + $0x1eb8] sm:$0xff]  ;;  %v5066_v1 = vpack.c.bf16 %v3946_v57, %v3942_v56  ;;  %v3956_v9 = vld [vmem:[%s9169_s1 + $0x1eb0] sm:$0xff]  ;;  %v3963_v11 = vld [vmem:[%s9169_s1 + $0x1ee8] sm:$0xff] }
 0x1cd   : > { %v5268_v8 = vpack.c.bf16 %v3957_v0, %v3953_v63  ;;  %v3961_v12 = vld [vmem:[%s9169_s1 + $0x1ed8] sm:$0xff]  ;;  %v3988_v57 = vld [vmem:[%s9169_s1 + $0x1fb0] sm:$0xff] }
 0x1ce   : > { %5035 = vmatpush1.bf16.msra.mxu0 %v5034_v22  ;;  %v3920_v22 = vld [vmem:[%s9169_s1 + $0x1d90] sm:$0xff]  ;;  %v3965_v13 = vld [vmem:[%s9169_s1 + $0x1ef8] sm:$0xff] }
 0x1cf   : > { %5235 = vmatpush1.bf16.msra.mxu1 %v5234_v23  ;;  %5037 = vmatprep.subr.bf16.mxu0 %v5036_v24  ;;  %v5252_v23 = vpack.c.bf16 %v3925_v15, %v3921_v14  ;;  %v3924_v24 = vld [vmem:[%s9169_s1 + $0x1db0] sm:$0xff]  ;;  %v5270_v15 = vpack.c.bf16 %v3956_v9, %v3952_v7  ;;  %v5272_v20 = vpack.c.bf16 %v3965_v13, %v3961_v12  ;;  %v3999_v7 = vld [vmem:[%s9169_s1 + $0x2008] sm:$0xff]  ;;  %v4001_v9 = vld [vmem:[%s9169_s1 + $0x2018] sm:$0xff] }
 0x1d0   : > { %5237 = vmatprep.subr.bf16.mxu1 %v5236_v28  ;;  %v3933_v28 = vld [vmem:[%s9169_s1 + $0x1df8] sm:$0xff]  ;;  %v5254_v30 = vpack.c.bf16 %v3924_v24, %v3920_v22  ;;  %v3967_v22 = vld [vmem:[%s9169_s1 + $0x1f08] sm:$0xff] }
 0x1d1   : > { %v5256_v35 = vpack.c.bf16 %v3933_v28, %v3929_v27  ;;  %v3969_v24 = vld [vmem:[%s9169_s1 + $0x1f18] sm:$0xff] }
 0x1d2   : > { %5039 = vmatpush1.bf16.msra.mxu0 %v5038_v34  ;;  %v3928_v34 = vld [vmem:[%s9169_s1 + $0x1dd0] sm:$0xff]  ;;  %v5276_v32 = vpack.c.bf16 %v3973_v25, %v3969_v24 }
 0x1d3   : > { %5239 = vmatpush1.bf16.msra.mxu1 %v5238_v37  ;;  %5041 = vmatprep.subr.bf16.mxu0 %v5040_v38  ;;  %v3935_v37 = vld [vmem:[%s9169_s1 + $0x1e08] sm:$0xff] }
 0x1d4   : > { %5241 = vmatprep.subr.bf16.mxu1 %v5240_v42  ;;  %v3939_v38 = vld [vmem:[%s9169_s1 + $0x1e28] sm:$0xff]  ;;  %v5258_v42 = vpack.c.bf16 %v3932_v36, %v3928_v34  ;;  %v3977_v36 = vld [vmem:[%s9169_s1 + $0x1f58] sm:$0xff] }
 0x1d5   : > { %v5060_v43 = vpack.c.bf16 %v3939_v38, %v3935_v37  ;;  %v3975_v34 = vld [vmem:[%s9169_s1 + $0x1f48] sm:$0xff]  ;;  %v3981_v37 = vld [vmem:[%s9169_s1 + $0x1f78] sm:$0xff] }
 0x1d6   : > { %5043 = vmatpush1.bf16.msra.mxu0 %v5042_v48  ;;  %v3940_v48 = vld [vmem:[%s9169_s1 + $0x1e30] sm:$0xff] }
 0x1d7   : > { %5243 = vmatpush1.bf16.msra.mxu1 %v5242_v53  ;;  %5045 = vmatprep.subr.bf16.mxu0 %v5044_v54  ;;  %v5062_v53 = vpack.c.bf16 %v3938_v45, %v3934_v44  ;;  %v5262_v54 = vpack.c.bf16 %v3940_v48, %v3936_v46  ;;  %v5280_v44 = vpack.c.bf16 %v3981_v37, %v3977_v36  ;;  %v3980_v45 = vld [vmem:[%s9169_s1 + $0x1f70] sm:$0xff]  ;;  %v3983_v46 = vld [vmem:[%s9169_s1 + $0x1f88] sm:$0xff]  ;;  %v3985_v48 = vld [vmem:[%s9169_s1 + $0x1f98] sm:$0xff] }
 0x1d8   : > { %5245 = vmatprep.subr.bf16.mxu1 %v5244_v58  ;;  %v3944_v58 = vld [vmem:[%s9169_s1 + $0x1e50] sm:$0xff]  ;;  %v5284_v56 = vpack.c.bf16 %v3989_v49, %v3985_v48  ;;  %v4022_v48 = vld [vmem:[%s9169_s1 + $0x20c0] sm:$0xff] }
 0x1d9   : > { %2748 = vmatmul.mubr.f32.vlgmr.msra.gmra.mrb[0].mxu0 %v2656_v3  ;;  %v4026_v49 = vld [vmem:[%s9169_s1 + $0x20e0] sm:$0xff] }
 0x1da   : > { %5047 = vmatpush1.bf16.msra.mxu0 %v5046_v4  ;;  %3032 = vmatmul.mubr.f32.vlgmr.msra.gmra.mrb[0].mxu1 %v2656_v3  ;;  %v5266_v3 = vpack.c.bf16 %v3948_v60, %v3944_v58  ;;  %v5068_v4 = vpack.c.bf16 %v3955_v62, %v3951_v61  ;;  %v3991_v58 = vld [vmem:[%s9169_s1 + $0x1fc8] sm:$0xff]  ;;  %v3993_v60 = vld [vmem:[%s9169_s1 + $0x1fd8] sm:$0xff] }
 0x1db   : > { %5247 = vmatpush1.bf16.msra.mxu1 %v5246_v5  ;;  %5049 = vmatprep.subr.bf16.mxu0 %v5048_v6  ;;  %v3950_v5 = vld [vmem:[%s9169_s1 + $0x1e80] sm:$0xff]  ;;  %v3997_v61 = vld [vmem:[%s9169_s1 + $0x1ff8] sm:$0xff] }
 0x1dc   : > { %5249 = vmatprep.subr.bf16.mxu1 %v5248_v10  ;;  %2818 = vmatprep.mubr.f32.mxu0 %v2665_v16  ;;  %v3954_v6 = vld [vmem:[%s9169_s1 + $0x1ea0] sm:$0xff]  ;;  %v3959_v10 = vld [vmem:[%s9169_s1 + $0x1ec8] sm:$0xff] }
 0x1dd   : > { %3102 = vmatprep.mubr.f32.mxu1 %v2665_v16  ;;  %v5070_v14 = vpack.c.bf16 %v3954_v6, %v3950_v5  ;;  %v5072_v16 = vpack.c.bf16 %v3963_v11, %v3959_v10  ;;  %v5288_v5 = vpack.c.bf16 %v3997_v61, %v3993_v60  ;;  %v3996_v6 = vld [vmem:[%s9169_s1 + $0x1ff0] sm:$0xff]  ;;  %v4005_v10 = vld [vmem:[%s9169_s1 + $0x2038] sm:$0xff]  ;;  %v5106_v61 = vpack.c.bf16 %v4026_v49, %v4022_v48 }
 0x1de   : > { %5051 = vmatpush1.bf16.msra.mxu0 %v5050_v17  ;;  %v3958_v17 = vld [vmem:[%s9169_s1 + $0x1ec0] sm:$0xff]  ;;  %v4037_v60 = vld [vmem:[%s9169_s1 + $0x2138] sm:$0xff]  ;;  %v4060_v49 = vld [vmem:[%s9169_s1 + $0x21f0] sm:$0xff] }
 0x1df   : > { %5251 = vmatpush1.bf16.msra.mxu1 %v5250_v18  ;;  %5053 = vmatprep.subr.bf16.mxu0 %v5052_v19  ;;  %v3962_v18 = vld [vmem:[%s9169_s1 + $0x1ee0] sm:$0xff]  ;;  %v3960_v19 = vld [vmem:[%s9169_s1 + $0x1ed0] sm:$0xff] }
 0x1e0   : > { %5253 = vmatprep.subr.bf16.mxu1 %v5252_v23  ;;  %v3971_v23 = vld [vmem:[%s9169_s1 + $0x1f28] sm:$0xff]  ;;  %v5074_v26 = vpack.c.bf16 %v3962_v18, %v3958_v17  ;;  %v5274_v27 = vpack.c.bf16 %v3964_v21, %v3960_v19  ;;  %v5292_v17 = vpack.c.bf16 %v4005_v10, %v4001_v9  ;;  %v4004_v18 = vld [vmem:[%s9169_s1 + $0x2030] sm:$0xff]  ;;  %v4009_v21 = vld [vmem:[%s9169_s1 + $0x2058] sm:$0xff] }
 0x1e1   : > { %v5076_v28 = vpack.c.bf16 %v3971_v23, %v3967_v22  ;;  %v4007_v19 = vld [vmem:[%s9169_s1 + $0x2048] sm:$0xff]  ;;  %v4013_v22 = vld [vmem:[%s9169_s1 + $0x2078] sm:$0xff]  ;;  %v4036_v9 = vld [vmem:[%s9169_s1 + $0x2130] sm:$0xff] }
 0x1e2   : > { %5055 = vmatpush1.bf16.msra.mxu0 %v5054_v29  ;;  %v3966_v29 = vld [vmem:[%s9169_s1 + $0x1f00] sm:$0xff]  ;;  %v4039_v10 = vld [vmem:[%s9169_s1 + $0x2148] sm:$0xff] }
 0x1e3   : > { %5255 = vmatpush1.bf16.msra.mxu1 %v5254_v30  ;;  %5057 = vmatprep.subr.bf16.mxu0 %v5056_v31  ;;  %v3970_v30 = vld [vmem:[%s9169_s1 + $0x1f20] sm:$0xff]  ;;  %v3968_v31 = vld [vmem:[%s9169_s1 + $0x1f10] sm:$0xff] }
 0x1e4   : > { %5257 = vmatprep.subr.bf16.mxu1 %v5256_v35  ;;  %v3979_v35 = vld [vmem:[%s9169_s1 + $0x1f68] sm:$0xff]  ;;  %v5078_v38 = vpack.c.bf16 %v3970_v30, %v3966_v29  ;;  %v5278_v39 = vpack.c.bf16 %v3972_v33, %v3968_v31  ;;  %v5296_v29 = vpack.c.bf16 %v4013_v22, %v4009_v21  ;;  %v4012_v30 = vld [vmem:[%s9169_s1 + $0x2070] sm:$0xff]  ;;  %v4017_v33 = vld [vmem:[%s9169_s1 + $0x2098] sm:$0xff] }
 0x1e5   : > { %v5080_v40 = vpack.c.bf16 %v3979_v35, %v3975_v34  ;;  %v4015_v31 = vld [vmem:[%s9169_s1 + $0x2088] sm:$0xff]  ;;  %v4021_v34 = vld [vmem:[%s9169_s1 + $0x20b8] sm:$0xff]  ;;  %v4042_v21 = vld [vmem:[%s9169_s1 + $0x2160] sm:$0xff] }
 0x1e6   : > { %5059 = vmatpush1.bf16.msra.mxu0 %v5058_v41  ;;  %v3974_v41 = vld [vmem:[%s9169_s1 + $0x1f40] sm:$0xff]  ;;  %v4040_v22 = vld [vmem:[%s9169_s1 + $0x2150] sm:$0xff] }
 0x1e7   : > { %5259 = vmatpush1.bf16.msra.mxu1 %v5258_v42  ;;  %5061 = vmatprep.subr.bf16.mxu0 %v5060_v43  ;;  %v3978_v42 = vld [vmem:[%s9169_s1 + $0x1f60] sm:$0xff]  ;;  %v3976_v43 = vld [vmem:[%s9169_s1 + $0x1f50] sm:$0xff] }
 0x1e8   : > { %5261 = vmatprep.subr.bf16.mxu1 %v5260_v47  ;;  %v3987_v47 = vld [vmem:[%s9169_s1 + $0x1fa8] sm:$0xff]  ;;  %v5082_v50 = vpack.c.bf16 %v3978_v42, %v3974_v41  ;;  %v5282_v51 = vpack.c.bf16 %v3980_v45, %v3976_v43  ;;  %v5300_v41 = vpack.c.bf16 %v4021_v34, %v4017_v33  ;;  %v4020_v42 = vld [vmem:[%s9169_s1 + $0x20b0] sm:$0xff]  ;;  %v4025_v45 = vld [vmem:[%s9169_s1 + $0x20d8] sm:$0xff] }
 0x1e9   : > { %v5084_v52 = vpack.c.bf16 %v3987_v47, %v3983_v46  ;;  %v4023_v43 = vld [vmem:[%s9169_s1 + $0x20c8] sm:$0xff]  ;;  %v4029_v46 = vld [vmem:[%s9169_s1 + $0x20f8] sm:$0xff]  ;;  %v4046_v33 = vld [vmem:[%s9169_s1 + $0x2180] sm:$0xff] }
 0x1ea   : > { %5063 = vmatpush1.bf16.msra.mxu0 %v5062_v53  ;;  %v3982_v53 = vld [vmem:[%s9169_s1 + $0x1f80] sm:$0xff] }
 0x1eb   : > { %5263 = vmatpush1.bf16.msra.mxu1 %v5262_v54  ;;  %5065 = vmatprep.subr.bf16.mxu0 %v5064_v55  ;;  %v3986_v54 = vld [vmem:[%s9169_s1 + $0x1fa0] sm:$0xff]  ;;  %v3984_v55 = vld [vmem:[%s9169_s1 + $0x1f90] sm:$0xff] }
 0x1ec   : > { %5265 = vmatprep.subr.bf16.mxu1 %v5264_v59  ;;  %v3995_v59 = vld [vmem:[%s9169_s1 + $0x1fe8] sm:$0xff]  ;;  %v5086_v62 = vpack.c.bf16 %v3986_v54, %v3982_v53  ;;  %v5286_v63 = vpack.c.bf16 %v3988_v57, %v3984_v55  ;;  %v2226_v53 = vld [vmem:[%s5768_s11 + $0x10] sm:$0xfc]  ;;  %v5304_v55 = vpack.c.bf16 %v4029_v46, %v4025_v45  ;;  %v4050_v34 = vld [vmem:[%s9169_s1 + $0x21a0] sm:$0xff] }
 0x1ed   : > { %v5088_v0 = vpack.c.bf16 %v3995_v59, %v3991_v58  ;;  %v2233_v54 = vld [vmem:[%s5768_s11 + $0x48] sm:$0x3]  ;;  %v4033_v59 = vld [vmem:[%s9169_s1 + $0x2118] sm:$0xff]  ;;  %v4054_v45 = vld [vmem:[%s9169_s1 + $0x21c0] sm:$0xff] }
 0x1ee   : > { %5067 = vmatpush1.bf16.msra.mxu0 %v5066_v1  ;;  %v3990_v1 = vld [vmem:[%s9169_s1 + $0x1fc0] sm:$0xff]  ;;  %v4031_v57 = vld [vmem:[%s9169_s1 + $0x2108] sm:$0xff] }
 0x1ef   : > { %5267 = vmatpush1.bf16.msra.mxu1 %v5266_v3  ;;  %5069 = vmatprep.subr.bf16.mxu0 %v5068_v4  ;;  %v3994_v3 = vld [vmem:[%s9169_s1 + $0x1fe0] sm:$0xff]  ;;  %v3992_v4 = vld [vmem:[%s9169_s1 + $0x1fd0] sm:$0xff]  ;;  %v4035_v58 = vld [vmem:[%s9169_s1 + $0x2128] sm:$0xff] }
 0x1f0   : > { %5269 = vmatprep.subr.bf16.mxu1 %v5268_v8  ;;  %v4003_v8 = vld [vmem:[%s9169_s1 + $0x2028] sm:$0xff]  ;;  %v5090_v11 = vpack.c.bf16 %v3994_v3, %v3990_v1  ;;  %v5290_v12 = vpack.c.bf16 %v3996_v6, %v3992_v4  ;;  %v2236_v1 = vld [vmem:[%s5768_s11 + $0x60] sm:$0x3]  ;;  %v5108_v4 = vpack.c.bf16 %v4035_v58, %v4031_v57 }
 0x1f1   : > { %v5092_v13 = vpack.c.bf16 %v4003_v8, %v3999_v7  ;;  %v4034_v6 = vld [vmem:[%s9169_s1 + $0x2120] sm:$0xff]  ;;  %v4032_v7 = vld [vmem:[%s9169_s1 + $0x2110] sm:$0xff]  ;;  %v5308_v8 = vpack.c.bf16 %v4037_v60, %v4033_v59 }
 0x1f2   : > { %5071 = vmatpush1.bf16.msra.mxu0 %v5070_v14  ;;  %v3998_v14 = vld [vmem:[%s9169_s1 + $0x2000] sm:$0xff]  ;;  %v4064_v59 = vld [vmem:[%s9169_s1 + $0x2210] sm:$0xff] }
 0x1f3   : > { %5271 = vmatpush1.bf16.msra.mxu1 %v5270_v15  ;;  %5073 = vmatprep.subr.bf16.mxu0 %v5072_v16  ;;  %v4002_v15 = vld [vmem:[%s9169_s1 + $0x2020] sm:$0xff]  ;;  %v4000_v16 = vld [vmem:[%s9169_s1 + $0x2010] sm:$0xff] }
 0x1f4   : > { %5273 = vmatprep.subr.bf16.mxu1 %v5272_v20  ;;  %v4011_v20 = vld [vmem:[%s9169_s1 + $0x2068] sm:$0xff]  ;;  %v5094_v23 = vpack.c.bf16 %v4002_v15, %v3998_v14  ;;  %v5294_v24 = vpack.c.bf16 %v4004_v18, %v4000_v16  ;;  %v2670_v15 = vrot.slane %v2236_v1, 2  ;;  %v5310_v18 = vpack.c.bf16 %v4036_v9, %v4032_v7  ;;  %v4058_v46 = vld [vmem:[%s9169_s1 + $0x21e0] sm:$0xff]  ;;  %v4077_v1 = vld [vmem:[%s9169_s1 + $0x2278] sm:$0xff] }
 0x1f5   : > { %v5096_v25 = vpack.c.bf16 %v4011_v20, %v4007_v19  ;;  %v4038_v20 = vld [vmem:[%s9169_s1 + $0x2140] sm:$0xff] }
 0x1f6   : > { %5075 = vmatpush1.bf16.msra.mxu0 %v5074_v26  ;;  %v4006_v26 = vld [vmem:[%s9169_s1 + $0x2040] sm:$0xff] }
 0x1f7   : > { %5275 = vmatpush1.bf16.msra.mxu1 %v5274_v27  ;;  %5077 = vmatprep.subr.bf16.mxu0 %v5076_v28  ;;  %v4010_v27 = vld [vmem:[%s9169_s1 + $0x2060] sm:$0xff]  ;;  %v4008_v28 = vld [vmem:[%s9169_s1 + $0x2050] sm:$0xff] }
 0x1f8   : > { %5277 = vmatprep.subr.bf16.mxu1 %v5276_v32  ;;  %v4019_v32 = vld [vmem:[%s9169_s1 + $0x20a8] sm:$0xff]  ;;  %v5098_v35 = vpack.c.bf16 %v4010_v27, %v4006_v26  ;;  %v5298_v36 = vpack.c.bf16 %v4012_v30, %v4008_v28  ;;  %v4049_v27 = vld [vmem:[%s9169_s1 + $0x2198] sm:$0xff]  ;;  %v5114_v30 = vpack.c.bf16 %v4042_v21, %v4038_v20  ;;  %v4062_v57 = vld [vmem:[%s9169_s1 + $0x2200] sm:$0xff] }
 0x1f9   : > { %v5100_v37 = vpack.c.bf16 %v4019_v32, %v4015_v31  ;;  %v4051_v26 = vld [vmem:[%s9169_s1 + $0x21a8] sm:$0xff]  ;;  %v4053_v28 = vld [vmem:[%s9169_s1 + $0x21b8] sm:$0xff]  ;;  %v4066_v58 = vld [vmem:[%s9169_s1 + $0x2220] sm:$0xff] }
 0x1fa   : > { %5079 = vmatpush1.bf16.msra.mxu0 %v5078_v38  ;;  %v4014_v38 = vld [vmem:[%s9169_s1 + $0x2080] sm:$0xff]  ;;  %v4080_v20 = vld [vmem:[%s9169_s1 + $0x2290] sm:$0xff] }
 0x1fb   : > { %5279 = vmatpush1.bf16.msra.mxu1 %v5278_v39  ;;  %5081 = vmatprep.subr.bf16.mxu0 %v5080_v40  ;;  %v4018_v39 = vld [vmem:[%s9169_s1 + $0x20a0] sm:$0xff]  ;;  %v4016_v40 = vld [vmem:[%s9169_s1 + $0x2090] sm:$0xff] }
 0x1fc   : > { %5281 = vmatprep.subr.bf16.mxu1 %v5280_v44  ;;  %v4027_v44 = vld [vmem:[%s9169_s1 + $0x20e8] sm:$0xff]  ;;  %v5102_v47 = vpack.c.bf16 %v4018_v39, %v4014_v38  ;;  %v4074_v7 = vld [vmem:[%s9169_s1 + $0x2260] sm:$0xff] }
 0x1fd   : > { %v4055_v38 = vld [vmem:[%s9169_s1 + $0x21c8] sm:$0xff] }
 0x1fe   : > { %5083 = vmatpush1.bf16.msra.mxu0 %v5082_v50  ;;  %v5302_v50 = vpack.c.bf16 %v4020_v42, %v4016_v40  ;;  %v4059_v39 = vld [vmem:[%s9169_s1 + $0x21e8] sm:$0xff]  ;;  %v4057_v40 = vld [vmem:[%s9169_s1 + $0x21d8] sm:$0xff]  ;;  %v5118_v42 = vpack.c.bf16 %v4050_v34, %v4046_v33  ;;  %v4092_v34 = vld [vmem:[%s9169_s1 + $0x22f0] sm:$0xff] }
 0x1ff   : > { %5283 = vmatpush1.bf16.msra.mxu1 %v5282_v51  ;;  %5085 = vmatprep.subr.bf16.mxu0 %v5084_v52  ;;  %v5104_v51 = vpack.c.bf16 %v4027_v44, %v4023_v43  ;;  %v4024_v52 = vld [vmem:[%s9169_s1 + $0x20d0] sm:$0xff]  ;;  %v5120_v44 = vpack.c.bf16 %v4059_v39, %v4055_v38  ;;  %v4101_v38 = vld [vmem:[%s9169_s1 + $0x2338] sm:$0xff] }
 0x200   : > { %5285 = vmatprep.subr.bf16.mxu1 %v5284_v56  ;;  %v4028_v56 = vld [vmem:[%s9169_s1 + $0x20f0] sm:$0xff] }
 0x201   : > { %v5306_v3 = vpack.c.bf16 %v4028_v56, %v4024_v52  ;;  %v4065_v52 = vld [vmem:[%s9169_s1 + $0x2218] sm:$0xff] }
 0x202   : > { %5087 = vmatpush1.bf16.msra.mxu0 %v5086_v62  ;;  %v2660_v62 = vrot.slane %v2226_v53, 2  ;;  %v4069_v53 = vld [vmem:[%s9169_s1 + $0x2238] sm:$0xff] }
 0x203   : > { %5287 = vmatpush1.bf16.msra.mxu1 %v5286_v63  ;;  %5089 = vmatprep.subr.bf16.mxu0 %v5088_v0  ;;  %v2661_v63 = vrot.slane %v2233_v54, 2  ;;  %v2229_v0 = vld [vmem:[%s5768_s11 + $0x28] sm:$0xfc]  ;;  %v5122_v54 = vpack.c.bf16 %v4058_v46, %v4054_v45  ;;  %v5324_v60 = vpack.c.bf16 %v4069_v53, %v4065_v52  ;;  %v4100_v46 = vld [vmem:[%s9169_s1 + $0x2330] sm:$0xff] }
 0x204   : > { %5289 = vmatprep.subr.bf16.mxu1 %v5288_v5  ;;  %v4030_v5 = vld [vmem:[%s9169_s1 + $0x2100] sm:$0xff]  ;;  %v2669_v14 = vrot.slane %v2229_v0, 2  ;;  %v4073_v0 = vld [vmem:[%s9169_s1 + $0x2258] sm:$0xff] }
 0x205   : > { %v2662_v16 = vsel %vm2653_vm2, %v2660_v62, %v2661_v63  ;;  %v4071_v62 = vld [vmem:[%s9169_s1 + $0x2248] sm:$0xff]  ;;  %v5328_v9 = vpack.c.bf16 %v4077_v1, %v4073_v0 }
 0x206   : > { %5091 = vmatpush1.bf16.msra.mxu0 %v5090_v11  ;;  %v4043_v11 = vld [vmem:[%s9169_s1 + $0x2168] sm:$0xff] }
 0x207   : > { %5291 = vmatpush1.bf16.msra.mxu1 %v5290_v12  ;;  %5093 = vmatprep.subr.bf16.mxu0 %v5092_v13  ;;  %v4041_v12 = vld [vmem:[%s9169_s1 + $0x2158] sm:$0xff]  ;;  %v5112_v19 = vpack.c.bf16 %v4043_v11, %v4039_v10  ;;  %v4075_v63 = vld [vmem:[%s9169_s1 + $0x2268] sm:$0xff]  ;;  %v4076_v10 = vld [vmem:[%s9169_s1 + $0x2270] sm:$0xff] }
 0x208   : > { %5293 = vmatprep.subr.bf16.mxu1 %v5292_v17  ;;  %v4045_v13 = vld [vmem:[%s9169_s1 + $0x2178] sm:$0xff]  ;;  %v5110_v17 = vpack.c.bf16 %v4034_v6, %v4030_v5  ;;  %v5128_v5 = vpack.c.bf16 %v4075_v63, %v4071_v62  ;;  %v4070_v6 = vld [vmem:[%s9169_s1 + $0x2240] sm:$0xff]  ;;  %v4079_v11 = vld [vmem:[%s9169_s1 + $0x2288] sm:$0xff] }
 0x209   : > { %v4117_v62 = vld [vmem:[%s9169_s1 + $0x23b8] sm:$0xff] }
 0x20a   : > { %5095 = vmatpush1.bf16.msra.mxu0 %v5094_v23  ;;  %v5312_v23 = vpack.c.bf16 %v4045_v13, %v4041_v12  ;;  %v4083_v12 = vld [vmem:[%s9169_s1 + $0x22a8] sm:$0xff]  ;;  %v4081_v13 = vld [vmem:[%s9169_s1 + $0x2298] sm:$0xff] }
 0x20b   : > { %5295 = vmatpush1.bf16.msra.mxu1 %v5294_v24  ;;  %5097 = vmatprep.subr.bf16.mxu0 %v5096_v25  ;;  %v4044_v24 = vld [vmem:[%s9169_s1 + $0x2170] sm:$0xff]  ;;  %v4047_v25 = vld [vmem:[%s9169_s1 + $0x2188] sm:$0xff] }
 0x20c   : > { %5297 = vmatprep.subr.bf16.mxu1 %v5296_v29  ;;  %v2671_v29 = vsel %vm2653_vm2, %v2669_v14, %v2670_v15  ;;  %v5314_v31 = vpack.c.bf16 %v4044_v24, %v4040_v22  ;;  %v5116_v32 = vpack.c.bf16 %v4051_v26, %v4047_v25  ;;  %v4085_v14 = vld [vmem:[%s9169_s1 + $0x22b8] sm:$0xff]  ;;  %v5130_v15 = vpack.c.bf16 %v4074_v7, %v4070_v6  ;;  %v4084_v22 = vld [vmem:[%s9169_s1 + $0x22b0] sm:$0xff]  ;;  %v4091_v24 = vld [vmem:[%s9169_s1 + $0x22e8] sm:$0xff] }
 0x20d   : > { %v5332_v21 = vpack.c.bf16 %v4085_v14, %v4081_v13  ;;  %v4089_v25 = vld [vmem:[%s9169_s1 + $0x22d8] sm:$0xff]  ;;  %v4116_v7 = vld [vmem:[%s9169_s1 + $0x23b0] sm:$0xff] }
 0x20e   : > { %5099 = vmatpush1.bf16.msra.mxu0 %v5098_v35  ;;  %v4048_v35 = vld [vmem:[%s9169_s1 + $0x2190] sm:$0xff]  ;;  %v4093_v26 = vld [vmem:[%s9169_s1 + $0x22f8] sm:$0xff] }
 0x20f   : > { %5299 = vmatpush1.bf16.msra.mxu1 %v5298_v36  ;;  %5101 = vmatprep.subr.bf16.mxu0 %v5100_v37  ;;  %v5316_v36 = vpack.c.bf16 %v4053_v28, %v4049_v27  ;;  %v4052_v37 = vld [vmem:[%s9169_s1 + $0x21b0] sm:$0xff]  ;;  %v5334_v28 = vpack.c.bf16 %v4084_v22, %v4080_v20  ;;  %v5336_v33 = vpack.c.bf16 %v4093_v26, %v4089_v25  ;;  %v4127_v20 = vld [vmem:[%s9169_s1 + $0x2408] sm:$0xff]  ;;  %v4129_v22 = vld [vmem:[%s9169_s1 + $0x2418] sm:$0xff] }
 0x210   : > { %5301 = vmatprep.subr.bf16.mxu1 %v5300_v41  ;;  %v4061_v41 = vld [vmem:[%s9169_s1 + $0x21f8] sm:$0xff]  ;;  %v5318_v43 = vpack.c.bf16 %v4052_v37, %v4048_v35  ;;  %v4095_v35 = vld [vmem:[%s9169_s1 + $0x2308] sm:$0xff] }
 0x211   : > { %v5320_v48 = vpack.c.bf16 %v4061_v41, %v4057_v40  ;;  %v4097_v37 = vld [vmem:[%s9169_s1 + $0x2318] sm:$0xff] }
 0x212   : > { %5103 = vmatpush1.bf16.msra.mxu0 %v5102_v47  ;;  %v4056_v47 = vld [vmem:[%s9169_s1 + $0x21d0] sm:$0xff]  ;;  %v5340_v45 = vpack.c.bf16 %v4101_v38, %v4097_v37 }
 0x213   : > { %5303 = vmatpush1.bf16.msra.mxu1 %v5302_v50  ;;  %5105 = vmatprep.subr.bf16.mxu0 %v5104_v51  ;;  %v4063_v50 = vld [vmem:[%s9169_s1 + $0x2208] sm:$0xff] }
 0x214   : > { %5305 = vmatprep.subr.bf16.mxu1 %v5304_v55  ;;  %v4067_v51 = vld [vmem:[%s9169_s1 + $0x2228] sm:$0xff]  ;;  %v5322_v55 = vpack.c.bf16 %v4060_v49, %v4056_v47  ;;  %v4105_v49 = vld [vmem:[%s9169_s1 + $0x2358] sm:$0xff] }
 0x215   : > { %v5124_v56 = vpack.c.bf16 %v4067_v51, %v4063_v50  ;;  %v4103_v47 = vld [vmem:[%s9169_s1 + $0x2348] sm:$0xff]  ;;  %v4109_v50 = vld [vmem:[%s9169_s1 + $0x2378] sm:$0xff] }
 0x216   : > { %5107 = vmatpush1.bf16.msra.mxu0 %v5106_v61  ;;  %v4068_v61 = vld [vmem:[%s9169_s1 + $0x2230] sm:$0xff] }
 0x217   : > { %5307 = vmatpush1.bf16.msra.mxu1 %v5306_v3  ;;  %5109 = vmatprep.subr.bf16.mxu0 %v5108_v4  ;;  %v5126_v3 = vpack.c.bf16 %v4066_v58, %v4062_v57  ;;  %v5326_v4 = vpack.c.bf16 %v4068_v61, %v4064_v59  ;;  %v5344_v57 = vpack.c.bf16 %v4109_v50, %v4105_v49  ;;  %v4108_v58 = vld [vmem:[%s9169_s1 + $0x2370] sm:$0xff]  ;;  %v4111_v59 = vld [vmem:[%s9169_s1 + $0x2388] sm:$0xff]  ;;  %v4113_v61 = vld [vmem:[%s9169_s1 + $0x2398] sm:$0xff] }
 0x218   : > { %5309 = vmatprep.subr.bf16.mxu1 %v5308_v8  ;;  %v4072_v8 = vld [vmem:[%s9169_s1 + $0x2250] sm:$0xff]  ;;  %v5348_v6 = vpack.c.bf16 %v4117_v62, %v4113_v61  ;;  %v4150_v61 = vld [vmem:[%s9169_s1 + $0x24c0] sm:$0xff] }
 0x219   : > { %2819 = vmatmul.mubr.f32.vlgmr.msra.gmra.mrb[0].mxu0 %v2662_v16  ;;  %v4154_v62 = vld [vmem:[%s9169_s1 + $0x24e0] sm:$0xff] }
 0x21a   : > { %5111 = vmatpush1.bf16.msra.mxu0 %v5110_v17  ;;  %3103 = vmatmul.mubr.f32.vlgmr.msra.gmra.mrb[0].mxu1 %v2662_v16  ;;  %v5330_v16 = vpack.c.bf16 %v4076_v10, %v4072_v8  ;;  %v5132_v17 = vpack.c.bf16 %v4083_v12, %v4079_v11  ;;  %v4119_v8 = vld [vmem:[%s9169_s1 + $0x23c8] sm:$0xff]  ;;  %v4121_v10 = vld [vmem:[%s9169_s1 + $0x23d8] sm:$0xff] }
 0x21b   : > { %5311 = vmatpush1.bf16.msra.mxu1 %v5310_v18  ;;  %5113 = vmatprep.subr.bf16.mxu0 %v5112_v19  ;;  %v4078_v18 = vld [vmem:[%s9169_s1 + $0x2280] sm:$0xff]  ;;  %v4125_v11 = vld [vmem:[%s9169_s1 + $0x23f8] sm:$0xff] }
 0x21c   : > { %5313 = vmatprep.subr.bf16.mxu1 %v5312_v23  ;;  %2889 = vmatprep.mubr.f32.mxu0 %v2671_v29  ;;  %v4082_v19 = vld [vmem:[%s9169_s1 + $0x22a0] sm:$0xff]  ;;  %v4087_v23 = vld [vmem:[%s9169_s1 + $0x22c8] sm:$0xff] }
 0x21d   : > { %3173 = vmatprep.mubr.f32.mxu1 %v2671_v29  ;;  %v5134_v27 = vpack.c.bf16 %v4082_v19, %v4078_v18  ;;  %v5136_v29 = vpack.c.bf16 %v4091_v24, %v4087_v23  ;;  %v5352_v18 = vpack.c.bf16 %v4125_v11, %v4121_v10  ;;  %v4124_v19 = vld [vmem:[%s9169_s1 + $0x23f0] sm:$0xff]  ;;  %v4133_v23 = vld [vmem:[%s9169_s1 + $0x2438] sm:$0xff]  ;;  %v5170_v11 = vpack.c.bf16 %v4154_v62, %v4150_v61 }
 0x21e   : > { %5115 = vmatpush1.bf16.msra.mxu0 %v5114_v30  ;;  %v4086_v30 = vld [vmem:[%s9169_s1 + $0x22c0] sm:$0xff]  ;;  %v4165_v10 = vld [vmem:[%s9169_s1 + $0x2538] sm:$0xff] }
 0x21f   : > { %5315 = vmatpush1.bf16.msra.mxu1 %v5314_v31  ;;  %5117 = vmatprep.subr.bf16.mxu0 %v5116_v32  ;;  %v4090_v31 = vld [vmem:[%s9169_s1 + $0x22e0] sm:$0xff]  ;;  %v4088_v32 = vld [vmem:[%s9169_s1 + $0x22d0] sm:$0xff] }
 0x220   : > { %5317 = vmatprep.subr.bf16.mxu1 %v5316_v36  ;;  %v4099_v36 = vld [vmem:[%s9169_s1 + $0x2328] sm:$0xff]  ;;  %v5138_v39 = vpack.c.bf16 %v4090_v31, %v4086_v30  ;;  %v5338_v40 = vpack.c.bf16 %v4092_v34, %v4088_v32  ;;  %v5356_v30 = vpack.c.bf16 %v4133_v23, %v4129_v22  ;;  %v4132_v31 = vld [vmem:[%s9169_s1 + $0x2430] sm:$0xff]  ;;  %v4137_v34 = vld [vmem:[%s9169_s1 + $0x2458] sm:$0xff] }
 0x221   : > { %v5140_v41 = vpack.c.bf16 %v4099_v36, %v4095_v35  ;;  %v4135_v32 = vld [vmem:[%s9169_s1 + $0x2448] sm:$0xff]  ;;  %v4141_v35 = vld [vmem:[%s9169_s1 + $0x2478] sm:$0xff] }
 0x222   : > { %5119 = vmatpush1.bf16.msra.mxu0 %v5118_v42  ;;  %v4094_v42 = vld [vmem:[%s9169_s1 + $0x2300] sm:$0xff]  ;;  %v4171_v22 = vld [vmem:[%s9169_s1 + $0x2568] sm:$0xff]  ;;  %v4169_v23 = vld [vmem:[%s9169_s1 + $0x2558] sm:$0xff] }
 0x223   : > { %5319 = vmatpush1.bf16.msra.mxu1 %v5318_v43  ;;  %5121 = vmatprep.subr.bf16.mxu0 %v5120_v44  ;;  %v4098_v43 = vld [vmem:[%s9169_s1 + $0x2320] sm:$0xff]  ;;  %v4096_v44 = vld [vmem:[%s9169_s1 + $0x2310] sm:$0xff] }
 0x224   : > { %5321 = vmatprep.subr.bf16.mxu1 %v5320_v48  ;;  %v4107_v48 = vld [vmem:[%s9169_s1 + $0x2368] sm:$0xff]  ;;  %v5142_v51 = vpack.c.bf16 %v4098_v43, %v4094_v42  ;;  %v5342_v52 = vpack.c.bf16 %v4100_v46, %v4096_v44  ;;  %v5360_v42 = vpack.c.bf16 %v4141_v35, %v4137_v34  ;;  %v4140_v43 = vld [vmem:[%s9169_s1 + $0x2470] sm:$0xff]  ;;  %v4145_v46 = vld [vmem:[%s9169_s1 + $0x2498] sm:$0xff] }
 0x225   : > { %v5144_v53 = vpack.c.bf16 %v4107_v48, %v4103_v47  ;;  %v4143_v44 = vld [vmem:[%s9169_s1 + $0x2488] sm:$0xff]  ;;  %v4149_v47 = vld [vmem:[%s9169_s1 + $0x24b8] sm:$0xff]  ;;  %v4168_v34 = vld [vmem:[%s9169_s1 + $0x2550] sm:$0xff] }
 0x226   : > { %5123 = vmatpush1.bf16.msra.mxu0 %v5122_v54  ;;  %v4102_v54 = vld [vmem:[%s9169_s1 + $0x2340] sm:$0xff]  ;;  %v4172_v35 = vld [vmem:[%s9169_s1 + $0x2570] sm:$0xff] }
 0x227   : > { %5323 = vmatpush1.bf16.msra.mxu1 %v5322_v55  ;;  %5125 = vmatprep.subr.bf16.mxu0 %v5124_v56  ;;  %v4106_v55 = vld [vmem:[%s9169_s1 + $0x2360] sm:$0xff]  ;;  %v4104_v56 = vld [vmem:[%s9169_s1 + $0x2350] sm:$0xff] }
 0x228   : > { %5325 = vmatprep.subr.bf16.mxu1 %v5324_v60  ;;  %v4115_v60 = vld [vmem:[%s9169_s1 + $0x23a8] sm:$0xff]  ;;  %v5146_v63 = vpack.c.bf16 %v4106_v55, %v4102_v54  ;;  %v5346_v0 = vpack.c.bf16 %v4108_v58, %v4104_v56  ;;  %v5364_v54 = vpack.c.bf16 %v4149_v47, %v4145_v46  ;;  %v4148_v55 = vld [vmem:[%s9169_s1 + $0x24b0] sm:$0xff]  ;;  %v4153_v58 = vld [vmem:[%s9169_s1 + $0x24d8] sm:$0xff] }
 0x229   : > { %v5148_v1 = vpack.c.bf16 %v4115_v60, %v4111_v59  ;;  %v4151_v56 = vld [vmem:[%s9169_s1 + $0x24c8] sm:$0xff]  ;;  %v4157_v59 = vld [vmem:[%s9169_s1 + $0x24f8] sm:$0xff] }
 0x22a   : > { %5127 = vmatpush1.bf16.msra.mxu0 %v5126_v3  ;;  %v4110_v3 = vld [vmem:[%s9169_s1 + $0x2380] sm:$0xff] }
 0x22b   : > { %5327 = vmatpush1.bf16.msra.mxu1 %v5326_v4  ;;  %5129 = vmatprep.subr.bf16.mxu0 %v5128_v5  ;;  %v4114_v4 = vld [vmem:[%s9169_s1 + $0x23a0] sm:$0xff]  ;;  %v4112_v5 = vld [vmem:[%s9169_s1 + $0x2390] sm:$0xff] }
 0x22c   : > { %5329 = vmatprep.subr.bf16.mxu1 %v5328_v9  ;;  %v4123_v9 = vld [vmem:[%s9169_s1 + $0x23e8] sm:$0xff]  ;;  %v5150_v12 = vpack.c.bf16 %v4114_v4, %v4110_v3  ;;  %v5350_v13 = vpack.c.bf16 %v4116_v7, %v4112_v5  ;;  %v2228_v3 = vld [vmem:[%s5768_s11 + $0x20] sm:$0xfc]  ;;  %v2235_v4 = vld [vmem:[%s5768_s11 + $0x58] sm:$0x3]  ;;  %v5368_v5 = vpack.c.bf16 %v4157_v59, %v4153_v58 }
 0x22d   : > { %v5152_v14 = vpack.c.bf16 %v4123_v9, %v4119_v8  ;;  %v4159_v7 = vld [vmem:[%s9169_s1 + $0x2508] sm:$0xff]  ;;  %v4161_v9 = vld [vmem:[%s9169_s1 + $0x2518] sm:$0xff] }
 0x22e   : > { %5131 = vmatpush1.bf16.msra.mxu0 %v5130_v15  ;;  %v4118_v15 = vld [vmem:[%s9169_s1 + $0x23c0] sm:$0xff]  ;;  %v4163_v8 = vld [vmem:[%s9169_s1 + $0x2528] sm:$0xff] }
 0x22f   : > { %5331 = vmatpush1.bf16.msra.mxu1 %v5330_v16  ;;  %5133 = vmatprep.subr.bf16.mxu0 %v5132_v17  ;;  %v4122_v16 = vld [vmem:[%s9169_s1 + $0x23e0] sm:$0xff]  ;;  %v4120_v17 = vld [vmem:[%s9169_s1 + $0x23d0] sm:$0xff] }
 0x230   : > { %5333 = vmatprep.subr.bf16.mxu1 %v5332_v21  ;;  %v4131_v21 = vld [vmem:[%s9169_s1 + $0x2428] sm:$0xff]  ;;  %v5154_v24 = vpack.c.bf16 %v4122_v16, %v4118_v15  ;;  %v5354_v25 = vpack.c.bf16 %v4124_v19, %v4120_v17  ;;  %v5172_v15 = vpack.c.bf16 %v4163_v8, %v4159_v7  ;;  %v4158_v16 = vld [vmem:[%s9169_s1 + $0x2500] sm:$0xff]  ;;  %v5372_v19 = vpack.c.bf16 %v4165_v10, %v4161_v9 }
 0x231   : > { %v5156_v26 = vpack.c.bf16 %v4131_v21, %v4127_v20  ;;  %v4162_v17 = vld [vmem:[%s9169_s1 + $0x2520] sm:$0xff]  ;;  %v4164_v20 = vld [vmem:[%s9169_s1 + $0x2530] sm:$0xff]  ;;  %v4167_v21 = vld [vmem:[%s9169_s1 + $0x2548] sm:$0xff] }
 0x232   : > { %5135 = vmatpush1.bf16.msra.mxu0 %v5134_v27  ;;  %v4126_v27 = vld [vmem:[%s9169_s1 + $0x2400] sm:$0xff] }
 0x233   : > { %5335 = vmatpush1.bf16.msra.mxu1 %v5334_v28  ;;  %5137 = vmatprep.subr.bf16.mxu0 %v5136_v29  ;;  %v4130_v28 = vld [vmem:[%s9169_s1 + $0x2420] sm:$0xff]  ;;  %v4128_v29 = vld [vmem:[%s9169_s1 + $0x2410] sm:$0xff] }
 0x234   : > { %5337 = vmatprep.subr.bf16.mxu1 %v5336_v33  ;;  %v4139_v33 = vld [vmem:[%s9169_s1 + $0x2468] sm:$0xff]  ;;  %v5158_v36 = vpack.c.bf16 %v4130_v28, %v4126_v27  ;;  %v5358_v37 = vpack.c.bf16 %v4132_v31, %v4128_v29  ;;  %v4166_v27 = vld [vmem:[%s9169_s1 + $0x2540] sm:$0xff]  ;;  %v5176_v29 = vpack.c.bf16 %v4171_v22, %v4167_v21  ;;  %v2230_v31 = vld [vmem:[%s5768_s11 + $0x30] sm:$0xfc] }
 0x235   : > { %v5160_v38 = vpack.c.bf16 %v4139_v33, %v4135_v32  ;;  %v2237_v32 = vld [vmem:[%s5768_s11 + $0x68] sm:$0x3]  ;;  %s4178_s11 = sshll.u32 %s9175_s16, 5 }
 0x236   : > { %5139 = vmatpush1.bf16.msra.mxu0 %v5138_v39  ;;  %v4134_v39 = vld [vmem:[%s9169_s1 + $0x2440] sm:$0xff]  ;;  %s212_s26 = scalar_lea.vmem %s9171_s3, %s4178_s11  ;;  %s217_s28 = scalar_lea.vmem %s9172_s4, %s4178_s11 }
 0x237   : > { %5339 = vmatpush1.bf16.msra.mxu1 %v5338_v40  ;;  %5141 = vmatprep.subr.bf16.mxu0 %v5140_v41  ;;  %v4138_v40 = vld [vmem:[%s9169_s1 + $0x2460] sm:$0xff]  ;;  %v4136_v41 = vld [vmem:[%s9169_s1 + $0x2450] sm:$0xff]  ;;  %v3284_v61 = vld [vmem:[%s212_s26 + $0x18] sm:$0xff] }
 0x238   : > { %5341 = vmatprep.subr.bf16.mxu1 %v5340_v45  ;;  %v4147_v45 = vld [vmem:[%s9169_s1 + $0x24a8] sm:$0xff]  ;;  %v5162_v48 = vpack.c.bf16 %v4138_v40, %v4134_v39  ;;  %v5362_v49 = vpack.c.bf16 %v4140_v43, %v4136_v41  ;;  %v5378_v39 = vpack.c.bf16 %v4172_v35, %v4168_v34  ;;  %v3257_v41 = vlaneseq }
 0x239   : > { %v5164_v50 = vpack.c.bf16 %v4147_v45, %v4143_v44  ;;  %v3255_v44 = vld [vmem:[%s9170_s2] sm:$0xf] }
 0x23a   : > { %5143 = vmatpush1.bf16.msra.mxu0 %v5142_v51  ;;  %v4142_v51 = vld [vmem:[%s9169_s1 + $0x2480] sm:$0xff] }
 0x23b   : > { %5343 = vmatpush1.bf16.msra.mxu1 %v5342_v52  ;;  %5145 = vmatprep.subr.bf16.mxu0 %v5144_v53  ;;  %v4146_v52 = vld [vmem:[%s9169_s1 + $0x24a0] sm:$0xff]  ;;  %v4144_v53 = vld [vmem:[%s9169_s1 + $0x2490] sm:$0xff] }
 0x23c   : > { %5345 = vmatprep.subr.bf16.mxu1 %v5344_v57  ;;  %v4155_v57 = vld [vmem:[%s9169_s1 + $0x24e8] sm:$0xff]  ;;  %v5166_v60 = vpack.c.bf16 %v4146_v52, %v4142_v51  ;;  %v3281_v52 = vld [vmem:[%s212_s26] sm:$0xff] }
 0x23e   : > { %5147 = vmatpush1.bf16.msra.mxu0 %v5146_v63  ;;  %v5366_v63 = vpack.c.bf16 %v4148_v55, %v4144_v53  ;;  %v3283_v55 = vld [vmem:[%s212_s26 + $0x10] sm:$0xff] }
 0x23f   : > { %5347 = vmatpush1.bf16.msra.mxu1 %v5346_v0  ;;  %5149 = vmatprep.subr.bf16.mxu0 %v5148_v1  ;;  %v5168_v0 = vpack.c.bf16 %v4155_v57, %v4151_v56  ;;  %v4152_v1 = vld [vmem:[%s9169_s1 + $0x24d0] sm:$0xff]  ;;  %v3282_v57 = vld [vmem:[%s212_s26 + $0x8] sm:$0xff] }
 0x240   : > { %5349 = vmatprep.subr.bf16.mxu1 %v5348_v6  ;;  %v4156_v6 = vld [vmem:[%s9169_s1 + $0x24f0] sm:$0xff] }
 0x242   : > { %5151 = vmatpush1.bf16.msra.mxu0 %v5150_v12  ;;  %v2666_v12 = vrot.slane %v2228_v3, 2 }
 0x243   : > { %5351 = vmatpush1.bf16.msra.mxu1 %v5350_v13  ;;  %5153 = vmatprep.subr.bf16.mxu0 %v5152_v14  ;;  %v2667_v13 = vrot.slane %v2235_v4, 2  ;;  %v5370_v14 = vpack.c.bf16 %v4156_v6, %v4152_v1 }
 0x244   : > { %5353 = vmatprep.subr.bf16.mxu1 %v5352_v18  ;;  %v4160_v18 = vld [vmem:[%s9169_s1 + $0x2510] sm:$0xff] }
 0x245   : > { %v5374_v28 = vpack.c.bf16 %v4164_v20, %v4160_v18 }
 0x246   : > { %5155 = vmatpush1.bf16.msra.mxu0 %v5154_v24  ;;  %v4173_v24 = vld [vmem:[%s9169_s1 + $0x2578] sm:$0xff] }
 0x247   : > { %5355 = vmatpush1.bf16.msra.mxu1 %v5354_v25  ;;  %5157 = vmatprep.subr.bf16.mxu0 %v5156_v26  ;;  %v2668_v25 = vsel %vm2653_vm2, %v2666_v12, %v2667_v13  ;;  %v5174_v26 = vpack.c.bf16 %v4162_v17, %v4158_v16  ;;  %v5376_v33 = vpack.c.bf16 %v4173_v24, %v4169_v23 }
 0x248   : > { %5357 = vmatprep.subr.bf16.mxu1 %v5356_v30  ;;  %v4170_v30 = vld [vmem:[%s9169_s1 + $0x2560] sm:$0xff] }
 0x24a   : > { %5159 = vmatpush1.bf16.msra.mxu0 %v5158_v36  ;;  %v5178_v36 = vpack.c.bf16 %v4170_v30, %v4166_v27 }
 0x24b   : > { %5359 = vmatpush1.bf16.msra.mxu1 %v5358_v37  ;;  %5161 = vmatprep.subr.bf16.mxu0 %v5160_v38  ;;  %v2672_v37 = vrot.slane %v2230_v31, 2  ;;  %v2673_v38 = vrot.slane %v2237_v32, 2 }
 0x24c   : > { %5361 = vmatprep.subr.bf16.mxu1 %v5360_v42  ;;  %v3258_v42 = vshrl.u32 %v3257_v41, 7 }
 0x24d   : > { %v2674_v40 = vsel %vm2653_vm2, %v2672_v37, %v2673_v38 }
 0x24e   : > { %5163 = vmatpush1.bf16.msra.mxu0 %v5162_v48  ;;  %v3259_v43 = vsub.s32 0, %v3258_v42  ;;  %v3267_v45 = vsub.s32 2, %v3258_v42  ;;  %v3263_v46 = vsub.s32 1, %v3258_v42  ;;  %v3271_v47 = vsub.s32 3, %v3258_v42 }
 0x24f   : > { %5363 = vmatpush1.bf16.msra.mxu1 %v5362_v49  ;;  %5165 = vmatprep.subr.bf16.mxu0 %v5164_v50 }
 0x250   : > { %5365 = vmatprep.subr.bf16.mxu1 %v5364_v54  ;;  %v3268_v48 = vrot.slane %v3255_v44, %v3267_v45  ;;  %v3264_v49 = vrot.slane %v3255_v44, %v3263_v46  ;;  %v3272_v50 = vrot.slane %v3255_v44, %v3271_v47 }
 0x252   : > { %5167 = vmatpush1.bf16.msra.mxu0 %v5166_v60 }
 0x253   : > { %5367 = vmatpush1.bf16.msra.mxu1 %v5366_v63  ;;  %5169 = vmatprep.subr.bf16.mxu0 %v5168_v0 }
 0x254   : > { %5369 = vmatprep.subr.bf16.mxu1 %v5368_v5 }
 0x256   : > { %5171 = vmatpush1.bf16.msra.mxu0 %v5170_v11 }
 0x257   : > { %5371 = vmatpush1.bf16.msra.mxu1 %v5370_v14  ;;  %5173 = vmatprep.subr.bf16.mxu0 %v5172_v15 }
 0x258   : > { %5373 = vmatprep.subr.bf16.mxu1 %v5372_v19 }
 0x259   : > { %2890 = vmatmul.mubr.f32.vlgmr.msra.gmra.mrb[0].mxu0 %v2668_v25 }
 0x25a   : > { %3174 = vmatmul.mubr.f32.vlgmr.msra.gmra.mrb[0].mxu1 %v2668_v25  ;;  %5175 = vmatpush1.bf16.msra.mxu0 %v5174_v26 }
 0x25b   : > { %5375 = vmatpush1.bf16.msra.mxu1 %v5374_v28  ;;  %5177 = vmatprep.subr.bf16.mxu0 %v5176_v29 }
 0x25c   : > { %5377 = vmatprep.subr.bf16.mxu1 %v5376_v33  ;;  %2960 = vmatprep.mubr.f32.mxu0 %v5442_v2 }
 0x25d   : > { %3244 = vmatprep.mubr.f32.mxu1 %v5442_v2  ;;  %v3260_v2 = vrot.slane %v3255_v44, %v3259_v43 }
 0x25e   : > { %5179 = vmatpush1.bf16.msra.mxu0 %v5178_v36 }
 0x25f   : > { %5379 = vmatpush1.bf16.msra.mxu1 %v5378_v39 }
 0x261   : > { %4174 = vmatmul.mubr.msk.f32.vlgmr.msra.gmra.mrb[0].mxu0 %vm1082_vm1, %v2674_v40 }
 0x262   : > { %4175 = vmatmul.mubr.msk.f32.vlgmr.msra.gmra.mrb[0].mxu1 %vm1082_vm1, %v2674_v40 }
 0x334   : > { %v2962_v51 = vpop.f32.mrb[0].mxu0 }
 0x335   : > { %v3277_v53 = vadd.f32 %v3260_v2, %v2962_v51  ;;  %v3246_v54 = vpop.f32.mrb[0].mxu1  ;;  %v2964_v56 = vpop.f32.mrb[1].mxu0 }
 0x336   : > { %v3279_v58 = vadd.f32 %v3268_v48, %v3246_v54  ;;  %v3278_v59 = vadd.f32 %v3264_v49, %v2964_v56  ;;  %v3248_v60 = vpop.f32.mrb[1].mxu1 }
 0x337   : > { %v3285_v62 = vmul.f32 %v3281_v52, %v3277_v53  ;;  %v3280_v63 = vadd.f32 %v3272_v50, %v3248_v60 }
 0x338   : > { %v3287_v0 = vmul.f32 %v3283_v55, %v3279_v58  ;;  %v3286_v1 = vmul.f32 %v3282_v57, %v3278_v59 }
 0x339   : > { %3289 = vst [vmem:[%s217_s28] sm:$0xff] %v3285_v62  ;;  %v3288_v3 = vmul.f32 %v3284_v61, %v3280_v63 }
 0x33a   : > { %3291 = vst [vmem:[%s217_s28 + $0x10] sm:$0xff] %v3287_v0  ;;  %3290 = vst [vmem:[%s217_s28 + $0x8] sm:$0xff] %v3286_v1 }
 0x33b   : > { %3292 = vst [vmem:[%s217_s28 + $0x18] sm:$0xff] %v3288_v3 }
 0x33c PF: > { %s14_s15 = sadd.s32 1, %s5440_s15  }
 0x33d   : > { %p11_p4 = scmp.ge.s32.totalorder %s14_s15, 4  }
 0x33f   :  { %13 = sbr.rel (!%p11_p4) target bundleno = 1 (0x1), region = 71 }

// kernel: geometry_head_sparse_forward.14
= control target key start
LH: loop header
LB: loop body
LE: loop exit
PB: predicated region body
PF: predicated region fallthrough
CT: control target
= control target key end

     0   :  { %v44_v0 = vlaneseq  ;;  %v662_v1 = vmov 0.0|0.0   ;;  %vm663_vm0 = vmmov 0   ;;  %v664_v4 = vmov 0.0   ;;  %s1018_s0 = inlined_call_operand.vmem [shape: f32[1,64,128], index: 0, kind: input, shape index: {}]   ;;  %s1019_s1 = inlined_call_operand.vmem [shape: f32[1,64,128], index: 1, kind: input, shape index: {}]   ;;  %s1020_s3 = inlined_call_operand.vmem [shape: f32[1,128], index: 3, kind: input, shape index: {}]   ;;  %s1021_s4 = inlined_call_operand.vmem [shape: f32[1,128], index: 4, kind: input, shape index: {}]   ;;  %s1022_s2 = inlined_call_operand.vmem [shape: f32[1,64,128], index: 2, kind: input, shape index: {}]   ;;  %s1023_s5 = inlined_call_operand.vmem [shape: f32[1,64,128], index: 5, kind: output, shape index: {}]  }
   0x1   :  { %630 = vmatprep.subr.bf16.mxu0 %v662_v1  ;;  %627 = vmatprep.mubr.msk.f32.mxu0 %vm663_vm0, %v664_v4  ;;  %v665_v23 = vmov 1.0|1.0   ;;  %v738_v26 = vld [vmem:[%s1019_s1] sm:$0xff]  ;;  %v756_v31 = vld [vmem:[%s1019_s1 + $0x8] sm:$0xff]  ;;  %v761_v32 = vld [vmem:[%s1019_s1 + $0x10] sm:$0xff] }
   0x2   :  { %v697_v2 = vshrl.u32 %v44_v0, 7  ;;  %v62_v3 = vand.u32 127, %v44_v0  ;;  %v28_v27 = vld [vmem:[%s1018_s0] sm:$0xff]  ;;  %v766_v33 = vld [vmem:[%s1019_s1 + $0x18] sm:$0xff]  ;;  %v29_v35 = vld [vmem:[%s1018_s0 + $0x8] sm:$0xff]  ;;  %v349_v41 = vadd.f32 %v756_v31, %v738_v26 }
   0x3   :  { %v30_v36 = vld [vmem:[%s1018_s0 + $0x10] sm:$0xff]  ;;  %v31_v37 = vld [vmem:[%s1018_s0 + $0x18] sm:$0xff]  ;;  %v781_v38 = vld [vmem:[%s1019_s1 + $0x20] sm:$0xff]  ;;  %v787_v40 = vmul.f32 %v28_v27, %v738_v26  ;;  %v817_v49 = vmul.f32 %v29_v35, %v756_v31 }
   0x4   :  { %v46_v5 = vadd.s32 8, %v697_v2  ;;  %v67_v6 = vand.u32 7, %v697_v2  ;;  %v701_v7 = vand.u32 7, %v62_v3  ;;  %v47_v8 = vadd.s32 16, %v697_v2  ;;  %v32_v39 = vld [vmem:[%s1018_s0 + $0x20] sm:$0xff]  ;;  %v811_v47 = vld [vmem:[%s1019_s1 + $0x28] sm:$0xff] }
   0x5   :  { %v48_v9 = vadd.s32 24, %v697_v2  ;;  %v49_v10 = vadd.s32 32, %v697_v2  ;;  %v50_v11 = vadd.s32 40, %v697_v2  ;;  %v51_v16 = vadd.s32 48, %v697_v2  ;;  %v33_v48 = vld [vmem:[%s1018_s0 + $0x28] sm:$0xff]  ;;  %v839_v56 = vld [vmem:[%s1019_s1 + $0x30] sm:$0xff] }
   0x6   :  { %v74_v12 = vand.u32 7, %v46_v5  ;;  %vm708_vm1 = vcmp.eq.s32.totalorder %v67_v6, %v701_v7  ;;  %v81_v14 = vand.u32 7, %v47_v8  ;;  %v52_v17 = vadd.s32 56, %v697_v2  ;;  %v34_v57 = vld [vmem:[%s1018_s0 + $0x30] sm:$0xff]  ;;  %v868_v4 = vld [vmem:[%s1019_s1 + $0x38] sm:$0xff] }
   0x7   :  { %v88_v15 = vand.u32 7, %v48_v9  ;;  %v95_v19 = vand.u32 7, %v49_v10  ;;  %v102_v20 = vand.u32 7, %v50_v11  ;;  %v53_v22 = vadd.s32 64, %v697_v2  ;;  %v35_v5 = vld [vmem:[%s1018_s0 + $0x38] sm:$0xff] }
   0x8   :  { %vm268_vm2 = vcmp.eq.s32.totalorder %v74_v12, %v701_v7  ;;  %vm716_vm3 = vcmp.eq.s32.totalorder %v81_v14, %v701_v7  ;;  %v109_v24 = vand.u32 7, %v51_v16  ;;  %v54_v25 = vadd.s32 72, %v697_v2 }
   0x9   :  { %vm631_vm4 = vmpackc.low %vm268_vm2, %vm708_vm1  ;;  %vm723_vm5 = vcmp.eq.s32.totalorder %v88_v15, %v701_v7  ;;  %vm744_vm7 = vcmp.eq.s32.totalorder %v95_v19, %v701_v7  ;;  %vm749_vm8 = vcmp.eq.s32.totalorder %v102_v20, %v701_v7  ;;  %v116_v30 = vand.u32 7, %v52_v17 }
   0xa   :  { %632 = vmatpush3.bf16.msk.msra.mxu0 %vm631_vm4, %v665_v23  ;;  %vm634_vm6 = vmpackc.low %vm723_vm5, %vm716_vm3  ;;  %v123_v34 = vand.u32 7, %v53_v22  ;;  %vm797_vm10 = vcmp.eq.s32.totalorder %v109_v24, %v701_v7  ;;  %v130_v43 = vand.u32 7, %v54_v25  ;;  %v55_v44 = vadd.s32 80, %v697_v2 }
   0xb   :  { %633 = vmatprep.subr.bf16.mxu0 %v662_v1  ;;  %vm637_vm9 = vmpackc.low %vm749_vm8, %vm744_vm7  ;;  %v56_v45 = vadd.s32 88, %v697_v2  ;;  %vm804_vm11 = vcmp.eq.s32.totalorder %v116_v30, %v701_v7  ;;  %v820_v50 = vmul.f32 %v30_v36, %v761_v32  ;;  %v823_v51 = vmul.f32 %v31_v37, %v766_v33 }
   0xc   :  { %vm826_vm12 = vcmp.eq.s32.totalorder %v123_v34, %v701_v7  ;;  %v57_v53 = vadd.s32 96, %v697_v2  ;;  %v58_v54 = vadd.s32 104, %v697_v2  ;;  %v833_v55 = vmul.f32 %v32_v39, %v781_v38  ;;  %vm640_vm13 = vmpackc.low %vm804_vm11, %vm797_vm10 }
   0xd   :  { %v315_v58 = vadd.f32 %v817_v49, %v787_v40  ;;  %v328_v59 = vmul.f32 %v787_v40, %v787_v40  ;;  %v329_v60 = vmul.f32 %v817_v49, %v817_v49  ;;  %v330_v61 = vmul.f32 %v820_v50, %v820_v50 }
   0xe   :  { %635 = vmatpush3.bf16.msk.msra.mxu0 %vm634_vm6, %v665_v23  ;;  %vm858_vm14 = vcmp.eq.s32.totalorder %v130_v43, %v701_v7  ;;  %v137_v63 = vand.u32 7, %v55_v44  ;;  %v144_v0 = vand.u32 7, %v56_v45  ;;  %v863_v3 = vmul.f32 %v33_v48, %v811_v47 }
   0xf   :  { %636 = vmatprep.subr.bf16.mxu0 %v662_v1  ;;  %v316_v6 = vadd.f32 %v315_v58, %v820_v50  ;;  %v331_v8 = vmul.f32 %v823_v51, %v823_v51  ;;  %v336_v9 = vadd.f32 %v329_v60, %v328_v59  ;;  %v350_v10 = vadd.f32 %v349_v41, %v761_v32  ;;  %vm643_vm15 = vmpackc.low %vm858_vm14, %vm826_vm12 }
  0x10   :  { %v151_v11 = vand.u32 7, %v57_v53  ;;  %v59_v12 = vadd.s32 112, %v697_v2  ;;  %v60_v13 = vadd.s32 120, %v697_v2  ;;  %v880_v14 = vmul.f32 %v34_v57, %v839_v56 }
  0x11   :  { %v317_v15 = vadd.f32 %v316_v6, %v823_v51  ;;  %v332_v16 = vmul.f32 %v833_v55, %v833_v55  ;;  %v337_v17 = vadd.f32 %v336_v9, %v330_v61  ;;  %v351_v18 = vadd.f32 %v350_v10, %v766_v33 }
  0x12   :  { %638 = vmatpush3.bf16.msk.msra.mxu0 %vm637_vm9, %v665_v23  ;;  %vm893_vm0 = vcmp.eq.s32.totalorder %v137_v63, %v701_v7  ;;  %vm898_vm1 = vcmp.eq.s32.totalorder %v144_v0, %v701_v7  ;;  %v158_v21 = vand.u32 7, %v58_v54  ;;  %v903_v22 = vmul.f32 %v35_v5, %v868_v4 }
  0x13   :  { %639 = vmatprep.subr.bf16.mxu0 %v662_v1  ;;  %v318_v24 = vadd.f32 %v317_v15, %v833_v55  ;;  %v333_v25 = vmul.f32 %v863_v3, %v863_v3  ;;  %v338_v27 = vadd.f32 %v337_v17, %v331_v8  ;;  %v352_v28 = vadd.f32 %v351_v18, %v781_v38  ;;  %vm646_vm2 = vmpackc.low %vm898_vm1, %vm893_vm0 }
  0x14   :  { %v334_v30 = vmul.f32 %v880_v14, %v880_v14  ;;  %vm920_vm3 = vcmp.eq.s32.totalorder %v151_v11, %v701_v7  ;;  %vm925_vm4 = vcmp.eq.s32.totalorder %v158_v21, %v701_v7  ;;  %v165_v39 = vand.u32 7, %v59_v12 }
  0x15   :  { %v319_v29 = vadd.f32 %v318_v24, %v863_v3  ;;  %v339_v34 = vadd.f32 %v338_v27, %v332_v16  ;;  %v353_v35 = vadd.f32 %v352_v28, %v811_v47  ;;  %v172_v41 = vand.u32 7, %v60_v13  ;;  %vm649_vm5 = vmpackc.low %vm925_vm4, %vm920_vm3 }
  0x16   :  { %641 = vmatpush3.bf16.msk.msra.mxu0 %vm640_vm13, %v665_v23  ;;  %v335_v43 = vmul.f32 %v903_v22, %v903_v22  ;;  %vm281_vm6 = vcmp.eq.s32.totalorder %v165_v39, %v701_v7  ;;  %vm362_vm9 = vcmask 1040384   ;;  %vm364_vm10 = vcmask 1041408  }
  0x17   :  { %642 = vmatprep.subr.bf16.mxu0 %v662_v1  ;;  %v320_v42 = vadd.f32 %v319_v29, %v880_v14  ;;  %v340_v44 = vadd.f32 %v339_v34, %v333_v25  ;;  %v354_v45 = vadd.f32 %v353_v35, %v839_v56  ;;  %vm282_vm7 = vcmp.eq.s32.totalorder %v172_v41, %v701_v7  ;;  %v576_v35 = vld [vmem:[%s1020_s3] ss:$0 sm:$0xff] }
  0x18   :  { %vm652_vm8 = vmpackc.low %vm282_vm7, %vm281_vm6  ;;  %v475_v36 = vsub.s32 1, %v697_v2 }
  0x19   :  { %v321_v46 = vadd.f32 %v320_v42, %v903_v22  ;;  %v341_v48 = vadd.f32 %v340_v44, %v334_v30  ;;  %v355_v52 = vadd.f32 %v354_v45, %v868_v4  ;;  %v455_v30 = vsub.s32 0, %v697_v2  ;;  %v577_v2 = vld [vmem:[%s1021_s4] ss:$0 sm:$0xff] }
  0x1a   :  { %644 = vmatpush3.bf16.msk.msra.mxu0 %vm643_vm15, %v665_v23 }
  0x1b   :  { %645 = vmatprep.subr.bf16.mxu0 %v662_v1  ;;  %v322_v53 = vrot.slane %v321_v46, 4  ;;  %v342_v54 = vadd.f32 %v341_v48, %v335_v43  ;;  %v356_v57 = vrot.slane %v355_v52, 4 }
  0x1d   :  { %v323_v58 = vadd.f32 %v322_v53, %v321_v46  ;;  %v343_v59 = vrot.slane %v342_v54, 4  ;;  %v357_v60 = vadd.f32 %v356_v57, %v355_v52 }
  0x1e   :  { %647 = vmatpush3.bf16.msk.msra.mxu0 %vm646_vm2, %v665_v23 }
  0x1f   :  { %648 = vmatprep.subr.bf16.mxu0 %v662_v1  ;;  %v324_v61 = vrot.slane %v323_v58, 2  ;;  %v344_v62 = vadd.f32 %v343_v59, %v342_v54  ;;  %v358_v63 = vrot.slane %v357_v60, 2  ;;  %v503_v59 = vld [vmem:[%s1022_s2 + $0x18] sm:$0xff] }
  0x21   :  { %v325_v0 = vadd.f32 %v324_v61, %v323_v58  ;;  %v345_v5 = vrot.slane %v344_v62, 2  ;;  %v359_v6 = vadd.f32 %v358_v63, %v357_v60  ;;  %v502_v58 = vld [vmem:[%s1022_s2 + $0x10] sm:$0xff]  ;;  %v504_v60 = vld [vmem:[%s1022_s2 + $0x20] sm:$0xff] }
  0x22   :  { %650 = vmatpush3.bf16.msk.msra.mxu0 %vm649_vm5, %v665_v23 }
  0x23   :  { %651 = vmatprep.subr.bf16.mxu0 %v662_v1  ;;  %v326_v7 = vrot.slane %v325_v0, 1  ;;  %v346_v8 = vadd.f32 %v345_v5, %v344_v62  ;;  %v360_v9 = vrot.slane %v359_v6, 1  ;;  %v505_v5 = vld [vmem:[%s1022_s2 + $0x28] sm:$0xff] }
  0x25   :  { %v327_v10 = vadd.f32 %v326_v7, %v325_v0  ;;  %v347_v11 = vrot.slane %v346_v8, 1  ;;  %v361_v12 = vadd.f32 %v360_v9, %v359_v6  ;;  %v506_v6 = vld [vmem:[%s1022_s2 + $0x30] sm:$0xff]  ;;  %v507_v7 = vld [vmem:[%s1022_s2 + $0x38] sm:$0xff] }
  0x26   :  { %653 = vmatpush3.bf16.msk.msra.mxu0 %vm652_vm8, %v665_v23 }
  0x27   :  { %v348_v13 = vadd.f32 %v347_v11, %v346_v8 }
  0x29   :  { %v363_v15 = vsel %vm362_vm9, %v327_v10, %v348_v13 }
  0x2a   :  { %v365_v1 = vsel %vm364_vm10, %v363_v15, %v361_v12 }
  0x2b   :  { %628 = vmatmul.mubr.f32.vlgmr.msra.gmra.mrb[0].mxu0 %v365_v1 }
  0xfe   :  { %v432_v16 = vpop.f32.mrb[0].mxu0 }
  0xff   :  { %v436_v17 = vmax.f32 %v432_v16, 1.0  ;;  %v629_v18 = vpop.f32.mrb[1].mxu0 }
 0x101   :  { %658 = vrcp.f32 %v436_v17 }
 0x10b   :  { %v659_v23 = vpop.eup %658 }
 0x10c   :  { %v440_v19 = vrot.slane %v659_v23, 2  ;;  %v443_v21 = vrot.slane %v659_v23, 1 }
 0x10e   :  { %v442_v20 = vmul.f32 %v440_v19, %v432_v16  ;;  %v445_v25 = vmul.f32 %v443_v21, %v432_v16 }
 0x110   :  { %v446_v24 = vmul.f32 %v442_v20, %v442_v20  ;;  %v456_v34 = vrot.slane %v442_v20, %v455_v30 }
 0x112   :  { %v448_v27 = vrot.slane %v446_v24, 7  ;;  %v457_v41 = vsub.f32 %v787_v40, %v456_v34  ;;  %v458_v42 = vsub.f32 %v817_v49, %v456_v34  ;;  %v459_v43 = vsub.f32 %v820_v50, %v456_v34  ;;  %v500_v50 = vld [vmem:[%s1022_s2] sm:$0xff] }
 0x113   :  { %v460_v44 = vsub.f32 %v823_v51, %v456_v34  ;;  %v461_v46 = vsub.f32 %v833_v55, %v456_v34  ;;  %v462_v48 = vsub.f32 %v863_v3, %v456_v34  ;;  %v463_v52 = vsub.f32 %v880_v14, %v456_v34  ;;  %v501_v51 = vld [vmem:[%s1022_s2 + $0x8] sm:$0xff] }
 0x114   :  { %v450_v28 = vsub.f32 %v445_v25, %v448_v27  ;;  %v464_v53 = vsub.f32 %v903_v22, %v456_v34 }
 0x116   :  { %v451_v29 = vadd.f32 1e-05, %v450_v28 }
 0x118   :  { %660 = vrsqrt.f32 %v451_v29 }
 0x122   :  { %v661_v37 = vpop.eup %660 }
 0x123   :  { %v472_v39 = vmul.f32 %v661_v37, %v576_v35 }
 0x125   :  { %v476_v45 = vrot.slane %v472_v39, %v475_v36 }
 0x127   :  { %v477_v40 = vmul.f32 %v476_v45, %v457_v41  ;;  %v478_v54 = vmul.f32 %v476_v45, %v458_v42  ;;  %v479_v49 = vmul.f32 %v476_v45, %v459_v43  ;;  %v480_v57 = vmul.f32 %v476_v45, %v460_v44 }
 0x128   :  { %v481_v55 = vmul.f32 %v476_v45, %v461_v46  ;;  %v482_v3 = vmul.f32 %v476_v45, %v462_v48  ;;  %v483_v14 = vmul.f32 %v476_v45, %v463_v52  ;;  %v484_v22 = vmul.f32 %v476_v45, %v464_v53 }
 0x129   :  { %v492_v61 = vadd.f32 %v577_v2, %v477_v40  ;;  %v493_v62 = vadd.f32 %v577_v2, %v478_v54  ;;  %v494_v63 = vadd.f32 %v577_v2, %v479_v49  ;;  %v495_v0 = vadd.f32 %v577_v2, %v480_v57 }
 0x12a   :  { %v496_v8 = vadd.f32 %v577_v2, %v481_v55  ;;  %v497_v9 = vadd.f32 %v577_v2, %v482_v3  ;;  %v498_v10 = vadd.f32 %v577_v2, %v483_v14  ;;  %v499_v11 = vadd.f32 %v577_v2, %v484_v22 }
 0x12b   :  { %v508_v12 = vadd.f32 %v500_v50, %v492_v61  ;;  %v509_v13 = vadd.f32 %v501_v51, %v493_v62  ;;  %v510_v15 = vadd.f32 %v502_v58, %v494_v63  ;;  %v511_v1 = vadd.f32 %v503_v59, %v495_v0 }
 0x12c   :  { %v512_v16 = vadd.f32 %v504_v60, %v496_v8  ;;  %v513_v17 = vadd.f32 %v505_v5, %v497_v9  ;;  %v514_v18 = vadd.f32 %v506_v6, %v498_v10  ;;  %v515_v23 = vadd.f32 %v507_v7, %v499_v11 }
 0x12d   :  { %v516_v19 = vmax.f32 %v508_v12, 0.0  ;;  %v517_v20 = vmax.f32 %v509_v13, 0.0  ;;  %v518_v21 = vmax.f32 %v510_v15, 0.0  ;;  %v519_v24 = vmax.f32 %v511_v1, 0.0 }
 0x12e   :  { %v520_v25 = vmax.f32 %v512_v16, 0.0  ;;  %v521_v27 = vmax.f32 %v513_v17, 0.0  ;;  %v522_v28 = vmax.f32 %v514_v18, 0.0  ;;  %v523_v29 = vmax.f32 %v515_v23, 0.0 }
 0x12f   :  { %v524_v30 = vmul.f32 %v516_v19, %v738_v26  ;;  %v525_v34 = vmul.f32 %v517_v20, %v756_v31  ;;  %v526_v35 = vmul.f32 %v518_v21, %v761_v32  ;;  %v527_v36 = vmul.f32 %v519_v24, %v766_v33 }
 0x130   :  { %v528_v37 = vmul.f32 %v520_v25, %v781_v38  ;;  %v529_v39 = vmul.f32 %v521_v27, %v811_v47  ;;  %v530_v41 = vmul.f32 %v522_v28, %v839_v56  ;;  %v531_v42 = vmul.f32 %v523_v29, %v868_v4 }
 0x131   :  { %532 = vst [vmem:[%s1023_s5] sm:$0xff] %v524_v30  ;;  %533 = vst [vmem:[%s1023_s5 + $0x8] sm:$0xff] %v525_v34 }
 0x132   :  { %534 = vst [vmem:[%s1023_s5 + $0x10] sm:$0xff] %v526_v35  ;;  %535 = vst [vmem:[%s1023_s5 + $0x18] sm:$0xff] %v527_v36 }
 0x133   :  { %536 = vst [vmem:[%s1023_s5 + $0x20] sm:$0xff] %v528_v37  ;;  %537 = vst [vmem:[%s1023_s5 + $0x28] sm:$0xff] %v529_v39 }
 0x134   :  { %538 = vst [vmem:[%s1023_s5 + $0x30] sm:$0xff] %v530_v41  ;;  %539 = vst [vmem:[%s1023_s5 + $0x38] sm:$0xff] %v531_v42 }

// kernel: mul.11
= control target key start
LH: loop header
LB: loop body
LE: loop exit
PB: predicated region body
PF: predicated region fallthrough
CT: control target
= control target key end

     0   :  { %s1756_s0 = inlined_call_operand.vmem [shape: f32[2,8,8,8], index: 0, kind: input, shape index: {}]   ;;  %s1757_s1 = inlined_call_operand.vmem [shape: f32[2,8,8,8,4], index: 1, kind: output, shape index: {}]  }
   0x1   :  { %v4_v0 = vld [vmem:[%s1756_s0] ss:$0 sm:$0xff]  ;;  %v726_v2 = vld [vmem:[%s1756_s0 + $0x8] ss:$0 sm:$0xff]  ;;  %v730_v4 = vld [vmem:[%s1756_s0 + $0x10] ss:$0 sm:$0xff] }
   0x2   :  { %v724_v1 = vld [vmem:[%s1756_s0 + $0x40] ss:$0 sm:$0xff]  ;;  %5 = vst [vmem:[%s1757_s1] sm:$0xf] %v4_v0  ;;  %727 = vst [vmem:[%s1757_s1 + $0x20] sm:$0xf] %v726_v2 }
   0x3   :  { %725 = vst [vmem:[%s1757_s1 + $0x100] sm:$0xf] %v724_v1  ;;  %v728_v3 = vld [vmem:[%s1756_s0 + $0x48] ss:$0 sm:$0xff]  ;;  %v732_v5 = vld [vmem:[%s1756_s0 + $0x50] ss:$0 sm:$0xff] }
   0x4   :  { %729 = vst [vmem:[%s1757_s1 + $0x120] sm:$0xf] %v728_v3  ;;  %731 = vst [vmem:[%s1757_s1 + $0x40] sm:$0xf] %v730_v4  ;;  %v734_v6 = vld [vmem:[%s1756_s0 + $0x18] ss:$0 sm:$0xff] }
   0x5   :  { %733 = vst [vmem:[%s1757_s1 + $0x140] sm:$0xf] %v732_v5  ;;  %v736_v7 = vld [vmem:[%s1756_s0 + $0x58] ss:$0 sm:$0xff]  ;;  %v738_v8 = vld [vmem:[%s1756_s0 + $0x20] ss:$0 sm:$0xff] }
   0x6   :  { %735 = vst [vmem:[%s1757_s1 + $0x60] sm:$0xf] %v734_v6  ;;  %737 = vst [vmem:[%s1757_s1 + $0x160] sm:$0xf] %v736_v7  ;;  %v740_v9 = vld [vmem:[%s1756_s0 + $0x60] ss:$0 sm:$0xff] }
   0x7   :  { %739 = vst [vmem:[%s1757_s1 + $0x80] sm:$0xf] %v738_v8  ;;  %v742_v10 = vld [vmem:[%s1756_s0 + $0x28] ss:$0 sm:$0xff]  ;;  %741 = vst [vmem:[%s1757_s1 + $0x180] sm:$0xf] %v740_v9 }
   0x8   :  { %v744_v11 = vld [vmem:[%s1756_s0 + $0x68] ss:$0 sm:$0xff]  ;;  %743 = vst [vmem:[%s1757_s1 + $0xa0] sm:$0xf] %v742_v10  ;;  %v746_v12 = vld [vmem:[%s1756_s0 + $0x30] ss:$0 sm:$0xff] }
   0x9   :  { %745 = vst [vmem:[%s1757_s1 + $0x1a0] sm:$0xf] %v744_v11  ;;  %v748_v13 = vld [vmem:[%s1756_s0 + $0x70] ss:$0 sm:$0xff]  ;;  %v750_v14 = vld [vmem:[%s1756_s0 + $0x38] ss:$0 sm:$0xff] }
   0xa   :  { %747 = vst [vmem:[%s1757_s1 + $0xc0] sm:$0xf] %v746_v12  ;;  %749 = vst [vmem:[%s1757_s1 + $0x1c0] sm:$0xf] %v748_v13  ;;  %v752_v15 = vld [vmem:[%s1756_s0 + $0x78] ss:$0 sm:$0xff] }
   0xb   :  { %751 = vst [vmem:[%s1757_s1 + $0xe0] sm:$0xf] %v750_v14  ;;  %v754_v16 = vld [vmem:[%s1756_s0 + $0x1] ss:$0 sm:$0xff]  ;;  %753 = vst [vmem:[%s1757_s1 + $0x1e0] sm:$0xf] %v752_v15 }
   0xc   :  { %v756_v17 = vld [vmem:[%s1756_s0 + $0x41] ss:$0 sm:$0xff]  ;;  %755 = vst [vmem:[%s1757_s1 + $0x4] sm:$0xf] %v754_v16  ;;  %v758_v18 = vld [vmem:[%s1756_s0 + $0x9] ss:$0 sm:$0xff] }
   0xd   :  { %757 = vst [vmem:[%s1757_s1 + $0x104] sm:$0xf] %v756_v17  ;;  %v760_v19 = vld [vmem:[%s1756_s0 + $0x49] ss:$0 sm:$0xff]  ;;  %v762_v20 = vld [vmem:[%s1756_s0 + $0x11] ss:$0 sm:$0xff] }
   0xe   :  { %759 = vst [vmem:[%s1757_s1 + $0x24] sm:$0xf] %v758_v18  ;;  %761 = vst [vmem:[%s1757_s1 + $0x124] sm:$0xf] %v760_v19  ;;  %v764_v21 = vld [vmem:[%s1756_s0 + $0x51] ss:$0 sm:$0xff] }
   0xf   :  { %763 = vst [vmem:[%s1757_s1 + $0x44] sm:$0xf] %v762_v20  ;;  %v766_v22 = vld [vmem:[%s1756_s0 + $0x19] ss:$0 sm:$0xff]  ;;  %765 = vst [vmem:[%s1757_s1 + $0x144] sm:$0xf] %v764_v21 }
  0x10   :  { %v768_v23 = vld [vmem:[%s1756_s0 + $0x59] ss:$0 sm:$0xff]  ;;  %767 = vst [vmem:[%s1757_s1 + $0x64] sm:$0xf] %v766_v22  ;;  %v770_v24 = vld [vmem:[%s1756_s0 + $0x21] ss:$0 sm:$0xff] }
  0x11   :  { %769 = vst [vmem:[%s1757_s1 + $0x164] sm:$0xf] %v768_v23  ;;  %v772_v25 = vld [vmem:[%s1756_s0 + $0x61] ss:$0 sm:$0xff]  ;;  %v774_v26 = vld [vmem:[%s1756_s0 + $0x29] ss:$0 sm:$0xff] }
  0x12   :  { %771 = vst [vmem:[%s1757_s1 + $0x84] sm:$0xf] %v770_v24  ;;  %773 = vst [vmem:[%s1757_s1 + $0x184] sm:$0xf] %v772_v25  ;;  %v776_v27 = vld [vmem:[%s1756_s0 + $0x69] ss:$0 sm:$0xff] }
  0x13   :  { %775 = vst [vmem:[%s1757_s1 + $0xa4] sm:$0xf] %v774_v26  ;;  %v778_v28 = vld [vmem:[%s1756_s0 + $0x31] ss:$0 sm:$0xff]  ;;  %777 = vst [vmem:[%s1757_s1 + $0x1a4] sm:$0xf] %v776_v27 }
  0x14   :  { %v780_v29 = vld [vmem:[%s1756_s0 + $0x71] ss:$0 sm:$0xff]  ;;  %779 = vst [vmem:[%s1757_s1 + $0xc4] sm:$0xf] %v778_v28  ;;  %v782_v30 = vld [vmem:[%s1756_s0 + $0x39] ss:$0 sm:$0xff] }
  0x15   :  { %781 = vst [vmem:[%s1757_s1 + $0x1c4] sm:$0xf] %v780_v29  ;;  %v784_v31 = vld [vmem:[%s1756_s0 + $0x79] ss:$0 sm:$0xff]  ;;  %v786_v32 = vld [vmem:[%s1756_s0 + $0x2] ss:$0 sm:$0xff] }
  0x16   :  { %783 = vst [vmem:[%s1757_s1 + $0xe4] sm:$0xf] %v782_v30  ;;  %785 = vst [vmem:[%s1757_s1 + $0x1e4] sm:$0xf] %v784_v31  ;;  %v788_v33 = vld [vmem:[%s1756_s0 + $0x42] ss:$0 sm:$0xff] }
  0x17   :  { %787 = vst [vmem:[%s1757_s1 + $0x8] sm:$0xf] %v786_v32  ;;  %v790_v34 = vld [vmem:[%s1756_s0 + $0xa] ss:$0 sm:$0xff]  ;;  %789 = vst [vmem:[%s1757_s1 + $0x108] sm:$0xf] %v788_v33 }
  0x18   :  { %v792_v35 = vld [vmem:[%s1756_s0 + $0x4a] ss:$0 sm:$0xff]  ;;  %791 = vst [vmem:[%s1757_s1 + $0x28] sm:$0xf] %v790_v34  ;;  %v794_v36 = vld [vmem:[%s1756_s0 + $0x12] ss:$0 sm:$0xff] }
  0x19   :  { %793 = vst [vmem:[%s1757_s1 + $0x128] sm:$0xf] %v792_v35  ;;  %v796_v37 = vld [vmem:[%s1756_s0 + $0x52] ss:$0 sm:$0xff]  ;;  %v798_v38 = vld [vmem:[%s1756_s0 + $0x1a] ss:$0 sm:$0xff] }
  0x1a   :  { %795 = vst [vmem:[%s1757_s1 + $0x48] sm:$0xf] %v794_v36  ;;  %797 = vst [vmem:[%s1757_s1 + $0x148] sm:$0xf] %v796_v37  ;;  %v800_v39 = vld [vmem:[%s1756_s0 + $0x5a] ss:$0 sm:$0xff] }
  0x1b   :  { %799 = vst [vmem:[%s1757_s1 + $0x68] sm:$0xf] %v798_v38  ;;  %v802_v40 = vld [vmem:[%s1756_s0 + $0x22] ss:$0 sm:$0xff]  ;;  %801 = vst [vmem:[%s1757_s1 + $0x168] sm:$0xf] %v800_v39 }
  0x1c   :  { %v804_v41 = vld [vmem:[%s1756_s0 + $0x62] ss:$0 sm:$0xff]  ;;  %803 = vst [vmem:[%s1757_s1 + $0x88] sm:$0xf] %v802_v40  ;;  %v806_v42 = vld [vmem:[%s1756_s0 + $0x2a] ss:$0 sm:$0xff] }
  0x1d   :  { %805 = vst [vmem:[%s1757_s1 + $0x188] sm:$0xf] %v804_v41  ;;  %v808_v43 = vld [vmem:[%s1756_s0 + $0x6a] ss:$0 sm:$0xff]  ;;  %v810_v44 = vld [vmem:[%s1756_s0 + $0x32] ss:$0 sm:$0xff] }
  0x1e   :  { %807 = vst [vmem:[%s1757_s1 + $0xa8] sm:$0xf] %v806_v42  ;;  %809 = vst [vmem:[%s1757_s1 + $0x1a8] sm:$0xf] %v808_v43  ;;  %v812_v45 = vld [vmem:[%s1756_s0 + $0x72] ss:$0 sm:$0xff] }
  0x1f   :  { %811 = vst [vmem:[%s1757_s1 + $0xc8] sm:$0xf] %v810_v44  ;;  %v814_v46 = vld [vmem:[%s1756_s0 + $0x3a] ss:$0 sm:$0xff]  ;;  %813 = vst [vmem:[%s1757_s1 + $0x1c8] sm:$0xf] %v812_v45 }
  0x20   :  { %v816_v47 = vld [vmem:[%s1756_s0 + $0x7a] ss:$0 sm:$0xff]  ;;  %815 = vst [vmem:[%s1757_s1 + $0xe8] sm:$0xf] %v814_v46  ;;  %v818_v48 = vld [vmem:[%s1756_s0 + $0x3] ss:$0 sm:$0xff] }
  0x21   :  { %817 = vst [vmem:[%s1757_s1 + $0x1e8] sm:$0xf] %v816_v47  ;;  %v820_v49 = vld [vmem:[%s1756_s0 + $0x43] ss:$0 sm:$0xff]  ;;  %v822_v50 = vld [vmem:[%s1756_s0 + $0xb] ss:$0 sm:$0xff] }
  0x22   :  { %819 = vst [vmem:[%s1757_s1 + $0xc] sm:$0xf] %v818_v48  ;;  %821 = vst [vmem:[%s1757_s1 + $0x10c] sm:$0xf] %v820_v49  ;;  %v824_v51 = vld [vmem:[%s1756_s0 + $0x4b] ss:$0 sm:$0xff] }
  0x23   :  { %823 = vst [vmem:[%s1757_s1 + $0x2c] sm:$0xf] %v822_v50  ;;  %v826_v52 = vld [vmem:[%s1756_s0 + $0x13] ss:$0 sm:$0xff]  ;;  %825 = vst [vmem:[%s1757_s1 + $0x12c] sm:$0xf] %v824_v51 }
  0x24   :  { %v828_v53 = vld [vmem:[%s1756_s0 + $0x53] ss:$0 sm:$0xff]  ;;  %827 = vst [vmem:[%s1757_s1 + $0x4c] sm:$0xf] %v826_v52  ;;  %v830_v54 = vld [vmem:[%s1756_s0 + $0x1b] ss:$0 sm:$0xff] }
  0x25   :  { %829 = vst [vmem:[%s1757_s1 + $0x14c] sm:$0xf] %v828_v53  ;;  %v832_v55 = vld [vmem:[%s1756_s0 + $0x5b] ss:$0 sm:$0xff]  ;;  %v834_v56 = vld [vmem:[%s1756_s0 + $0x23] ss:$0 sm:$0xff] }
  0x26   :  { %831 = vst [vmem:[%s1757_s1 + $0x6c] sm:$0xf] %v830_v54  ;;  %833 = vst [vmem:[%s1757_s1 + $0x16c] sm:$0xf] %v832_v55  ;;  %v836_v57 = vld [vmem:[%s1756_s0 + $0x63] ss:$0 sm:$0xff] }
  0x27   :  { %835 = vst [vmem:[%s1757_s1 + $0x8c] sm:$0xf] %v834_v56  ;;  %v838_v58 = vld [vmem:[%s1756_s0 + $0x2b] ss:$0 sm:$0xff]  ;;  %837 = vst [vmem:[%s1757_s1 + $0x18c] sm:$0xf] %v836_v57 }
  0x28   :  { %v840_v59 = vld [vmem:[%s1756_s0 + $0x6b] ss:$0 sm:$0xff]  ;;  %839 = vst [vmem:[%s1757_s1 + $0xac] sm:$0xf] %v838_v58  ;;  %v842_v60 = vld [vmem:[%s1756_s0 + $0x33] ss:$0 sm:$0xff] }
  0x29   :  { %841 = vst [vmem:[%s1757_s1 + $0x1ac] sm:$0xf] %v840_v59  ;;  %v844_v61 = vld [vmem:[%s1756_s0 + $0x73] ss:$0 sm:$0xff]  ;;  %v846_v62 = vld [vmem:[%s1756_s0 + $0x3b] ss:$0 sm:$0xff] }
  0x2a   :  { %843 = vst [vmem:[%s1757_s1 + $0xcc] sm:$0xf] %v842_v60  ;;  %845 = vst [vmem:[%s1757_s1 + $0x1cc] sm:$0xf] %v844_v61  ;;  %v848_v63 = vld [vmem:[%s1756_s0 + $0x7b] ss:$0 sm:$0xff] }
  0x2b   :  { %847 = vst [vmem:[%s1757_s1 + $0xec] sm:$0xf] %v846_v62  ;;  %v850_v0 = vld [vmem:[%s1756_s0 + $0x4] ss:$0 sm:$0xff]  ;;  %849 = vst [vmem:[%s1757_s1 + $0x1ec] sm:$0xf] %v848_v63 }
  0x2c   :  { %v852_v1 = vld [vmem:[%s1756_s0 + $0x44] ss:$0 sm:$0xff]  ;;  %851 = vst [vmem:[%s1757_s1 + $0x10] sm:$0xf] %v850_v0  ;;  %v854_v2 = vld [vmem:[%s1756_s0 + $0xc] ss:$0 sm:$0xff] }
  0x2d   :  { %853 = vst [vmem:[%s1757_s1 + $0x110] sm:$0xf] %v852_v1  ;;  %v856_v3 = vld [vmem:[%s1756_s0 + $0x4c] ss:$0 sm:$0xff]  ;;  %v858_v4 = vld [vmem:[%s1756_s0 + $0x14] ss:$0 sm:$0xff] }
  0x2e   :  { %855 = vst [vmem:[%s1757_s1 + $0x30] sm:$0xf] %v854_v2  ;;  %857 = vst [vmem:[%s1757_s1 + $0x130] sm:$0xf] %v856_v3  ;;  %v860_v5 = vld [vmem:[%s1756_s0 + $0x54] ss:$0 sm:$0xff] }
  0x2f   :  { %859 = vst [vmem:[%s1757_s1 + $0x50] sm:$0xf] %v858_v4  ;;  %v862_v6 = vld [vmem:[%s1756_s0 + $0x1c] ss:$0 sm:$0xff]  ;;  %861 = vst [vmem:[%s1757_s1 + $0x150] sm:$0xf] %v860_v5 }
  0x30   :  { %v864_v7 = vld [vmem:[%s1756_s0 + $0x5c] ss:$0 sm:$0xff]  ;;  %863 = vst [vmem:[%s1757_s1 + $0x70] sm:$0xf] %v862_v6  ;;  %v866_v8 = vld [vmem:[%s1756_s0 + $0x24] ss:$0 sm:$0xff] }
  0x31   :  { %865 = vst [vmem:[%s1757_s1 + $0x170] sm:$0xf] %v864_v7  ;;  %v868_v9 = vld [vmem:[%s1756_s0 + $0x64] ss:$0 sm:$0xff]  ;;  %v870_v10 = vld [vmem:[%s1756_s0 + $0x2c] ss:$0 sm:$0xff] }
  0x32   :  { %867 = vst [vmem:[%s1757_s1 + $0x90] sm:$0xf] %v866_v8  ;;  %869 = vst [vmem:[%s1757_s1 + $0x190] sm:$0xf] %v868_v9  ;;  %v872_v11 = vld [vmem:[%s1756_s0 + $0x6c] ss:$0 sm:$0xff] }
  0x33   :  { %871 = vst [vmem:[%s1757_s1 + $0xb0] sm:$0xf] %v870_v10  ;;  %v874_v12 = vld [vmem:[%s1756_s0 + $0x34] ss:$0 sm:$0xff]  ;;  %873 = vst [vmem:[%s1757_s1 + $0x1b0] sm:$0xf] %v872_v11 }
  0x34   :  { %v876_v13 = vld [vmem:[%s1756_s0 + $0x74] ss:$0 sm:$0xff]  ;;  %875 = vst [vmem:[%s1757_s1 + $0xd0] sm:$0xf] %v874_v12  ;;  %v878_v14 = vld [vmem:[%s1756_s0 + $0x3c] ss:$0 sm:$0xff] }
  0x35   :  { %877 = vst [vmem:[%s1757_s1 + $0x1d0] sm:$0xf] %v876_v13  ;;  %v880_v15 = vld [vmem:[%s1756_s0 + $0x7c] ss:$0 sm:$0xff]  ;;  %v882_v16 = vld [vmem:[%s1756_s0 + $0x5] ss:$0 sm:$0xff] }
  0x36   :  { %879 = vst [vmem:[%s1757_s1 + $0xf0] sm:$0xf] %v878_v14  ;;  %881 = vst [vmem:[%s1757_s1 + $0x1f0] sm:$0xf] %v880_v15  ;;  %v884_v17 = vld [vmem:[%s1756_s0 + $0x45] ss:$0 sm:$0xff] }
  0x37   :  { %883 = vst [vmem:[%s1757_s1 + $0x14] sm:$0xf] %v882_v16  ;;  %v886_v18 = vld [vmem:[%s1756_s0 + $0xd] ss:$0 sm:$0xff]  ;;  %885 = vst [vmem:[%s1757_s1 + $0x114] sm:$0xf] %v884_v17 }
  0x38   :  { %v888_v19 = vld [vmem:[%s1756_s0 + $0x4d] ss:$0 sm:$0xff]  ;;  %887 = vst [vmem:[%s1757_s1 + $0x34] sm:$0xf] %v886_v18  ;;  %v890_v20 = vld [vmem:[%s1756_s0 + $0x15] ss:$0 sm:$0xff] }
  0x39   :  { %889 = vst [vmem:[%s1757_s1 + $0x134] sm:$0xf] %v888_v19  ;;  %v892_v21 = vld [vmem:[%s1756_s0 + $0x55] ss:$0 sm:$0xff]  ;;  %v894_v22 = vld [vmem:[%s1756_s0 + $0x1d] ss:$0 sm:$0xff] }
  0x3a   :  { %891 = vst [vmem:[%s1757_s1 + $0x54] sm:$0xf] %v890_v20  ;;  %893 = vst [vmem:[%s1757_s1 + $0x154] sm:$0xf] %v892_v21  ;;  %v896_v23 = vld [vmem:[%s1756_s0 + $0x5d] ss:$0 sm:$0xff] }
  0x3b   :  { %895 = vst [vmem:[%s1757_s1 + $0x74] sm:$0xf] %v894_v22  ;;  %v898_v24 = vld [vmem:[%s1756_s0 + $0x25] ss:$0 sm:$0xff]  ;;  %897 = vst [vmem:[%s1757_s1 + $0x174] sm:$0xf] %v896_v23 }
  0x3c   :  { %v900_v25 = vld [vmem:[%s1756_s0 + $0x65] ss:$0 sm:$0xff]  ;;  %899 = vst [vmem:[%s1757_s1 + $0x94] sm:$0xf] %v898_v24  ;;  %v902_v26 = vld [vmem:[%s1756_s0 + $0x2d] ss:$0 sm:$0xff] }
  0x3d   :  { %901 = vst [vmem:[%s1757_s1 + $0x194] sm:$0xf] %v900_v25  ;;  %v904_v27 = vld [vmem:[%s1756_s0 + $0x6d] ss:$0 sm:$0xff]  ;;  %v906_v28 = vld [vmem:[%s1756_s0 + $0x35] ss:$0 sm:$0xff] }
  0x3e   :  { %903 = vst [vmem:[%s1757_s1 + $0xb4] sm:$0xf] %v902_v26  ;;  %905 = vst [vmem:[%s1757_s1 + $0x1b4] sm:$0xf] %v904_v27  ;;  %v908_v29 = vld [vmem:[%s1756_s0 + $0x75] ss:$0 sm:$0xff] }
  0x3f   :  { %907 = vst [vmem:[%s1757_s1 + $0xd4] sm:$0xf] %v906_v28  ;;  %v910_v30 = vld [vmem:[%s1756_s0 + $0x3d] ss:$0 sm:$0xff]  ;;  %909 = vst [vmem:[%s1757_s1 + $0x1d4] sm:$0xf] %v908_v29 }
  0x40   :  { %v912_v31 = vld [vmem:[%s1756_s0 + $0x7d] ss:$0 sm:$0xff]  ;;  %911 = vst [vmem:[%s1757_s1 + $0xf4] sm:$0xf] %v910_v30  ;;  %v914_v32 = vld [vmem:[%s1756_s0 + $0x6] ss:$0 sm:$0xff] }
  0x41   :  { %913 = vst [vmem:[%s1757_s1 + $0x1f4] sm:$0xf] %v912_v31  ;;  %v916_v33 = vld [vmem:[%s1756_s0 + $0x46] ss:$0 sm:$0xff]  ;;  %v918_v34 = vld [vmem:[%s1756_s0 + $0xe] ss:$0 sm:$0xff] }
  0x42   :  { %915 = vst [vmem:[%s1757_s1 + $0x18] sm:$0xf] %v914_v32  ;;  %917 = vst [vmem:[%s1757_s1 + $0x118] sm:$0xf] %v916_v33  ;;  %v920_v35 = vld [vmem:[%s1756_s0 + $0x4e] ss:$0 sm:$0xff] }
  0x43   :  { %919 = vst [vmem:[%s1757_s1 + $0x38] sm:$0xf] %v918_v34  ;;  %v922_v36 = vld [vmem:[%s1756_s0 + $0x16] ss:$0 sm:$0xff]  ;;  %921 = vst [vmem:[%s1757_s1 + $0x138] sm:$0xf] %v920_v35 }
  0x44   :  { %v924_v37 = vld [vmem:[%s1756_s0 + $0x56] ss:$0 sm:$0xff]  ;;  %923 = vst [vmem:[%s1757_s1 + $0x58] sm:$0xf] %v922_v36  ;;  %v926_v38 = vld [vmem:[%s1756_s0 + $0x1e] ss:$0 sm:$0xff] }
  0x45   :  { %925 = vst [vmem:[%s1757_s1 + $0x158] sm:$0xf] %v924_v37  ;;  %v928_v39 = vld [vmem:[%s1756_s0 + $0x5e] ss:$0 sm:$0xff]  ;;  %v930_v40 = vld [vmem:[%s1756_s0 + $0x26] ss:$0 sm:$0xff] }
  0x46   :  { %927 = vst [vmem:[%s1757_s1 + $0x78] sm:$0xf] %v926_v38  ;;  %929 = vst [vmem:[%s1757_s1 + $0x178] sm:$0xf] %v928_v39  ;;  %v932_v41 = vld [vmem:[%s1756_s0 + $0x66] ss:$0 sm:$0xff] }
  0x47   :  { %931 = vst [vmem:[%s1757_s1 + $0x98] sm:$0xf] %v930_v40  ;;  %v934_v42 = vld [vmem:[%s1756_s0 + $0x2e] ss:$0 sm:$0xff]  ;;  %933 = vst [vmem:[%s1757_s1 + $0x198] sm:$0xf] %v932_v41 }
  0x48   :  { %v936_v43 = vld [vmem:[%s1756_s0 + $0x6e] ss:$0 sm:$0xff]  ;;  %935 = vst [vmem:[%s1757_s1 + $0xb8] sm:$0xf] %v934_v42  ;;  %v938_v44 = vld [vmem:[%s1756_s0 + $0x36] ss:$0 sm:$0xff] }
  0x49   :  { %937 = vst [vmem:[%s1757_s1 + $0x1b8] sm:$0xf] %v936_v43  ;;  %v940_v45 = vld [vmem:[%s1756_s0 + $0x76] ss:$0 sm:$0xff]  ;;  %v942_v46 = vld [vmem:[%s1756_s0 + $0x3e] ss:$0 sm:$0xff] }
  0x4a   :  { %939 = vst [vmem:[%s1757_s1 + $0xd8] sm:$0xf] %v938_v44  ;;  %941 = vst [vmem:[%s1757_s1 + $0x1d8] sm:$0xf] %v940_v45  ;;  %v944_v47 = vld [vmem:[%s1756_s0 + $0x7e] ss:$0 sm:$0xff] }
  0x4b   :  { %943 = vst [vmem:[%s1757_s1 + $0xf8] sm:$0xf] %v942_v46  ;;  %v946_v48 = vld [vmem:[%s1756_s0 + $0x7] ss:$0 sm:$0xff]  ;;  %945 = vst [vmem:[%s1757_s1 + $0x1f8] sm:$0xf] %v944_v47 }
  0x4c   :  { %v948_v49 = vld [vmem:[%s1756_s0 + $0x47] ss:$0 sm:$0xff]  ;;  %947 = vst [vmem:[%s1757_s1 + $0x1c] sm:$0xf] %v946_v48  ;;  %v950_v50 = vld [vmem:[%s1756_s0 + $0xf] ss:$0 sm:$0xff] }
  0x4d   :  { %949 = vst [vmem:[%s1757_s1 + $0x11c] sm:$0xf] %v948_v49  ;;  %v952_v51 = vld [vmem:[%s1756_s0 + $0x4f] ss:$0 sm:$0xff]  ;;  %v954_v52 = vld [vmem:[%s1756_s0 + $0x17] ss:$0 sm:$0xff] }
  0x4e   :  { %951 = vst [vmem:[%s1757_s1 + $0x3c] sm:$0xf] %v950_v50  ;;  %953 = vst [vmem:[%s1757_s1 + $0x13c] sm:$0xf] %v952_v51  ;;  %v956_v53 = vld [vmem:[%s1756_s0 + $0x57] ss:$0 sm:$0xff] }
  0x4f   :  { %955 = vst [vmem:[%s1757_s1 + $0x5c] sm:$0xf] %v954_v52  ;;  %v958_v54 = vld [vmem:[%s1756_s0 + $0x1f] ss:$0 sm:$0xff]  ;;  %957 = vst [vmem:[%s1757_s1 + $0x15c] sm:$0xf] %v956_v53 }
  0x50   :  { %v960_v55 = vld [vmem:[%s1756_s0 + $0x5f] ss:$0 sm:$0xff]  ;;  %959 = vst [vmem:[%s1757_s1 + $0x7c] sm:$0xf] %v958_v54  ;;  %v962_v56 = vld [vmem:[%s1756_s0 + $0x27] ss:$0 sm:$0xff] }
  0x51   :  { %961 = vst [vmem:[%s1757_s1 + $0x17c] sm:$0xf] %v960_v55  ;;  %v964_v57 = vld [vmem:[%s1756_s0 + $0x67] ss:$0 sm:$0xff]  ;;  %v966_v58 = vld [vmem:[%s1756_s0 + $0x2f] ss:$0 sm:$0xff] }
  0x52   :  { %963 = vst [vmem:[%s1757_s1 + $0x9c] sm:$0xf] %v962_v56  ;;  %965 = vst [vmem:[%s1757_s1 + $0x19c] sm:$0xf] %v964_v57  ;;  %v968_v59 = vld [vmem:[%s1756_s0 + $0x6f] ss:$0 sm:$0xff] }
  0x53   :  { %967 = vst [vmem:[%s1757_s1 + $0xbc] sm:$0xf] %v966_v58  ;;  %v970_v60 = vld [vmem:[%s1756_s0 + $0x37] ss:$0 sm:$0xff]  ;;  %969 = vst [vmem:[%s1757_s1 + $0x1bc] sm:$0xf] %v968_v59 }
  0x54   :  { %v972_v61 = vld [vmem:[%s1756_s0 + $0x77] ss:$0 sm:$0xff]  ;;  %971 = vst [vmem:[%s1757_s1 + $0xdc] sm:$0xf] %v970_v60  ;;  %v974_v62 = vld [vmem:[%s1756_s0 + $0x3f] ss:$0 sm:$0xff] }
  0x55   :  { %973 = vst [vmem:[%s1757_s1 + $0x1dc] sm:$0xf] %v972_v61  ;;  %v976_v63 = vld [vmem:[%s1756_s0 + $0x7f] ss:$0 sm:$0xff]  ;;  %975 = vst [vmem:[%s1757_s1 + $0xfc] sm:$0xf] %v974_v62 }
  0x56   :  { %977 = vst [vmem:[%s1757_s1 + $0x1fc] sm:$0xf] %v976_v63 }

// kernel: tile.108
= control target key start
LH: loop header
LB: loop body
LE: loop exit
PB: predicated region body
PF: predicated region fallthrough
CT: control target
= control target key end

     0   :  { %s64_s0 = inlined_call_operand.vmem [shape: f32[4], index: 0, kind: input, shape index: {}]   ;;  %s65_s1 = inlined_call_operand.vmem [shape: f32[64,4], index: 1, kind: output, shape index: {}]  }
   0x1   :  { %v4_v0 = vld [vmem:[%s64_s0] ss:$0 sm:$0xff] }
   0x2   :  { %5 = vst [vmem:[%s65_s1] sm:$0xff] %v4_v0  ;;  %20 = vst [vmem:[%s65_s1 + $0x8] sm:$0xff] %v4_v0 }
   0x3   :  { %21 = vst [vmem:[%s65_s1 + $0x10] sm:$0xff] %v4_v0  ;;  %22 = vst [vmem:[%s65_s1 + $0x18] sm:$0xff] %v4_v0 }
   0x4   :  { %23 = vst [vmem:[%s65_s1 + $0x20] sm:$0xff] %v4_v0  ;;  %24 = vst [vmem:[%s65_s1 + $0x28] sm:$0xff] %v4_v0 }
   0x5   :  { %25 = vst [vmem:[%s65_s1 + $0x30] sm:$0xff] %v4_v0  ;;  %26 = vst [vmem:[%s65_s1 + $0x38] sm:$0xff] %v4_v0 }

// kernel: tile.109
= control target key start
LH: loop header
LB: loop body
LE: loop exit
PB: predicated region body
PF: predicated region fallthrough
CT: control target
= control target key end

     0   :  { %vm5_vm0 = vcmask 1041409   ;;  %s425_s14 = smov 124   ;;  %s426_s21 = smov 116   ;;  %vm7_vm1 = vcmask 31744   ;;  %vm17_vm2 = vcmask 1048544   ;;  %vm27_vm3 = vcmask 1015744   ;;  %s696_s0 = inlined_call_operand.vmem [shape: f32[64,4], index: 0, kind: input, shape index: {}]   ;;  %s697_s1 = inlined_call_operand.vmem [shape: f32[1,256], index: 1, kind: output, shape index: {}]  }
   0x1   :  { %v331_v0 = vld [vmem:[%s696_s0 + $0x1f] sm:$0x1]   ;;  %v335_v3 = vld [vmem:[%s696_s0 + $0x1d] sm:$0x1]   ;;  %v333_v6 = vld [vmem:[%s696_s0 + $0x1e] sm:$0x1]  }
   0x2   :  { %v332_v1 = vld [vmem:[%s696_s0 + $0x3e] sm:$0x2]   ;;  %v336_v4 = vld [vmem:[%s696_s0 + $0x3c] sm:$0x2]   ;;  %v334_v7 = vld [vmem:[%s696_s0 + $0x3d] sm:$0x2]  }
   0x3   :  { %v14_v2 = vsel %vm5_vm0, %v332_v1, %v331_v0  ;;  %v34_v5 = vsel %vm5_vm0, %v336_v4, %v335_v3  ;;  %v337_v8 = vld [vmem:[%s696_s0 + $0x1c] sm:$0x1]   ;;  %v24_v9 = vsel %vm5_vm0, %v334_v7, %v333_v6  ;;  %v339_v12 = vld [vmem:[%s696_s0 + $0x1b] sm:$0x1]   ;;  %v341_v14 = vld [vmem:[%s696_s0 + $0x1a] sm:$0x1]  }
   0x4   :  { %15 = vrot.lane.b32.xlu0 %v14_v2, %s425_s14  ;;  %35 = vrot.lane.b32.xlu1 %v34_v5, %s426_s21  ;;  %v338_v10 = vld [vmem:[%s696_s0 + $0x3b] sm:$0x2]   ;;  %v340_v13 = vld [vmem:[%s696_s0 + $0x3a] sm:$0x2]   ;;  %s427_s3 = smov 120   ;;  %s428_s4 = smov 112  }
   0x5   :  { %v44_v11 = vsel %vm5_vm0, %v338_v10, %v337_v8  ;;  %v342_v15 = vld [vmem:[%s696_s0 + $0x39] sm:$0x2]   ;;  %v54_v16 = vsel %vm5_vm0, %v340_v13, %v339_v12  ;;  %v343_v18 = vld [vmem:[%s696_s0 + $0x19] sm:$0x1]   ;;  %v345_v20 = vld [vmem:[%s696_s0 + $0x18] sm:$0x1]  }
   0x6   :  { %v64_v17 = vsel %vm5_vm0, %v342_v15, %v341_v14  ;;  %v344_v19 = vld [vmem:[%s696_s0 + $0x38] sm:$0x2]   ;;  %v346_v21 = vld [vmem:[%s696_s0 + $0x37] sm:$0x2]   ;;  %s429_s13 = smov 108   ;;  %s430_s14 = smov 104  }
   0x7   :  { %v74_v22 = vsel %vm5_vm0, %v344_v19, %v343_v18  ;;  %v84_v23 = vsel %vm5_vm0, %v346_v21, %v345_v20  ;;  %v347_v24 = vld [vmem:[%s696_s0 + $0x17] sm:$0x1]   ;;  %v349_v26 = vld [vmem:[%s696_s0 + $0x16] sm:$0x1]   ;;  %s431_s23 = smov 100   ;;  %s432_s24 = smov 96  }
   0x8   :  { %25 = vrot.lane.b32.xlu0 %v24_v9, %s427_s3  ;;  %45 = vrot.lane.b32.xlu1 %v44_v11, %s428_s4  ;;  %v348_v25 = vld [vmem:[%s696_s0 + $0x36] sm:$0x2]   ;;  %v350_v27 = vld [vmem:[%s696_s0 + $0x35] sm:$0x2]   ;;  %s433_s4 = smov 92   ;;  %s434_s5 = smov 88  }
   0x9   :  { %v94_v28 = vsel %vm5_vm0, %v348_v25, %v347_v24  ;;  %v104_v29 = vsel %vm5_vm0, %v350_v27, %v349_v26  ;;  %v351_v30 = vld [vmem:[%s696_s0 + $0x15] sm:$0x1]   ;;  %v353_v32 = vld [vmem:[%s696_s0 + $0x14] sm:$0x1]   ;;  %v355_v36 = vld [vmem:[%s696_s0 + $0x13] sm:$0x1]  }
   0xa   :  { %v352_v31 = vld [vmem:[%s696_s0 + $0x34] sm:$0x2]   ;;  %v354_v33 = vld [vmem:[%s696_s0 + $0x33] sm:$0x2]   ;;  %v356_v37 = vld [vmem:[%s696_s0 + $0x32] sm:$0x2]  }
   0xb   :  { %v114_v34 = vsel %vm5_vm0, %v352_v31, %v351_v30  ;;  %v124_v35 = vsel %vm5_vm0, %v354_v33, %v353_v32  ;;  %v357_v38 = vld [vmem:[%s696_s0 + $0x12] sm:$0x1]   ;;  %s436_s15 = smov 80   ;;  %v134_v40 = vsel %vm5_vm0, %v356_v37, %v355_v36  ;;  %v359_v42 = vld [vmem:[%s696_s0 + $0x11] sm:$0x1]   ;;  %s438_s29 = smov 72  }
   0xc   :  { %55 = vrot.lane.b32.xlu0 %v54_v16, %s429_s13  ;;  %65 = vrot.lane.b32.xlu1 %v64_v17, %s430_s14  ;;  %v358_v39 = vld [vmem:[%s696_s0 + $0x31] sm:$0x2]   ;;  %s435_s14 = smov 84   ;;  %v360_v43 = vld [vmem:[%s696_s0 + $0x30] sm:$0x2]   ;;  %s439_s9 = smov 68  }
   0xd   :  { %v144_v41 = vsel %vm5_vm0, %v358_v39, %v357_v38  ;;  %v361_v44 = vld [vmem:[%s696_s0 + $0x10] sm:$0x1]   ;;  %v2_v46 = vld [vmem:[%s696_s0] sm:$0x1]   ;;  %v154_v48 = vsel %vm5_vm0, %v360_v43, %v359_v42  ;;  %v363_v51 = vld [vmem:[%s696_s0 + $0xf] sm:$0x1]  }
   0xe   :  { %v362_v45 = vld [vmem:[%s696_s0 + $0x2f] sm:$0x2]   ;;  %v330_v47 = vld [vmem:[%s696_s0 + $0x1f] sm:$0x2]   ;;  %v364_v52 = vld [vmem:[%s696_s0 + $0x2e] sm:$0x2]  }
   0xf   :  { %v6_v49 = vsel %vm5_vm0, %v330_v47, %v2_v46  ;;  %v164_v50 = vsel %vm5_vm0, %v362_v45, %v361_v44  ;;  %v365_v53 = vld [vmem:[%s696_s0 + $0xe] sm:$0x1]   ;;  %s440_s10 = smov 64   ;;  %v174_v55 = vsel %vm5_vm0, %v364_v52, %v363_v51  ;;  %v367_v57 = vld [vmem:[%s696_s0 + $0xd] sm:$0x1]   ;;  %s441_s19 = smov 60  }
  0x10   :  { %75 = vrot.lane.b32.xlu0 %v74_v22, %s431_s23  ;;  %85 = vrot.lane.b32.xlu1 %v84_v23, %s432_s24  ;;  %s437_s24 = smov 76   ;;  %8 = vst.msk [vmem:[#allocation0] ss:$8 sm:$0x3] %vm7_vm1, %v6_v49   ;;  %v366_v54 = vld [vmem:[%s696_s0 + $0x2d] sm:$0x2]  }
  0x11   :  { %v184_v56 = vsel %vm5_vm0, %v366_v54, %v365_v53  ;;  %v368_v58 = vld [vmem:[%s696_s0 + $0x2c] sm:$0x2]   ;;  %v369_v59 = vld [vmem:[%s696_s0 + $0xc] sm:$0x1]   ;;  %s442_s20 = smov 56   ;;  %s444_s30 = smov 48  }
  0x12   :  { %v370_v60 = vld [vmem:[%s696_s0 + $0x2b] sm:$0x2]   ;;  %v194_v61 = vsel %vm5_vm0, %v368_v58, %v367_v57  ;;  %v371_v63 = vld [vmem:[%s696_s0 + $0xb] sm:$0x1]   ;;  %v373_v1 = vld [vmem:[%s696_s0 + $0xa] sm:$0x1]  }
  0x13   :  { %v204_v62 = vsel %vm5_vm0, %v370_v60, %v369_v59  ;;  %v372_v0 = vld [vmem:[%s696_s0 + $0x2a] sm:$0x2]   ;;  %v374_v2 = vld [vmem:[%s696_s0 + $0x29] sm:$0x2]   ;;  %v375_v5 = vld [vmem:[%s696_s0 + $0x9] sm:$0x1]  }
  0x14   :  { %95 = vrot.lane.b32.xlu0 %v94_v28, %s433_s4  ;;  %105 = vrot.lane.b32.xlu1 %v104_v29, %s434_s5  ;;  %v214_v3 = vsel %vm5_vm0, %v372_v0, %v371_v63  ;;  %v224_v4 = vsel %vm5_vm0, %v374_v2, %v373_v1  ;;  %v376_v6 = vld [vmem:[%s696_s0 + $0x28] sm:$0x2]   ;;  %v377_v7 = vld [vmem:[%s696_s0 + $0x8] sm:$0x1]   ;;  %s446_s11 = smov 40   ;;  %s448_s21 = smov 32  }
  0x15   :  { %v378_v8 = vld [vmem:[%s696_s0 + $0x27] sm:$0x2]   ;;  %v234_v9 = vsel %vm5_vm0, %v376_v6, %v375_v5  ;;  %v379_v11 = vld [vmem:[%s696_s0 + $0x7] sm:$0x1]   ;;  %v381_v13 = vld [vmem:[%s696_s0 + $0x6] sm:$0x1]  }
  0x16   :  { %v244_v10 = vsel %vm5_vm0, %v378_v8, %v377_v7  ;;  %v380_v12 = vld [vmem:[%s696_s0 + $0x26] sm:$0x2]   ;;  %v382_v14 = vld [vmem:[%s696_s0 + $0x25] sm:$0x2]   ;;  %v383_v17 = vld [vmem:[%s696_s0 + $0x5] sm:$0x1]  }
  0x17   :  { %v254_v15 = vsel %vm5_vm0, %v380_v12, %v379_v11  ;;  %v264_v16 = vsel %vm5_vm0, %v382_v14, %v381_v13  ;;  %v384_v18 = vld [vmem:[%s696_s0 + $0x24] sm:$0x2]   ;;  %v385_v19 = vld [vmem:[%s696_s0 + $0x4] sm:$0x1]   ;;  %s450_s2 = smov 24   ;;  %s452_s12 = smov 16  }
  0x18   :  { %115 = vrot.lane.b32.xlu0 %v114_v34, %s435_s14  ;;  %125 = vrot.lane.b32.xlu1 %v124_v35, %s436_s15  ;;  %v386_v20 = vld [vmem:[%s696_s0 + $0x23] sm:$0x2]   ;;  %v274_v21 = vsel %vm5_vm0, %v384_v18, %v383_v17  ;;  %v387_v23 = vld [vmem:[%s696_s0 + $0x3] sm:$0x1]   ;;  %s454_s17 = smov 8   ;;  %s455_s18 = smov 4  }
  0x19   :  { %v284_v22 = vsel %vm5_vm0, %v386_v20, %v385_v19  ;;  %v388_v24 = vld [vmem:[%s696_s0 + $0x22] sm:$0x2]   ;;  %v389_v25 = vld [vmem:[%s696_s0 + $0x2] sm:$0x1]   ;;  %v391_v29 = vld [vmem:[%s696_s0 + $0x1] sm:$0x1]  }
  0x1a   :  { %v390_v26 = vld [vmem:[%s696_s0 + $0x21] sm:$0x2]   ;;  %v294_v27 = vsel %vm5_vm0, %v388_v24, %v387_v23  ;;  %v392_v30 = vld [vmem:[%s696_s0 + $0x20] sm:$0x2]   ;;  %s453_s0 = smov 12   ;;  %vm37_vm4 = vcmask 982944  }
  0x1b   :  { %v304_v28 = vsel %vm5_vm0, %v390_v26, %v389_v25  ;;  %v314_v31 = vsel %vm5_vm0, %v392_v30, %v391_v29  ;;  %vm47_vm5 = vcmask 950144   ;;  %vm57_vm6 = vcmask 917344  }
  0x1c   :  { %135 = vrot.lane.b32.xlu0 %v134_v40, %s437_s24  ;;  %145 = vrot.lane.b32.xlu1 %v144_v41, %s438_s29  ;;  %s443_s29 = smov 52   ;;  %vm67_vm7 = vcmask 884544   ;;  %vm77_vm8 = vcmask 851744   ;;  %vm87_vm9 = vcmask 818944   ;;  %vm97_vm10 = vcmask 786144  }
  0x1d   :  { %vm107_vm11 = vcmask 753344   ;;  %vm117_vm12 = vcmask 720544   ;;  %vm127_vm13 = vcmask 687744   ;;  %vm137_vm14 = vcmask 654944  }
  0x1e   :  { %vm147_vm15 = vcmask 622144   ;;  %vm157_vm0 = vcmask 589344   ;;  %vm167_vm1 = vcmask 556544  }
  0x20   :  { %155 = vrot.lane.b32.xlu0 %v154_v48, %s439_s9  ;;  %165 = vrot.lane.b32.xlu1 %v164_v50, %s440_s10  ;;  %s445_s10 = smov 44  }
  0x24   :  { %175 = vrot.lane.b32.xlu0 %v174_v55, %s441_s19  ;;  %185 = vrot.lane.b32.xlu1 %v184_v56, %s442_s20  ;;  %s447_s20 = smov 36  }
  0x28   :  { %195 = vrot.lane.b32.xlu0 %v194_v61, %s443_s29  ;;  %205 = vrot.lane.b32.xlu1 %v204_v62, %s444_s30  ;;  %s449_s30 = smov 28  }
  0x2c   :  { %215 = vrot.lane.b32.xlu0 %v214_v3, %s445_s10  ;;  %225 = vrot.lane.b32.xlu1 %v224_v4, %s446_s11  ;;  %s451_s11 = smov 20  }
  0x30   :  { %235 = vrot.lane.b32.xlu0 %v234_v9, %s447_s20  ;;  %245 = vrot.lane.b32.xlu1 %v244_v10, %s448_s21 }
  0x34   :  { %255 = vrot.lane.b32.xlu0 %v254_v15, %s449_s30  ;;  %265 = vrot.lane.b32.xlu1 %v264_v16, %s450_s2 }
  0x38   :  { %275 = vrot.lane.b32.xlu0 %v274_v21, %s451_s11  ;;  %285 = vrot.lane.b32.xlu1 %v284_v22, %s452_s12 }
  0x3c   :  { %295 = vrot.lane.b32.xlu0 %v294_v27, %s453_s0  ;;  %305 = vrot.lane.b32.xlu1 %v304_v28, %s454_s17 }
  0x40   :  { %315 = vrot.lane.b32.xlu0 %v314_v31, %s455_s18 }
  0x76   :  { %v16_v32 = vpop.permute.xlu0 %15   ;;  %v36_v33 = vpop.permute.xlu1 %35  }
  0x77   :  { %18 = vst.msk [vmem:[#allocation0] ss:$8 sm:$0x3] %vm17_vm2, %v16_v32   ;;  %vm177_vm2 = vcmask 523744  }
  0x7a   :  { %v26_v34 = vpop.permute.xlu0 %25   ;;  %v46_v35 = vpop.permute.xlu1 %45  }
  0x7b   :  { %28 = vst.msk [vmem:[#allocation0] ss:$8 sm:$0x3] %vm27_vm3, %v26_v34   ;;  %vm187_vm3 = vcmask 490944  }
  0x7c   :  { %38 = vst.msk [vmem:[#allocation0] ss:$8 sm:$0x3] %vm37_vm4, %v36_v33   ;;  %vm197_vm4 = vcmask 458144  }
  0x7d   :  { %48 = vst.msk [vmem:[#allocation0] ss:$8 sm:$0x3] %vm47_vm5, %v46_v35   ;;  %vm207_vm5 = vcmask 425344  }
  0x7e   :  { %v56_v36 = vpop.permute.xlu0 %55   ;;  %v66_v37 = vpop.permute.xlu1 %65  }
  0x7f   :  { %58 = vst.msk [vmem:[#allocation0] ss:$8 sm:$0x3] %vm57_vm6, %v56_v36   ;;  %vm217_vm6 = vcmask 392544  }
  0x80   :  { %68 = vst.msk [vmem:[#allocation0] ss:$8 sm:$0x3] %vm67_vm7, %v66_v37   ;;  %vm227_vm7 = vcmask 359744  }
  0x82   :  { %v76_v38 = vpop.permute.xlu0 %75   ;;  %v86_v39 = vpop.permute.xlu1 %85  }
  0x83   :  { %78 = vst.msk [vmem:[#allocation0] ss:$8 sm:$0x3] %vm77_vm8, %v76_v38   ;;  %vm237_vm8 = vcmask 326944  }
  0x84   :  { %88 = vst.msk [vmem:[#allocation0] ss:$8 sm:$0x3] %vm87_vm9, %v86_v39   ;;  %vm247_vm9 = vcmask 294144  }
  0x86   :  { %v96_v40 = vpop.permute.xlu0 %95   ;;  %v106_v41 = vpop.permute.xlu1 %105  }
  0x87   :  { %98 = vst.msk [vmem:[#allocation0] ss:$8 sm:$0x3] %vm97_vm10, %v96_v40   ;;  %vm257_vm10 = vcmask 261344  }
  0x88   :  { %108 = vst.msk [vmem:[#allocation0] ss:$8 sm:$0x3] %vm107_vm11, %v106_v41   ;;  %vm267_vm11 = vcmask 228544  }
  0x8a   :  { %v116_v42 = vpop.permute.xlu0 %115   ;;  %v126_v43 = vpop.permute.xlu1 %125  }
  0x8b   :  { %118 = vst.msk [vmem:[#allocation0] ss:$8 sm:$0x3] %vm117_vm12, %v116_v42   ;;  %vm277_vm12 = vcmask 195744  }
  0x8c   :  { %128 = vst.msk [vmem:[#allocation0] ss:$8 sm:$0x3] %vm127_vm13, %v126_v43   ;;  %vm287_vm13 = vcmask 162944  }
  0x8e   :  { %v136_v44 = vpop.permute.xlu0 %135   ;;  %v146_v45 = vpop.permute.xlu1 %145  }
  0x8f   :  { %138 = vst.msk [vmem:[#allocation0] ss:$8 sm:$0x3] %vm137_vm14, %v136_v44   ;;  %vm297_vm14 = vcmask 130144  }
  0x90   :  { %148 = vst.msk [vmem:[#allocation0] ss:$8 sm:$0x3] %vm147_vm15, %v146_v45   ;;  %vm307_vm15 = vcmask 97344  }
  0x92   :  { %v156_v46 = vpop.permute.xlu0 %155   ;;  %v166_v47 = vpop.permute.xlu1 %165  }
  0x93   :  { %158 = vst.msk [vmem:[#allocation0] ss:$8 sm:$0x3] %vm157_vm0, %v156_v46   ;;  %vm317_vm0 = vcmask 64544  }
  0x94   :  { %168 = vst.msk [vmem:[#allocation0] ss:$8 sm:$0x3] %vm167_vm1, %v166_v47  }
  0x96   :  { %v176_v48 = vpop.permute.xlu0 %175   ;;  %v186_v49 = vpop.permute.xlu1 %185  }
  0x97   :  { %178 = vst.msk [vmem:[#allocation0] ss:$8 sm:$0x3] %vm177_vm2, %v176_v48  }
  0x98   :  { %188 = vst.msk [vmem:[#allocation0] ss:$8 sm:$0x3] %vm187_vm3, %v186_v49  }
  0x9a   :  { %v196_v50 = vpop.permute.xlu0 %195   ;;  %v206_v51 = vpop.permute.xlu1 %205  }
  0x9b   :  { %198 = vst.msk [vmem:[#allocation0] ss:$8 sm:$0x3] %vm197_vm4, %v196_v50  }
  0x9c   :  { %208 = vst.msk [vmem:[#allocation0] ss:$8 sm:$0x3] %vm207_vm5, %v206_v51  }
  0x9e   :  { %v216_v52 = vpop.permute.xlu0 %215   ;;  %v226_v53 = vpop.permute.xlu1 %225  }
  0x9f   :  { %218 = vst.msk [vmem:[#allocation0] ss:$8 sm:$0x3] %vm217_vm6, %v216_v52  }
  0xa0   :  { %228 = vst.msk [vmem:[#allocation0] ss:$8 sm:$0x3] %vm227_vm7, %v226_v53  }
  0xa2   :  { %v236_v54 = vpop.permute.xlu0 %235   ;;  %v246_v55 = vpop.permute.xlu1 %245  }
  0xa3   :  { %238 = vst.msk [vmem:[#allocation0] ss:$8 sm:$0x3] %vm237_vm8, %v236_v54  }
  0xa4   :  { %248 = vst.msk [vmem:[#allocation0] ss:$8 sm:$0x3] %vm247_vm9, %v246_v55  }
  0xa6   :  { %v256_v56 = vpop.permute.xlu0 %255   ;;  %v266_v57 = vpop.permute.xlu1 %265  }
  0xa7   :  { %258 = vst.msk [vmem:[#allocation0] ss:$8 sm:$0x3] %vm257_vm10, %v256_v56  }
  0xa8   :  { %268 = vst.msk [vmem:[#allocation0] ss:$8 sm:$0x3] %vm267_vm11, %v266_v57  }
  0xaa   :  { %v276_v58 = vpop.permute.xlu0 %275   ;;  %v286_v59 = vpop.permute.xlu1 %285  }
  0xab   :  { %278 = vst.msk [vmem:[#allocation0] ss:$8 sm:$0x3] %vm277_vm12, %v276_v58  }
  0xac   :  { %288 = vst.msk [vmem:[#allocation0] ss:$8 sm:$0x3] %vm287_vm13, %v286_v59  }
  0xae   :  { %v296_v60 = vpop.permute.xlu0 %295   ;;  %v306_v61 = vpop.permute.xlu1 %305  }
  0xaf   :  { %298 = vst.msk [vmem:[#allocation0] ss:$8 sm:$0x3] %vm297_vm14, %v296_v60  }
  0xb0   :  { %308 = vst.msk [vmem:[#allocation0] ss:$8 sm:$0x3] %vm307_vm15, %v306_v61  }
  0xb2   :  { %v316_v62 = vpop.permute.xlu0 %315  }
  0xb3   :  { %318 = vst.msk [vmem:[#allocation0] ss:$8 sm:$0x3] %vm317_vm0, %v316_v62  }
  0xba   :  { %v322_v63 = vld [vmem:[#allocation0] sm:$0x1]  ;;  %v326_v0 = vld [vmem:[#allocation0 + $0x8] sm:$0x1] }
  0xbb   :  { %324 = vst [vmem:[%s697_s1] sm:$0x1] %v322_v63  ;;  %393 = vst [vmem:[%s697_s1 + $0x1] sm:$0x1] %v326_v0 }

// kernel: geometry_head_sparse_forward.19
= control target key start
LH: loop header
LB: loop body
LE: loop exit
PB: predicated region body
PF: predicated region fallthrough
CT: control target
= control target key end

     0   :  { %s2971_s15 = smov 0   ;;  %s4861_s0 = inlined_call_operand.vmem [shape: f32[2,10,800], index: 0, kind: input, shape index: {}]   ;;  %s4862_s1 = inlined_call_operand.vmem [shape: f32[3,800,256], index: 1, kind: input, shape index: {}]   ;;  %s4863_s2 = inlined_call_operand.vmem [shape: f32[1,256], index: 2, kind: input, shape index: {}]   ;;  %s4864_s3 = inlined_call_operand.vmem [shape: f32[2,8,256], index: 3, kind: input, shape index: {}]   ;;  %s4865_s4 = inlined_call_operand.vmem [shape: f32[2,8,256], index: 4, kind: output, shape index: {}]  }
   0x1 LB: > { %s1888_s16 = sadd.s32 4294967295, %s2943_s15   ;;  %p1892_p0 = scmp.ge.s32.totalorder %s2943_s15, 1  ;;  %s2943_s15 = sphi %s2971_s15, %s14_s15  }
   0x2   : > { %p172_p1 = scmp.lt.s32.totalorder %s2943_s15, 3 }
   0x4   : > { %p173_p2 = pnand %p1892_p0, %p172_p1 }
   0x5   : > { %v1899_v0 = vld [vmem:[%s4862_s1 + $0x648] sm:$0xff] (!%p173_p2)  ;;  %v1901_v1 = vld [vmem:[%s4862_s1 + $0x658] sm:$0xff] (!%p173_p2)  ;;  %p203_p3 = scmp.lt.s32.totalorder (!%p173_p2), %s1888_s16, 1  ;;  %v1898_v5 = vld [vmem:[%s4862_s1 + $0x640] sm:$0xff] (!%p173_p2)  ;;  %v2945_v7 = vmov (!%p173_p2), 0.0   ;;  %vm654_vm0 = vcmask (!%p173_p2), 1046528  }
   0x6   : > { %176 = sbr.rel (%p173_p2) target bundleno = 550 (0x226), region = 36  ;;  %v2091_v2 = vld [vmem:[%s4862_s1 + $0xc48] sm:$0xff] (!%p173_p2)  ;;  %v2305_v3 = vpack.c.bf16 (!%p173_p2), %v1901_v1, %v1899_v0  ;;  %v2093_v4 = vld [vmem:[%s4862_s1 + $0xc58] sm:$0xff] (!%p173_p2)  ;;  %v1900_v6 = vld [vmem:[%s4862_s1 + $0x650] sm:$0xff] (!%p173_p2)  ;;  %962 = vmatprep.mubr.f32.mxu0 (!%p173_p2), %v2945_v7  ;;  %vm682_vm1 = vcmask (!%p173_p2), 261120   ;;  %vm1485_vm2 = vcmask (!%p173_p2), 1045504  }
   0x7   : > { %v2497_v8 = vpack.c.bf16 (!%p173_p2), %v2093_v4, %v2091_v2  ;;  %v2307_v9 = vpack.c.bf16 (!%p173_p2), %v1900_v6, %v1898_v5  ;;  %v2090_v10 = vld [vmem:[%s4862_s1 + $0xc40] sm:$0xff] (!%p173_p2)  ;;  %v2092_v11 = vld [vmem:[%s4862_s1 + $0xc50] sm:$0xff] (!%p173_p2)  ;;  %v1903_v12 = vld [vmem:[%s4862_s1 + $0x668] sm:$0xff] (!%p173_p2) }
   0x8   : > { %2306 = vmatprep.subr.bf16.mxu1 (!%p173_p2), %v2305_v3  ;;  %v2499_v13 = vpack.c.bf16 (!%p173_p2), %v2092_v11, %v2090_v10  ;;  %v1905_v14 = vld [vmem:[%s4862_s1 + $0x678] sm:$0xff] (!%p173_p2)  ;;  %v2095_v15 = vld [vmem:[%s4862_s1 + $0xc68] sm:$0xff] (!%p173_p2)  ;;  %v1902_v19 = vld [vmem:[%s4862_s1 + $0x660] sm:$0xff] (!%p173_p2) }
   0x9   : > { %v2097_v16 = vld [vmem:[%s4862_s1 + $0xc78] sm:$0xff] (!%p173_p2)  ;;  %2498 = vmatprep.subr.bf16.mxu0 (!%p173_p2), %v2497_v8  ;;  %2308 = vmatpush1.bf16.msra.mxu1 (!%p173_p2), %v2307_v9  ;;  %v2309_v17 = vpack.c.bf16 (!%p173_p2), %v1905_v14, %v1903_v12  ;;  %v1904_v20 = vld [vmem:[%s4862_s1 + $0x670] sm:$0xff] (!%p173_p2)  ;;  %v2094_v21 = vld [vmem:[%s4862_s1 + $0xc60] sm:$0xff] (!%p173_p2) }
   0xa   : > { %v2501_v18 = vpack.c.bf16 (!%p173_p2), %v2097_v16, %v2095_v15  ;;  %2500 = vmatpush1.bf16.msra.mxu0 (!%p173_p2), %v2499_v13  ;;  %v2311_v22 = vpack.c.bf16 (!%p173_p2), %v1904_v20, %v1902_v19  ;;  %v2096_v23 = vld [vmem:[%s4862_s1 + $0xc70] sm:$0xff] (!%p173_p2)  ;;  %v1907_v24 = vld [vmem:[%s4862_s1 + $0x688] sm:$0xff] (!%p173_p2)  ;;  %v1909_v25 = vld [vmem:[%s4862_s1 + $0x698] sm:$0xff] (!%p173_p2) }
   0xb   : > { %2310 = vmatprep.subr.bf16.mxu1 (!%p173_p2), %v2309_v17  ;;  %v2503_v26 = vpack.c.bf16 (!%p173_p2), %v2096_v23, %v2094_v21  ;;  %v2313_v27 = vpack.c.bf16 (!%p173_p2), %v1909_v25, %v1907_v24  ;;  %v354_v28 = vld [vmem:[%s4862_s1 + $0x408] sm:$0xff] (!%p173_p2)  ;;  %v356_v29 = vld [vmem:[%s4862_s1 + $0x418] sm:$0xff] (!%p173_p2)  ;;  %v1906_v30 = vld [vmem:[%s4862_s1 + $0x680] sm:$0xff] (!%p173_p2) }
   0xc   : > { %2502 = vmatprep.subr.bf16.mxu0 (!%p173_p2), %v2501_v18  ;;  %v2633_v31 = vpack.c.bf16 (!%p173_p2), %v356_v29, %v354_v28  ;;  %v1908_v32 = vld [vmem:[%s4862_s1 + $0x690] sm:$0xff] (!%p173_p2)  ;;  %v353_v38 = vld [vmem:[%s4862_s1 + $0x400] sm:$0xff] (!%p173_p2)  ;;  %v1911_v40 = vld [vmem:[%s4862_s1 + $0x6a8] sm:$0xff] (!%p173_p2) }
   0xd   : > { %s4867_s16 = smov (!%p203_p3, %s1888_s16), 1  ;;  %2312 = vmatpush1.bf16.msra.mxu1 %v2311_v22  ;;  %v2315_v35 = vpack.c.bf16 %v1908_v32, %v1906_v30  ;;  %v355_v39 = vld [vmem:[%s4862_s1 + $0x410] sm:$0xff]  ;;  %v1913_v42 = vld [vmem:[%s4862_s1 + $0x6b8] sm:$0xff]  ;;  %v358_v43 = vld [vmem:[%s4862_s1 + $0x428] sm:$0xff] }
   0xe   : > { %s2927_s23 = smul.u32 112, %s4867_s16  ;;  %2504 = vmatpush1.bf16.msra.mxu0 %v2503_v26  ;;  %2314 = vmatprep.subr.bf16.mxu1 %v2313_v27  ;;  %v2635_v41 = vpack.c.bf16 %v355_v39, %v353_v38  ;;  %v360_v44 = vld [vmem:[%s4862_s1 + $0x438] sm:$0xff]  ;;  %v2317_v46 = vpack.c.bf16 %v1913_v42, %v1911_v40  ;;  %v1910_v48 = vld [vmem:[%s4862_s1 + $0x6a0] sm:$0xff]  ;;  %v1912_v49 = vld [vmem:[%s4862_s1 + $0x6b0] sm:$0xff] }
   0xf   : > { %2634 = vmatprep.subr.bf16.mxu0 %v2633_v31  ;;  %v2637_v47 = vpack.c.bf16 %v360_v44, %v358_v43  ;;  %v357_v50 = vld [vmem:[%s4862_s1 + $0x420] sm:$0xff]  ;;  %v359_v51 = vld [vmem:[%s4862_s1 + $0x430] sm:$0xff]  ;;  %v1915_v52 = vld [vmem:[%s4862_s1 + $0x6c8] sm:$0xff]  ;;  %v2319_v54 = vpack.c.bf16 %v1912_v49, %v1910_v48 }
  0x10   : > { %s3049_s12 = scalar_lea.vmem %s4861_s0, %s2927_s23  ;;  %v1917_v53 = vld [vmem:[%s4862_s1 + $0x6d8] sm:$0xff]  ;;  %v362_v55 = vld [vmem:[%s4862_s1 + $0x448] sm:$0xff]  ;;  %v2639_v57 = vpack.c.bf16 %v359_v51, %v357_v50  ;;  %v1914_v59 = vld [vmem:[%s4862_s1 + $0x6c0] sm:$0xff]  ;;  %s2303_s23 = sshll.u32 %s4867_s16, 4 }
  0x11   : > { %v431_v33 = vld [vmem:[%s3049_s12 + $0x30] sm:$0xfe]  ;;  %v438_v34 = vld [vmem:[%s3049_s12 + $0x68] sm:$0x1]  ;;  %2316 = vmatpush1.bf16.msra.mxu1 %v2315_v35  ;;  %v364_v56 = vld [vmem:[%s4862_s1 + $0x458] sm:$0xff]  ;;  %v2321_v58 = vpack.c.bf16 %v1917_v53, %v1915_v52  ;;  %s212_s27 = scalar_lea.vmem %s4864_s3, %s2303_s23  ;;  %s217_s29 = scalar_lea.vmem %s4865_s4, %s2303_s23 }
  0x12   : > { %v673_v36 = vrot.slane %v431_v33, 1  ;;  %v674_v37 = vrot.slane %v438_v34, 1  ;;  %2318 = vmatprep.subr.bf16.mxu1 %v2317_v46  ;;  %v1916_v60 = vld [vmem:[%s4862_s1 + $0x6d0] sm:$0xff]  ;;  %v361_v61 = vld [vmem:[%s4862_s1 + $0x440] sm:$0xff]  ;;  %v2641_v62 = vpack.c.bf16 %v364_v56, %v362_v55  ;;  %v1919_v0 = vld [vmem:[%s4862_s1 + $0x6e8] sm:$0xff] }
  0x13   : > { %v363_v63 = vld [vmem:[%s4862_s1 + $0x450] sm:$0xff]  ;;  %v1921_v1 = vld [vmem:[%s4862_s1 + $0x6f8] sm:$0xff]  ;;  %v366_v2 = vld [vmem:[%s4862_s1 + $0x468] sm:$0xff]  ;;  %v2323_v4 = vpack.c.bf16 %v1916_v60, %v1914_v59 }
  0x14   : > { %v675_v45 = vsel %vm654_vm0, %v673_v36, %v674_v37  ;;  %v368_v3 = vld [vmem:[%s4862_s1 + $0x478] sm:$0xff]  ;;  %v2643_v5 = vpack.c.bf16 %v363_v63, %v361_v61  ;;  %v2325_v6 = vpack.c.bf16 %v1921_v1, %v1919_v0  ;;  %v1918_v8 = vld [vmem:[%s4862_s1 + $0x6e0] sm:$0xff]  ;;  %v1920_v9 = vld [vmem:[%s4862_s1 + $0x6f0] sm:$0xff] }
  0x15   : > { %2098 = vmatmul.mubr.msk.f32.vlgmr.msra.gmra.mrb[0].mxu0 %vm682_vm1, %v675_v45  ;;  %2320 = vmatpush1.bf16.msra.mxu1 %v2319_v54  ;;  %v365_v10 = vld [vmem:[%s4862_s1 + $0x460] sm:$0xff]  ;;  %v2645_v11 = vpack.c.bf16 %v368_v3, %v366_v2  ;;  %v367_v12 = vld [vmem:[%s4862_s1 + $0x470] sm:$0xff]  ;;  %v1923_v13 = vld [vmem:[%s4862_s1 + $0x708] sm:$0xff]  ;;  %v2327_v17 = vpack.c.bf16 %v1920_v9, %v1918_v8 }
  0x16   : > { %2636 = vmatpush1.bf16.msra.mxu0 %v2635_v41  ;;  %2322 = vmatprep.subr.bf16.mxu1 %v2321_v58  ;;  %v1925_v14 = vld [vmem:[%s4862_s1 + $0x718] sm:$0xff]  ;;  %v370_v15 = vld [vmem:[%s4862_s1 + $0x488] sm:$0xff]  ;;  %v2647_v18 = vpack.c.bf16 %v367_v12, %v365_v10  ;;  %v1922_v20 = vld [vmem:[%s4862_s1 + $0x700] sm:$0xff] }
  0x17   : > { %2638 = vmatprep.subr.bf16.mxu0 %v2637_v47  ;;  %v372_v16 = vld [vmem:[%s4862_s1 + $0x498] sm:$0xff]  ;;  %v2329_v19 = vpack.c.bf16 %v1925_v14, %v1923_v13  ;;  %v1924_v21 = vld [vmem:[%s4862_s1 + $0x710] sm:$0xff]  ;;  %v369_v22 = vld [vmem:[%s4862_s1 + $0x480] sm:$0xff] }
  0x18   : > { %v2649_v23 = vpack.c.bf16 %v372_v16, %v370_v15  ;;  %v371_v24 = vld [vmem:[%s4862_s1 + $0x490] sm:$0xff]  ;;  %v1927_v25 = vld [vmem:[%s4862_s1 + $0x728] sm:$0xff]  ;;  %v1929_v26 = vld [vmem:[%s4862_s1 + $0x738] sm:$0xff]  ;;  %v2331_v29 = vpack.c.bf16 %v1924_v21, %v1922_v20 }
  0x19   : > { %2324 = vmatpush1.bf16.msra.mxu1 %v2323_v4  ;;  %v374_v27 = vld [vmem:[%s4862_s1 + $0x4a8] sm:$0xff]  ;;  %v376_v28 = vld [vmem:[%s4862_s1 + $0x4b8] sm:$0xff]  ;;  %v2651_v30 = vpack.c.bf16 %v371_v24, %v369_v22  ;;  %v2333_v31 = vpack.c.bf16 %v1929_v26, %v1927_v25  ;;  %v1926_v32 = vld [vmem:[%s4862_s1 + $0x720] sm:$0xff] }
  0x1a   : > { %2640 = vmatpush1.bf16.msra.mxu0 %v2639_v57  ;;  %2326 = vmatprep.subr.bf16.mxu1 %v2325_v6  ;;  %v1928_v33 = vld [vmem:[%s4862_s1 + $0x730] sm:$0xff]  ;;  %v373_v34 = vld [vmem:[%s4862_s1 + $0x4a0] sm:$0xff]  ;;  %v2653_v35 = vpack.c.bf16 %v376_v28, %v374_v27  ;;  %v1931_v37 = vld [vmem:[%s4862_s1 + $0x748] sm:$0xff] }
  0x1b   : > { %2642 = vmatprep.subr.bf16.mxu0 %v2641_v62  ;;  %v375_v36 = vld [vmem:[%s4862_s1 + $0x4b0] sm:$0xff]  ;;  %v1933_v38 = vld [vmem:[%s4862_s1 + $0x758] sm:$0xff]  ;;  %v378_v39 = vld [vmem:[%s4862_s1 + $0x4c8] sm:$0xff]  ;;  %v2335_v41 = vpack.c.bf16 %v1928_v33, %v1926_v32 }
  0x1c   : > { %v380_v40 = vld [vmem:[%s4862_s1 + $0x4d8] sm:$0xff]  ;;  %v2655_v42 = vpack.c.bf16 %v375_v36, %v373_v34  ;;  %v2337_v43 = vpack.c.bf16 %v1933_v38, %v1931_v37  ;;  %v1930_v44 = vld [vmem:[%s4862_s1 + $0x740] sm:$0xff]  ;;  %v1932_v45 = vld [vmem:[%s4862_s1 + $0x750] sm:$0xff] }
  0x1d   : > { %2328 = vmatpush1.bf16.msra.mxu1 %v2327_v17  ;;  %v377_v46 = vld [vmem:[%s4862_s1 + $0x4c0] sm:$0xff]  ;;  %v2657_v47 = vpack.c.bf16 %v380_v40, %v378_v39  ;;  %v379_v48 = vld [vmem:[%s4862_s1 + $0x4d0] sm:$0xff]  ;;  %v1935_v49 = vld [vmem:[%s4862_s1 + $0x768] sm:$0xff]  ;;  %v2339_v53 = vpack.c.bf16 %v1932_v45, %v1930_v44 }
  0x1e   : > { %2644 = vmatpush1.bf16.msra.mxu0 %v2643_v5  ;;  %2330 = vmatprep.subr.bf16.mxu1 %v2329_v19  ;;  %v1937_v50 = vld [vmem:[%s4862_s1 + $0x778] sm:$0xff]  ;;  %v382_v51 = vld [vmem:[%s4862_s1 + $0x4e8] sm:$0xff]  ;;  %v2659_v54 = vpack.c.bf16 %v379_v48, %v377_v46  ;;  %v1934_v56 = vld [vmem:[%s4862_s1 + $0x760] sm:$0xff] }
  0x1f   : > { %2646 = vmatprep.subr.bf16.mxu0 %v2645_v11  ;;  %v384_v52 = vld [vmem:[%s4862_s1 + $0x4f8] sm:$0xff]  ;;  %v2341_v55 = vpack.c.bf16 %v1937_v50, %v1935_v49  ;;  %v1936_v57 = vld [vmem:[%s4862_s1 + $0x770] sm:$0xff]  ;;  %v381_v58 = vld [vmem:[%s4862_s1 + $0x4e0] sm:$0xff] }
  0x20   : > { %v2661_v59 = vpack.c.bf16 %v384_v52, %v382_v51  ;;  %v383_v60 = vld [vmem:[%s4862_s1 + $0x4f0] sm:$0xff]  ;;  %v1939_v61 = vld [vmem:[%s4862_s1 + $0x788] sm:$0xff]  ;;  %v1941_v62 = vld [vmem:[%s4862_s1 + $0x798] sm:$0xff]  ;;  %v2343_v1 = vpack.c.bf16 %v1936_v57, %v1934_v56 }
  0x21   : > { %2332 = vmatpush1.bf16.msra.mxu1 %v2331_v29  ;;  %v386_v63 = vld [vmem:[%s4862_s1 + $0x508] sm:$0xff]  ;;  %v388_v0 = vld [vmem:[%s4862_s1 + $0x518] sm:$0xff]  ;;  %v2663_v2 = vpack.c.bf16 %v383_v60, %v381_v58  ;;  %v2345_v3 = vpack.c.bf16 %v1941_v62, %v1939_v61  ;;  %v1938_v4 = vld [vmem:[%s4862_s1 + $0x780] sm:$0xff] }
  0x22   : > { %2648 = vmatpush1.bf16.msra.mxu0 %v2647_v18  ;;  %2334 = vmatprep.subr.bf16.mxu1 %v2333_v31  ;;  %v1940_v5 = vld [vmem:[%s4862_s1 + $0x790] sm:$0xff]  ;;  %v385_v6 = vld [vmem:[%s4862_s1 + $0x500] sm:$0xff]  ;;  %v2665_v8 = vpack.c.bf16 %v388_v0, %v386_v63  ;;  %v1943_v10 = vld [vmem:[%s4862_s1 + $0x7a8] sm:$0xff] }
  0x23   : > { %2650 = vmatprep.subr.bf16.mxu0 %v2649_v23  ;;  %v387_v9 = vld [vmem:[%s4862_s1 + $0x510] sm:$0xff]  ;;  %v1945_v11 = vld [vmem:[%s4862_s1 + $0x7b8] sm:$0xff]  ;;  %v390_v12 = vld [vmem:[%s4862_s1 + $0x528] sm:$0xff]  ;;  %v2347_v14 = vpack.c.bf16 %v1940_v5, %v1938_v4 }
  0x24   : > { %v392_v13 = vld [vmem:[%s4862_s1 + $0x538] sm:$0xff]  ;;  %v1942_v15 = vld [vmem:[%s4862_s1 + $0x7a0] sm:$0xff]  ;;  %v2667_v16 = vpack.c.bf16 %v387_v9, %v385_v6  ;;  %v2349_v17 = vpack.c.bf16 %v1945_v11, %v1943_v10  ;;  %v1944_v18 = vld [vmem:[%s4862_s1 + $0x7b0] sm:$0xff] }
  0x25   : > { %2336 = vmatpush1.bf16.msra.mxu1 %v2335_v41  ;;  %v389_v19 = vld [vmem:[%s4862_s1 + $0x520] sm:$0xff]  ;;  %v391_v20 = vld [vmem:[%s4862_s1 + $0x530] sm:$0xff]  ;;  %v2669_v21 = vpack.c.bf16 %v392_v13, %v390_v12  ;;  %v1947_v22 = vld [vmem:[%s4862_s1 + $0x7c8] sm:$0xff]  ;;  %v2351_v28 = vpack.c.bf16 %v1944_v18, %v1942_v15 }
  0x26   : > { %2652 = vmatpush1.bf16.msra.mxu0 %v2651_v30  ;;  %2338 = vmatprep.subr.bf16.mxu1 %v2337_v43  ;;  %v1949_v23 = vld [vmem:[%s4862_s1 + $0x7d8] sm:$0xff]  ;;  %v394_v24 = vld [vmem:[%s4862_s1 + $0x548] sm:$0xff]  ;;  %v433_v27 = vld [vmem:[%s3049_s12 + $0x40] sm:$0x1]  ;;  %v2671_v31 = vpack.c.bf16 %v391_v20, %v389_v19 }
  0x27   : > { %2654 = vmatprep.subr.bf16.mxu0 %v2653_v35  ;;  %v396_v25 = vld [vmem:[%s4862_s1 + $0x558] sm:$0xff]  ;;  %v426_v26 = vld [vmem:[%s3049_s12 + $0x8] sm:$0xfe]  ;;  %v659_v30 = vrot.slane %v433_v27, 1  ;;  %v2353_v32 = vpack.c.bf16 %v1949_v23, %v1947_v22  ;;  %v1946_v33 = vld [vmem:[%s4862_s1 + $0x7c0] sm:$0xff] }
  0x28   : > { %v658_v29 = vrot.slane %v426_v26, 1  ;;  %v1948_v34 = vld [vmem:[%s4862_s1 + $0x7d0] sm:$0xff]  ;;  %v393_v35 = vld [vmem:[%s4862_s1 + $0x540] sm:$0xff]  ;;  %v2673_v36 = vpack.c.bf16 %v396_v25, %v394_v24  ;;  %v1951_v38 = vld [vmem:[%s4862_s1 + $0x7e8] sm:$0xff] }
  0x29   : > { %2340 = vmatpush1.bf16.msra.mxu1 %v2339_v53  ;;  %v395_v37 = vld [vmem:[%s4862_s1 + $0x550] sm:$0xff]  ;;  %v1953_v39 = vld [vmem:[%s4862_s1 + $0x7f8] sm:$0xff]  ;;  %v398_v41 = vld [vmem:[%s4862_s1 + $0x568] sm:$0xff]  ;;  %v2355_v43 = vpack.c.bf16 %v1948_v34, %v1946_v33 }
  0x2a   : > { %2656 = vmatpush1.bf16.msra.mxu0 %v2655_v42  ;;  %2342 = vmatprep.subr.bf16.mxu1 %v2341_v55  ;;  %v660_v40 = vsel %vm654_vm0, %v658_v29, %v659_v30  ;;  %v400_v42 = vld [vmem:[%s4862_s1 + $0x578] sm:$0xff]  ;;  %v1950_v44 = vld [vmem:[%s4862_s1 + $0x7e0] sm:$0xff]  ;;  %v2675_v45 = vpack.c.bf16 %v395_v37, %v393_v35  ;;  %v2357_v46 = vpack.c.bf16 %v1953_v39, %v1951_v38  ;;  %v399_v49 = vld [vmem:[%s4862_s1 + $0x570] sm:$0xff] }
  0x2b   : > { %2658 = vmatprep.subr.bf16.mxu0 %v2657_v47  ;;  %749 = vmatprep.mubr.f32.mxu1 %v660_v40  ;;  %v1952_v47 = vld [vmem:[%s4862_s1 + $0x7f0] sm:$0xff]  ;;  %v397_v48 = vld [vmem:[%s4862_s1 + $0x560] sm:$0xff]  ;;  %v2677_v50 = vpack.c.bf16 %v400_v42, %v398_v41  ;;  %v1955_v51 = vld [vmem:[%s4862_s1 + $0x808] sm:$0xff] }
  0x2c   : > { %v1957_v52 = vld [vmem:[%s4862_s1 + $0x818] sm:$0xff]  ;;  %v223_v53 = vld [vmem:[%s3049_s12 + $0x28] sm:$0xff]  ;;  %v2359_v56 = vpack.c.bf16 %v1952_v47, %v1950_v44  ;;  %v2679_v57 = vpack.c.bf16 %v399_v49, %v397_v48  ;;  %v1956_v60 = vld [vmem:[%s4862_s1 + $0x810] sm:$0xff] }
  0x2d   : > { %2344 = vmatpush1.bf16.msra.mxu1 %v2343_v1  ;;  %v404_v55 = vld [vmem:[%s4862_s1 + $0x598] sm:$0xff]  ;;  %1178 = vmatprep.mubr.f32.mxu0 %v223_v53  ;;  %v2361_v58 = vpack.c.bf16 %v1957_v52, %v1955_v51  ;;  %v401_v61 = vld [vmem:[%s4862_s1 + $0x580] sm:$0xff]  ;;  %v403_v63 = vld [vmem:[%s4862_s1 + $0x590] sm:$0xff] }
  0x2e   : > { %2660 = vmatpush1.bf16.msra.mxu0 %v2659_v54  ;;  %2346 = vmatprep.subr.bf16.mxu1 %v2345_v3  ;;  %v402_v54 = vld [vmem:[%s4862_s1 + $0x588] sm:$0xff]  ;;  %v1961_v1 = vld [vmem:[%s4862_s1 + $0x838] sm:$0xff]  ;;  %v1958_v5 = vld [vmem:[%s4862_s1 + $0x820] sm:$0xff] }
  0x2f   : > { %2662 = vmatprep.subr.bf16.mxu0 %v2661_v59  ;;  %v1954_v59 = vld [vmem:[%s4862_s1 + $0x800] sm:$0xff]  ;;  %v2681_v62 = vpack.c.bf16 %v404_v55, %v402_v54  ;;  %v1959_v0 = vld [vmem:[%s4862_s1 + $0x828] sm:$0xff]  ;;  %v408_v3 = vld [vmem:[%s4862_s1 + $0x5b8] sm:$0xff] }
  0x30   : > { %v2363_v4 = vpack.c.bf16 %v1956_v60, %v1954_v59  ;;  %v1960_v6 = vld [vmem:[%s4862_s1 + $0x830] sm:$0xff]  ;;  %v2365_v9 = vpack.c.bf16 %v1961_v1, %v1959_v0  ;;  %v405_v10 = vld [vmem:[%s4862_s1 + $0x5a0] sm:$0xff]  ;;  %v432_v12 = vld [vmem:[%s3049_s12 + $0x38] sm:$0x1] }
  0x31   : > { %2348 = vmatpush1.bf16.msra.mxu1 %v2347_v14  ;;  %v425_v11 = vld [vmem:[%s3049_s12] sm:$0xfe]  ;;  %v407_v14 = vld [vmem:[%s4862_s1 + $0x5b0] sm:$0xff]  ;;  %v1963_v15 = vld [vmem:[%s4862_s1 + $0x848] sm:$0xff]  ;;  %v2367_v19 = vpack.c.bf16 %v1960_v6, %v1958_v5 }
  0x32   : > { %2664 = vmatpush1.bf16.msra.mxu0 %v2663_v2  ;;  %2350 = vmatprep.subr.bf16.mxu1 %v2349_v17  ;;  %v406_v2 = vld [vmem:[%s4862_s1 + $0x5a8] sm:$0xff]  ;;  %v412_v18 = vld [vmem:[%s4862_s1 + $0x5d8] sm:$0xff]  ;;  %v655_v20 = vrot.slane %v425_v11, 1  ;;  %v2687_v22 = vpack.c.bf16 %v407_v14, %v405_v10  ;;  %v1962_v24 = vld [vmem:[%s4862_s1 + $0x840] sm:$0xff] }
  0x33   : > { %2666 = vmatprep.subr.bf16.mxu0 %v2665_v8  ;;  %v2683_v8 = vpack.c.bf16 %v403_v63, %v401_v61  ;;  %v2685_v13 = vpack.c.bf16 %v408_v3, %v406_v2  ;;  %v410_v17 = vld [vmem:[%s4862_s1 + $0x5c8] sm:$0xff]  ;;  %v1964_v25 = vld [vmem:[%s4862_s1 + $0x850] sm:$0xff]  ;;  %v409_v26 = vld [vmem:[%s4862_s1 + $0x5c0] sm:$0xff] }
  0x34   : > { %v2689_v27 = vpack.c.bf16 %v412_v18, %v410_v17  ;;  %v1967_v29 = vld [vmem:[%s4862_s1 + $0x868] sm:$0xff]  ;;  %v1969_v30 = vld [vmem:[%s4862_s1 + $0x878] sm:$0xff]  ;;  %v2371_v34 = vpack.c.bf16 %v1964_v25, %v1962_v24  ;;  %v1966_v37 = vld [vmem:[%s4862_s1 + $0x860] sm:$0xff] }
  0x35   : > { %2352 = vmatpush1.bf16.msra.mxu1 %v2351_v28  ;;  %v411_v28 = vld [vmem:[%s4862_s1 + $0x5d0] sm:$0xff]  ;;  %v413_v39 = vld [vmem:[%s4862_s1 + $0x5e0] sm:$0xff]  ;;  %v1971_v42 = vld [vmem:[%s4862_s1 + $0x888] sm:$0xff] }
  0x36   : > { %2668 = vmatpush1.bf16.msra.mxu0 %v2667_v16  ;;  %2354 = vmatprep.subr.bf16.mxu1 %v2353_v32  ;;  %v1965_v16 = vld [vmem:[%s4862_s1 + $0x858] sm:$0xff]  ;;  %v2691_v35 = vpack.c.bf16 %v411_v28, %v409_v26  ;;  %v1968_v38 = vld [vmem:[%s4862_s1 + $0x870] sm:$0xff]  ;;  %v418_v44 = vld [vmem:[%s4862_s1 + $0x608] sm:$0xff] }
  0x37   : > { %2670 = vmatprep.subr.bf16.mxu0 %v2669_v21  ;;  %v656_v21 = vrot.slane %v432_v12, 1  ;;  %v2369_v23 = vpack.c.bf16 %v1965_v16, %v1963_v15  ;;  %v416_v32 = vld [vmem:[%s4862_s1 + $0x5f8] sm:$0xff]  ;;  %v415_v41 = vld [vmem:[%s4862_s1 + $0x5f0] sm:$0xff]  ;;  %v1970_v49 = vld [vmem:[%s4862_s1 + $0x880] sm:$0xff] }
  0x38   : > { %v2695_v47 = vpack.c.bf16 %v415_v41, %v413_v39  ;;  %v417_v51 = vld [vmem:[%s4862_s1 + $0x600] sm:$0xff]  ;;  %v419_v53 = vld [vmem:[%s4862_s1 + $0x610] sm:$0xff]  ;;  %v1975_v54 = vld [vmem:[%s4862_s1 + $0x8a8] sm:$0xff] }
  0x39   : > { %2356 = vmatpush1.bf16.msra.mxu1 %v2355_v43  ;;  %v657_v33 = vsel %vm654_vm0, %v655_v20, %v656_v21  ;;  %v1973_v43 = vld [vmem:[%s4862_s1 + $0x898] sm:$0xff]  ;;  %v222_v59 = vld [vmem:[%s3049_s12 + $0x20] sm:$0xff]  ;;  %v2699_v60 = vpack.c.bf16 %v419_v53, %v417_v51  ;;  %v1976_v63 = vld [vmem:[%s4862_s1 + $0x8b0] sm:$0xff] }
  0x3a   : > { %2672 = vmatpush1.bf16.msra.mxu0 %v2671_v31  ;;  %2358 = vmatprep.subr.bf16.mxu1 %v2357_v46  ;;  %v414_v31 = vld [vmem:[%s4862_s1 + $0x5e8] sm:$0xff]  ;;  %v2375_v46 = vpack.c.bf16 %v1968_v38, %v1966_v37  ;;  %v2377_v48 = vpack.c.bf16 %v1973_v43, %v1971_v42  ;;  %v1977_v55 = vld [vmem:[%s4862_s1 + $0x8b8] sm:$0xff]  ;;  %v421_v0 = vld [vmem:[%s4862_s1 + $0x620] sm:$0xff] }
  0x3b   : > { %2674 = vmatprep.subr.bf16.mxu0 %v2673_v36  ;;  %v2373_v36 = vpack.c.bf16 %v1969_v30, %v1967_v29  ;;  %v2693_v40 = vpack.c.bf16 %v416_v32, %v414_v31  ;;  %v2381_v61 = vpack.c.bf16 %v1977_v55, %v1975_v54  ;;  %v423_v2 = vld [vmem:[%s4862_s1 + $0x630] sm:$0xff]  ;;  %v1979_v3 = vld [vmem:[%s4862_s1 + $0x8c8] sm:$0xff]  ;;  %v2103_v6 = vld [vmem:[%s4862_s1 + $0xc98] sm:$0xff] }
  0x3c   : > { %v2101_v5 = vld [vmem:[%s4862_s1 + $0xc88] sm:$0xff]  ;;  %v1978_v11 = vld [vmem:[%s4862_s1 + $0x8c0] sm:$0xff]  ;;  %v1980_v12 = vld [vmem:[%s4862_s1 + $0x8d0] sm:$0xff] }
  0x3d   : > { %2360 = vmatpush1.bf16.msra.mxu1 %v2359_v56  ;;  %v422_v56 = vld [vmem:[%s4862_s1 + $0x628] sm:$0xff]  ;;  %v2705_v14 = vpack.c.bf16 %v2103_v6, %v2101_v5  ;;  %v2102_v15 = vld [vmem:[%s4862_s1 + $0xc90] sm:$0xff]  ;;  %v1985_v17 = vld [vmem:[%s4862_s1 + $0x8f8] sm:$0xff]  ;;  %v2387_v20 = vpack.c.bf16 %v1980_v12, %v1978_v11 }
  0x3e   : > { %2676 = vmatpush1.bf16.msra.mxu0 %v2675_v45  ;;  %2362 = vmatprep.subr.bf16.mxu1 %v2361_v58  ;;  %v420_v45 = vld [vmem:[%s4862_s1 + $0x618] sm:$0xff]  ;;  %v1983_v16 = vld [vmem:[%s4862_s1 + $0x8e8] sm:$0xff]  ;;  %v224_v21 = vld [vmem:[%s3049_s12 + $0x30] sm:$0xff] }
  0x3f   : > { %2678 = vmatprep.subr.bf16.mxu0 %v2677_v50  ;;  %v1972_v50 = vld [vmem:[%s4862_s1 + $0x890] sm:$0xff]  ;;  %v2697_v52 = vpack.c.bf16 %v420_v45, %v418_v44  ;;  %v2105_v18 = vld [vmem:[%s4862_s1 + $0xca8] sm:$0xff]  ;;  %v1982_v24 = vld [vmem:[%s4862_s1 + $0x8e0] sm:$0xff] }
  0x40   : > { %v2379_v58 = vpack.c.bf16 %v1972_v50, %v1970_v49  ;;  %v1984_v25 = vld [vmem:[%s4862_s1 + $0x8f0] sm:$0xff]  ;;  %v2104_v26 = vld [vmem:[%s4862_s1 + $0xca0] sm:$0xff]  ;;  %v1987_v29 = vld [vmem:[%s4862_s1 + $0x908] sm:$0xff] }
  0x41   : > { %2364 = vmatpush1.bf16.msra.mxu1 %v2363_v4  ;;  %v1981_v4 = vld [vmem:[%s4862_s1 + $0x8d8] sm:$0xff]  ;;  %v2106_v28 = vld [vmem:[%s4862_s1 + $0xcb0] sm:$0xff]  ;;  %v2109_v31 = vld [vmem:[%s4862_s1 + $0xcc8] sm:$0xff] }
  0x42   : > { %2680 = vmatpush1.bf16.msra.mxu0 %v2679_v57  ;;  %2366 = vmatprep.subr.bf16.mxu1 %v2365_v9  ;;  %v424_v57 = vld [vmem:[%s4862_s1 + $0x638] sm:$0xff]  ;;  %v2703_v9 = vpack.c.bf16 %v423_v2, %v421_v0  ;;  %v2385_v10 = vpack.c.bf16 %v1981_v4, %v1979_v3  ;;  %v1988_v37 = vld [vmem:[%s4862_s1 + $0x910] sm:$0xff]  ;;  %v2108_v38 = vld [vmem:[%s4862_s1 + $0xcc0] sm:$0xff] }
  0x43   : > { %2682 = vmatprep.subr.bf16.mxu0 %v2681_v62  ;;  %v1974_v62 = vld [vmem:[%s4862_s1 + $0x8a0] sm:$0xff]  ;;  %v2701_v1 = vpack.c.bf16 %v424_v57, %v422_v56  ;;  %v1989_v30 = vld [vmem:[%s4862_s1 + $0x918] sm:$0xff]  ;;  %v1991_v41 = vld [vmem:[%s4862_s1 + $0x928] sm:$0xff] }
  0x44   : > { %v2111_v32 = vld [vmem:[%s4862_s1 + $0xcd8] sm:$0xff]  ;;  %v2113_v43 = vld [vmem:[%s4862_s1 + $0xce8] sm:$0xff]  ;;  %v1990_v50 = vld [vmem:[%s4862_s1 + $0x920] sm:$0xff] }
  0x45   : > { %2368 = vmatpush1.bf16.msra.mxu1 %v2367_v19  ;;  %v2107_v19 = vld [vmem:[%s4862_s1 + $0xcb8] sm:$0xff]  ;;  %v2713_v39 = vpack.c.bf16 %v2111_v32, %v2109_v31  ;;  %v1992_v51 = vld [vmem:[%s4862_s1 + $0x930] sm:$0xff]  ;;  %v1995_v57 = vld [vmem:[%s4862_s1 + $0x948] sm:$0xff] }
  0x46   : > { %2684 = vmatpush1.bf16.msra.mxu0 %v2683_v8  ;;  %2370 = vmatprep.subr.bf16.mxu1 %v2369_v23  ;;  %v2383_v8 = vpack.c.bf16 %v1976_v63, %v1974_v62  ;;  %v2389_v23 = vpack.c.bf16 %v1985_v17, %v1983_v16  ;;  %v1993_v42 = vld [vmem:[%s4862_s1 + $0x938] sm:$0xff]  ;;  %v2114_v56 = vld [vmem:[%s4862_s1 + $0xcf0] sm:$0xff]  ;;  %v2399_v62 = vpack.c.bf16 %v1992_v51, %v1990_v50  ;;  %v2116_v3 = vld [vmem:[%s4862_s1 + $0xd00] sm:$0xff] }
  0x47   : > { %2686 = vmatprep.subr.bf16.mxu0 %v2685_v13  ;;  %v2100_v13 = vld [vmem:[%s4862_s1 + $0xc80] sm:$0xff]  ;;  %v2115_v44 = vld [vmem:[%s4862_s1 + $0xcf8] sm:$0xff]  ;;  %v2397_v49 = vpack.c.bf16 %v1993_v42, %v1991_v41  ;;  %v1996_v2 = vld [vmem:[%s4862_s1 + $0x950] sm:$0xff] }
  0x48   : > { %750 = vmatmul.mubr.f32.vlgmr.msra.gmra.mrb[0].mxu1 %v657_v33  ;;  %v2391_v33 = vpack.c.bf16 %v1984_v25, %v1982_v24  ;;  %v2717_v55 = vpack.c.bf16 %v2115_v44, %v2113_v43  ;;  %v2118_v5 = vld [vmem:[%s4862_s1 + $0xd10] sm:$0xff]  ;;  %v1999_v6 = vld [vmem:[%s4862_s1 + $0x968] sm:$0xff]  ;;  %v2120_v16 = vld [vmem:[%s4862_s1 + $0xd20] sm:$0xff] }
  0x49   : > { %2372 = vmatpush1.bf16.msra.mxu1 %v2371_v34  ;;  %v2711_v34 = vpack.c.bf16 %v2106_v28, %v2104_v26  ;;  %v2723_v12 = vpack.c.bf16 %v2118_v5, %v2116_v3  ;;  %v2002_v24 = vld [vmem:[%s4862_s1 + $0x980] sm:$0xff]  ;;  %v2004_v25 = vld [vmem:[%s4862_s1 + $0x990] sm:$0xff]  ;;  %v2133_v50 = vld [vmem:[%s4862_s1 + $0xd88] sm:$0xff] }
  0x4a   : > { %2688 = vmatpush1.bf16.msra.mxu0 %v2687_v22  ;;  %2374 = vmatprep.subr.bf16.mxu1 %v2373_v36  ;;  %v2707_v22 = vpack.c.bf16 %v2102_v15, %v2100_v13  ;;  %v1986_v36 = vld [vmem:[%s4862_s1 + $0x900] sm:$0xff]  ;;  %v2000_v15 = vld [vmem:[%s4862_s1 + $0x970] sm:$0xff]  ;;  %v2135_v51 = vld [vmem:[%s4862_s1 + $0xd98] sm:$0xff] }
  0x4b   : > { %2690 = vmatprep.subr.bf16.mxu0 %v2689_v27  ;;  %v2709_v27 = vpack.c.bf16 %v2107_v19, %v2105_v18  ;;  %v2395_v45 = vpack.c.bf16 %v1988_v37, %v1986_v36  ;;  %v2122_v18 = vld [vmem:[%s4862_s1 + $0xd30] sm:$0xff]  ;;  %v2003_v19 = vld [vmem:[%s4862_s1 + $0x988] sm:$0xff]  ;;  %v2124_v28 = vld [vmem:[%s4862_s1 + $0xd40] sm:$0xff] }
  0x4c   : > { %v2727_v26 = vpack.c.bf16 %v2122_v18, %v2120_v16  ;;  %v2126_v32 = vld [vmem:[%s4862_s1 + $0xd50] sm:$0xff]  ;;  %v2129_v37 = vld [vmem:[%s4862_s1 + $0xd68] sm:$0xff]  ;;  %v2006_v43 = vld [vmem:[%s4862_s1 + $0x9a0] sm:$0xff] }
  0x4d   : > { %2376 = vmatpush1.bf16.msra.mxu1 %v2375_v46  ;;  %v428_v46 = vld [vmem:[%s3049_s12 + $0x18] sm:$0xfe]  ;;  %v2731_v41 = vpack.c.bf16 %v2126_v32, %v2124_v28  ;;  %v2008_v44 = vld [vmem:[%s4862_s1 + $0x9b0] sm:$0xff]  ;;  %v2014_v3 = vld [vmem:[%s4862_s1 + $0x9e0] sm:$0xff] }
  0x4e   : > { %2692 = vmatpush1.bf16.msra.mxu0 %v2691_v35  ;;  %2378 = vmatprep.subr.bf16.mxu1 %v2377_v48  ;;  %v2393_v35 = vpack.c.bf16 %v1989_v30, %v1987_v29  ;;  %v664_v53 = vrot.slane %v428_v46, 1  ;;  %v1257_v29 = vld [vmem:[%s3049_s12 + $0x8] sm:$0xfc]  ;;  %v1264_v30 = vld [vmem:[%s3049_s12 + $0x40] sm:$0x3] }
  0x4f   : > { %2694 = vmatprep.subr.bf16.mxu0 %v2693_v40  ;;  %v2110_v40 = vld [vmem:[%s4862_s1 + $0xcd0] sm:$0xff]  ;;  %v1490_v36 = vrot.slane %v1264_v30, 2  ;;  %v2136_v5 = vld [vmem:[%s4862_s1 + $0xda0] sm:$0xff]  ;;  %v434_v32 = vld [vmem:[%s3049_s12 + $0x48] sm:$0x1] }
  0x50   : > { %v2715_v48 = vpack.c.bf16 %v2110_v40, %v2108_v38  ;;  %v2131_v38 = vld [vmem:[%s4862_s1 + $0xd78] sm:$0xff]  ;;  %v2018_v16 = vld [vmem:[%s4862_s1 + $0xa00] sm:$0xff] }
  0x51   : > { %2380 = vmatpush1.bf16.msra.mxu1 %v2379_v58  ;;  %v1997_v58 = vld [vmem:[%s4862_s1 + $0x958] sm:$0xff]  ;;  %v2733_v46 = vpack.c.bf16 %v2131_v38, %v2129_v37  ;;  %v2140_v18 = vld [vmem:[%s4862_s1 + $0xdc0] sm:$0xff]  ;;  %v2149_v37 = vld [vmem:[%s4862_s1 + $0xe08] sm:$0xff] }
  0x52   : > { %2696 = vmatpush1.bf16.msra.mxu0 %v2695_v47  ;;  %2382 = vmatprep.subr.bf16.mxu1 %v2381_v61  ;;  %v435_v47 = vld [vmem:[%s3049_s12 + $0x50] sm:$0x1]  ;;  %v2401_v0 = vpack.c.bf16 %v1997_v58, %v1995_v57  ;;  %v2132_v57 = vld [vmem:[%s4862_s1 + $0xd80] sm:$0xff]  ;;  %v2737_v58 = vpack.c.bf16 %v2135_v51, %v2133_v50  ;;  %v2151_v38 = vld [vmem:[%s4862_s1 + $0xe18] sm:$0xff] }
  0x53   : > { %2698 = vmatprep.subr.bf16.mxu0 %v2697_v52  ;;  %v2112_v52 = vld [vmem:[%s4862_s1 + $0xce0] sm:$0xff]  ;;  %v665_v54 = vrot.slane %v435_v47, 1  ;;  %v2130_v47 = vld [vmem:[%s4862_s1 + $0xd70] sm:$0xff]  ;;  %v2033_v50 = vld [vmem:[%s4862_s1 + $0xa78] sm:$0xff] }
  0x54   : > { %v2719_v63 = vpack.c.bf16 %v2114_v56, %v2112_v52  ;;  %v2415_v52 = vpack.c.bf16 %v2008_v44, %v2006_v43  ;;  %v2012_v56 = vld [vmem:[%s4862_s1 + $0x9d0] sm:$0xff]  ;;  %v2144_v30 = vld [vmem:[%s4862_s1 + $0xde0] sm:$0xff]  ;;  %v2153_v51 = vld [vmem:[%s4862_s1 + $0xe28] sm:$0xff] }
  0x55   : > { %1179 = vmatmul.mubr.f32.vlgmr.msra.gmra.mrb[2].mxu0 %v222_v59  ;;  %2384 = vmatpush1.bf16.msra.mxu1 %v2383_v8  ;;  %v2117_v59 = vld [vmem:[%s4862_s1 + $0xd08] sm:$0xff]  ;;  %v666_v61 = vsel %vm654_vm0, %v664_v53, %v665_v54  ;;  %v2001_v8 = vld [vmem:[%s4862_s1 + $0x978] sm:$0xff]  ;;  %v2026_v44 = vld [vmem:[%s4862_s1 + $0xa40] sm:$0xff] }
  0x56   : > { %2700 = vmatpush1.bf16.msra.mxu0 %v2699_v60  ;;  %1249 = vmatprep.mubr.f32.mxu0 %v2945_v7  ;;  %v2119_v60 = vld [vmem:[%s4862_s1 + $0xd18] sm:$0xff]  ;;  %v2405_v13 = vpack.c.bf16 %v2001_v8, %v1999_v6  ;;  %v2138_v8 = vld [vmem:[%s4862_s1 + $0xdb0] sm:$0xff] }
  0x57   : > { %2702 = vmatprep.subr.bf16.mxu0 %v2701_v1  ;;  %2386 = vmatprep.subr.bf16.mxu1 %v2385_v10  ;;  %v1994_v1 = vld [vmem:[%s4862_s1 + $0x940] sm:$0xff]  ;;  %v2721_v4 = vpack.c.bf16 %v2119_v60, %v2117_v59  ;;  %v2123_v10 = vld [vmem:[%s4862_s1 + $0xd38] sm:$0xff]  ;;  %v2134_v59 = vld [vmem:[%s4862_s1 + $0xd90] sm:$0xff] }
  0x58   : > { %820 = vmatprep.mubr.f32.mxu1 %v666_v61  ;;  %v2403_v11 = vpack.c.bf16 %v1996_v2, %v1994_v1  ;;  %v2015_v60 = vld [vmem:[%s4862_s1 + $0x9e8] sm:$0xff]  ;;  %v2017_v61 = vld [vmem:[%s4862_s1 + $0x9f8] sm:$0xff]  ;;  %v2739_v1 = vpack.c.bf16 %v2134_v59, %v2132_v57  ;;  %v2030_v57 = vld [vmem:[%s4862_s1 + $0xa60] sm:$0xff] }
  0x59   : > { %2388 = vmatpush1.bf16.msra.mxu1 %v2387_v20  ;;  %v2005_v20 = vld [vmem:[%s4862_s1 + $0x998] sm:$0xff]  ;;  %v2421_v2 = vpack.c.bf16 %v2017_v61, %v2015_v60  ;;  %v2152_v59 = vld [vmem:[%s4862_s1 + $0xe20] sm:$0xff]  ;;  %v2154_v61 = vld [vmem:[%s4862_s1 + $0xe30] sm:$0xff] }
  0x5a   : > { %2704 = vmatpush1.bf16.msra.mxu0 %v2703_v9  ;;  %2390 = vmatprep.subr.bf16.mxu1 %v2389_v23  ;;  %v2121_v9 = vld [vmem:[%s4862_s1 + $0xd28] sm:$0xff] }
  0x5b   : > { %2706 = vmatprep.subr.bf16.mxu0 %v2705_v14  ;;  %v1998_v14 = vld [vmem:[%s4862_s1 + $0x960] sm:$0xff]  ;;  %v2725_v17 = vpack.c.bf16 %v2123_v10, %v2121_v9  ;;  %v2019_v9 = vld [vmem:[%s4862_s1 + $0xa08] sm:$0xff]  ;;  %v2021_v10 = vld [vmem:[%s4862_s1 + $0xa18] sm:$0xff] }
  0x5c   : > { %v2407_v23 = vpack.c.bf16 %v2000_v15, %v1998_v14  ;;  %v2743_v14 = vpack.c.bf16 %v2138_v8, %v2136_v5  ;;  %v2425_v15 = vpack.c.bf16 %v2021_v10, %v2019_v9  ;;  %v2759_v5 = vpack.c.bf16 %v2154_v61, %v2152_v59  ;;  %v2156_v8 = vld [vmem:[%s4862_s1 + $0xe40] sm:$0xff]  ;;  %v2158_v9 = vld [vmem:[%s4862_s1 + $0xe50] sm:$0xff]  ;;  %v430_v10 = vld [vmem:[%s3049_s12 + $0x28] sm:$0xfe] }
  0x5d   : > { %2099 = vmatmul.mubr.msk.f32.vlgmr.msra.gmra.mrb[2].mxu0 %vm682_vm1, %v224_v21  ;;  %2392 = vmatpush1.bf16.msra.mxu1 %v2391_v33  ;;  %v2125_v21 = vld [vmem:[%s4862_s1 + $0xd48] sm:$0xff]  ;;  %v1259_v59 = vld [vmem:[%s3049_s12 + $0x18] sm:$0xfc] }
  0x5e   : > { %2708 = vmatpush1.bf16.msra.mxu0 %v2707_v22  ;;  %2394 = vmatprep.subr.bf16.mxu1 %v2393_v35  ;;  %v2127_v22 = vld [vmem:[%s4862_s1 + $0xd58] sm:$0xff]  ;;  %v2007_v33 = vld [vmem:[%s4862_s1 + $0x9a8] sm:$0xff]  ;;  %v1489_v35 = vrot.slane %v1257_v29, 2 }
  0x5f   : > { %2710 = vmatprep.subr.bf16.mxu0 %v2709_v27  ;;  %v2409_v27 = vpack.c.bf16 %v2005_v20, %v2003_v19  ;;  %v2729_v31 = vpack.c.bf16 %v2127_v22, %v2125_v21  ;;  %v2142_v20 = vld [vmem:[%s4862_s1 + $0xdd0] sm:$0xff]  ;;  %v2023_v21 = vld [vmem:[%s4862_s1 + $0xa28] sm:$0xff]  ;;  %v2025_v22 = vld [vmem:[%s4862_s1 + $0xa38] sm:$0xff] }
  0x60   : > { %v1491_v40 = vsel %vm1485_vm2, %v1489_v35, %v1490_v36  ;;  %v2747_v28 = vpack.c.bf16 %v2142_v20, %v2140_v18  ;;  %v2429_v29 = vpack.c.bf16 %v2025_v22, %v2023_v21  ;;  %v2027_v35 = vld [vmem:[%s4862_s1 + $0xa48] sm:$0xff]  ;;  %v2029_v36 = vld [vmem:[%s4862_s1 + $0xa58] sm:$0xff]  ;;  %v2038_v20 = vld [vmem:[%s4862_s1 + $0xaa0] sm:$0xff]  ;;  %v2763_v22 = vpack.c.bf16 %v2158_v9, %v2156_v8 }
  0x61   : > { %2396 = vmatpush1.bf16.msra.mxu1 %v2395_v45  ;;  %v2128_v45 = vld [vmem:[%s4862_s1 + $0xd60] sm:$0xff]  ;;  %1579 = vmatprep.mubr.f32.mxu0 %v1491_v40  ;;  %v2433_v43 = vpack.c.bf16 %v2029_v36, %v2027_v35  ;;  %v2040_v21 = vld [vmem:[%s4862_s1 + $0xab0] sm:$0xff]  ;;  %v2173_v61 = vld [vmem:[%s4862_s1 + $0xec8] sm:$0xff] }
  0x62   : > { %2712 = vmatpush1.bf16.msra.mxu0 %v2711_v34  ;;  %2398 = vmatprep.subr.bf16.mxu1 %v2397_v49  ;;  %v2009_v34 = vld [vmem:[%s4862_s1 + $0x9b8] sm:$0xff]  ;;  %v2735_v53 = vpack.c.bf16 %v2130_v47, %v2128_v45  ;;  %v2028_v45 = vld [vmem:[%s4862_s1 + $0xa50] sm:$0xff]  ;;  %v2753_v47 = vpack.c.bf16 %v2151_v38, %v2149_v37  ;;  %v2042_v37 = vld [vmem:[%s4862_s1 + $0xac0] sm:$0xff] }
  0x63   : > { %2714 = vmatprep.subr.bf16.mxu0 %v2713_v39  ;;  %v2411_v39 = vpack.c.bf16 %v2004_v25, %v2002_v24  ;;  %v2413_v42 = vpack.c.bf16 %v2009_v34, %v2007_v33  ;;  %v2013_v49 = vld [vmem:[%s4862_s1 + $0x9d8] sm:$0xff]  ;;  %v2146_v34 = vld [vmem:[%s4862_s1 + $0xdf0] sm:$0xff] }
  0x64   : > { %v2147_v24 = vld [vmem:[%s4862_s1 + $0xdf8] sm:$0xff]  ;;  %v2044_v38 = vld [vmem:[%s4862_s1 + $0xad0] sm:$0xff] }
  0x65   : > { %2400 = vmatpush1.bf16.msra.mxu1 %v2399_v62  ;;  %v2137_v62 = vld [vmem:[%s4862_s1 + $0xda8] sm:$0xff] }
  0x66   : > { %2716 = vmatpush1.bf16.msra.mxu0 %v2715_v48  ;;  %2402 = vmatprep.subr.bf16.mxu1 %v2401_v0  ;;  %v2011_v48 = vld [vmem:[%s4862_s1 + $0x9c8] sm:$0xff] }
  0x67   : > { %2718 = vmatprep.subr.bf16.mxu0 %v2717_v55  ;;  %v2417_v54 = vpack.c.bf16 %v2013_v49, %v2011_v48  ;;  %v2010_v55 = vld [vmem:[%s4862_s1 + $0x9c0] sm:$0xff]  ;;  %v2150_v48 = vld [vmem:[%s4862_s1 + $0xe10] sm:$0xff]  ;;  %v2031_v49 = vld [vmem:[%s4862_s1 + $0xa68] sm:$0xff] }
  0x68   : > { %v2419_v0 = vpack.c.bf16 %v2012_v56, %v2010_v55  ;;  %v2437_v56 = vpack.c.bf16 %v2033_v50, %v2031_v49  ;;  %v2046_v49 = vld [vmem:[%s4862_s1 + $0xae0] sm:$0xff]  ;;  %v2048_v50 = vld [vmem:[%s4862_s1 + $0xaf0] sm:$0xff] }
  0x69   : > { %2404 = vmatpush1.bf16.msra.mxu1 %v2403_v11  ;;  %v2141_v11 = vld [vmem:[%s4862_s1 + $0xdc8] sm:$0xff] }
  0x6a   : > { %2720 = vmatpush1.bf16.msra.mxu0 %v2719_v63  ;;  %2406 = vmatprep.subr.bf16.mxu1 %v2405_v13  ;;  %v2139_v63 = vld [vmem:[%s4862_s1 + $0xdb8] sm:$0xff] }
  0x6b   : > { %2722 = vmatprep.subr.bf16.mxu0 %v2721_v4  ;;  %v2016_v4 = vld [vmem:[%s4862_s1 + $0x9f0] sm:$0xff]  ;;  %v2741_v6 = vpack.c.bf16 %v2139_v63, %v2137_v62  ;;  %v2035_v62 = vld [vmem:[%s4862_s1 + $0xa88] sm:$0xff]  ;;  %v2037_v63 = vld [vmem:[%s4862_s1 + $0xa98] sm:$0xff] }
  0x6c   : > { %v2423_v13 = vpack.c.bf16 %v2016_v4, %v2014_v3  ;;  %v2034_v3 = vld [vmem:[%s4862_s1 + $0xa80] sm:$0xff]  ;;  %v2036_v4 = vld [vmem:[%s4862_s1 + $0xa90] sm:$0xff] }
  0x6d   : > { %2408 = vmatpush1.bf16.msra.mxu1 %v2407_v23  ;;  %v2145_v23 = vld [vmem:[%s4862_s1 + $0xde8] sm:$0xff] }
  0x6e   : > { %2724 = vmatpush1.bf16.msra.mxu0 %v2723_v12  ;;  %2410 = vmatprep.subr.bf16.mxu1 %v2409_v27  ;;  %v2143_v12 = vld [vmem:[%s4862_s1 + $0xdd8] sm:$0xff]  ;;  %v2024_v27 = vld [vmem:[%s4862_s1 + $0xa30] sm:$0xff]  ;;  %v2749_v33 = vpack.c.bf16 %v2147_v24, %v2145_v23  ;;  %v2160_v24 = vld [vmem:[%s4862_s1 + $0xe60] sm:$0xff] }
  0x6f   : > { %2726 = vmatprep.subr.bf16.mxu0 %v2725_v17  ;;  %v2020_v17 = vld [vmem:[%s4862_s1 + $0xa10] sm:$0xff]  ;;  %v2745_v19 = vpack.c.bf16 %v2143_v12, %v2141_v11  ;;  %v2039_v12 = vld [vmem:[%s4862_s1 + $0xaa8] sm:$0xff] }
  0x70   : > { %v2427_v25 = vpack.c.bf16 %v2020_v17, %v2018_v16  ;;  %v2161_v16 = vld [vmem:[%s4862_s1 + $0xe68] sm:$0xff]  ;;  %v2163_v17 = vld [vmem:[%s4862_s1 + $0xe78] sm:$0xff] }
  0x71   : > { %2412 = vmatpush1.bf16.msra.mxu1 %v2411_v39 }
  0x72   : > { %2728 = vmatpush1.bf16.msra.mxu0 %v2727_v26  ;;  %2414 = vmatprep.subr.bf16.mxu1 %v2413_v42  ;;  %v2022_v26 = vld [vmem:[%s4862_s1 + $0xa20] sm:$0xff]  ;;  %v2751_v42 = vpack.c.bf16 %v2146_v34, %v2144_v30  ;;  %v2447_v34 = vpack.c.bf16 %v2040_v21, %v2038_v20 }
  0x73   : > { %2730 = vmatprep.subr.bf16.mxu0 %v2729_v31  ;;  %v427_v31 = vld [vmem:[%s3049_s12 + $0x10] sm:$0xfe]  ;;  %v2431_v39 = vpack.c.bf16 %v2024_v27, %v2022_v26  ;;  %v2043_v26 = vld [vmem:[%s4862_s1 + $0xac8] sm:$0xff]  ;;  %v1256_v30 = vld [vmem:[%s3049_s12] sm:$0xfc] }
  0x74   : > { %v661_v40 = vrot.slane %v427_v31, 1  ;;  %v1263_v31 = vld [vmem:[%s3049_s12 + $0x38] sm:$0x3]  ;;  %v2176_v20 = vld [vmem:[%s4862_s1 + $0xee0] sm:$0xff] }
  0x75   : > { %2416 = vmatpush1.bf16.msra.mxu1 %v2415_v52  ;;  %v2155_v52 = vld [vmem:[%s4862_s1 + $0xe38] sm:$0xff] }
  0x76   : > { %2732 = vmatpush1.bf16.msra.mxu0 %v2731_v41  ;;  %2418 = vmatprep.subr.bf16.mxu1 %v2417_v54  ;;  %v662_v41 = vrot.slane %v434_v32, 1  ;;  %v2435_v54 = vpack.c.bf16 %v2028_v45, %v2026_v44  ;;  %v2757_v60 = vpack.c.bf16 %v2155_v52, %v2153_v51  ;;  %v2165_v32 = vld [vmem:[%s4862_s1 + $0xe88] sm:$0xff]  ;;  %v2049_v45 = vld [vmem:[%s4862_s1 + $0xaf8] sm:$0xff] }
  0x77   : > { %2734 = vmatprep.subr.bf16.mxu0 %v2733_v46  ;;  %v2148_v46 = vld [vmem:[%s4862_s1 + $0xe00] sm:$0xff]  ;;  %v2047_v44 = vld [vmem:[%s4862_s1 + $0xae8] sm:$0xff] }
  0x78   : > { %v2755_v55 = vpack.c.bf16 %v2150_v48, %v2148_v46  ;;  %v2169_v46 = vld [vmem:[%s4862_s1 + $0xea8] sm:$0xff]  ;;  %v2451_v48 = vpack.c.bf16 %v2044_v38, %v2042_v37  ;;  %v2187_v38 = vld [vmem:[%s4862_s1 + $0xf38] sm:$0xff] }
  0x79   : > { %2420 = vmatpush1.bf16.msra.mxu1 %v2419_v0  ;;  %v2157_v0 = vld [vmem:[%s4862_s1 + $0xe48] sm:$0xff] }
  0x7a   : > { %2736 = vmatpush1.bf16.msra.mxu0 %v2735_v53  ;;  %2422 = vmatprep.subr.bf16.mxu1 %v2421_v2  ;;  %v663_v53 = vsel %vm654_vm0, %v661_v40, %v662_v41  ;;  %v1487_v40 = vrot.slane %v1263_v31, 2  ;;  %v2164_v41 = vld [vmem:[%s4862_s1 + $0xe80] sm:$0xff]  ;;  %v2060_v31 = vld [vmem:[%s4862_s1 + $0xb50] sm:$0xff]  ;;  %v2185_v37 = vld [vmem:[%s4862_s1 + $0xf28] sm:$0xff] }
  0x7b   : > { %2738 = vmatprep.subr.bf16.mxu0 %v2737_v58  ;;  %v2032_v58 = vld [vmem:[%s4862_s1 + $0xa70] sm:$0xff] }
  0x7c   : > { %v2439_v2 = vpack.c.bf16 %v2032_v58, %v2030_v57  ;;  %v2053_v58 = vld [vmem:[%s4862_s1 + $0xb18] sm:$0xff] }
  0x7d   : > { %2424 = vmatpush1.bf16.msra.mxu1 %v2423_v13  ;;  %v2041_v13 = vld [vmem:[%s4862_s1 + $0xab8] sm:$0xff] }
  0x7e   : > { %2740 = vmatpush1.bf16.msra.mxu0 %v2739_v1  ;;  %2426 = vmatprep.subr.bf16.mxu1 %v2425_v15  ;;  %v2159_v1 = vld [vmem:[%s4862_s1 + $0xe58] sm:$0xff]  ;;  %v670_v15 = vrot.slane %v430_v10, 1  ;;  %v2445_v23 = vpack.c.bf16 %v2041_v13, %v2039_v12  ;;  %v2174_v10 = vld [vmem:[%s4862_s1 + $0xed0] sm:$0xff]  ;;  %v2177_v13 = vld [vmem:[%s4862_s1 + $0xee8] sm:$0xff] }
  0x7f   : > { %2742 = vmatprep.subr.bf16.mxu0 %v2741_v6  ;;  %v2441_v6 = vpack.c.bf16 %v2037_v63, %v2035_v62  ;;  %v2761_v11 = vpack.c.bf16 %v2159_v1, %v2157_v0  ;;  %v2175_v62 = vld [vmem:[%s4862_s1 + $0xed8] sm:$0xff]  ;;  %v1495_v63 = vrot.slane %v1259_v59, 2  ;;  %v2455_v1 = vpack.c.bf16 %v2048_v50, %v2046_v49  ;;  %v2189_v49 = vld [vmem:[%s4862_s1 + $0xf48] sm:$0xff] }
  0x80   : > { %v2777_v9 = vpack.c.bf16 %v2175_v62, %v2173_v61  ;;  %v2057_v12 = vld [vmem:[%s4862_s1 + $0xb38] sm:$0xff]  ;;  %v2071_v59 = vld [vmem:[%s4862_s1 + $0xba8] sm:$0xff] }
  0x81   : > { %2428 = vmatpush1.bf16.msra.mxu1 %v2427_v25  ;;  %v2162_v25 = vld [vmem:[%s4862_s1 + $0xe70] sm:$0xff]  ;;  %v2191_v50 = vld [vmem:[%s4862_s1 + $0xf58] sm:$0xff]  ;;  %v2193_v61 = vld [vmem:[%s4862_s1 + $0xf68] sm:$0xff] }
  0x82   : > { %2744 = vmatpush1.bf16.msra.mxu0 %v2743_v14  ;;  %2430 = vmatprep.subr.bf16.mxu1 %v2429_v29  ;;  %v437_v14 = vld [vmem:[%s3049_s12 + $0x60] sm:$0x1]  ;;  %v2045_v29 = vld [vmem:[%s4862_s1 + $0xad8] sm:$0xff]  ;;  %v2767_v35 = vpack.c.bf16 %v2162_v25, %v2160_v24  ;;  %v2181_v25 = vld [vmem:[%s4862_s1 + $0xf08] sm:$0xff] }
  0x83   : > { %2746 = vmatprep.subr.bf16.mxu0 %v2745_v19  ;;  %v671_v18 = vrot.slane %v437_v14, 1  ;;  %v2443_v19 = vpack.c.bf16 %v2036_v4, %v2034_v3  ;;  %v2449_v36 = vpack.c.bf16 %v2045_v29, %v2043_v26  ;;  %v2050_v4 = vld [vmem:[%s4862_s1 + $0xb00] sm:$0xff]  ;;  %v2179_v14 = vld [vmem:[%s4862_s1 + $0xef8] sm:$0xff] }
  0x84   : > { %v2781_v21 = vpack.c.bf16 %v2179_v14, %v2177_v13  ;;  %v2061_v24 = vld [vmem:[%s4862_s1 + $0xb58] sm:$0xff] }
  0x85   : > { %2432 = vmatpush1.bf16.msra.mxu1 %v2431_v39  ;;  %v672_v27 = vsel %vm654_vm0, %v670_v15, %v671_v18  ;;  %v1486_v39 = vrot.slane %v1256_v30, 2  ;;  %v2054_v18 = vld [vmem:[%s4862_s1 + $0xb20] sm:$0xff]  ;;  %v2183_v26 = vld [vmem:[%s4862_s1 + $0xf18] sm:$0xff] }
  0x86   : > { %2748 = vmatpush1.bf16.msra.mxu0 %v2747_v28  ;;  %2434 = vmatprep.subr.bf16.mxu1 %v2433_v43  ;;  %v2765_v28 = vpack.c.bf16 %v2163_v17, %v2161_v16  ;;  %v2166_v43 = vld [vmem:[%s4862_s1 + $0xe90] sm:$0xff]  ;;  %v2058_v30 = vld [vmem:[%s4862_s1 + $0xb40] sm:$0xff]  ;;  %v2195_v62 = vld [vmem:[%s4862_s1 + $0xf78] sm:$0xff] }
  0x87   : > { %2750 = vmatprep.subr.bf16.mxu0 %v2749_v33  ;;  %v2167_v33 = vld [vmem:[%s4862_s1 + $0xe98] sm:$0xff]  ;;  %v1488_v51 = vsel %vm1485_vm2, %v1486_v39, %v1487_v40  ;;  %v2771_v52 = vpack.c.bf16 %v2166_v43, %v2164_v41  ;;  %v2467_v39 = vpack.c.bf16 %v2060_v31, %v2058_v30  ;;  %v2064_v43 = vld [vmem:[%s4862_s1 + $0xb70] sm:$0xff] }
  0x88   : > { %821 = vmatmul.mubr.f32.vlgmr.msra.gmra.mrb[0].mxu1 %v663_v53  ;;  %v2453_v53 = vpack.c.bf16 %v2049_v45, %v2047_v44  ;;  %v2184_v44 = vld [vmem:[%s4862_s1 + $0xf20] sm:$0xff]  ;;  %v2789_v45 = vpack.c.bf16 %v2187_v38, %v2185_v37  ;;  %v2202_v31 = vld [vmem:[%s4862_s1 + $0xfb0] sm:$0xff] }
  0x89   : > { %2436 = vmatpush1.bf16.msra.mxu1 %v2435_v54  ;;  %891 = vmatprep.mubr.f32.mxu1 %v672_v27  ;;  %v2168_v54 = vld [vmem:[%s4862_s1 + $0xea0] sm:$0xff] }
  0x8a   : > { %2752 = vmatpush1.bf16.msra.mxu0 %v2751_v42  ;;  %2438 = vmatprep.subr.bf16.mxu1 %v2437_v56  ;;  %v2769_v42 = vpack.c.bf16 %v2167_v33, %v2165_v32  ;;  %v2051_v56 = vld [vmem:[%s4862_s1 + $0xb08] sm:$0xff]  ;;  %v2180_v32 = vld [vmem:[%s4862_s1 + $0xf00] sm:$0xff]  ;;  %v2785_v33 = vpack.c.bf16 %v2183_v26, %v2181_v25 }
  0x8b   : > { %2754 = vmatprep.subr.bf16.mxu0 %v2753_v47  ;;  %v2171_v47 = vld [vmem:[%s4862_s1 + $0xeb8] sm:$0xff]  ;;  %v2457_v3 = vpack.c.bf16 %v2053_v58, %v2051_v56  ;;  %v2188_v56 = vld [vmem:[%s4862_s1 + $0xf40] sm:$0xff]  ;;  %v2190_v58 = vld [vmem:[%s4862_s1 + $0xf50] sm:$0xff] }
  0x8c   : > { %v2773_v57 = vpack.c.bf16 %v2171_v47, %v2169_v46  ;;  %v2186_v46 = vld [vmem:[%s4862_s1 + $0xf30] sm:$0xff]  ;;  %v2067_v47 = vld [vmem:[%s4862_s1 + $0xb88] sm:$0xff] }
  0x8d   : > { %2440 = vmatpush1.bf16.msra.mxu1 %v2439_v2 }
  0x8e   : > { %2756 = vmatpush1.bf16.msra.mxu0 %v2755_v55  ;;  %2442 = vmatprep.subr.bf16.mxu1 %v2441_v6  ;;  %v2170_v55 = vld [vmem:[%s4862_s1 + $0xeb0] sm:$0xff]  ;;  %v2172_v6 = vld [vmem:[%s4862_s1 + $0xec0] sm:$0xff] }
  0x8f   : > { %2758 = vmatprep.subr.bf16.mxu0 %v2757_v60  ;;  %v1266_v60 = vld [vmem:[%s3049_s12 + $0x50] sm:$0x3]  ;;  %v2775_v2 = vpack.c.bf16 %v2170_v55, %v2168_v54  ;;  %v2779_v16 = vpack.c.bf16 %v2174_v10, %v2172_v6  ;;  %v2066_v54 = vld [vmem:[%s4862_s1 + $0xb80] sm:$0xff]  ;;  %v2197_v10 = vld [vmem:[%s4862_s1 + $0xf88] sm:$0xff] }
  0x90   : > { %v1496_v0 = vrot.slane %v1266_v60, 2  ;;  %v2068_v55 = vld [vmem:[%s4862_s1 + $0xb90] sm:$0xff]  ;;  %v2073_v60 = vld [vmem:[%s4862_s1 + $0xbb8] sm:$0xff] }
  0x91   : > { %2444 = vmatpush1.bf16.msra.mxu1 %v2443_v19  ;;  %v2056_v19 = vld [vmem:[%s4862_s1 + $0xb30] sm:$0xff] }
  0x92   : > { %2760 = vmatpush1.bf16.msra.mxu0 %v2759_v5  ;;  %2446 = vmatprep.subr.bf16.mxu1 %v2445_v23  ;;  %v2052_v5 = vld [vmem:[%s4862_s1 + $0xb10] sm:$0xff]  ;;  %v1497_v8 = vsel %vm1485_vm2, %v1495_v63, %v1496_v0  ;;  %v2059_v23 = vld [vmem:[%s4862_s1 + $0xb48] sm:$0xff]  ;;  %v2463_v27 = vpack.c.bf16 %v2056_v19, %v2054_v18  ;;  %v2475_v63 = vpack.c.bf16 %v2068_v55, %v2066_v54  ;;  %v429_v54 = vld [vmem:[%s3049_s12 + $0x20] sm:$0xfe] }
  0x93   : > { %2762 = vmatprep.subr.bf16.mxu0 %v2761_v11  ;;  %v2055_v11 = vld [vmem:[%s4862_s1 + $0xb28] sm:$0xff]  ;;  %v2459_v15 = vpack.c.bf16 %v2052_v5, %v2050_v4  ;;  %v2465_v29 = vpack.c.bf16 %v2061_v24, %v2059_v23  ;;  %v2795_v0 = vpack.c.bf16 %v2190_v58, %v2188_v56  ;;  %v2192_v4 = vld [vmem:[%s4862_s1 + $0xf60] sm:$0xff]  ;;  %v2797_v5 = vpack.c.bf16 %v2195_v62, %v2193_v61  ;;  %v2194_v6 = vld [vmem:[%s4862_s1 + $0xf70] sm:$0xff] }
  0x94   : > { %v2461_v17 = vpack.c.bf16 %v2057_v12, %v2055_v11  ;;  %v2199_v11 = vld [vmem:[%s4862_s1 + $0xf98] sm:$0xff]  ;;  %v2799_v13 = vpack.c.bf16 %v2194_v6, %v2192_v4  ;;  %v2198_v19 = vld [vmem:[%s4862_s1 + $0xf90] sm:$0xff]  ;;  %v226_v58 = vld [vmem:[%s4862_s1 + $0x8] sm:$0xff] }
  0x95   : > { %2448 = vmatpush1.bf16.msra.mxu1 %v2447_v34  ;;  %v2182_v34 = vld [vmem:[%s4862_s1 + $0xf10] sm:$0xff]  ;;  %v2801_v18 = vpack.c.bf16 %v2199_v11, %v2197_v10  ;;  %v2203_v23 = vld [vmem:[%s4862_s1 + $0xfb8] sm:$0xff]  ;;  %v2217_v11 = vld [vmem:[%s4862_s1 + $0x1028] sm:$0xff] }
  0x96   : > { %2764 = vmatpush1.bf16.msra.mxu0 %v2763_v22  ;;  %2450 = vmatprep.subr.bf16.mxu1 %v2449_v36  ;;  %v2178_v22 = vld [vmem:[%s4862_s1 + $0xef0] sm:$0xff]  ;;  %v2065_v36 = vld [vmem:[%s4862_s1 + $0xb78] sm:$0xff]  ;;  %v2787_v40 = vpack.c.bf16 %v2182_v34, %v2180_v32  ;;  %v2083_v32 = vld [vmem:[%s4862_s1 + $0xc08] sm:$0xff] }
  0x97   : > { %2766 = vmatprep.subr.bf16.mxu0 %v2765_v28  ;;  %v2783_v28 = vpack.c.bf16 %v2178_v22, %v2176_v20  ;;  %v2079_v20 = vld [vmem:[%s4862_s1 + $0xbe8] sm:$0xff]  ;;  %v436_v55 = vld [vmem:[%s3049_s12 + $0x58] sm:$0x1]  ;;  %v227_v4 = vld [vmem:[%s4862_s1 + $0x10] sm:$0xff] }
  0x98   : > { %v2201_v22 = vld [vmem:[%s4862_s1 + $0xfa8] sm:$0xff]  ;;  %v2215_v61 = vld [vmem:[%s4862_s1 + $0x1018] sm:$0xff] }
  0x99   : > { %2452 = vmatpush1.bf16.msra.mxu1 %v2451_v48  ;;  %v2069_v48 = vld [vmem:[%s4862_s1 + $0xb98] sm:$0xff]  ;;  %v2805_v30 = vpack.c.bf16 %v2203_v23, %v2201_v22  ;;  %v2205_v34 = vld [vmem:[%s4862_s1 + $0xfc8] sm:$0xff]  ;;  %v2218_v22 = vld [vmem:[%s4862_s1 + $0x1030] sm:$0xff] }
  0x9a   : > { %2768 = vmatpush1.bf16.msra.mxu0 %v2767_v35  ;;  %2454 = vmatprep.subr.bf16.mxu1 %v2453_v53  ;;  %v2063_v35 = vld [vmem:[%s4862_s1 + $0xb68] sm:$0xff]  ;;  %v2473_v53 = vpack.c.bf16 %v2069_v48, %v2067_v47  ;;  %v2211_v47 = vld [vmem:[%s4862_s1 + $0xff8] sm:$0xff] }
  0x9b   : > { %2770 = vmatprep.subr.bf16.mxu0 %v2769_v42  ;;  %v2469_v41 = vpack.c.bf16 %v2065_v36, %v2063_v35  ;;  %v2062_v42 = vld [vmem:[%s4862_s1 + $0xb60] sm:$0xff]  ;;  %v2207_v35 = vld [vmem:[%s4862_s1 + $0xfd8] sm:$0xff]  ;;  %v234_v23 = vld [vmem:[%s4862_s1 + $0x48] sm:$0xff] }
  0x9c   : > { %v232_v10 = vld [vmem:[%s4862_s1 + $0x38] sm:$0xff] }
  0x9d   : > { %1580 = vmatmul.mubr.f32.vlgmr.msra.gmra.mrb[2].mxu0 %v1488_v51  ;;  %2456 = vmatpush1.bf16.msra.mxu1 %v2455_v1  ;;  %v2471_v51 = vpack.c.bf16 %v2064_v43, %v2062_v42  ;;  %v2477_v1 = vpack.c.bf16 %v2073_v60, %v2071_v59  ;;  %v2809_v42 = vpack.c.bf16 %v2207_v35, %v2205_v34  ;;  %v2206_v43 = vld [vmem:[%s4862_s1 + $0xfd0] sm:$0xff]  ;;  %v228_v59 = vld [vmem:[%s4862_s1 + $0x18] sm:$0xff]  ;;  %v2213_v60 = vld [vmem:[%s4862_s1 + $0x1008] sm:$0xff] }
  0x9e   : > { %2772 = vmatpush1.bf16.msra.mxu0 %v2771_v52  ;;  %1650 = vmatprep.mubr.f32.mxu0 %v1497_v8  ;;  %v2791_v52 = vpack.c.bf16 %v2186_v46, %v2184_v44  ;;  %v2075_v8 = vld [vmem:[%s4862_s1 + $0xbc8] sm:$0xff]  ;;  %v2817_v6 = vpack.c.bf16 %v2215_v61, %v2213_v60  ;;  %v2222_v34 = vld [vmem:[%s4862_s1 + $0x1050] sm:$0xff] }
  0x9f   : > { %2774 = vmatprep.subr.bf16.mxu0 %v2773_v57  ;;  %2458 = vmatprep.subr.bf16.mxu1 %v2457_v3  ;;  %v2793_v57 = vpack.c.bf16 %v2191_v50, %v2189_v49  ;;  %v2072_v3 = vld [vmem:[%s4862_s1 + $0xbb0] sm:$0xff]  ;;  %v2087_v44 = vld [vmem:[%s4862_s1 + $0xc28] sm:$0xff]  ;;  %v2086_v49 = vld [vmem:[%s4862_s1 + $0xc20] sm:$0xff] }
  0xa0   : > { %v2209_v46 = vld [vmem:[%s4862_s1 + $0xfe8] sm:$0xff]  ;;  %v2088_v50 = vld [vmem:[%s4862_s1 + $0xc30] sm:$0xff] }
  0xa1   : > { %2460 = vmatpush1.bf16.msra.mxu1 %v2459_v15  ;;  %v2074_v15 = vld [vmem:[%s4862_s1 + $0xbc0] sm:$0xff]  ;;  %v2813_v56 = vpack.c.bf16 %v2211_v47, %v2209_v46  ;;  %v2495_v62 = vpack.c.bf16 %v2088_v50, %v2086_v49  ;;  %v238_v35 = vld [vmem:[%s4862_s1 + $0x68] sm:$0xff]  ;;  %v1258_v49 = vld [vmem:[%s3049_s12 + $0x10] sm:$0xfc] }
  0xa2   : > { %2776 = vmatpush1.bf16.msra.mxu0 %v2775_v2  ;;  %2462 = vmatprep.subr.bf16.mxu1 %v2461_v17  ;;  %v2070_v2 = vld [vmem:[%s4862_s1 + $0xba0] sm:$0xff]  ;;  %v242_v46 = vld [vmem:[%s4862_s1 + $0x88] sm:$0xff]  ;;  %v1492_v60 = vrot.slane %v1258_v49, 2 }
  0xa3   : > { %2778 = vmatprep.subr.bf16.mxu0 %v2777_v9  ;;  %v2077_v9 = vld [vmem:[%s4862_s1 + $0xbd8] sm:$0xff]  ;;  %v2479_v12 = vpack.c.bf16 %v2072_v3, %v2070_v2  ;;  %v2196_v17 = vld [vmem:[%s4862_s1 + $0xf80] sm:$0xff]  ;;  %v2505_v2 = vpack.c.bf16 %v228_v59, %v226_v58  ;;  %v1265_v50 = vld [vmem:[%s3049_s12 + $0x48] sm:$0x3] }
  0xa4   : > { %v2481_v14 = vpack.c.bf16 %v2077_v9, %v2075_v8  ;;  %v2803_v25 = vpack.c.bf16 %v2198_v19, %v2196_v17  ;;  %v225_v3 = vld [vmem:[%s4862_s1] sm:$0xff]  ;;  %v2214_v8 = vld [vmem:[%s4862_s1 + $0x1010] sm:$0xff]  ;;  %v230_v9 = vld [vmem:[%s4862_s1 + $0x28] sm:$0xff]  ;;  %v1493_v61 = vrot.slane %v1265_v50, 2 }
  0xa5   : > { %2464 = vmatpush1.bf16.msra.mxu1 %v2463_v27  ;;  %v2078_v27 = vld [vmem:[%s4862_s1 + $0xbe0] sm:$0xff]  ;;  %v2509_v17 = vpack.c.bf16 %v232_v10, %v230_v9  ;;  %v243_v59 = vld [vmem:[%s4862_s1 + $0x90] sm:$0xff] }
  0xa6   : > { %2780 = vmatpush1.bf16.msra.mxu0 %v2779_v16  ;;  %2466 = vmatprep.subr.bf16.mxu1 %v2465_v29  ;;  %v2076_v16 = vld [vmem:[%s4862_s1 + $0xbd0] sm:$0xff]  ;;  %v2200_v29 = vld [vmem:[%s4862_s1 + $0xfa0] sm:$0xff]  ;;  %v1494_v9 = vsel %vm1485_vm2, %v1492_v60, %v1493_v61 }
  0xa7   : > { %2782 = vmatprep.subr.bf16.mxu0 %v2781_v21  ;;  %v2081_v21 = vld [vmem:[%s4862_s1 + $0xbf8] sm:$0xff]  ;;  %v2483_v24 = vpack.c.bf16 %v2076_v16, %v2074_v15  ;;  %v2807_v37 = vpack.c.bf16 %v2202_v31, %v2200_v29  ;;  %v229_v15 = vld [vmem:[%s4862_s1 + $0x20] sm:$0xff]  ;;  %v235_v31 = vld [vmem:[%s4862_s1 + $0x50] sm:$0xff] }
  0xa8   : > { %v2485_v26 = vpack.c.bf16 %v2081_v21, %v2079_v20  ;;  %v2216_v19 = vld [vmem:[%s4862_s1 + $0x1020] sm:$0xff]  ;;  %v219_v20 = vld [vmem:[%s3049_s12 + $0x8] sm:$0xff]  ;;  %v259_v50 = vld [vmem:[%s4862_s1 + $0x110] sm:$0xff] }
  0xa9   : > { %2468 = vmatpush1.bf16.msra.mxu1 %v2467_v39  ;;  %v2082_v39 = vld [vmem:[%s4862_s1 + $0xc00] sm:$0xff] }
  0xaa   : > { %2784 = vmatpush1.bf16.msra.mxu0 %v2783_v28  ;;  %2470 = vmatprep.subr.bf16.mxu1 %v2469_v41  ;;  %v2080_v28 = vld [vmem:[%s4862_s1 + $0xbf0] sm:$0xff]  ;;  %v2204_v41 = vld [vmem:[%s4862_s1 + $0xfc0] sm:$0xff] }
  0xab   : > { %2786 = vmatprep.subr.bf16.mxu0 %v2785_v33  ;;  %v2085_v33 = vld [vmem:[%s4862_s1 + $0xc18] sm:$0xff]  ;;  %v2487_v36 = vpack.c.bf16 %v2080_v28, %v2078_v27  ;;  %v2823_v28 = vpack.c.bf16 %v2218_v22, %v2216_v19  ;;  %v241_v58 = vld [vmem:[%s4862_s1 + $0x80] sm:$0xff]  ;;  %v2237_v19 = vld [vmem:[%s4862_s1 + $0x10c8] sm:$0xff] }
  0xac   : > { %v2489_v38 = vpack.c.bf16 %v2085_v33, %v2083_v32  ;;  %v2220_v32 = vld [vmem:[%s4862_s1 + $0x1040] sm:$0xff] }
  0xad   : > { %2472 = vmatpush1.bf16.msra.mxu1 %v2471_v51  ;;  %v2811_v51 = vpack.c.bf16 %v2206_v43, %v2204_v41  ;;  %v239_v41 = vld [vmem:[%s4862_s1 + $0x70] sm:$0xff]  ;;  %v257_v49 = vld [vmem:[%s4862_s1 + $0x100] sm:$0xff] }
  0xae   : > { %2788 = vmatpush1.bf16.msra.mxu0 %v2787_v40  ;;  %2474 = vmatprep.subr.bf16.mxu1 %v2473_v53  ;;  %v2084_v40 = vld [vmem:[%s4862_s1 + $0xc10] sm:$0xff]  ;;  %v2208_v53 = vld [vmem:[%s4862_s1 + $0xfe0] sm:$0xff] }
  0xaf   : > { %2790 = vmatprep.subr.bf16.mxu0 %v2789_v45  ;;  %v2089_v45 = vld [vmem:[%s4862_s1 + $0xc38] sm:$0xff]  ;;  %v2491_v48 = vpack.c.bf16 %v2084_v40, %v2082_v39  ;;  %v237_v40 = vld [vmem:[%s4862_s1 + $0x60] sm:$0xff] }
  0xb1   : > { %2476 = vmatpush1.bf16.msra.mxu1 %v2475_v63  ;;  %v667_v63 = vrot.slane %v429_v54, 1  ;;  %v1261_v54 = vld [vmem:[%s3049_s12 + $0x28] sm:$0xfc] }
  0xb2   : > { %2792 = vmatpush1.bf16.msra.mxu0 %v2791_v52  ;;  %2478 = vmatprep.subr.bf16.mxu1 %v2477_v1  ;;  %v2493_v52 = vpack.c.bf16 %v2089_v45, %v2087_v44  ;;  %v2224_v44 = vld [vmem:[%s4862_s1 + $0x1060] sm:$0xff]  ;;  %v2226_v45 = vld [vmem:[%s4862_s1 + $0x1070] sm:$0xff] }
  0xb3   : > { %2794 = vmatprep.subr.bf16.mxu0 %v2793_v57  ;;  %v2210_v57 = vld [vmem:[%s4862_s1 + $0xff0] sm:$0xff] }
  0xb4   : > { %v2815_v1 = vpack.c.bf16 %v2210_v57, %v2208_v53  ;;  %v2519_v53 = vpack.c.bf16 %v239_v41, %v237_v40  ;;  %v2242_v41 = vld [vmem:[%s4862_s1 + $0x10f0] sm:$0xff] }
  0xb5   : > { %2480 = vmatpush1.bf16.msra.mxu1 %v2479_v12  ;;  %v2219_v12 = vld [vmem:[%s4862_s1 + $0x1038] sm:$0xff] }
  0xb6   : > { %2796 = vmatpush1.bf16.msra.mxu0 %v2795_v0  ;;  %2482 = vmatprep.subr.bf16.mxu1 %v2481_v14  ;;  %v668_v0 = vrot.slane %v436_v55, 1  ;;  %v2507_v14 = vpack.c.bf16 %v227_v4, %v225_v3  ;;  %v2821_v21 = vpack.c.bf16 %v2219_v12, %v2217_v11  ;;  %v1268_v55 = vld [vmem:[%s3049_s12 + $0x60] sm:$0x3]  ;;  %v2233_v3 = vld [vmem:[%s4862_s1 + $0x10a8] sm:$0xff]  ;;  %v2235_v4 = vld [vmem:[%s4862_s1 + $0x10b8] sm:$0xff] }
  0xb7   : > { %2798 = vmatprep.subr.bf16.mxu0 %v2797_v5  ;;  %v2212_v5 = vld [vmem:[%s4862_s1 + $0x1000] sm:$0xff] }
  0xb8   : > { %v2819_v16 = vpack.c.bf16 %v2214_v8, %v2212_v5  ;;  %v1501_v5 = vrot.slane %v1261_v54, 2  ;;  %v2523_v8 = vpack.c.bf16 %v243_v59, %v241_v58  ;;  %v245_v12 = vld [vmem:[%s4862_s1 + $0xa0] sm:$0xff]  ;;  %v262_v54 = vld [vmem:[%s4862_s1 + $0x128] sm:$0xff]  ;;  %v2539_v59 = vpack.c.bf16 %v259_v50, %v257_v49  ;;  %v279_v49 = vld [vmem:[%s4862_s1 + $0x1b0] sm:$0xff] }
  0xb9   : > { %2484 = vmatpush1.bf16.msra.mxu1 %v2483_v24  ;;  %v236_v24 = vld [vmem:[%s4862_s1 + $0x58] sm:$0xff]  ;;  %v2264_v50 = vld [vmem:[%s4862_s1 + $0x11a0] sm:$0xff] }
  0xba   : > { %2800 = vmatpush1.bf16.msra.mxu0 %v2799_v13  ;;  %2486 = vmatprep.subr.bf16.mxu1 %v2485_v26  ;;  %v669_v13 = vsel %vm654_vm0, %v667_v63, %v668_v0  ;;  %v2223_v26 = vld [vmem:[%s4862_s1 + $0x1058] sm:$0xff]  ;;  %v2513_v29 = vpack.c.bf16 %v236_v24, %v234_v23  ;;  %v2230_v0 = vld [vmem:[%s4862_s1 + $0x1090] sm:$0xff] }
  0xbb   : > { %2802 = vmatprep.subr.bf16.mxu0 %v2801_v18  ;;  %v231_v18 = vld [vmem:[%s4862_s1 + $0x30] sm:$0xff] }
  0xbc   : > { %v2511_v27 = vpack.c.bf16 %v231_v18, %v229_v15  ;;  %v2837_v15 = vpack.c.bf16 %v2235_v4, %v2233_v3  ;;  %v252_v18 = vld [vmem:[%s4862_s1 + $0xd8] sm:$0xff]  ;;  %v2250_v3 = vld [vmem:[%s4862_s1 + $0x1130] sm:$0xff]  ;;  %v266_v4 = vld [vmem:[%s4862_s1 + $0x148] sm:$0xff] }
  0xbd   : > { %2488 = vmatpush1.bf16.msra.mxu1 %v2487_v36  ;;  %v240_v36 = vld [vmem:[%s4862_s1 + $0x78] sm:$0xff] }
  0xbe   : > { %2804 = vmatpush1.bf16.msra.mxu0 %v2803_v25  ;;  %2490 = vmatprep.subr.bf16.mxu1 %v2489_v38  ;;  %v2221_v25 = vld [vmem:[%s4862_s1 + $0x1048] sm:$0xff]  ;;  %v2227_v38 = vld [vmem:[%s4862_s1 + $0x1078] sm:$0xff]  ;;  %v2517_v43 = vpack.c.bf16 %v240_v36, %v238_v35 }
  0xbf   : > { %2806 = vmatprep.subr.bf16.mxu0 %v2805_v30  ;;  %v233_v30 = vld [vmem:[%s4862_s1 + $0x40] sm:$0xff]  ;;  %v2825_v33 = vpack.c.bf16 %v2223_v26, %v2221_v25  ;;  %v251_v26 = vld [vmem:[%s4862_s1 + $0xd0] sm:$0xff] }
  0xc0   : > { %v2515_v39 = vpack.c.bf16 %v235_v31, %v233_v30  ;;  %v249_v25 = vld [vmem:[%s4862_s1 + $0xc0] sm:$0xff]  ;;  %v254_v30 = vld [vmem:[%s4862_s1 + $0xe8] sm:$0xff]  ;;  %v256_v31 = vld [vmem:[%s4862_s1 + $0xf8] sm:$0xff] }
  0xc1   : > { %2492 = vmatpush1.bf16.msra.mxu1 %v2491_v48  ;;  %v244_v48 = vld [vmem:[%s4862_s1 + $0x98] sm:$0xff]  ;;  %v2533_v36 = vpack.c.bf16 %v256_v31, %v254_v30  ;;  %v2261_v31 = vld [vmem:[%s4862_s1 + $0x1188] sm:$0xff] }
  0xc2   : > { %2808 = vmatpush1.bf16.msra.mxu0 %v2807_v37  ;;  %2494 = vmatprep.subr.bf16.mxu1 %v2493_v52  ;;  %v2225_v37 = vld [vmem:[%s4862_s1 + $0x1068] sm:$0xff]  ;;  %v2231_v52 = vld [vmem:[%s4862_s1 + $0x1098] sm:$0xff]  ;;  %v2521_v57 = vpack.c.bf16 %v244_v48, %v242_v46 }
  0xc3   : > { %2810 = vmatprep.subr.bf16.mxu0 %v2809_v42  ;;  %v2827_v42 = vpack.c.bf16 %v2222_v34, %v2220_v32  ;;  %v2829_v47 = vpack.c.bf16 %v2227_v38, %v2225_v37  ;;  %v2241_v32 = vld [vmem:[%s4862_s1 + $0x10e8] sm:$0xff]  ;;  %v2531_v34 = vpack.c.bf16 %v251_v26, %v249_v25  ;;  %v253_v37 = vld [vmem:[%s4862_s1 + $0xe0] sm:$0xff]  ;;  %v255_v38 = vld [vmem:[%s4862_s1 + $0xf0] sm:$0xff] }
  0xc4   : > { %v2535_v46 = vpack.c.bf16 %v255_v38, %v253_v37  ;;  %v271_v25 = vld [vmem:[%s4862_s1 + $0x170] sm:$0xff]  ;;  %v2256_v26 = vld [vmem:[%s4862_s1 + $0x1160] sm:$0xff]  ;;  %v276_v30 = vld [vmem:[%s4862_s1 + $0x198] sm:$0xff] }
  0xc5   : > { %2496 = vmatpush1.bf16.msra.mxu1 %v2495_v62  ;;  %v2228_v62 = vld [vmem:[%s4862_s1 + $0x1080] sm:$0xff]  ;;  %v275_v37 = vld [vmem:[%s4862_s1 + $0x190] sm:$0xff] }
  0xc6   : > { %2812 = vmatpush1.bf16.msra.mxu0 %v2811_v51  ;;  %2506 = vmatprep.subr.bf16.mxu1 %v2505_v2  ;;  %v2229_v51 = vld [vmem:[%s4862_s1 + $0x1088] sm:$0xff]  ;;  %v248_v2 = vld [vmem:[%s4862_s1 + $0xb8] sm:$0xff]  ;;  %v2835_v10 = vpack.c.bf16 %v2230_v0, %v2228_v62  ;;  %v263_v0 = vld [vmem:[%s4862_s1 + $0x130] sm:$0xff] }
  0xc7   : > { %2814 = vmatprep.subr.bf16.mxu0 %v2813_v56  ;;  %v2831_v56 = vpack.c.bf16 %v2226_v45, %v2224_v44  ;;  %v2833_v63 = vpack.c.bf16 %v2231_v52, %v2229_v51  ;;  %v2245_v44 = vld [vmem:[%s4862_s1 + $0x1108] sm:$0xff]  ;;  %v2247_v45 = vld [vmem:[%s4862_s1 + $0x1118] sm:$0xff]  ;;  %v2244_v51 = vld [vmem:[%s4862_s1 + $0x1100] sm:$0xff] }
  0xc8   : > { %892 = vmatmul.mubr.f32.vlgmr.msra.gmra.mrb[0].mxu1 %v669_v13  ;;  %v247_v13 = vld [vmem:[%s4862_s1 + $0xb0] sm:$0xff]  ;;  %v2849_v52 = vpack.c.bf16 %v2247_v45, %v2245_v44  ;;  %v2260_v38 = vld [vmem:[%s4862_s1 + $0x1180] sm:$0xff]  ;;  %v2267_v44 = vld [vmem:[%s4862_s1 + $0x11b8] sm:$0xff] }
  0xc9   : > { %2508 = vmatpush1.bf16.msra.mxu1 %v2507_v14  ;;  %1036 = vmatprep.mubr.f32.mxu1 %v219_v20  ;;  %v2232_v14 = vld [vmem:[%s4862_s1 + $0x10a0] sm:$0xff]  ;;  %v2239_v20 = vld [vmem:[%s4862_s1 + $0x10d8] sm:$0xff]  ;;  %v2527_v22 = vpack.c.bf16 %v247_v13, %v245_v12  ;;  %v267_v13 = vld [vmem:[%s4862_s1 + $0x150] sm:$0xff] }
  0xca   : > { %2816 = vmatpush1.bf16.msra.mxu0 %v2815_v1  ;;  %2510 = vmatprep.subr.bf16.mxu1 %v2509_v17  ;;  %v246_v1 = vld [vmem:[%s4862_s1 + $0xa8] sm:$0xff]  ;;  %v265_v12 = vld [vmem:[%s4862_s1 + $0x140] sm:$0xff] }
  0xcb   : > { %2818 = vmatprep.subr.bf16.mxu0 %v2817_v6  ;;  %v1502_v6 = vrot.slane %v1268_v55, 2  ;;  %v2525_v11 = vpack.c.bf16 %v248_v2, %v246_v1  ;;  %v250_v17 = vld [vmem:[%s4862_s1 + $0xc8] sm:$0xff]  ;;  %v264_v55 = vld [vmem:[%s4862_s1 + $0x138] sm:$0xff]  ;;  %v2248_v1 = vld [vmem:[%s4862_s1 + $0x1120] sm:$0xff] }
  0xcc   : > { %v2529_v24 = vpack.c.bf16 %v252_v18, %v250_v17  ;;  %v2541_v62 = vpack.c.bf16 %v264_v55, %v262_v54  ;;  %v270_v17 = vld [vmem:[%s4862_s1 + $0x168] sm:$0xff]  ;;  %v272_v18 = vld [vmem:[%s4862_s1 + $0x178] sm:$0xff] }
  0xcd   : > { %2512 = vmatpush1.bf16.msra.mxu1 %v2511_v27  ;;  %v2236_v27 = vld [vmem:[%s4862_s1 + $0x10c0] sm:$0xff]  ;;  %v284_v54 = vld [vmem:[%s4862_s1 + $0x1d8] sm:$0xff]  ;;  %v2269_v55 = vld [vmem:[%s4862_s1 + $0x11c8] sm:$0xff] }
  0xce   : > { %2820 = vmatpush1.bf16.msra.mxu0 %v2819_v16  ;;  %2514 = vmatprep.subr.bf16.mxu1 %v2513_v29  ;;  %v2234_v16 = vld [vmem:[%s4862_s1 + $0x10b0] sm:$0xff] }
  0xcf   : > { %2822 = vmatprep.subr.bf16.mxu0 %v2821_v21  ;;  %v1503_v21 = vsel %vm1485_vm2, %v1501_v5, %v1502_v6  ;;  %v2839_v23 = vpack.c.bf16 %v2234_v16, %v2232_v14  ;;  %v2238_v29 = vld [vmem:[%s4862_s1 + $0x10d0] sm:$0xff]  ;;  %v268_v5 = vld [vmem:[%s4862_s1 + $0x158] sm:$0xff]  ;;  %v2253_v6 = vld [vmem:[%s4862_s1 + $0x1148] sm:$0xff] }
  0xd0   : > { %v2843_v35 = vpack.c.bf16 %v2238_v29, %v2236_v27  ;;  %v2252_v14 = vld [vmem:[%s4862_s1 + $0x1140] sm:$0xff]  ;;  %v2254_v16 = vld [vmem:[%s4862_s1 + $0x1150] sm:$0xff]  ;;  %v274_v29 = vld [vmem:[%s4862_s1 + $0x188] sm:$0xff] }
  0xd1   : > { %2516 = vmatpush1.bf16.msra.mxu1 %v2515_v39  ;;  %v2240_v39 = vld [vmem:[%s4862_s1 + $0x10e0] sm:$0xff] }
  0xd2   : > { %2824 = vmatpush1.bf16.msra.mxu0 %v2823_v28  ;;  %2518 = vmatprep.subr.bf16.mxu1 %v2517_v43  ;;  %v2841_v28 = vpack.c.bf16 %v2239_v20, %v2237_v19  ;;  %v260_v43 = vld [vmem:[%s4862_s1 + $0x118] sm:$0xff]  ;;  %v2257_v19 = vld [vmem:[%s4862_s1 + $0x1168] sm:$0xff] }
  0xd3   : > { %2826 = vmatprep.subr.bf16.mxu0 %v2825_v33  ;;  %v2243_v33 = vld [vmem:[%s4862_s1 + $0x10f8] sm:$0xff] }
  0xd4   : > { %v2845_v40 = vpack.c.bf16 %v2243_v33, %v2241_v32  ;;  %v2259_v20 = vld [vmem:[%s4862_s1 + $0x1178] sm:$0xff] }
  0xd5   : > { %2520 = vmatpush1.bf16.msra.mxu1 %v2519_v53  ;;  %v2246_v53 = vld [vmem:[%s4862_s1 + $0x1110] sm:$0xff]  ;;  %v2861_v27 = vpack.c.bf16 %v2259_v20, %v2257_v19  ;;  %v2263_v32 = vld [vmem:[%s4862_s1 + $0x1198] sm:$0xff] }
  0xd6   : > { %2828 = vmatpush1.bf16.msra.mxu0 %v2827_v42  ;;  %2522 = vmatprep.subr.bf16.mxu1 %v2521_v57  ;;  %v258_v42 = vld [vmem:[%s4862_s1 + $0x108] sm:$0xff]  ;;  %v2251_v57 = vld [vmem:[%s4862_s1 + $0x1138] sm:$0xff]  ;;  %v2851_v61 = vpack.c.bf16 %v2246_v53, %v2244_v51 }
  0xd7   : > { %2830 = vmatprep.subr.bf16.mxu0 %v2829_v47  ;;  %v2847_v47 = vpack.c.bf16 %v2242_v41, %v2240_v39  ;;  %v2537_v48 = vpack.c.bf16 %v260_v43, %v258_v42  ;;  %v2865_v39 = vpack.c.bf16 %v2263_v32, %v2261_v31  ;;  %v278_v41 = vld [vmem:[%s4862_s1 + $0x1a8] sm:$0xff]  ;;  %v280_v42 = vld [vmem:[%s4862_s1 + $0x1b8] sm:$0xff]  ;;  %v218_v32 = vld [vmem:[%s3049_s12] sm:$0xff] }
  0xd8   : > { %v2265_v43 = vld [vmem:[%s4862_s1 + $0x11a8] sm:$0xff]  ;;  %v2279_v19 = vld [vmem:[%s4862_s1 + $0x1218] sm:$0xff] }
  0xd9   : > { %2524 = vmatpush1.bf16.msra.mxu1 %v2523_v8  ;;  %v2255_v8 = vld [vmem:[%s4862_s1 + $0x1158] sm:$0xff]  ;;  %v2869_v51 = vpack.c.bf16 %v2267_v44, %v2265_v43  ;;  %v282_v53 = vld [vmem:[%s4862_s1 + $0x1c8] sm:$0xff] }
  0xda   : > { %2832 = vmatpush1.bf16.msra.mxu0 %v2831_v56  ;;  %2526 = vmatprep.subr.bf16.mxu1 %v2525_v11  ;;  %v2249_v56 = vld [vmem:[%s4862_s1 + $0x1128] sm:$0xff]  ;;  %v2545_v11 = vpack.c.bf16 %v268_v5, %v266_v4  ;;  %v288_v4 = vld [vmem:[%s4862_s1 + $0x1f8] sm:$0xff] }
  0xdb   : > { %2834 = vmatprep.subr.bf16.mxu0 %v2833_v63  ;;  %v261_v63 = vld [vmem:[%s4862_s1 + $0x120] sm:$0xff]  ;;  %v2853_v2 = vpack.c.bf16 %v2251_v57, %v2249_v56  ;;  %v2271_v56 = vld [vmem:[%s4862_s1 + $0x11d8] sm:$0xff]  ;;  %v2273_v5 = vld [vmem:[%s4862_s1 + $0x11e8] sm:$0xff] }
  0xdc   : > { %v2283_v31 = vld [vmem:[%s4862_s1 + $0x1238] sm:$0xff]  ;;  %v2285_v44 = vld [vmem:[%s4862_s1 + $0x1248] sm:$0xff] }
  0xdd   : > { %1651 = vmatmul.mubr.f32.vlgmr.msra.gmra.mrb[2].mxu0 %v1494_v9  ;;  %2528 = vmatpush1.bf16.msra.mxu1 %v2527_v22  ;;  %v2543_v9 = vpack.c.bf16 %v263_v0, %v261_v63  ;;  %v2859_v22 = vpack.c.bf16 %v2254_v16, %v2252_v14  ;;  %v283_v63 = vld [vmem:[%s4862_s1 + $0x1d0] sm:$0xff]  ;;  %v2268_v0 = vld [vmem:[%s4862_s1 + $0x11c0] sm:$0xff]  ;;  %v290_v16 = vld [vmem:[%s4862_s1 + $0x208] sm:$0xff] }
  0xde   : > { %2836 = vmatpush1.bf16.msra.mxu0 %v2835_v10  ;;  %1721 = vmatprep.mubr.f32.mxu0 %v1503_v21  ;;  %v2855_v10 = vpack.c.bf16 %v2250_v3, %v2248_v1  ;;  %v2547_v21 = vpack.c.bf16 %v267_v13, %v265_v12  ;;  %v2873_v1 = vpack.c.bf16 %v2271_v56, %v2269_v55  ;;  %v286_v3 = vld [vmem:[%s4862_s1 + $0x1e8] sm:$0xff]  ;;  %v287_v12 = vld [vmem:[%s4862_s1 + $0x1f0] sm:$0xff]  ;;  %v2272_v13 = vld [vmem:[%s4862_s1 + $0x11e0] sm:$0xff] }
  0xdf   : > { %2838 = vmatprep.subr.bf16.mxu0 %v2837_v15  ;;  %2530 = vmatprep.subr.bf16.mxu1 %v2529_v24  ;;  %v2857_v15 = vpack.c.bf16 %v2255_v8, %v2253_v6  ;;  %v269_v24 = vld [vmem:[%s4862_s1 + $0x160] sm:$0xff]  ;;  %v2275_v6 = vld [vmem:[%s4862_s1 + $0x11f8] sm:$0xff]  ;;  %v2289_v56 = vld [vmem:[%s4862_s1 + $0x1268] sm:$0xff] }
  0xe0   : > { %v2551_v33 = vpack.c.bf16 %v271_v25, %v269_v24  ;;  %v2877_v14 = vpack.c.bf16 %v2275_v6, %v2273_v5  ;;  %v291_v24 = vld [vmem:[%s4862_s1 + $0x210] sm:$0xff]  ;;  %v2276_v25 = vld [vmem:[%s4862_s1 + $0x1200] sm:$0xff]  ;;  %v300_v43 = vld [vmem:[%s4862_s1 + $0x258] sm:$0xff] }
  0xe1   : > { %2532 = vmatpush1.bf16.msra.mxu1 %v2531_v34  ;;  %v304_v55 = vld [vmem:[%s4862_s1 + $0x278] sm:$0xff]  ;;  %v1260_v6 = vld [vmem:[%s3049_s12 + $0x20] sm:$0xfc] }
  0xe2   : > { %2840 = vmatpush1.bf16.msra.mxu0 %v2839_v23  ;;  %2534 = vmatprep.subr.bf16.mxu1 %v2533_v36  ;;  %v2549_v23 = vpack.c.bf16 %v272_v18, %v270_v17  ;;  %v273_v36 = vld [vmem:[%s4862_s1 + $0x180] sm:$0xff]  ;;  %v292_v17 = vld [vmem:[%s4862_s1 + $0x218] sm:$0xff]  ;;  %v2277_v18 = vld [vmem:[%s4862_s1 + $0x1208] sm:$0xff] }
  0xe3   : > { %2842 = vmatprep.subr.bf16.mxu0 %v2841_v28  ;;  %v2258_v28 = vld [vmem:[%s4862_s1 + $0x1170] sm:$0xff]  ;;  %v2555_v45 = vpack.c.bf16 %v275_v37, %v273_v36  ;;  %v308_v5 = vld [vmem:[%s4862_s1 + $0x298] sm:$0xff] }
  0xe4   : > { %v2863_v34 = vpack.c.bf16 %v2258_v28, %v2256_v26  ;;  %v2881_v26 = vpack.c.bf16 %v2279_v19, %v2277_v18  ;;  %v294_v28 = vld [vmem:[%s4862_s1 + $0x228] sm:$0xff]  ;;  %v295_v37 = vld [vmem:[%s4862_s1 + $0x230] sm:$0xff]  ;;  %v2292_v18 = vld [vmem:[%s4862_s1 + $0x1280] sm:$0xff] }
  0xe5   : > { %2536 = vmatpush1.bf16.msra.mxu1 %v2535_v46 }
  0xe6   : > { %2844 = vmatpush1.bf16.msra.mxu0 %v2843_v35  ;;  %2538 = vmatprep.subr.bf16.mxu1 %v2537_v48  ;;  %v2553_v35 = vpack.c.bf16 %v276_v30, %v274_v29  ;;  %v277_v48 = vld [vmem:[%s4862_s1 + $0x1a0] sm:$0xff]  ;;  %v296_v29 = vld [vmem:[%s4862_s1 + $0x238] sm:$0xff]  ;;  %v2281_v30 = vld [vmem:[%s4862_s1 + $0x1228] sm:$0xff] }
  0xe7   : > { %2846 = vmatprep.subr.bf16.mxu0 %v2845_v40  ;;  %v2262_v40 = vld [vmem:[%s4862_s1 + $0x1190] sm:$0xff]  ;;  %v2559_v57 = vpack.c.bf16 %v279_v49, %v277_v48  ;;  %v2573_v36 = vpack.c.bf16 %v296_v29, %v294_v28  ;;  %v297_v49 = vld [vmem:[%s4862_s1 + $0x240] sm:$0xff] }
  0xe8   : > { %v4411_v58 = vpop.f32.mrb[0].mxu0  ;;  %v2867_v46 = vpack.c.bf16 %v2262_v40, %v2260_v38  ;;  %v2280_v38 = vld [vmem:[%s4862_s1 + $0x1220] sm:$0xff]  ;;  %v2885_v40 = vpack.c.bf16 %v2283_v31, %v2281_v30 }
  0xe9   : > { %v4413_v60 = vpop.f32.mrb[1].mxu0  ;;  %2540 = vmatpush1.bf16.msra.mxu1 %v2539_v59  ;;  %v2296_v31 = vld [vmem:[%s4862_s1 + $0x12a0] sm:$0xff] }
  0xea   : > { %2848 = vmatpush1.bf16.msra.mxu0 %v2847_v47  ;;  %2542 = vmatprep.subr.bf16.mxu1 %v2541_v62  ;;  %v2557_v47 = vpack.c.bf16 %v280_v42, %v278_v41  ;;  %v281_v62 = vld [vmem:[%s4862_s1 + $0x1c0] sm:$0xff]  ;;  %v2282_v41 = vld [vmem:[%s4862_s1 + $0x1230] sm:$0xff]  ;;  %v298_v42 = vld [vmem:[%s4862_s1 + $0x248] sm:$0xff] }
  0xeb   : > { %2850 = vmatprep.subr.bf16.mxu0 %v2849_v52  ;;  %v2266_v52 = vld [vmem:[%s4862_s1 + $0x11b0] sm:$0xff]  ;;  %v2563_v8 = vpack.c.bf16 %v283_v63, %v281_v62  ;;  %v2577_v48 = vpack.c.bf16 %v300_v43, %v298_v42  ;;  %v313_v43 = vld [vmem:[%s4862_s1 + $0x2c0] sm:$0xff] }
  0xec   : > { %v2871_v59 = vpack.c.bf16 %v2266_v52, %v2264_v50  ;;  %v299_v50 = vld [vmem:[%s4862_s1 + $0x250] sm:$0xff] }
  0xed   : > { %2544 = vmatpush1.bf16.msra.mxu1 %v2543_v9  ;;  %v303_v62 = vld [vmem:[%s4862_s1 + $0x270] sm:$0xff] }
  0xee   : > { %2852 = vmatpush1.bf16.msra.mxu0 %v2851_v61  ;;  %2546 = vmatprep.subr.bf16.mxu1 %v2545_v11  ;;  %v2561_v61 = vpack.c.bf16 %v284_v54, %v282_v53  ;;  %v285_v11 = vld [vmem:[%s4862_s1 + $0x1e0] sm:$0xff]  ;;  %v2286_v53 = vld [vmem:[%s4862_s1 + $0x1250] sm:$0xff]  ;;  %v302_v54 = vld [vmem:[%s4862_s1 + $0x268] sm:$0xff] }
  0xef   : > { %2854 = vmatprep.subr.bf16.mxu0 %v2853_v2  ;;  %v2270_v2 = vld [vmem:[%s4862_s1 + $0x11d0] sm:$0xff]  ;;  %v2567_v20 = vpack.c.bf16 %v287_v12, %v285_v11 }
  0xf0   : > { %v2875_v9 = vpack.c.bf16 %v2270_v2, %v2268_v0  ;;  %v2581_v0 = vpack.c.bf16 %v304_v55, %v302_v54  ;;  %v2290_v2 = vld [vmem:[%s4862_s1 + $0x1270] sm:$0xff]  ;;  %v321_v55 = vld [vmem:[%s4862_s1 + $0x300] sm:$0xff] }
  0xf1   : > { %2548 = vmatpush1.bf16.msra.mxu1 %v2547_v21 }
  0xf2   : > { %2856 = vmatpush1.bf16.msra.mxu0 %v2855_v10  ;;  %2550 = vmatprep.subr.bf16.mxu1 %v2549_v23  ;;  %v2565_v10 = vpack.c.bf16 %v288_v4, %v286_v3  ;;  %v289_v23 = vld [vmem:[%s4862_s1 + $0x200] sm:$0xff]  ;;  %v306_v3 = vld [vmem:[%s4862_s1 + $0x288] sm:$0xff] }
  0xf3   : > { %2858 = vmatprep.subr.bf16.mxu0 %v2857_v15  ;;  %v2274_v15 = vld [vmem:[%s4862_s1 + $0x11f0] sm:$0xff] }
  0xf4   : > { %v2879_v21 = vpack.c.bf16 %v2274_v15, %v2272_v13  ;;  %v2585_v13 = vpack.c.bf16 %v308_v5, %v306_v3  ;;  %v329_v5 = vld [vmem:[%s4862_s1 + $0x340] sm:$0xff] }
  0xf5   : > { %2552 = vmatpush1.bf16.msra.mxu1 %v2551_v33  ;;  %v2571_v33 = vpack.c.bf16 %v291_v24, %v289_v23  ;;  %v2297_v23 = vld [vmem:[%s4862_s1 + $0x12a8] sm:$0xff]  ;;  %v2299_v24 = vld [vmem:[%s4862_s1 + $0x12b8] sm:$0xff] }
  0xf6   : > { %2860 = vmatpush1.bf16.msra.mxu0 %v2859_v22  ;;  %2554 = vmatprep.subr.bf16.mxu1 %v2553_v35  ;;  %v2569_v22 = vpack.c.bf16 %v292_v17, %v290_v16  ;;  %v305_v16 = vld [vmem:[%s4862_s1 + $0x280] sm:$0xff]  ;;  %v307_v17 = vld [vmem:[%s4862_s1 + $0x290] sm:$0xff] }
  0xf7   : > { %2862 = vmatprep.subr.bf16.mxu0 %v2861_v27  ;;  %v2278_v27 = vld [vmem:[%s4862_s1 + $0x1210] sm:$0xff] }
  0xf8   : > { %v2883_v35 = vpack.c.bf16 %v2278_v27, %v2276_v25  ;;  %v2587_v25 = vpack.c.bf16 %v307_v17, %v305_v16  ;;  %v311_v27 = vld [vmem:[%s4862_s1 + $0x2b0] sm:$0xff] }
  0xf9   : > { %2556 = vmatpush1.bf16.msra.mxu1 %v2555_v45  ;;  %v2287_v45 = vld [vmem:[%s4862_s1 + $0x1258] sm:$0xff] }
  0xfa   : > { %2864 = vmatpush1.bf16.msra.mxu0 %v2863_v34  ;;  %2558 = vmatprep.subr.bf16.mxu1 %v2557_v47  ;;  %v293_v34 = vld [vmem:[%s4862_s1 + $0x220] sm:$0xff]  ;;  %v2887_v47 = vpack.c.bf16 %v2282_v41, %v2280_v38  ;;  %v2889_v52 = vpack.c.bf16 %v2287_v45, %v2285_v44  ;;  %v315_v44 = vld [vmem:[%s4862_s1 + $0x2d0] sm:$0xff]  ;;  %v318_v45 = vld [vmem:[%s4862_s1 + $0x2e8] sm:$0xff] }
  0xfb   : > { %2866 = vmatprep.subr.bf16.mxu0 %v2865_v39  ;;  %v221_v39 = vld [vmem:[%s3049_s12 + $0x18] sm:$0xff] }
  0xfd   : > { %2560 = vmatpush1.bf16.msra.mxu1 %v2559_v57  ;;  %v2291_v57 = vld [vmem:[%s4862_s1 + $0x1278] sm:$0xff] }
  0xfe   : > { %2868 = vmatpush1.bf16.msra.mxu0 %v2867_v46  ;;  %2562 = vmatprep.subr.bf16.mxu1 %v2561_v61  ;;  %v2575_v46 = vpack.c.bf16 %v295_v37, %v293_v34  ;;  %v301_v61 = vld [vmem:[%s4862_s1 + $0x260] sm:$0xff]  ;;  %v2893_v4 = vpack.c.bf16 %v2291_v57, %v2289_v56  ;;  %v2901_v34 = vpack.c.bf16 %v2299_v24, %v2297_v23  ;;  %v1269_v37 = vld [vmem:[%s3049_s12 + $0x68] sm:$0x3]  ;;  %v323_v56 = vld [vmem:[%s4862_s1 + $0x310] sm:$0xff] }
  0xff   : > { %2870 = vmatprep.subr.bf16.mxu0 %v2869_v51  ;;  %v2284_v51 = vld [vmem:[%s4862_s1 + $0x1240] sm:$0xff]  ;;  %v2583_v11 = vpack.c.bf16 %v303_v62, %v301_v61  ;;  %v1505_v42 = vrot.slane %v1269_v37, 2  ;;  %v326_v57 = vld [vmem:[%s4862_s1 + $0x328] sm:$0xff]  ;;  %v2603_v61 = vpack.c.bf16 %v323_v56, %v321_v55  ;;  %v351_v37 = vld [vmem:[%s4862_s1 + $0x3f0] sm:$0xff] }
 0x100   : > { %v2891_v63 = vpack.c.bf16 %v2286_v53, %v2284_v51  ;;  %v322_v51 = vld [vmem:[%s4862_s1 + $0x308] sm:$0xff]  ;;  %v341_v24 = vld [vmem:[%s4862_s1 + $0x3a0] sm:$0xff] }
 0x101   : > { %2564 = vmatpush1.bf16.msra.mxu1 %v2563_v8  ;;  %v1267_v8 = vld [vmem:[%s3049_s12 + $0x58] sm:$0x3]  ;;  %v1815_v55 = vld [vmem:[%s212_s27] sm:$0xff] }
 0x102   : > { %2872 = vmatpush1.bf16.msra.mxu0 %v2871_v59  ;;  %2566 = vmatprep.subr.bf16.mxu1 %v2565_v10  ;;  %v2579_v59 = vpack.c.bf16 %v299_v50, %v297_v49  ;;  %v2295_v10 = vld [vmem:[%s4862_s1 + $0x1298] sm:$0xff]  ;;  %v1499_v15 = vrot.slane %v1267_v8, 2  ;;  %v317_v50 = vld [vmem:[%s4862_s1 + $0x2e0] sm:$0xff]  ;;  %v334_v8 = vld [vmem:[%s4862_s1 + $0x368] sm:$0xff] }
 0x103   : > { %2874 = vmatprep.subr.bf16.mxu0 %v2873_v1  ;;  %v2288_v1 = vld [vmem:[%s4862_s1 + $0x1260] sm:$0xff] }
 0x104   : > { %v2895_v12 = vpack.c.bf16 %v2290_v2, %v2288_v1  ;;  %v330_v1 = vld [vmem:[%s4862_s1 + $0x348] sm:$0xff]  ;;  %v332_v2 = vld [vmem:[%s4862_s1 + $0x358] sm:$0xff] }
 0x105   : > { %2568 = vmatpush1.bf16.msra.mxu1 %v2567_v20  ;;  %v2294_v20 = vld [vmem:[%s4862_s1 + $0x1290] sm:$0xff] }
 0x106   : > { %2876 = vmatpush1.bf16.msra.mxu0 %v2875_v9  ;;  %2570 = vmatprep.subr.bf16.mxu1 %v2569_v22  ;;  %v2293_v9 = vld [vmem:[%s4862_s1 + $0x1288] sm:$0xff]  ;;  %v312_v22 = vld [vmem:[%s4862_s1 + $0x2b8] sm:$0xff]  ;;  %v2899_v29 = vpack.c.bf16 %v2294_v20, %v2292_v18  ;;  %v337_v18 = vld [vmem:[%s4862_s1 + $0x380] sm:$0xff] }
 0x107   : > { %2878 = vmatprep.subr.bf16.mxu0 %v2877_v14  ;;  %v1498_v14 = vrot.slane %v1260_v6, 2  ;;  %v2897_v19 = vpack.c.bf16 %v2295_v10, %v2293_v9  ;;  %v331_v6 = vld [vmem:[%s4862_s1 + $0x350] sm:$0xff]  ;;  %v336_v9 = vld [vmem:[%s4862_s1 + $0x378] sm:$0xff]  ;;  %v342_v20 = vld [vmem:[%s4862_s1 + $0x3a8] sm:$0xff] }
 0x108   : > { %1037 = vmatmul.mubr.f32.vlgmr.msra.gmra.mrb[2].mxu1 %v218_v32  ;;  %v2298_v32 = vld [vmem:[%s4862_s1 + $0x12b0] sm:$0xff]  ;;  %v2611_v10 = vpack.c.bf16 %v331_v6, %v329_v5 }
 0x109   : > { %2572 = vmatpush1.bf16.msra.mxu1 %v2571_v33  ;;  %1107 = vmatprep.mubr.f32.mxu1 %v221_v39  ;;  %v1500_v28 = vsel %vm1485_vm2, %v1498_v14, %v1499_v15  ;;  %v314_v33 = vld [vmem:[%s4862_s1 + $0x2c8] sm:$0xff]  ;;  %v2903_v39 = vpack.c.bf16 %v2298_v32, %v2296_v31  ;;  %v340_v15 = vld [vmem:[%s4862_s1 + $0x398] sm:$0xff]  ;;  %v347_v31 = vld [vmem:[%s4862_s1 + $0x3d0] sm:$0xff] }
 0x10a   : > { %2880 = vmatpush1.bf16.msra.mxu0 %v2879_v21  ;;  %2574 = vmatprep.subr.bf16.mxu1 %v2573_v36  ;;  %v310_v21 = vld [vmem:[%s4862_s1 + $0x2a8] sm:$0xff]  ;;  %v1262_v36 = vld [vmem:[%s3049_s12 + $0x30] sm:$0xfc] }
 0x10b   : > { %2882 = vmatprep.subr.bf16.mxu0 %v2881_v26  ;;  %v309_v26 = vld [vmem:[%s4862_s1 + $0x2a0] sm:$0xff]  ;;  %v2589_v30 = vpack.c.bf16 %v312_v22, %v310_v21  ;;  %v1504_v41 = vrot.slane %v1262_v36, 2  ;;  %v338_v14 = vld [vmem:[%s4862_s1 + $0x388] sm:$0xff]  ;;  %v344_v21 = vld [vmem:[%s4862_s1 + $0x3b8] sm:$0xff] }
 0x10c   : > { %v2591_v38 = vpack.c.bf16 %v311_v27, %v309_v26  ;;  %v2617_v17 = vpack.c.bf16 %v340_v15, %v338_v14  ;;  %v2621_v23 = vpack.c.bf16 %v344_v21, %v342_v20  ;;  %v346_v26 = vld [vmem:[%s4862_s1 + $0x3c8] sm:$0xff]  ;;  %v348_v27 = vld [vmem:[%s4862_s1 + $0x3d8] sm:$0xff]  ;;  %v349_v36 = vld [vmem:[%s4862_s1 + $0x3e0] sm:$0xff] }
 0x10d   : > { %2576 = vmatpush1.bf16.msra.mxu1 %v2575_v46  ;;  %v320_v46 = vld [vmem:[%s4862_s1 + $0x2f8] sm:$0xff]  ;;  %v350_v32 = vld [vmem:[%s4862_s1 + $0x3e8] sm:$0xff] }
 0x10e   : > { %2884 = vmatpush1.bf16.msra.mxu0 %v2883_v35  ;;  %2578 = vmatprep.subr.bf16.mxu1 %v2577_v48  ;;  %v316_v35 = vld [vmem:[%s4862_s1 + $0x2d8] sm:$0xff]  ;;  %v1506_v48 = vsel %vm1485_vm2, %v1504_v41, %v1505_v42  ;;  %v2597_v49 = vpack.c.bf16 %v320_v46, %v318_v45  ;;  %v1803_v46 = vlaneseq }
 0x10f   : > { %2886 = vmatprep.subr.bf16.mxu0 %v2885_v40  ;;  %v2593_v40 = vpack.c.bf16 %v316_v35, %v314_v33  ;;  %v352_v33 = vld [vmem:[%s4862_s1 + $0x3f8] sm:$0xff] }
 0x110   : > { %v2629_v35 = vpack.c.bf16 %v352_v33, %v350_v32 }
 0x111   : > { %2580 = vmatpush1.bf16.msra.mxu1 %v2579_v59  ;;  %v328_v59 = vld [vmem:[%s4862_s1 + $0x338] sm:$0xff] }
 0x112   : > { %2888 = vmatpush1.bf16.msra.mxu0 %v2887_v47  ;;  %2582 = vmatprep.subr.bf16.mxu1 %v2581_v0  ;;  %v2595_v47 = vpack.c.bf16 %v315_v44, %v313_v43  ;;  %v2605_v62 = vpack.c.bf16 %v328_v59, %v326_v57  ;;  %v327_v0 = vld [vmem:[%s4862_s1 + $0x330] sm:$0xff]  ;;  %v1816_v59 = vld [vmem:[%s212_s27 + $0x8] sm:$0xff] }
 0x113   : > { %2890 = vmatprep.subr.bf16.mxu0 %v2889_v52  ;;  %v324_v52 = vld [vmem:[%s4862_s1 + $0x318] sm:$0xff] }
 0x114   : > { %v2601_v54 = vpack.c.bf16 %v324_v52, %v322_v51 }
 0x115   : > { %2584 = vmatpush1.bf16.msra.mxu1 %v2583_v11  ;;  %v2613_v11 = vpack.c.bf16 %v336_v9, %v334_v8 }
 0x116   : > { %2892 = vmatpush1.bf16.msra.mxu0 %v2891_v63  ;;  %2586 = vmatprep.subr.bf16.mxu1 %v2585_v13  ;;  %v325_v63 = vld [vmem:[%s4862_s1 + $0x320] sm:$0xff]  ;;  %v335_v13 = vld [vmem:[%s4862_s1 + $0x370] sm:$0xff] }
 0x117   : > { %2894 = vmatprep.subr.bf16.mxu0 %v2893_v4  ;;  %v2607_v3 = vpack.c.bf16 %v327_v0, %v325_v63  ;;  %v2609_v4 = vpack.c.bf16 %v332_v2, %v330_v1 }
 0x119   : > { %2588 = vmatpush1.bf16.msra.mxu1 %v2587_v25  ;;  %v343_v25 = vld [vmem:[%s4862_s1 + $0x3b0] sm:$0xff] }
 0x11a   : > { %2896 = vmatpush1.bf16.msra.mxu0 %v2895_v12  ;;  %2590 = vmatprep.subr.bf16.mxu1 %v2589_v30  ;;  %v333_v12 = vld [vmem:[%s4862_s1 + $0x360] sm:$0xff] }
 0x11b   : > { %2898 = vmatprep.subr.bf16.mxu0 %v2897_v19  ;;  %v2615_v16 = vpack.c.bf16 %v335_v13, %v333_v12  ;;  %v339_v19 = vld [vmem:[%s4862_s1 + $0x390] sm:$0xff]  ;;  %v345_v30 = vld [vmem:[%s4862_s1 + $0x3c0] sm:$0xff] }
 0x11c   : > { %v2619_v22 = vpack.c.bf16 %v339_v19, %v337_v18 }
 0x11d   : > { %1722 = vmatmul.mubr.f32.vlgmr.msra.gmra.mrb[2].mxu0 %v1500_v28  ;;  %2592 = vmatpush1.bf16.msra.mxu1 %v2591_v38  ;;  %v2623_v28 = vpack.c.bf16 %v343_v25, %v341_v24  ;;  %v2631_v38 = vpack.c.bf16 %v351_v37, %v349_v36 }
 0x11e   : > { %2900 = vmatpush1.bf16.msra.mxu0 %v2899_v29  ;;  %1792 = vmatprep.mubr.f32.mxu0 %v2945_v7  ;;  %v319_v7 = vld [vmem:[%s4862_s1 + $0x2f0] sm:$0xff]  ;;  %v2625_v29 = vpack.c.bf16 %v348_v27, %v346_v26 }
 0x11f   : > { %2902 = vmatprep.subr.bf16.mxu0 %v2901_v34  ;;  %2594 = vmatprep.subr.bf16.mxu1 %v2593_v40  ;;  %v2599_v53 = vpack.c.bf16 %v319_v7, %v317_v50  ;;  %v2627_v34 = vpack.c.bf16 %v347_v31, %v345_v30 }
 0x121   : > { %2596 = vmatpush1.bf16.msra.mxu1 %v2595_v47  ;;  %v1804_v47 = vshrl.u32 %v1803_v46, 7 }
 0x122   : > { %2904 = vmatpush1.bf16.msra.mxu0 %v2903_v39  ;;  %2598 = vmatprep.subr.bf16.mxu1 %v2597_v49  ;;  %v220_v39 = vld [vmem:[%s3049_s12 + $0x10] sm:$0xff]  ;;  %v1801_v49 = vld [vmem:[%s4863_s2] sm:$0x3] }
 0x123   : > { %v1809_v50 = vsub.s32 1, %v1804_v47 }
 0x125   : > { %2300 = vmatmul.mubr.msk.f32.vlgmr.msra.gmra.mrb[2].mxu0 %vm682_vm1, %v1506_v48  ;;  %2600 = vmatpush1.bf16.msra.mxu1 %v2599_v53  ;;  %v1805_v48 = vsub.s32 0, %v1804_v47  ;;  %v1810_v53 = vrot.slane %v1801_v49, %v1809_v50 }
 0x126   : > { %2602 = vmatprep.subr.bf16.mxu1 %v2601_v54 }
 0x127   : > { %v1806_v51 = vrot.slane %v1801_v49, %v1805_v48 }
 0x129   : > { %2604 = vmatpush1.bf16.msra.mxu1 %v2603_v61 }
 0x12a   : > { %2606 = vmatprep.subr.bf16.mxu1 %v2605_v62 }
 0x12d   : > { %2608 = vmatpush1.bf16.msra.mxu1 %v2607_v3 }
 0x12e   : > { %2610 = vmatprep.subr.bf16.mxu1 %v2609_v4 }
 0x131   : > { %2612 = vmatpush1.bf16.msra.mxu1 %v2611_v10 }
 0x132   : > { %2614 = vmatprep.subr.bf16.mxu1 %v2613_v11 }
 0x135   : > { %2616 = vmatpush1.bf16.msra.mxu1 %v2615_v16 }
 0x136   : > { %2618 = vmatprep.subr.bf16.mxu1 %v2617_v17 }
 0x139   : > { %2620 = vmatpush1.bf16.msra.mxu1 %v2619_v22 }
 0x13a   : > { %2622 = vmatprep.subr.bf16.mxu1 %v2621_v23 }
 0x13d   : > { %2624 = vmatpush1.bf16.msra.mxu1 %v2623_v28 }
 0x13e   : > { %2626 = vmatprep.subr.bf16.mxu1 %v2625_v29 }
 0x141   : > { %2628 = vmatpush1.bf16.msra.mxu1 %v2627_v34 }
 0x142   : > { %2630 = vmatprep.subr.bf16.mxu1 %v2629_v35 }
 0x145   : > { %2632 = vmatpush1.bf16.msra.mxu1 %v2631_v38 }
 0x148   : > { %1108 = vmatmul.mubr.f32.vlgmr.msra.gmra.mrb[2].mxu1 %v220_v39 }
 0x19b   : > { %v893_v40 = vpop.f32.mrb[0].mxu1 }
 0x19c   : > { %v2905_v41 = vadd.f32 %v4411_v58, %v893_v40  ;;  %v895_v42 = vpop.f32.mrb[1].mxu1 }
 0x19d   : > { %v2908_v43 = vadd.f32 %v4413_v60, %v895_v42 }
 0x1f8   : > { %v1794_v44 = vpop.f32.mrb[2].mxu0 }
 0x1f9   : > { %v1796_v45 = vpop.f32.mrb[3].mxu0 }
 0x21b   : > { %v1109_v7 = vpop.f32.mrb[2].mxu1 }
 0x21c   : > { %v2906_v58 = vadd.f32 %v2905_v41, %v1109_v7  ;;  %v1111_v52 = vpop.f32.mrb[3].mxu1 }
 0x21d   : > { %v2909_v60 = vadd.f32 %v2908_v43, %v1111_v52 }
 0x21e   : > { %v2907_v54 = vadd.f32 %v2906_v58, %v1794_v44 }
 0x21f   : > { %v2910_v56 = vadd.f32 %v2909_v60, %v1796_v45 }
 0x220   : > { %v1813_v57 = vadd.f32 %v2907_v54, %v1806_v51 }
 0x221   : > { %v1814_v61 = vadd.f32 %v2910_v56, %v1810_v53 }
 0x222   : > { %v1817_v62 = vmul.f32 %v1815_v55, %v1813_v57 }
 0x223   : > { %v1818_v63 = vmul.f32 %v1816_v59, %v1814_v61 }
 0x224   : > { %1819 = vst [vmem:[%s217_s29] sm:$0xff] %v1817_v62 }
 0x225   : > { %1820 = vst [vmem:[%s217_s29 + $0x8] sm:$0xff] %v1818_v63 }
 0x226 PF: > { %s14_s15 = sadd.s32 1, %s2943_s15  }
 0x227   : > { %p11_p4 = scmp.ge.s32.totalorder %s14_s15, 4  }
 0x229   :  { %13 = sbr.rel (!%p11_p4) target bundleno = 1 (0x1), region = 71 }

</bundles_post_ra>
